<compile_context>
chip_gen: v6e
topology: v6e:2x2x1
jax: 0.10.0
libtpu: 0.0.40
codegen_flags: <defaults>
</compile_context>

<pallas_src>
import numpy as np
import jax
import jax.numpy as jnp
from jax import lax
from jax.experimental import pallas as pl
from jax.experimental.pallas import tpu as pltpu

K = 3        # conv kernel size (all four layers)
STRIDE = 2   # conv stride (all four layers)


# --------------------------------------------------------------------------
# Fused multi-step forward kernel (one grid step == one PlasticCNN.forward)
# --------------------------------------------------------------------------
def _rollout_kernel(lr_ref, p1_ref, label_ref,
                    w1_ref, b1_ref,
                    s2_ref, wf2_ref, b2_ref,
                    s3_ref, wf3_ref, b3_ref,
                    s4_ref, wf4_ref, b4_ref,
                    w_ref, alpha_ref, hebb_in_ref,
                    out_ref, hebb_ref,
                    patch_ref):
    f32 = jnp.float32
    bf16 = jnp.bfloat16
    t = pl.program_id(0)

    # Seed the VMEM-resident hebb output block from the hebb input at step 0.
    @pl.when(t == 0)
    def _():
        hebb_ref[...] = hebb_in_ref[...]

    # ---- layer 1: GEMM on pre-im2col'ed patches, relu(p1 @ W1 + b1) ---------
    a = jnp.dot(p1_ref[0], w1_ref[...], preferred_element_type=f32)
    a = jnp.maximum(a + b1_ref[...], 0.0).astype(bf16)          # (450, 64) bf16

    # ---- layers 2..4: stride-2 conv = 9 MXU row-gathers staged into the lane
    #      blocks of patch_ref, then ONE (Mout, 9*Cin) @ (9*Cin, Cout) GEMM ----
    def conv_layer(a_prev, s_ref, wf_ref, b_ref):
        ntap, mo, _ = s_ref.shape
        c = a_prev.shape[-1]
        for tap in range(ntap):                                  # static unroll
            # 0/1 selection matrix picks rows (n, 2*oh+kh, 2*ow+kw) on the MXU
            g = jnp.dot(s_ref[tap], a_prev, preferred_element_type=f32)
            patch_ref[0:mo, tap * c:(tap + 1) * c] = g.astype(bf16)
        r = jnp.dot(patch_ref[0:mo, :], wf_ref[...],
                    preferred_element_type=f32)                  # K=576 conv GEMM
        return jnp.maximum(r + b_ref[...], 0.0)                  # bias+ReLU in f32

    a = conv_layer(a, s2_ref, wf2_ref, b2_ref).astype(bf16)      # (98, 64)
    a = conv_layer(a, s3_ref, wf3_ref, b3_ref).astype(bf16)      # (18, 64)
    a = conv_layer(a, s4_ref, wf4_ref, b4_ref)                   # (N, 64) f32

    # ---- plastic head (all f32) ---------------------------------------------
    hebb = hebb_ref[...]
    eff_w = w_ref[...] + alpha_ref[...] * hebb
    z = jnp.dot(a, eff_w, preferred_element_type=f32) + label_ref[0]
    z = z - jnp.max(z, axis=-1, keepdims=True)                   # softmax
    e = jnp.exp(z)
    p = e / jnp.sum(e, axis=-1, keepdims=True)
    out_ref[0] = p

    # Hebb update uses only batch element 0 (== torch.bmm(yi, yj)[0]).
    lr = lr_ref[...]                                             # (1, 1) f32
    yi = jnp.transpose(a[0:1, :])                                # (nbf, 1)
    hebb_ref[...] = (1.0 - lr) * hebb + lr * (yi * p[0:1, :])


# --------------------------------------------------------------------------
# One-time host-side parameter preparation
# --------------------------------------------------------------------------
def _sel_matrices(n, h, w, k, stride):
    """0/1 matrices S_t with S_t[(n,oh,ow), (n,2oh+kh,2ow+kw)] = 1, t=kh*k+kw."""
    ho = (h - k) // stride + 1
    wo = (w - k) // stride + 1
    sels = np.zeros((k * k, n * ho * wo, n * h * w), np.float32)
    for kh in range(k):
        for kw in range(k):
            t = kh * k + kw
            for b in range(n):
                for oh in range(ho):
                    for ow in range(wo):
                        m = (b * ho + oh) * wo + ow
                        r = (b * h + stride * oh + kh) * w + (stride * ow + kw)
                        sels[t, m, r] = 1.0
    return sels, ho, wo


def prepare_plastic_cnn(conv_params, batch, height, width):
    """Precompute kernel-side constants: flattened conv weights (bf16) and the
    tap-selection matrices that implement the stride-2 patch gather on the MXU."""
    assert len(conv_params) == 4
    prep = {}

    w1, b1 = conv_params[0]
    c1out, c1in, _, _ = w1.shape
    # layer-1 im2col GEMM weight, K ordered (Cin, kh, kw) to match wrapper patches
    prep["w1"] = jnp.asarray(np.asarray(w1).reshape(c1out, c1in * K * K).T,
                             jnp.bfloat16)
    prep["b1"] = jnp.asarray(np.asarray(b1).reshape(1, c1out), jnp.float32)

    h = (height - K) // STRIDE + 1
    w = (width - K) // STRIDE + 1
    for li, (wgt, b) in enumerate(conv_params[1:], start=2):
        cout, cin, _, _ = wgt.shape
        sels, ho, wo = _sel_matrices(batch, h, w, K, STRIDE)
        prep[f"s{li}"] = jnp.asarray(sels, jnp.bfloat16)          # (9, Mout, Min)
        # flattened conv weight (9*Cin, Cout), rows ordered (kh, kw, ci)
        prep[f"wf{li}"] = jnp.asarray(
            np.asarray(wgt).transpose(2, 3, 1, 0).reshape(K * K * cin, cout),
            jnp.bfloat16)
        prep[f"b{li}"] = jnp.asarray(np.asarray(b).reshape(1, cout), jnp.float32)
        h, w = ho, wo
    return prep


def _const_spec(arr):
    """Full-array block with a constant index_map (stays VMEM-resident)."""
    nd = arr.ndim
    return pl.BlockSpec(arr.shape, lambda t, _n=nd: (0,) * _n)


# --------------------------------------------------------------------------
# T-step rollout (each step mirrors PlasticCNN.forward, hebb trace chained)
# --------------------------------------------------------------------------
@jax.jit
def plastic_cnn_rollout(prep, w, alpha, lr, xs, labels, hebb0):
    T, N, C, H, W = xs.shape
    Ho = (H - K) // STRIDE + 1
    Wo = (W - K) // STRIDE + 1

    # Layer-1 im2col for ALL steps in one XLA op (columns ordered (Cin, kh, kw)).
    cols = [xs[:, :, :, i:i + STRIDE * Ho:STRIDE, j:j + STRIDE * Wo:STRIDE]
            for i in range(K) for j in range(K)]
    p1 = jnp.stack(cols, axis=3).reshape(T, N, C * K * K, Ho, Wo)
    p1 = p1.transpose(0, 1, 3, 4, 2).reshape(T, N * Ho * Wo, C * K * K)
    p1 = p1.astype(jnp.bfloat16)

    nbf, n_cls = w.shape
    m1 = N * Ho * Wo
    m2 = prep["s2"].shape[1]
    patch_lanes = prep["wf2"].shape[0]                 # 9 * Cin = 576
    lr_arr = jnp.full((1, 1), lr, jnp.float32)

    args = (lr_arr, p1, labels,
            prep["w1"], prep["b1"],
            prep["s2"], prep["wf2"], prep["b2"],
            prep["s3"], prep["wf3"], prep["b3"],
            prep["s4"], prep["wf4"], prep["b4"],
            w, alpha, hebb0)

    in_specs = [
        _const_spec(lr_arr),
        pl.BlockSpec((1, m1, C * K * K), lambda t: (t, 0, 0)),   # per-step patches
        pl.BlockSpec((1, N, n_cls), lambda t: (t, 0, 0)),        # per-step labels
        _const_spec(prep["w1"]), _const_spec(prep["b1"]),
        _const_spec(prep["s2"]), _const_spec(prep["wf2"]), _const_spec(prep["b2"]),
        _const_spec(prep["s3"]), _const_spec(prep["wf3"]), _const_spec(prep["b3"]),
        _const_spec(prep["s4"]), _const_spec(prep["wf4"]), _const_spec(prep["b4"]),
        _const_spec(w), _const_spec(alpha), _const_spec(hebb0),
    ]
    out_specs = (pl.BlockSpec((1, N, n_cls), lambda t: (t, 0, 0)),
                 pl.BlockSpec((nbf, n_cls), lambda t: (0, 0)))
    out_shape = (jax.ShapeDtypeStruct((T, N, n_cls), jnp.float32),
                 jax.ShapeDtypeStruct((nbf, n_cls), jnp.float32))

    activ_out, hebb_final = pl.pallas_call(
        _rollout_kernel,
        grid=(T,),
        in_specs=in_specs,
        out_specs=out_specs,
        out_shape=out_shape,
        scratch_shapes=[pltpu.VMEM((m2, patch_lanes), jnp.bfloat16)],
        compiler_params=pltpu.CompilerParams(
            dimension_semantics=("arbitrary",)),
    )(*args)
    return activ_out, hebb_final


# --------------------------------------------------------------------------
# Pure-JAX reference (one PlasticCNN.forward step) for correctness checking.
# --------------------------------------------------------------------------
def ref_forward(conv_params, w, alpha, lr, x, in_label, hebb):
    a = x
    for wgt, b in conv_params:
        a = lax.conv_general_dilated(
            a, wgt, (STRIDE, STRIDE), "VALID",
            dimension_numbers=("NCHW", "OIHW", "NCHW"))
        a = jax.nn.relu(a + b[None, :, None, None])
    nbf = w.shape[0]
    activ_in = a.reshape(-1, nbf)
    z = activ_in @ (w + alpha * hebb) + in_label
    p = jax.nn.softmax(z, axis=-1)
    new_hebb = (1.0 - lr) * hebb + lr * jnp.outer(activ_in[0], p[0])
    return p, new_hebb


if __name__ == "__main__":
    LR = 0.01            # params['lr']
    NBF = 64             # params['nbf'] (64 ch * 1 * 1 after four stride-2 convs)
    NR_CLASSES = 8       # params['nr_classes']
    B = 2
    H = W = 31           # 31 -> 15 -> 7 -> 3 -> 1 under k=3, stride=2 VALID convs
    T = 6                # episode length fused into one pallas_call

    key = jax.random.PRNGKey(0)
    keys = jax.random.split(key, 14)

    def conv_init(kw_key, kb_key, cout, cin, k):
        fan_in = cin * k * k
        bound = 1.0 / np.sqrt(fan_in)
        wgt = jax.random.uniform(kw_key, (cout, cin, k, k), jnp.float32, -bound, bound)
        b = jax.random.uniform(kb_key, (cout,), jnp.float32, -bound, bound)
        return wgt, b

    conv_params = [
        conv_init(keys[0], keys[1], 64, 3, 3),    # cv1: Conv2d(3, 64, 3, stride=2)
        conv_init(keys[2], keys[3], 64, 64, 3),   # cv2
        conv_init(keys[4], keys[5], 64, 64, 3),   # cv3
        conv_init(keys[6], keys[7], 64, 64, 3),   # cv4
    ]
    w_param = LR * jax.random.normal(keys[8], (NBF, NR_CLASSES), jnp.float32)
    alpha_param = LR * jax.random.uniform(keys[9], (NBF, NR_CLASSES), jnp.float32)
    # TODO(synk): scalar-alpha branch (params['alpha']=False) and the unused
    # self.eta parameter are not exercised here.

    xs = jax.random.normal(keys[10], (T, B, 3, H, W), jnp.float32)
    label_idx = jax.random.randint(keys[11], (T, B), 0, NR_CLASSES)
    labels = jax.nn.one_hot(label_idx, NR_CLASSES, dtype=jnp.float32)
    hebb0 = jnp.zeros((NBF, NR_CLASSES), jnp.float32)

    prep = prepare_plastic_cnn(conv_params, B, H, W)

    activ_out, hebb_final = plastic_cnn_rollout(
        prep, w_param, alpha_param, LR, xs, labels, hebb0)
    activ_out = jax.block_until_ready(activ_out)
    hebb_final = jax.block_until_ready(hebb_final)

    # Reference loop, chained over the same T steps.
    hebb_r = hebb0
    ref_outs = []
    for s in range(T):
        p_ref, hebb_r = ref_forward(conv_params, w_param, alpha_param, LR,
                                    xs[s], labels[s], hebb_r)
        ref_outs.append(p_ref)
    ref_outs = jnp.stack(ref_outs, axis=0)

    np.testing.assert_allclose(np.asarray(activ_out), np.asarray(ref_outs),
                               rtol=1e-2, atol=2e-3)
    np.testing.assert_allclose(np.asarray(hebb_final), np.asarray(hebb_r),
                               rtol=1e-2, atol=2e-3)
    print("KERNEL_OK")
</pallas_src>

<mosaic_0001>
module attributes {stable_mosaic.version = 11 : i64} {
  func.func @_rollout_kernel(%arg0: i32, %arg1: memref<1x1xf32, #tpu.memory_space<vmem>>, %arg2: memref<1x450x27xbf16, #tpu.memory_space<vmem>>, %arg3: memref<1x2x8xf32, #tpu.memory_space<vmem>>, %arg4: memref<27x64xbf16, #tpu.memory_space<vmem>>, %arg5: memref<1x64xf32, #tpu.memory_space<vmem>>, %arg6: memref<9x98x450xbf16, #tpu.memory_space<vmem>>, %arg7: memref<576x64xbf16, #tpu.memory_space<vmem>>, %arg8: memref<1x64xf32, #tpu.memory_space<vmem>>, %arg9: memref<9x18x98xbf16, #tpu.memory_space<vmem>>, %arg10: memref<576x64xbf16, #tpu.memory_space<vmem>>, %arg11: memref<1x64xf32, #tpu.memory_space<vmem>>, %arg12: memref<9x2x18xbf16, #tpu.memory_space<vmem>>, %arg13: memref<576x64xbf16, #tpu.memory_space<vmem>>, %arg14: memref<1x64xf32, #tpu.memory_space<vmem>>, %arg15: memref<64x8xf32, #tpu.memory_space<vmem>>, %arg16: memref<64x8xf32, #tpu.memory_space<vmem>>, %arg17: memref<64x8xf32, #tpu.memory_space<vmem>>, %arg18: memref<1x2x8xf32, #tpu.memory_space<vmem>>, %arg19: memref<64x8xf32, #tpu.memory_space<vmem>>, %arg20: memref<98x576xbf16, #tpu.memory_space<vmem>>) attributes {dimension_semantics = [#tpu.dimension_semantics<arbitrary>], iteration_bounds = array<i64: 6>, scalar_prefetch = 0 : i64, scratch_operands = 1 : i64, tpu.core_type = #tpu.core_type<tc>, window_params = [{pipeline_mode = #tpu.pipeline_mode<synchronous>, transform_indices = @transform_0, window_bounds = array<i64: 1, 1>}, {transform_indices = @transform_1, window_bounds = array<i64: 1, 450, 27>}, {transform_indices = @transform_2, window_bounds = array<i64: 1, 2, 8>}, {pipeline_mode = #tpu.pipeline_mode<synchronous>, transform_indices = @transform_3, window_bounds = array<i64: 27, 64>}, {pipeline_mode = #tpu.pipeline_mode<synchronous>, transform_indices = @transform_4, window_bounds = array<i64: 1, 64>}, {pipeline_mode = #tpu.pipeline_mode<synchronous>, transform_indices = @transform_5, window_bounds = array<i64: 9, 98, 450>}, {pipeline_mode = #tpu.pipeline_mode<synchronous>, transform_indices = @transform_6, window_bounds = array<i64: 576, 64>}, {pipeline_mode = #tpu.pipeline_mode<synchronous>, transform_indices = @transform_7, window_bounds = array<i64: 1, 64>}, {pipeline_mode = #tpu.pipeline_mode<synchronous>, transform_indices = @transform_8, window_bounds = array<i64: 9, 18, 98>}, {pipeline_mode = #tpu.pipeline_mode<synchronous>, transform_indices = @transform_9, window_bounds = array<i64: 576, 64>}, {pipeline_mode = #tpu.pipeline_mode<synchronous>, transform_indices = @transform_10, window_bounds = array<i64: 1, 64>}, {pipeline_mode = #tpu.pipeline_mode<synchronous>, transform_indices = @transform_11, window_bounds = array<i64: 9, 2, 18>}, {pipeline_mode = #tpu.pipeline_mode<synchronous>, transform_indices = @transform_12, window_bounds = array<i64: 576, 64>}, {pipeline_mode = #tpu.pipeline_mode<synchronous>, transform_indices = @transform_13, window_bounds = array<i64: 1, 64>}, {pipeline_mode = #tpu.pipeline_mode<synchronous>, transform_indices = @transform_14, window_bounds = array<i64: 64, 8>}, {pipeline_mode = #tpu.pipeline_mode<synchronous>, transform_indices = @transform_15, window_bounds = array<i64: 64, 8>}, {pipeline_mode = #tpu.pipeline_mode<synchronous>, transform_indices = @transform_16, window_bounds = array<i64: 64, 8>}, {transform_indices = @transform_17, window_bounds = array<i64: 1, 2, 8>}, {pipeline_mode = #tpu.pipeline_mode<synchronous>, transform_indices = @transform_18, window_bounds = array<i64: 64, 8>}]} {
    %c0_i32 = arith.constant 0 : i32
    %0 = arith.cmpi eq, %arg0, %c0_i32 : i32
    %1 = arith.extui %0 : i1 to i32
    %c0_i32_0 = arith.constant 0 : i32
    %2 = arith.cmpi ne, %1, %c0_i32_0 : i32
    scf.if %2 {
      %c0_198 = arith.constant 0 : index
      %c0_199 = arith.constant 0 : index
      %210 = vector.load %arg17[%c0_198, %c0_199] : memref<64x8xf32, #tpu.memory_space<vmem>>, vector<64x8xf32>
      %c0_200 = arith.constant 0 : index
      %c0_201 = arith.constant 0 : index
      %211 = vector.load %arg19[%c0_200, %c0_201] : memref<64x8xf32, #tpu.memory_space<vmem>>, vector<64x8xf32>
      tpu.vector_store %arg19[%c0_200, %c0_201], %210 {strides = array<i32>} : memref<64x8xf32, #tpu.memory_space<vmem>>, vector<64x8xf32>,
    } else {
    }
    %c0 = arith.constant 0 : index
    %c0_1 = arith.constant 0 : index
    %c0_2 = arith.constant 0 : index
    %3 = vector.load %arg2[%c0, %c0_1, %c0_2] : memref<1x450x27xbf16, #tpu.memory_space<vmem>>, vector<1x450x27xbf16>
    %4 = vector.shape_cast %3 : vector<1x450x27xbf16> to vector<450x27xbf16>
    %c0_3 = arith.constant 0 : index
    %c0_4 = arith.constant 0 : index
    %5 = vector.load %arg4[%c0_3, %c0_4] : memref<27x64xbf16, #tpu.memory_space<vmem>>, vector<27x64xbf16>
    %cst = arith.constant dense<0.000000e+00> : vector<450x64xf32>
    %6 = tpu.matmul %4, %5, %cst {dimension_numbers = #tpu.dot_dimension_numbers<[1], [0], [0], [1], [0, 0, 1, 1], [], []>} : vector<450x27xbf16>, vector<27x64xbf16>, vector<450x64xf32> -> vector<450x64xf32>
    %c0_5 = arith.constant 0 : index
    %c0_6 = arith.constant 0 : index
    %7 = vector.load %arg5[%c0_5, %c0_6] : memref<1x64xf32, #tpu.memory_space<vmem>>, vector<1x64xf32>
    %8 = vector.broadcast %7 : vector<1x64xf32> to vector<450x64xf32>
    %9 = arith.addf %6, %8 : vector<450x64xf32>
    %cst_7 = arith.constant 0.000000e+00 : f32
    %10 = vector.broadcast %cst_7 : f32 to vector<450x64xf32>
    %11 = arith.maximumf %9, %10 : vector<450x64xf32>
    %12 = arith.truncf %11 : vector<450x64xf32> to vector<450x64xbf16>
    %c0_8 = arith.constant 0 : index
    %c0_9 = arith.constant 0 : index
    %c0_10 = arith.constant 0 : index
    %13 = vector.load %arg6[%c0_8, %c0_9, %c0_10] : memref<9x98x450xbf16, #tpu.memory_space<vmem>>, vector<1x98x450xbf16>
    %14 = vector.shape_cast %13 : vector<1x98x450xbf16> to vector<98x450xbf16>
    %cst_11 = arith.constant dense<0.000000e+00> : vector<98x64xf32>
    %15 = tpu.matmul %14, %12, %cst_11 {dimension_numbers = #tpu.dot_dimension_numbers<[1], [0], [0], [1], [0, 0, 1, 1], [], []>} : vector<98x450xbf16>, vector<450x64xbf16>, vector<98x64xf32> -> vector<98x64xf32>
    %16 = arith.truncf %15 : vector<98x64xf32> to vector<98x64xbf16>
    %c0_12 = arith.constant 0 : index
    %c0_13 = arith.constant 0 : index
    %17 = vector.load %arg20[%c0_12, %c0_13] : memref<98x576xbf16, #tpu.memory_space<vmem>>, vector<98x64xbf16>
    tpu.vector_store %arg20[%c0_12, %c0_13], %16 {strides = array<i32>} : memref<98x576xbf16, #tpu.memory_space<vmem>>, vector<98x64xbf16>,
    %c1 = arith.constant 1 : index
    %c0_14 = arith.constant 0 : index
    %c0_15 = arith.constant 0 : index
    %18 = vector.load %arg6[%c1, %c0_14, %c0_15] : memref<9x98x450xbf16, #tpu.memory_space<vmem>>, vector<1x98x450xbf16>
    %19 = vector.shape_cast %18 : vector<1x98x450xbf16> to vector<98x450xbf16>
    %cst_16 = arith.constant dense<0.000000e+00> : vector<98x64xf32>
    %20 = tpu.matmul %19, %12, %cst_16 {dimension_numbers = #tpu.dot_dimension_numbers<[1], [0], [0], [1], [0, 0, 1, 1], [], []>} : vector<98x450xbf16>, vector<450x64xbf16>, vector<98x64xf32> -> vector<98x64xf32>
    %21 = arith.truncf %20 : vector<98x64xf32> to vector<98x64xbf16>
    %c0_17 = arith.constant 0 : index
    %c64 = arith.constant 64 : index
    %22 = vector.load %arg20[%c0_17, %c64] : memref<98x576xbf16, #tpu.memory_space<vmem>>, vector<98x64xbf16>
    tpu.vector_store %arg20[%c0_17, %c64], %21 {strides = array<i32>} : memref<98x576xbf16, #tpu.memory_space<vmem>>, vector<98x64xbf16>,
    %c2 = arith.constant 2 : index
    %c0_18 = arith.constant 0 : index
    %c0_19 = arith.constant 0 : index
    %23 = vector.load %arg6[%c2, %c0_18, %c0_19] : memref<9x98x450xbf16, #tpu.memory_space<vmem>>, vector<1x98x450xbf16>
    %24 = vector.shape_cast %23 : vector<1x98x450xbf16> to vector<98x450xbf16>
    %cst_20 = arith.constant dense<0.000000e+00> : vector<98x64xf32>
    %25 = tpu.matmul %24, %12, %cst_20 {dimension_numbers = #tpu.dot_dimension_numbers<[1], [0], [0], [1], [0, 0, 1, 1], [], []>} : vector<98x450xbf16>, vector<450x64xbf16>, vector<98x64xf32> -> vector<98x64xf32>
    %26 = arith.truncf %25 : vector<98x64xf32> to vector<98x64xbf16>
    %c0_21 = arith.constant 0 : index
    %c128 = arith.constant 128 : index
    %27 = vector.load %arg20[%c0_21, %c128] : memref<98x576xbf16, #tpu.memory_space<vmem>>, vector<98x64xbf16>
    tpu.vector_store %arg20[%c0_21, %c128], %26 {strides = array<i32>} : memref<98x576xbf16, #tpu.memory_space<vmem>>, vector<98x64xbf16>,
    %c3 = arith.constant 3 : index
    %c0_22 = arith.constant 0 : index
    %c0_23 = arith.constant 0 : index
    %28 = vector.load %arg6[%c3, %c0_22, %c0_23] : memref<9x98x450xbf16, #tpu.memory_space<vmem>>, vector<1x98x450xbf16>
    %29 = vector.shape_cast %28 : vector<1x98x450xbf16> to vector<98x450xbf16>
    %cst_24 = arith.constant dense<0.000000e+00> : vector<98x64xf32>
    %30 = tpu.matmul %29, %12, %cst_24 {dimension_numbers = #tpu.dot_dimension_numbers<[1], [0], [0], [1], [0, 0, 1, 1], [], []>} : vector<98x450xbf16>, vector<450x64xbf16>, vector<98x64xf32> -> vector<98x64xf32>
    %31 = arith.truncf %30 : vector<98x64xf32> to vector<98x64xbf16>
    %c0_25 = arith.constant 0 : index
    %c192 = arith.constant 192 : index
    %32 = vector.load %arg20[%c0_25, %c192] : memref<98x576xbf16, #tpu.memory_space<vmem>>, vector<98x64xbf16>
    tpu.vector_store %arg20[%c0_25, %c192], %31 {strides = array<i32>} : memref<98x576xbf16, #tpu.memory_space<vmem>>, vector<98x64xbf16>,
    %c4 = arith.constant 4 : index
    %c0_26 = arith.constant 0 : index
    %c0_27 = arith.constant 0 : index
    %33 = vector.load %arg6[%c4, %c0_26, %c0_27] : memref<9x98x450xbf16, #tpu.memory_space<vmem>>, vector<1x98x450xbf16>
    %34 = vector.shape_cast %33 : vector<1x98x450xbf16> to vector<98x450xbf16>
    %cst_28 = arith.constant dense<0.000000e+00> : vector<98x64xf32>
    %35 = tpu.matmul %34, %12, %cst_28 {dimension_numbers = #tpu.dot_dimension_numbers<[1], [0], [0], [1], [0, 0, 1, 1], [], []>} : vector<98x450xbf16>, vector<450x64xbf16>, vector<98x64xf32> -> vector<98x64xf32>
    %36 = arith.truncf %35 : vector<98x64xf32> to vector<98x64xbf16>
    %c0_29 = arith.constant 0 : index
    %c256 = arith.constant 256 : index
    %37 = vector.load %arg20[%c0_29, %c256] : memref<98x576xbf16, #tpu.memory_space<vmem>>, vector<98x64xbf16>
    tpu.vector_store %arg20[%c0_29, %c256], %36 {strides = array<i32>} : memref<98x576xbf16, #tpu.memory_space<vmem>>, vector<98x64xbf16>,
    %c5 = arith.constant 5 : index
    %c0_30 = arith.constant 0 : index
    %c0_31 = arith.constant 0 : index
    %38 = vector.load %arg6[%c5, %c0_30, %c0_31] : memref<9x98x450xbf16, #tpu.memory_space<vmem>>, vector<1x98x450xbf16>
    %39 = vector.shape_cast %38 : vector<1x98x450xbf16> to vector<98x450xbf16>
    %cst_32 = arith.constant dense<0.000000e+00> : vector<98x64xf32>
    %40 = tpu.matmul %39, %12, %cst_32 {dimension_numbers = #tpu.dot_dimension_numbers<[1], [0], [0], [1], [0, 0, 1, 1], [], []>} : vector<98x450xbf16>, vector<450x64xbf16>, vector<98x64xf32> -> vector<98x64xf32>
    %41 = arith.truncf %40 : vector<98x64xf32> to vector<98x64xbf16>
    %c0_33 = arith.constant 0 : index
    %c320 = arith.constant 320 : index
    %42 = vector.load %arg20[%c0_33, %c320] : memref<98x576xbf16, #tpu.memory_space<vmem>>, vector<98x64xbf16>
    tpu.vector_store %arg20[%c0_33, %c320], %41 {strides = array<i32>} : memref<98x576xbf16, #tpu.memory_space<vmem>>, vector<98x64xbf16>,
    %c6 = arith.constant 6 : index
    %c0_34 = arith.constant 0 : index
    %c0_35 = arith.constant 0 : index
    %43 = vector.load %arg6[%c6, %c0_34, %c0_35] : memref<9x98x450xbf16, #tpu.memory_space<vmem>>, vector<1x98x450xbf16>
    %44 = vector.shape_cast %43 : vector<1x98x450xbf16> to vector<98x450xbf16>
    %cst_36 = arith.constant dense<0.000000e+00> : vector<98x64xf32>
    %45 = tpu.matmul %44, %12, %cst_36 {dimension_numbers = #tpu.dot_dimension_numbers<[1], [0], [0], [1], [0, 0, 1, 1], [], []>} : vector<98x450xbf16>, vector<450x64xbf16>, vector<98x64xf32> -> vector<98x64xf32>
    %46 = arith.truncf %45 : vector<98x64xf32> to vector<98x64xbf16>
    %c0_37 = arith.constant 0 : index
    %c384 = arith.constant 384 : index
    %47 = vector.load %arg20[%c0_37, %c384] : memref<98x576xbf16, #tpu.memory_space<vmem>>, vector<98x64xbf16>
    tpu.vector_store %arg20[%c0_37, %c384], %46 {strides = array<i32>} : memref<98x576xbf16, #tpu.memory_space<vmem>>, vector<98x64xbf16>,
    %c7 = arith.constant 7 : index
    %c0_38 = arith.constant 0 : index
    %c0_39 = arith.constant 0 : index
    %48 = vector.load %arg6[%c7, %c0_38, %c0_39] : memref<9x98x450xbf16, #tpu.memory_space<vmem>>, vector<1x98x450xbf16>
    %49 = vector.shape_cast %48 : vector<1x98x450xbf16> to vector<98x450xbf16>
    %cst_40 = arith.constant dense<0.000000e+00> : vector<98x64xf32>
    %50 = tpu.matmul %49, %12, %cst_40 {dimension_numbers = #tpu.dot_dimension_numbers<[1], [0], [0], [1], [0, 0, 1, 1], [], []>} : vector<98x450xbf16>, vector<450x64xbf16>, vector<98x64xf32> -> vector<98x64xf32>
    %51 = arith.truncf %50 : vector<98x64xf32> to vector<98x64xbf16>
    %c0_41 = arith.constant 0 : index
    %c448 = arith.constant 448 : index
    %52 = vector.load %arg20[%c0_41, %c448] : memref<98x576xbf16, #tpu.memory_space<vmem>>, vector<98x64xbf16>
    tpu.vector_store %arg20[%c0_41, %c448], %51 {strides = array<i32>} : memref<98x576xbf16, #tpu.memory_space<vmem>>, vector<98x64xbf16>,
    %c8 = arith.constant 8 : index
    %c0_42 = arith.constant 0 : index
    %c0_43 = arith.constant 0 : index
    %53 = vector.load %arg6[%c8, %c0_42, %c0_43] : memref<9x98x450xbf16, #tpu.memory_space<vmem>>, vector<1x98x450xbf16>
    %54 = vector.shape_cast %53 : vector<1x98x450xbf16> to vector<98x450xbf16>
    %cst_44 = arith.constant dense<0.000000e+00> : vector<98x64xf32>
    %55 = tpu.matmul %54, %12, %cst_44 {dimension_numbers = #tpu.dot_dimension_numbers<[1], [0], [0], [1], [0, 0, 1, 1], [], []>} : vector<98x450xbf16>, vector<450x64xbf16>, vector<98x64xf32> -> vector<98x64xf32>
    %56 = arith.truncf %55 : vector<98x64xf32> to vector<98x64xbf16>
    %c0_45 = arith.constant 0 : index
    %c512 = arith.constant 512 : index
    %57 = vector.load %arg20[%c0_45, %c512] : memref<98x576xbf16, #tpu.memory_space<vmem>>, vector<98x64xbf16>
    tpu.vector_store %arg20[%c0_45, %c512], %56 {strides = array<i32>} : memref<98x576xbf16, #tpu.memory_space<vmem>>, vector<98x64xbf16>,
    %c0_46 = arith.constant 0 : index
    %c0_47 = arith.constant 0 : index
    %58 = vector.load %arg20[%c0_46, %c0_47] : memref<98x576xbf16, #tpu.memory_space<vmem>>, vector<98x576xbf16>
    %c0_48 = arith.constant 0 : index
    %c0_49 = arith.constant 0 : index
    %59 = vector.load %arg7[%c0_48, %c0_49] : memref<576x64xbf16, #tpu.memory_space<vmem>>, vector<576x64xbf16>
    %cst_50 = arith.constant dense<0.000000e+00> : vector<98x64xf32>
    %60 = tpu.matmul %58, %59, %cst_50 {dimension_numbers = #tpu.dot_dimension_numbers<[1], [0], [0], [1], [0, 0, 1, 1], [], []>} : vector<98x576xbf16>, vector<576x64xbf16>, vector<98x64xf32> -> vector<98x64xf32>
    %c0_51 = arith.constant 0 : index
    %c0_52 = arith.constant 0 : index
    %61 = vector.load %arg8[%c0_51, %c0_52] : memref<1x64xf32, #tpu.memory_space<vmem>>, vector<1x64xf32>
    %62 = vector.broadcast %61 : vector<1x64xf32> to vector<98x64xf32>
    %63 = arith.addf %60, %62 : vector<98x64xf32>
    %cst_53 = arith.constant 0.000000e+00 : f32
    %64 = vector.broadcast %cst_53 : f32 to vector<98x64xf32>
    %65 = arith.maximumf %63, %64 : vector<98x64xf32>
    %66 = arith.truncf %65 : vector<98x64xf32> to vector<98x64xbf16>
    %c0_54 = arith.constant 0 : index
    %c0_55 = arith.constant 0 : index
    %c0_56 = arith.constant 0 : index
    %67 = vector.load %arg9[%c0_54, %c0_55, %c0_56] : memref<9x18x98xbf16, #tpu.memory_space<vmem>>, vector<1x18x98xbf16>
    %68 = vector.shape_cast %67 : vector<1x18x98xbf16> to vector<18x98xbf16>
    %cst_57 = arith.constant dense<0.000000e+00> : vector<18x64xf32>
    %69 = tpu.matmul %68, %66, %cst_57 {dimension_numbers = #tpu.dot_dimension_numbers<[1], [0], [0], [1], [0, 0, 1, 1], [], []>} : vector<18x98xbf16>, vector<98x64xbf16>, vector<18x64xf32> -> vector<18x64xf32>
    %70 = arith.truncf %69 : vector<18x64xf32> to vector<18x64xbf16>
    %c0_58 = arith.constant 0 : index
    %c0_59 = arith.constant 0 : index
    %71 = vector.load %arg20[%c0_58, %c0_59] : memref<98x576xbf16, #tpu.memory_space<vmem>>, vector<18x64xbf16>
    tpu.vector_store %arg20[%c0_58, %c0_59], %70 {strides = array<i32>} : memref<98x576xbf16, #tpu.memory_space<vmem>>, vector<18x64xbf16>,
    %c1_60 = arith.constant 1 : index
    %c0_61 = arith.constant 0 : index
    %c0_62 = arith.constant 0 : index
    %72 = vector.load %arg9[%c1_60, %c0_61, %c0_62] : memref<9x18x98xbf16, #tpu.memory_space<vmem>>, vector<1x18x98xbf16>
    %73 = vector.shape_cast %72 : vector<1x18x98xbf16> to vector<18x98xbf16>
    %cst_63 = arith.constant dense<0.000000e+00> : vector<18x64xf32>
    %74 = tpu.matmul %73, %66, %cst_63 {dimension_numbers = #tpu.dot_dimension_numbers<[1], [0], [0], [1], [0, 0, 1, 1], [], []>} : vector<18x98xbf16>, vector<98x64xbf16>, vector<18x64xf32> -> vector<18x64xf32>
    %75 = arith.truncf %74 : vector<18x64xf32> to vector<18x64xbf16>
    %c0_64 = arith.constant 0 : index
    %c64_65 = arith.constant 64 : index
    %76 = vector.load %arg20[%c0_64, %c64_65] : memref<98x576xbf16, #tpu.memory_space<vmem>>, vector<18x64xbf16>
    tpu.vector_store %arg20[%c0_64, %c64_65], %75 {strides = array<i32>} : memref<98x576xbf16, #tpu.memory_space<vmem>>, vector<18x64xbf16>,
    %c2_66 = arith.constant 2 : index
    %c0_67 = arith.constant 0 : index
    %c0_68 = arith.constant 0 : index
    %77 = vector.load %arg9[%c2_66, %c0_67, %c0_68] : memref<9x18x98xbf16, #tpu.memory_space<vmem>>, vector<1x18x98xbf16>
    %78 = vector.shape_cast %77 : vector<1x18x98xbf16> to vector<18x98xbf16>
    %cst_69 = arith.constant dense<0.000000e+00> : vector<18x64xf32>
    %79 = tpu.matmul %78, %66, %cst_69 {dimension_numbers = #tpu.dot_dimension_numbers<[1], [0], [0], [1], [0, 0, 1, 1], [], []>} : vector<18x98xbf16>, vector<98x64xbf16>, vector<18x64xf32> -> vector<18x64xf32>
    %80 = arith.truncf %79 : vector<18x64xf32> to vector<18x64xbf16>
    %c0_70 = arith.constant 0 : index
    %c128_71 = arith.constant 128 : index
    %81 = vector.load %arg20[%c0_70, %c128_71] : memref<98x576xbf16, #tpu.memory_space<vmem>>, vector<18x64xbf16>
    tpu.vector_store %arg20[%c0_70, %c128_71], %80 {strides = array<i32>} : memref<98x576xbf16, #tpu.memory_space<vmem>>, vector<18x64xbf16>,
    %c3_72 = arith.constant 3 : index
    %c0_73 = arith.constant 0 : index
    %c0_74 = arith.constant 0 : index
    %82 = vector.load %arg9[%c3_72, %c0_73, %c0_74] : memref<9x18x98xbf16, #tpu.memory_space<vmem>>, vector<1x18x98xbf16>
    %83 = vector.shape_cast %82 : vector<1x18x98xbf16> to vector<18x98xbf16>
    %cst_75 = arith.constant dense<0.000000e+00> : vector<18x64xf32>
    %84 = tpu.matmul %83, %66, %cst_75 {dimension_numbers = #tpu.dot_dimension_numbers<[1], [0], [0], [1], [0, 0, 1, 1], [], []>} : vector<18x98xbf16>, vector<98x64xbf16>, vector<18x64xf32> -> vector<18x64xf32>
    %85 = arith.truncf %84 : vector<18x64xf32> to vector<18x64xbf16>
    %c0_76 = arith.constant 0 : index
    %c192_77 = arith.constant 192 : index
    %86 = vector.load %arg20[%c0_76, %c192_77] : memref<98x576xbf16, #tpu.memory_space<vmem>>, vector<18x64xbf16>
    tpu.vector_store %arg20[%c0_76, %c192_77], %85 {strides = array<i32>} : memref<98x576xbf16, #tpu.memory_space<vmem>>, vector<18x64xbf16>,
    %c4_78 = arith.constant 4 : index
    %c0_79 = arith.constant 0 : index
    %c0_80 = arith.constant 0 : index
    %87 = vector.load %arg9[%c4_78, %c0_79, %c0_80] : memref<9x18x98xbf16, #tpu.memory_space<vmem>>, vector<1x18x98xbf16>
    %88 = vector.shape_cast %87 : vector<1x18x98xbf16> to vector<18x98xbf16>
    %cst_81 = arith.constant dense<0.000000e+00> : vector<18x64xf32>
    %89 = tpu.matmul %88, %66, %cst_81 {dimension_numbers = #tpu.dot_dimension_numbers<[1], [0], [0], [1], [0, 0, 1, 1], [], []>} : vector<18x98xbf16>, vector<98x64xbf16>, vector<18x64xf32> -> vector<18x64xf32>
    %90 = arith.truncf %89 : vector<18x64xf32> to vector<18x64xbf16>
    %c0_82 = arith.constant 0 : index
    %c256_83 = arith.constant 256 : index
    %91 = vector.load %arg20[%c0_82, %c256_83] : memref<98x576xbf16, #tpu.memory_space<vmem>>, vector<18x64xbf16>
    tpu.vector_store %arg20[%c0_82, %c256_83], %90 {strides = array<i32>} : memref<98x576xbf16, #tpu.memory_space<vmem>>, vector<18x64xbf16>,
    %c5_84 = arith.constant 5 : index
    %c0_85 = arith.constant 0 : index
    %c0_86 = arith.constant 0 : index
    %92 = vector.load %arg9[%c5_84, %c0_85, %c0_86] : memref<9x18x98xbf16, #tpu.memory_space<vmem>>, vector<1x18x98xbf16>
    %93 = vector.shape_cast %92 : vector<1x18x98xbf16> to vector<18x98xbf16>
    %cst_87 = arith.constant dense<0.000000e+00> : vector<18x64xf32>
    %94 = tpu.matmul %93, %66, %cst_87 {dimension_numbers = #tpu.dot_dimension_numbers<[1], [0], [0], [1], [0, 0, 1, 1], [], []>} : vector<18x98xbf16>, vector<98x64xbf16>, vector<18x64xf32> -> vector<18x64xf32>
    %95 = arith.truncf %94 : vector<18x64xf32> to vector<18x64xbf16>
    %c0_88 = arith.constant 0 : index
    %c320_89 = arith.constant 320 : index
    %96 = vector.load %arg20[%c0_88, %c320_89] : memref<98x576xbf16, #tpu.memory_space<vmem>>, vector<18x64xbf16>
    tpu.vector_store %arg20[%c0_88, %c320_89], %95 {strides = array<i32>} : memref<98x576xbf16, #tpu.memory_space<vmem>>, vector<18x64xbf16>,
    %c6_90 = arith.constant 6 : index
    %c0_91 = arith.constant 0 : index
    %c0_92 = arith.constant 0 : index
    %97 = vector.load %arg9[%c6_90, %c0_91, %c0_92] : memref<9x18x98xbf16, #tpu.memory_space<vmem>>, vector<1x18x98xbf16>
    %98 = vector.shape_cast %97 : vector<1x18x98xbf16> to vector<18x98xbf16>
    %cst_93 = arith.constant dense<0.000000e+00> : vector<18x64xf32>
    %99 = tpu.matmul %98, %66, %cst_93 {dimension_numbers = #tpu.dot_dimension_numbers<[1], [0], [0], [1], [0, 0, 1, 1], [], []>} : vector<18x98xbf16>, vector<98x64xbf16>, vector<18x64xf32> -> vector<18x64xf32>
    %100 = arith.truncf %99 : vector<18x64xf32> to vector<18x64xbf16>
    %c0_94 = arith.constant 0 : index
    %c384_95 = arith.constant 384 : index
    %101 = vector.load %arg20[%c0_94, %c384_95] : memref<98x576xbf16, #tpu.memory_space<vmem>>, vector<18x64xbf16>
    tpu.vector_store %arg20[%c0_94, %c384_95], %100 {strides = array<i32>} : memref<98x576xbf16, #tpu.memory_space<vmem>>, vector<18x64xbf16>,
    %c7_96 = arith.constant 7 : index
    %c0_97 = arith.constant 0 : index
    %c0_98 = arith.constant 0 : index
    %102 = vector.load %arg9[%c7_96, %c0_97, %c0_98] : memref<9x18x98xbf16, #tpu.memory_space<vmem>>, vector<1x18x98xbf16>
    %103 = vector.shape_cast %102 : vector<1x18x98xbf16> to vector<18x98xbf16>
    %cst_99 = arith.constant dense<0.000000e+00> : vector<18x64xf32>
    %104 = tpu.matmul %103, %66, %cst_99 {dimension_numbers = #tpu.dot_dimension_numbers<[1], [0], [0], [1], [0, 0, 1, 1], [], []>} : vector<18x98xbf16>, vector<98x64xbf16>, vector<18x64xf32> -> vector<18x64xf32>
    %105 = arith.truncf %104 : vector<18x64xf32> to vector<18x64xbf16>
    %c0_100 = arith.constant 0 : index
    %c448_101 = arith.constant 448 : index
    %106 = vector.load %arg20[%c0_100, %c448_101] : memref<98x576xbf16, #tpu.memory_space<vmem>>, vector<18x64xbf16>
    tpu.vector_store %arg20[%c0_100, %c448_101], %105 {strides = array<i32>} : memref<98x576xbf16, #tpu.memory_space<vmem>>, vector<18x64xbf16>,
    %c8_102 = arith.constant 8 : index
    %c0_103 = arith.constant 0 : index
    %c0_104 = arith.constant 0 : index
    %107 = vector.load %arg9[%c8_102, %c0_103, %c0_104] : memref<9x18x98xbf16, #tpu.memory_space<vmem>>, vector<1x18x98xbf16>
    %108 = vector.shape_cast %107 : vector<1x18x98xbf16> to vector<18x98xbf16>
    %cst_105 = arith.constant dense<0.000000e+00> : vector<18x64xf32>
    %109 = tpu.matmul %108, %66, %cst_105 {dimension_numbers = #tpu.dot_dimension_numbers<[1], [0], [0], [1], [0, 0, 1, 1], [], []>} : vector<18x98xbf16>, vector<98x64xbf16>, vector<18x64xf32> -> vector<18x64xf32>
    %110 = arith.truncf %109 : vector<18x64xf32> to vector<18x64xbf16>
    %c0_106 = arith.constant 0 : index
    %c512_107 = arith.constant 512 : index
    %111 = vector.load %arg20[%c0_106, %c512_107] : memref<98x576xbf16, #tpu.memory_space<vmem>>, vector<18x64xbf16>
    tpu.vector_store %arg20[%c0_106, %c512_107], %110 {strides = array<i32>} : memref<98x576xbf16, #tpu.memory_space<vmem>>, vector<18x64xbf16>,
    %c0_108 = arith.constant 0 : index
    %c0_109 = arith.constant 0 : index
    %112 = vector.load %arg20[%c0_108, %c0_109] : memref<98x576xbf16, #tpu.memory_space<vmem>>, vector<18x576xbf16>
    %c0_110 = arith.constant 0 : index
    %c0_111 = arith.constant 0 : index
    %113 = vector.load %arg10[%c0_110, %c0_111] : memref<576x64xbf16, #tpu.memory_space<vmem>>, vector<576x64xbf16>
    %cst_112 = arith.constant dense<0.000000e+00> : vector<18x64xf32>
    %114 = tpu.matmul %112, %113, %cst_112 {dimension_numbers = #tpu.dot_dimension_numbers<[1], [0], [0], [1], [0, 0, 1, 1], [], []>} : vector<18x576xbf16>, vector<576x64xbf16>, vector<18x64xf32> -> vector<18x64xf32>
    %c0_113 = arith.constant 0 : index
    %c0_114 = arith.constant 0 : index
    %115 = vector.load %arg11[%c0_113, %c0_114] : memref<1x64xf32, #tpu.memory_space<vmem>>, vector<1x64xf32>
    %116 = vector.broadcast %115 : vector<1x64xf32> to vector<18x64xf32>
    %117 = arith.addf %114, %116 : vector<18x64xf32>
    %cst_115 = arith.constant 0.000000e+00 : f32
    %118 = vector.broadcast %cst_115 : f32 to vector<18x64xf32>
    %119 = arith.maximumf %117, %118 : vector<18x64xf32>
    %120 = arith.truncf %119 : vector<18x64xf32> to vector<18x64xbf16>
    %c0_116 = arith.constant 0 : index
    %c0_117 = arith.constant 0 : index
    %c0_118 = arith.constant 0 : index
    %121 = vector.load %arg12[%c0_116, %c0_117, %c0_118] : memref<9x2x18xbf16, #tpu.memory_space<vmem>>, vector<1x2x18xbf16>
    %122 = vector.shape_cast %121 : vector<1x2x18xbf16> to vector<2x18xbf16>
    %cst_119 = arith.constant dense<0.000000e+00> : vector<2x64xf32>
    %123 = tpu.matmul %122, %120, %cst_119 {dimension_numbers = #tpu.dot_dimension_numbers<[1], [0], [0], [1], [0, 0, 1, 1], [], []>} : vector<2x18xbf16>, vector<18x64xbf16>, vector<2x64xf32> -> vector<2x64xf32>
    %124 = arith.truncf %123 : vector<2x64xf32> to vector<2x64xbf16>
    %c0_120 = arith.constant 0 : index
    %c0_121 = arith.constant 0 : index
    %125 = vector.load %arg20[%c0_120, %c0_121] : memref<98x576xbf16, #tpu.memory_space<vmem>>, vector<2x64xbf16>
    tpu.vector_store %arg20[%c0_120, %c0_121], %124 {strides = array<i32>} : memref<98x576xbf16, #tpu.memory_space<vmem>>, vector<2x64xbf16>,
    %c1_122 = arith.constant 1 : index
    %c0_123 = arith.constant 0 : index
    %c0_124 = arith.constant 0 : index
    %126 = vector.load %arg12[%c1_122, %c0_123, %c0_124] : memref<9x2x18xbf16, #tpu.memory_space<vmem>>, vector<1x2x18xbf16>
    %127 = vector.shape_cast %126 : vector<1x2x18xbf16> to vector<2x18xbf16>
    %cst_125 = arith.constant dense<0.000000e+00> : vector<2x64xf32>
    %128 = tpu.matmul %127, %120, %cst_125 {dimension_numbers = #tpu.dot_dimension_numbers<[1], [0], [0], [1], [0, 0, 1, 1], [], []>} : vector<2x18xbf16>, vector<18x64xbf16>, vector<2x64xf32> -> vector<2x64xf32>
    %129 = arith.truncf %128 : vector<2x64xf32> to vector<2x64xbf16>
    %c0_126 = arith.constant 0 : index
    %c64_127 = arith.constant 64 : index
    %130 = vector.load %arg20[%c0_126, %c64_127] : memref<98x576xbf16, #tpu.memory_space<vmem>>, vector<2x64xbf16>
    tpu.vector_store %arg20[%c0_126, %c64_127], %129 {strides = array<i32>} : memref<98x576xbf16, #tpu.memory_space<vmem>>, vector<2x64xbf16>,
    %c2_128 = arith.constant 2 : index
    %c0_129 = arith.constant 0 : index
    %c0_130 = arith.constant 0 : index
    %131 = vector.load %arg12[%c2_128, %c0_129, %c0_130] : memref<9x2x18xbf16, #tpu.memory_space<vmem>>, vector<1x2x18xbf16>
    %132 = vector.shape_cast %131 : vector<1x2x18xbf16> to vector<2x18xbf16>
    %cst_131 = arith.constant dense<0.000000e+00> : vector<2x64xf32>
    %133 = tpu.matmul %132, %120, %cst_131 {dimension_numbers = #tpu.dot_dimension_numbers<[1], [0], [0], [1], [0, 0, 1, 1], [], []>} : vector<2x18xbf16>, vector<18x64xbf16>, vector<2x64xf32> -> vector<2x64xf32>
    %134 = arith.truncf %133 : vector<2x64xf32> to vector<2x64xbf16>
    %c0_132 = arith.constant 0 : index
    %c128_133 = arith.constant 128 : index
    %135 = vector.load %arg20[%c0_132, %c128_133] : memref<98x576xbf16, #tpu.memory_space<vmem>>, vector<2x64xbf16>
    tpu.vector_store %arg20[%c0_132, %c128_133], %134 {strides = array<i32>} : memref<98x576xbf16, #tpu.memory_space<vmem>>, vector<2x64xbf16>,
    %c3_134 = arith.constant 3 : index
    %c0_135 = arith.constant 0 : index
    %c0_136 = arith.constant 0 : index
    %136 = vector.load %arg12[%c3_134, %c0_135, %c0_136] : memref<9x2x18xbf16, #tpu.memory_space<vmem>>, vector<1x2x18xbf16>
    %137 = vector.shape_cast %136 : vector<1x2x18xbf16> to vector<2x18xbf16>
    %cst_137 = arith.constant dense<0.000000e+00> : vector<2x64xf32>
    %138 = tpu.matmul %137, %120, %cst_137 {dimension_numbers = #tpu.dot_dimension_numbers<[1], [0], [0], [1], [0, 0, 1, 1], [], []>} : vector<2x18xbf16>, vector<18x64xbf16>, vector<2x64xf32> -> vector<2x64xf32>
    %139 = arith.truncf %138 : vector<2x64xf32> to vector<2x64xbf16>
    %c0_138 = arith.constant 0 : index
    %c192_139 = arith.constant 192 : index
    %140 = vector.load %arg20[%c0_138, %c192_139] : memref<98x576xbf16, #tpu.memory_space<vmem>>, vector<2x64xbf16>
    tpu.vector_store %arg20[%c0_138, %c192_139], %139 {strides = array<i32>} : memref<98x576xbf16, #tpu.memory_space<vmem>>, vector<2x64xbf16>,
    %c4_140 = arith.constant 4 : index
    %c0_141 = arith.constant 0 : index
    %c0_142 = arith.constant 0 : index
    %141 = vector.load %arg12[%c4_140, %c0_141, %c0_142] : memref<9x2x18xbf16, #tpu.memory_space<vmem>>, vector<1x2x18xbf16>
    %142 = vector.shape_cast %141 : vector<1x2x18xbf16> to vector<2x18xbf16>
    %cst_143 = arith.constant dense<0.000000e+00> : vector<2x64xf32>
    %143 = tpu.matmul %142, %120, %cst_143 {dimension_numbers = #tpu.dot_dimension_numbers<[1], [0], [0], [1], [0, 0, 1, 1], [], []>} : vector<2x18xbf16>, vector<18x64xbf16>, vector<2x64xf32> -> vector<2x64xf32>
    %144 = arith.truncf %143 : vector<2x64xf32> to vector<2x64xbf16>
    %c0_144 = arith.constant 0 : index
    %c256_145 = arith.constant 256 : index
    %145 = vector.load %arg20[%c0_144, %c256_145] : memref<98x576xbf16, #tpu.memory_space<vmem>>, vector<2x64xbf16>
    tpu.vector_store %arg20[%c0_144, %c256_145], %144 {strides = array<i32>} : memref<98x576xbf16, #tpu.memory_space<vmem>>, vector<2x64xbf16>,
    %c5_146 = arith.constant 5 : index
    %c0_147 = arith.constant 0 : index
    %c0_148 = arith.constant 0 : index
    %146 = vector.load %arg12[%c5_146, %c0_147, %c0_148] : memref<9x2x18xbf16, #tpu.memory_space<vmem>>, vector<1x2x18xbf16>
    %147 = vector.shape_cast %146 : vector<1x2x18xbf16> to vector<2x18xbf16>
    %cst_149 = arith.constant dense<0.000000e+00> : vector<2x64xf32>
    %148 = tpu.matmul %147, %120, %cst_149 {dimension_numbers = #tpu.dot_dimension_numbers<[1], [0], [0], [1], [0, 0, 1, 1], [], []>} : vector<2x18xbf16>, vector<18x64xbf16>, vector<2x64xf32> -> vector<2x64xf32>
    %149 = arith.truncf %148 : vector<2x64xf32> to vector<2x64xbf16>
    %c0_150 = arith.constant 0 : index
    %c320_151 = arith.constant 320 : index
    %150 = vector.load %arg20[%c0_150, %c320_151] : memref<98x576xbf16, #tpu.memory_space<vmem>>, vector<2x64xbf16>
    tpu.vector_store %arg20[%c0_150, %c320_151], %149 {strides = array<i32>} : memref<98x576xbf16, #tpu.memory_space<vmem>>, vector<2x64xbf16>,
    %c6_152 = arith.constant 6 : index
    %c0_153 = arith.constant 0 : index
    %c0_154 = arith.constant 0 : index
    %151 = vector.load %arg12[%c6_152, %c0_153, %c0_154] : memref<9x2x18xbf16, #tpu.memory_space<vmem>>, vector<1x2x18xbf16>
    %152 = vector.shape_cast %151 : vector<1x2x18xbf16> to vector<2x18xbf16>
    %cst_155 = arith.constant dense<0.000000e+00> : vector<2x64xf32>
    %153 = tpu.matmul %152, %120, %cst_155 {dimension_numbers = #tpu.dot_dimension_numbers<[1], [0], [0], [1], [0, 0, 1, 1], [], []>} : vector<2x18xbf16>, vector<18x64xbf16>, vector<2x64xf32> -> vector<2x64xf32>
    %154 = arith.truncf %153 : vector<2x64xf32> to vector<2x64xbf16>
    %c0_156 = arith.constant 0 : index
    %c384_157 = arith.constant 384 : index
    %155 = vector.load %arg20[%c0_156, %c384_157] : memref<98x576xbf16, #tpu.memory_space<vmem>>, vector<2x64xbf16>
    tpu.vector_store %arg20[%c0_156, %c384_157], %154 {strides = array<i32>} : memref<98x576xbf16, #tpu.memory_space<vmem>>, vector<2x64xbf16>,
    %c7_158 = arith.constant 7 : index
    %c0_159 = arith.constant 0 : index
    %c0_160 = arith.constant 0 : index
    %156 = vector.load %arg12[%c7_158, %c0_159, %c0_160] : memref<9x2x18xbf16, #tpu.memory_space<vmem>>, vector<1x2x18xbf16>
    %157 = vector.shape_cast %156 : vector<1x2x18xbf16> to vector<2x18xbf16>
    %cst_161 = arith.constant dense<0.000000e+00> : vector<2x64xf32>
    %158 = tpu.matmul %157, %120, %cst_161 {dimension_numbers = #tpu.dot_dimension_numbers<[1], [0], [0], [1], [0, 0, 1, 1], [], []>} : vector<2x18xbf16>, vector<18x64xbf16>, vector<2x64xf32> -> vector<2x64xf32>
    %159 = arith.truncf %158 : vector<2x64xf32> to vector<2x64xbf16>
    %c0_162 = arith.constant 0 : index
    %c448_163 = arith.constant 448 : index
    %160 = vector.load %arg20[%c0_162, %c448_163] : memref<98x576xbf16, #tpu.memory_space<vmem>>, vector<2x64xbf16>
    tpu.vector_store %arg20[%c0_162, %c448_163], %159 {strides = array<i32>} : memref<98x576xbf16, #tpu.memory_space<vmem>>, vector<2x64xbf16>,
    %c8_164 = arith.constant 8 : index
    %c0_165 = arith.constant 0 : index
    %c0_166 = arith.constant 0 : index
    %161 = vector.load %arg12[%c8_164, %c0_165, %c0_166] : memref<9x2x18xbf16, #tpu.memory_space<vmem>>, vector<1x2x18xbf16>
    %162 = vector.shape_cast %161 : vector<1x2x18xbf16> to vector<2x18xbf16>
    %cst_167 = arith.constant dense<0.000000e+00> : vector<2x64xf32>
    %163 = tpu.matmul %162, %120, %cst_167 {dimension_numbers = #tpu.dot_dimension_numbers<[1], [0], [0], [1], [0, 0, 1, 1], [], []>} : vector<2x18xbf16>, vector<18x64xbf16>, vector<2x64xf32> -> vector<2x64xf32>
    %164 = arith.truncf %163 : vector<2x64xf32> to vector<2x64xbf16>
    %c0_168 = arith.constant 0 : index
    %c512_169 = arith.constant 512 : index
    %165 = vector.load %arg20[%c0_168, %c512_169] : memref<98x576xbf16, #tpu.memory_space<vmem>>, vector<2x64xbf16>
    tpu.vector_store %arg20[%c0_168, %c512_169], %164 {strides = array<i32>} : memref<98x576xbf16, #tpu.memory_space<vmem>>, vector<2x64xbf16>,
    %c0_170 = arith.constant 0 : index
    %c0_171 = arith.constant 0 : index
    %166 = vector.load %arg20[%c0_170, %c0_171] : memref<98x576xbf16, #tpu.memory_space<vmem>>, vector<2x576xbf16>
    %c0_172 = arith.constant 0 : index
    %c0_173 = arith.constant 0 : index
    %167 = vector.load %arg13[%c0_172, %c0_173] : memref<576x64xbf16, #tpu.memory_space<vmem>>, vector<576x64xbf16>
    %cst_174 = arith.constant dense<0.000000e+00> : vector<2x64xf32>
    %168 = tpu.matmul %166, %167, %cst_174 {dimension_numbers = #tpu.dot_dimension_numbers<[1], [0], [0], [1], [0, 0, 1, 1], [], []>} : vector<2x576xbf16>, vector<576x64xbf16>, vector<2x64xf32> -> vector<2x64xf32>
    %c0_175 = arith.constant 0 : index
    %c0_176 = arith.constant 0 : index
    %169 = vector.load %arg14[%c0_175, %c0_176] : memref<1x64xf32, #tpu.memory_space<vmem>>, vector<1x64xf32>
    %170 = vector.broadcast %169 : vector<1x64xf32> to vector<2x64xf32>
    %171 = arith.addf %168, %170 : vector<2x64xf32>
    %cst_177 = arith.constant 0.000000e+00 : f32
    %172 = vector.broadcast %cst_177 : f32 to vector<2x64xf32>
    %173 = arith.maximumf %171, %172 : vector<2x64xf32>
    %c0_178 = arith.constant 0 : index
    %c0_179 = arith.constant 0 : index
    %174 = vector.load %arg19[%c0_178, %c0_179] : memref<64x8xf32, #tpu.memory_space<vmem>>, vector<64x8xf32>
    %c0_180 = arith.constant 0 : index
    %c0_181 = arith.constant 0 : index
    %175 = vector.load %arg15[%c0_180, %c0_181] : memref<64x8xf32, #tpu.memory_space<vmem>>, vector<64x8xf32>
    %c0_182 = arith.constant 0 : index
    %c0_183 = arith.constant 0 : index
    %176 = vector.load %arg16[%c0_182, %c0_183] : memref<64x8xf32, #tpu.memory_space<vmem>>, vector<64x8xf32>
    %177 = arith.mulf %176, %174 : vector<64x8xf32>
    %178 = arith.addf %175, %177 : vector<64x8xf32>
    %cst_184 = arith.constant dense<0.000000e+00> : vector<2x8xf32>
    %179 = tpu.matmul %173, %178, %cst_184 {dimension_numbers = #tpu.dot_dimension_numbers<[1], [0], [0], [1], [0, 0, 1, 1], [], []>} : vector<2x64xf32>, vector<64x8xf32>, vector<2x8xf32> -> vector<2x8xf32>
    %c0_185 = arith.constant 0 : index
    %c0_186 = arith.constant 0 : index
    %c0_187 = arith.constant 0 : index
    %180 = vector.load %arg3[%c0_185, %c0_186, %c0_187] : memref<1x2x8xf32, #tpu.memory_space<vmem>>, vector<1x2x8xf32>
    %181 = vector.shape_cast %180 : vector<1x2x8xf32> to vector<2x8xf32>
    %182 = arith.addf %179, %181 : vector<2x8xf32>
    %cst_188 = arith.constant dense<0xFF800000> : vector<2xf32>
    %183 = vector.multi_reduction <maximumf>, %182, %cst_188 [1] : vector<2x8xf32> to vector<2xf32>
    %184 = vector.shape_cast %183 : vector<2xf32> to vector<2x1xf32>
    %185 = vector.broadcast %184 : vector<2x1xf32> to vector<2x8xf32>
    %186 = arith.subf %182, %185 : vector<2x8xf32>
    %187 = math.exp %186 : vector<2x8xf32>
    %cst_189 = arith.constant dense<0.000000e+00> : vector<2xf32>
    %188 = vector.multi_reduction <add>, %187, %cst_189 [1] : vector<2x8xf32> to vector<2xf32>
    %189 = vector.shape_cast %188 : vector<2xf32> to vector<2x1xf32>
    %190 = vector.broadcast %189 : vector<2x1xf32> to vector<2x8xf32>
    %191 = arith.divf %187, %190 : vector<2x8xf32>
    %c0_190 = arith.constant 0 : index
    %c0_191 = arith.constant 0 : index
    %c0_192 = arith.constant 0 : index
    %192 = vector.load %arg18[%c0_190, %c0_191, %c0_192] : memref<1x2x8xf32, #tpu.memory_space<vmem>>, vector<1x2x8xf32>
    %193 = vector.shape_cast %192 : vector<1x2x8xf32> to vector<2x8xf32>
    %194 = vector.shape_cast %191 : vector<2x8xf32> to vector<1x2x8xf32>
    tpu.vector_store %arg18[%c0_190, %c0_191, %c0_192], %194 {strides = array<i32>} : memref<1x2x8xf32, #tpu.memory_space<vmem>>, vector<1x2x8xf32>,
    %c0_193 = arith.constant 0 : index
    %c0_194 = arith.constant 0 : index
    %195 = vector.load %arg1[%c0_193, %c0_194] : memref<1x1xf32, #tpu.memory_space<vmem>>, vector<1x1xf32>
    %196 = vector.extract_strided_slice %173 {offsets = [0, 0], sizes = [1, 64], strides = [1, 1]} : vector<2x64xf32> to vector<1x64xf32>
    %197 = tpu.transpose %196, [1, 0] : vector<1x64xf32> -> vector<64x1xf32>
    %cst_195 = arith.constant 1.000000e+00 : f32
    %198 = vector.broadcast %cst_195 : f32 to vector<1x1xf32>
    %199 = arith.subf %198, %195 : vector<1x1xf32>
    %200 = vector.broadcast %199 : vector<1x1xf32> to vector<64x8xf32>
    %201 = arith.mulf %200, %174 : vector<64x8xf32>
    %202 = vector.extract_strided_slice %191 {offsets = [0, 0], sizes = [1, 8], strides = [1, 1]} : vector<2x8xf32> to vector<1x8xf32>
    %203 = vector.broadcast %197 : vector<64x1xf32> to vector<64x8xf32>
    %204 = vector.broadcast %202 : vector<1x8xf32> to vector<64x8xf32>
    %205 = arith.mulf %203, %204 : vector<64x8xf32>
    %206 = vector.broadcast %195 : vector<1x1xf32> to vector<64x8xf32>
    %207 = arith.mulf %206, %205 : vector<64x8xf32>
    %208 = arith.addf %201, %207 : vector<64x8xf32>
    %c0_196 = arith.constant 0 : index
    %c0_197 = arith.constant 0 : index
    %209 = vector.load %arg19[%c0_196, %c0_197] : memref<64x8xf32, #tpu.memory_space<vmem>>, vector<64x8xf32>
    tpu.vector_store %arg19[%c0_196, %c0_197], %208 {strides = array<i32>} : memref<64x8xf32, #tpu.memory_space<vmem>>, vector<64x8xf32>,
    return
  }
  func.func @transform_0(%arg0: i32) -> (i32, i32) {
    %c0_i32 = arith.constant 0 : i32
    %c0_i32_0 = arith.constant 0 : i32
    %c0_i32_1 = arith.constant 0 : i32
    return %c0_i32, %c0_i32_0 : i32, i32
  }
  func.func @transform_1(%arg0: i32) -> (i32, i32, i32) {
    %c0_i32 = arith.constant 0 : i32
    %c0_i32_0 = arith.constant 0 : i32
    %c0_i32_1 = arith.constant 0 : i32
    return %arg0, %c0_i32, %c0_i32_0 : i32, i32, i32
  }
  func.func @transform_2(%arg0: i32) -> (i32, i32, i32) {
    %c0_i32 = arith.constant 0 : i32
    %c0_i32_0 = arith.constant 0 : i32
    %c0_i32_1 = arith.constant 0 : i32
    return %arg0, %c0_i32, %c0_i32_0 : i32, i32, i32
  }
  func.func @transform_3(%arg0: i32) -> (i32, i32) {
    %c0_i32 = arith.constant 0 : i32
    %c0_i32_0 = arith.constant 0 : i32
    %c0_i32_1 = arith.constant 0 : i32
    return %c0_i32, %c0_i32_0 : i32, i32
  }
  func.func @transform_4(%arg0: i32) -> (i32, i32) {
    %c0_i32 = arith.constant 0 : i32
    %c0_i32_0 = arith.constant 0 : i32
    %c0_i32_1 = arith.constant 0 : i32
    return %c0_i32, %c0_i32_0 : i32, i32
  }
  func.func @transform_5(%arg0: i32) -> (i32, i32, i32) {
    %c0_i32 = arith.constant 0 : i32
    %c0_i32_0 = arith.constant 0 : i32
    %c0_i32_1 = arith.constant 0 : i32
    %c0_i32_2 = arith.constant 0 : i32
    return %c0_i32, %c0_i32_0, %c0_i32_1 : i32, i32, i32
  }
  func.func @transform_6(%arg0: i32) -> (i32, i32) {
    %c0_i32 = arith.constant 0 : i32
    %c0_i32_0 = arith.constant 0 : i32
    %c0_i32_1 = arith.constant 0 : i32
    return %c0_i32, %c0_i32_0 : i32, i32
  }
  func.func @transform_7(%arg0: i32) -> (i32, i32) {
    %c0_i32 = arith.constant 0 : i32
    %c0_i32_0 = arith.constant 0 : i32
    %c0_i32_1 = arith.constant 0 : i32
    return %c0_i32, %c0_i32_0 : i32, i32
  }
  func.func @transform_8(%arg0: i32) -> (i32, i32, i32) {
    %c0_i32 = arith.constant 0 : i32
    %c0_i32_0 = arith.constant 0 : i32
    %c0_i32_1 = arith.constant 0 : i32
    %c0_i32_2 = arith.constant 0 : i32
    return %c0_i32, %c0_i32_0, %c0_i32_1 : i32, i32, i32
  }
  func.func @transform_9(%arg0: i32) -> (i32, i32) {
    %c0_i32 = arith.constant 0 : i32
    %c0_i32_0 = arith.constant 0 : i32
    %c0_i32_1 = arith.constant 0 : i32
    return %c0_i32, %c0_i32_0 : i32, i32
  }
  func.func @transform_10(%arg0: i32) -> (i32, i32) {
    %c0_i32 = arith.constant 0 : i32
    %c0_i32_0 = arith.constant 0 : i32
    %c0_i32_1 = arith.constant 0 : i32
    return %c0_i32, %c0_i32_0 : i32, i32
  }
  func.func @transform_11(%arg0: i32) -> (i32, i32, i32) {
    %c0_i32 = arith.constant 0 : i32
    %c0_i32_0 = arith.constant 0 : i32
    %c0_i32_1 = arith.constant 0 : i32
    %c0_i32_2 = arith.constant 0 : i32
    return %c0_i32, %c0_i32_0, %c0_i32_1 : i32, i32, i32
  }
  func.func @transform_12(%arg0: i32) -> (i32, i32) {
    %c0_i32 = arith.constant 0 : i32
    %c0_i32_0 = arith.constant 0 : i32
    %c0_i32_1 = arith.constant 0 : i32
    return %c0_i32, %c0_i32_0 : i32, i32
  }
  func.func @transform_13(%arg0: i32) -> (i32, i32) {
    %c0_i32 = arith.constant 0 : i32
    %c0_i32_0 = arith.constant 0 : i32
    %c0_i32_1 = arith.constant 0 : i32
    return %c0_i32, %c0_i32_0 : i32, i32
  }
  func.func @transform_14(%arg0: i32) -> (i32, i32) {
    %c0_i32 = arith.constant 0 : i32
    %c0_i32_0 = arith.constant 0 : i32
    %c0_i32_1 = arith.constant 0 : i32
    return %c0_i32, %c0_i32_0 : i32, i32
  }
  func.func @transform_15(%arg0: i32) -> (i32, i32) {
    %c0_i32 = arith.constant 0 : i32
    %c0_i32_0 = arith.constant 0 : i32
    %c0_i32_1 = arith.constant 0 : i32
    return %c0_i32, %c0_i32_0 : i32, i32
  }
  func.func @transform_16(%arg0: i32) -> (i32, i32) {
    %c0_i32 = arith.constant 0 : i32
    %c0_i32_0 = arith.constant 0 : i32
    %c0_i32_1 = arith.constant 0 : i32
    return %c0_i32, %c0_i32_0 : i32, i32
  }
  func.func @transform_17(%arg0: i32) -> (i32, i32, i32) {
    %c0_i32 = arith.constant 0 : i32
    %c0_i32_0 = arith.constant 0 : i32
    %c0_i32_1 = arith.constant 0 : i32
    return %arg0, %c0_i32, %c0_i32_0 : i32, i32, i32
  }
  func.func @transform_18(%arg0: i32) -> (i32, i32) {
    %c0_i32 = arith.constant 0 : i32
    %c0_i32_0 = arith.constant 0 : i32
    %c0_i32_1 = arith.constant 0 : i32
    return %c0_i32, %c0_i32_0 : i32, i32
  }
}

</mosaic_0001>

<bundles_post_ra>
// kernel: plastic_cnn_rollout.1
= control target key start
LH: loop header
LB: loop body
LE: loop exit
PB: predicated region body
PF: predicated region fallthrough
CT: control target
= control target key end

     0   :  { %s15013_s0 = inlined_call_operand.<no memory space> [shape: f32[1,1], index: 0, kind: input, shape index: {}]   ;;  %s15014_s1 = inlined_call_operand.vmem [shape: bf16[6,450,27], index: 1, kind: input, shape index: {}]   ;;  %s15015_s2 = inlined_call_operand.vmem [shape: f32[6,2,8], index: 2, kind: input, shape index: {}]   ;;  %s15016_s3 = inlined_call_operand.vmem [shape: bf16[27,64], index: 3, kind: input, shape index: {}]   ;;  %s15017_s4 = inlined_call_operand.vmem [shape: f32[1,64], index: 4, kind: input, shape index: {}]   ;;  %s15018_s5 = inlined_call_operand.vmem [shape: bf16[9,98,450], index: 5, kind: input, shape index: {}]   ;;  %s15019_s6 = inlined_call_operand.vmem [shape: bf16[576,64], index: 6, kind: input, shape index: {}]   ;;  %s15020_s7 = inlined_call_operand.vmem [shape: f32[1,64], index: 7, kind: input, shape index: {}]   ;;  %s15021_s8 = inlined_call_operand.vmem [shape: bf16[9,18,98], index: 8, kind: input, shape index: {}]   ;;  %s15022_s9 = inlined_call_operand.vmem [shape: bf16[576,64], index: 9, kind: input, shape index: {}]   ;;  %s15023_s10 = inlined_call_operand.vmem [shape: f32[1,64], index: 10, kind: input, shape index: {}]   ;;  %s15024_s11 = inlined_call_operand.vmem [shape: bf16[9,2,18], index: 11, kind: input, shape index: {}]   ;;  %s15025_s12 = inlined_call_operand.vmem [shape: bf16[576,64], index: 12, kind: input, shape index: {}]   ;;  %s15026_s13 = inlined_call_operand.vmem [shape: f32[1,64], index: 13, kind: input, shape index: {}]   ;;  %s15027_s14 = inlined_call_operand.vmem [shape: f32[64,8], index: 14, kind: input, shape index: {}]   ;;  %s15028_s15 = inlined_call_operand.vmem [shape: f32[64,8], index: 15, kind: input, shape index: {}]   ;;  %s15029_s16 = inlined_call_operand.vmem [shape: f32[64,8], index: 16, kind: input, shape index: {}]   ;;  %s15030_s17 = inlined_call_operand.hbm [shape: f32[6,2,8], index: 17, kind: output, shape index: {0}]   ;;  %s15031_s18 = inlined_call_operand.vmem [shape: f32[64,8], index: 18, kind: output, shape index: {1}]  }
   0x1   :  { %15048 = sst [smem:[#allocation26_spill]] %s15013_s0 }
   0x2   :  { %15049 = sst [smem:[#allocation27_spill]] %s15014_s1 }
   0x3   :  { %15050 = sst [smem:[#allocation28_spill]] %s15015_s2 }
   0x4   :  { %15051 = sst [smem:[#allocation29_spill]] %s15026_s13 }
   0x5   :  { %15052 = sst [smem:[#allocation30_spill]] %s15030_s17 }
   0x6   :  { %s15053_s29 = sld [smem:[#allocation26_spill]] }
   0xc   :  { %v24_v0 = vstv %s15053_s29 }
   0xd   :  { %25 = vst [vmem:[#allocation3] sm:$0x1] %v24_v0 }
   0xe   :  { %26 = vsyncpa [#allocation5], 0 }
   0xf   :  { %28 = vsyncpa [#allocation5 + $0x1], 0  ;;  %s11731_s30 = smov 0   ;;  %s11733_s0 = smov 0  }
  0x10   :  { %s11735_s19 = smov 0   ;;  %s11737_s1 = smov 0  }
  0x11 LB: > { %15054 = sst [smem:[#allocation7_spill]] %s11613_s30  ;;  %s11752_s20 = sadd.s32 4294967295, %s11625_s1   ;;  %s11625_s1 = sphi %s11737_s1, %s15127_s1   ;;  %s11621_s19 = sphi %s11735_s19, %s15130_s19   ;;  %s11617_s0 = sphi %s11733_s0, %s15129_s0   ;;  %s11613_s30 = sphi %s11731_s30, %s15128_s30  }
  0x12   : > { %15055 = sst [smem:[#allocation8_spill]] %s11617_s0  ;;  %s8462_s21 = sadd.s32 4294967294, %s11625_s1  }
  0x13   : > { %15056 = sst [smem:[#allocation9_spill]] %s11621_s19  ;;  %s11756_s22 = sadd.s32 1, %s11625_s1  }
  0x14   : > { %15057 = sst [smem:[#allocation10_spill]] %s11625_s1  ;;  %s408_s2 = sadd.s32 1, %s11621_s19 }
  0x15   : > { %15058 = sst [smem:[#allocation11_spill]] %s11756_s22  ;;  %s405_s23 = ssub.s32 %s11625_s1, %s11756_s22 }
  0x16   : > { %p418_p0 = scmp.ne.s32.totalorder %s11621_s19, %s11617_s0  ;;  %p406_p1 = scmp.eq.s32.totalorder %s405_s23, 0 }
  0x17   : > { %p419_p2 = scmp.eq.s32.totalorder %s11752_s20, 5  ;;  %p424_p3 = scmp.ne.s32.totalorder %s11617_s0, %s11613_s30 }
  0x18   : > { %p425_p4 = scmp.eq.s32.totalorder %s8462_s21, 5  ;;  %p8465_p7 = scmp.ge.s32.totalorder %s11625_s1, 1 }
  0x19   : > { %s11767_s24 = scalar_select %p406_p1, %s11621_s19, %s408_s2  }
  0x1a   : > { %p11769_p5 = por %p419_p2, %p418_p0  ;;  %p11773_p6 = por %p425_p4, %p424_p3 }
  0x1b   : > { %15059 = sst [smem:[#allocation12_spill]] %s11767_s24  ;;  %p524_p8 = scmp.lt.s32.totalorder %s11625_s1, 7 }
  0x1c   : > { %s15060_s25 = scalar_select %p11769_p5, 1, 0 }
  0x1d   : > { %s15062_s26 = scalar_select %p11773_p6, 1, 0 }
  0x1e   : > { %15061 = sst [smem:[#allocation13_spill]] %s15060_s25  ;;  %p525_p9 = pnand %p8465_p7, %p524_p8 }
  0x1f   : > { %15063 = sst [smem:[#allocation14_spill]] %s15062_s26 }
  0x20   : > { %528 = sbr.rel (%p525_p9) target bundleno = 3301 (0xce5), region = 88 }
  0x25   : > { %s15041_s27 = sand.u32 1, %s11617_s0   ;;  %p582_p10 = scmp.lt.s32.totalorder %s11752_s20, 5 }
  0x26   : > { %s11783_s28 = sshll.u32 %s15041_s27, 1  ;;  %s15064_s19 = sld [smem:[#allocation28_spill]] }
  0x27   : > { %s583_s29 = scalar_select %p582_p10, %s11752_s20, 5 }
  0x28   : > { %s15065_s1 = sld [smem:[#allocation27_spill]]  ;;  %s579_s17 = scalar_lea.vmem [#allocation4], %s11783_s28 }
  0x29   : > { %s10953_s21 = smul.u32 228, %s583_s29  ;;  %s8468_s2 = sshll.u32 %s583_s29, 1 }
  0x2a   : > { %p8469_p11 = scmp.ne.s32.totalorder %s11752_s20, 0 }
  0x2c   : > { %s11789_s22 = scalar_lea.vmem %s15064_s19, %s8468_s2  ;;  %595 = sbr.rel (%p8469_p11) target bundleno = 54 (0x36), region = 92 }
  0x2e   : > { %s11794_s25 = scalar_lea.vmem %s15065_s1, %s10953_s21 }
  0x31   : > { %v596_v1 = vld [vmem:[%s15029_s16] sm:$0xff]  ;;  %vm604_vm0 = vcmask 64512   ;;  %v597_v2 = vld [vmem:[%s15029_s16 + $0x8] sm:$0xff]  ;;  %v598_v3 = vld [vmem:[%s15029_s16 + $0x10] sm:$0xff] }
  0x32   : > { %605 = vst.msk [vmem:[%s15031_s18] sm:$0xff] %vm604_vm0, %v596_v1  ;;  %606 = vst.msk [vmem:[%s15031_s18 + $0x8] sm:$0xff] %vm604_vm0, %v597_v2  ;;  %v599_v4 = vld [vmem:[%s15029_s16 + $0x18] sm:$0xff]  ;;  %v600_v5 = vld [vmem:[%s15029_s16 + $0x20] sm:$0xff] }
  0x33   : > { %607 = vst.msk [vmem:[%s15031_s18 + $0x10] sm:$0xff] %vm604_vm0, %v598_v3  ;;  %v601_v6 = vld [vmem:[%s15029_s16 + $0x28] sm:$0xff]  ;;  %608 = vst.msk [vmem:[%s15031_s18 + $0x18] sm:$0xff] %vm604_vm0, %v599_v4  ;;  %v602_v7 = vld [vmem:[%s15029_s16 + $0x30] sm:$0xff] }
  0x34   : > { %609 = vst.msk [vmem:[%s15031_s18 + $0x20] sm:$0xff] %vm604_vm0, %v600_v5  ;;  %610 = vst.msk [vmem:[%s15031_s18 + $0x28] sm:$0xff] %vm604_vm0, %v601_v6  ;;  %v603_v8 = vld [vmem:[%s15029_s16 + $0x38] sm:$0xff] }
  0x35   : > { %611 = vst.msk [vmem:[%s15031_s18 + $0x30] sm:$0xff] %vm604_vm0, %v602_v7  ;;  %612 = vst.msk [vmem:[%s15031_s18 + $0x38] sm:$0xff] %vm604_vm0, %v603_v8 }
  0x36 PF: > { %vm923_vm1 = vcmask 1044480   ;;  %v15043_v9 = vmov 0.0   ;;  %v11000_v10 = vld [vmem:[%s15016_s3 + $0x8] sm:$0x3f]   ;;  %vm924_vm2 = vcmask 1045504   ;;  %v11628_v11 = vmov 65535  }
  0x37   : > { %10511 = vmatprep.subr.bf16.mxu0 %v15043_v9  ;;  %v925_v12 = vsel %vm923_vm1, 4294967295, %v11628_v11  ;;  %vm11629_vm3 = vmmov 0   ;;  %v11001_v15 = vld [vmem:[%s15016_s3] sm:$0xff]   ;;  %vm835_vm4 = vcmask 220160   ;;  %v11003_v17 = vld [vmem:[%s11794_s25 + $0x8] sm:$0xff]   ;;  %v11004_v18 = vld [vmem:[%s11794_s25 + $0x10] sm:$0xff]  }
  0x38   : > { %v926_v13 = vsel %vm924_vm2, %v925_v12, 0  ;;  %10515 = vmatprep.mubr.msk.bf16.mxu0 %vm11629_vm3, %v15043_v9  ;;  %v11002_v16 = vld [vmem:[%s11794_s25] sm:$0xff]   ;;  %v11005_v19 = vld [vmem:[%s11794_s25 + $0x18] sm:$0xff]   ;;  %v11007_v21 = vld [vmem:[%s11794_s25 + $0x28] sm:$0xff]   ;;  %vm1433_vm5 = vcmask 539648   ;;  %vm1455_vm6 = vcmask 1040384  }
  0x39   : > { %v928_v14 = vand.u32 %v11000_v10, %v926_v13  ;;  %v11006_v20 = vld [vmem:[%s11794_s25 + $0x20] sm:$0xff]   ;;  %v11008_v22 = vld [vmem:[%s11794_s25 + $0x30] sm:$0xff]   ;;  %v11009_v23 = vld [vmem:[%s11794_s25 + $0x38] sm:$0xff]   ;;  %vm1688_vm7 = vcmask 519168   ;;  %vm1701_vm8 = vcmask 516096   ;;  %s11631_s21 = smov 64  }
  0x3a   : > { %v11010_v24 = vld [vmem:[%s11794_s25 + $0x40] sm:$0xff]   ;;  %v11011_v25 = vld [vmem:[%s11794_s25 + $0x48] sm:$0xff]   ;;  %v11012_v26 = vld [vmem:[%s11794_s25 + $0x50] sm:$0xff]   ;;  %vm2133_vm9 = vcmask 1043968   ;;  %vm2146_vm10 = vcmask 1040896   ;;  %vm5646_vm11 = vcmask 523264  }
  0x3b   : > { %10512 = vmatpush3.bf16.msra.mxu0 %v928_v14  ;;  %v11013_v27 = vld [vmem:[%s11794_s25 + $0x58] sm:$0xff]   ;;  %v11014_v28 = vld [vmem:[%s11794_s25 + $0x60] sm:$0xff]   ;;  %v11015_v29 = vld [vmem:[%s11794_s25 + $0x68] sm:$0xff]   ;;  %vm5963_vm12 = vcmask 801792   ;;  %vm7219_vm13 = vcmask 146432   ;;  %s15117_s29 = sld [smem:[#allocation29_spill]] }
  0x3c   : > { %10513 = vmatprep.subr.bf16.mxu0 %v15043_v9  ;;  %v11016_v30 = vld [vmem:[%s11794_s25 + $0x70] sm:$0xff]   ;;  %v11017_v31 = vld [vmem:[%s11794_s25 + $0x78] sm:$0xff]   ;;  %v11018_v32 = vld [vmem:[%s11794_s25 + $0x80] sm:$0xff]   ;;  %vm8221_vm14 = vcmask 58368   ;;  %s15119_s19 = sld [smem:[#allocation8_spill]]  ;;  %vm8362_vm15 = vcmask 64512  }
  0x3d   : > { %v11019_v33 = vld [vmem:[%s11794_s25 + $0x88] sm:$0xff]   ;;  %v11020_v34 = vld [vmem:[%s11794_s25 + $0x90] sm:$0xff]   ;;  %v11021_v35 = vld [vmem:[%s11794_s25 + $0x98] sm:$0xff]   ;;  %s15120_s1 = sld [smem:[#allocation30_spill]]  ;;  %s11632_s23 = smov [#allocation4]  }
  0x3e   : > { %v11022_v36 = vld [vmem:[%s11794_s25 + $0xa0] sm:$0xff]   ;;  %v11023_v37 = vld [vmem:[%s11794_s25 + $0xa8] sm:$0xff]   ;;  %v11024_v38 = vld [vmem:[%s11794_s25 + $0xb0] sm:$0xff]   ;;  %s11569_s13 = sshll.u32 %s11632_s23, 4  ;;  %s11570_s13 = int_to_ptr.vmem [resolvable:$false] %s11569_s13 }
  0x3f   : > { %10514 = vmatpush3.bf16.msra.mxu0 %v11001_v15  ;;  %v11025_v39 = vld [vmem:[%s11794_s25 + $0xb8] sm:$0xff]   ;;  %v11026_v40 = vld [vmem:[%s11794_s25 + $0xc0] sm:$0xff]   ;;  %v11027_v46 = vld [vmem:[%s11794_s25 + $0xc8] sm:$0xff]   ;;  %s11571_s28 = scalar_lea.vmem %s11570_s13, 64 }
  0x40   : > { %v11956_v41 = vld [vmem:[%s15017_s4] ss:$0 sm:$0xff]  ;;  %v11028_v56 = vld [vmem:[%s11794_s25 + $0xd0] sm:$0xff]   ;;  %v11029_v2 = vld [vmem:[%s11794_s25 + $0xd8] sm:$0xff]  }
  0x41   : > { %v11030_v13 = vld [vmem:[%s11794_s25 + $0xe0] ss:$0 sps:$4 sm:$0x11]   ;;  %s8385_s25 = sshll.u32 %s579_s17, 4  ;;  %s14929_s25 = int_to_ptr.vmem [resolvable:$true] %s8385_s25 }
  0x42   : > { %10516 = vmatmul.mubr.msk.bf16.vlgmr.msra.gmra.mxu0 %vm835_vm4, %v11002_v16  ;;  %s11565_s27 = scalar_lea.vmem %s14929_s25, 32  ;;  %p11572_p1 = scmp.lt.s32.totalorder %s14929_s25, %s11570_s13 }
  0x43   : > { %10519 = vmatprep.mubr.msk.bf16.mxu0 %vm11629_vm3, %v15043_v9  ;;  %s15121_s26 = smov %s15120_s1  ;;  %p11566_p12 = scmp.ne.s32.totalorder %s14929_s25, %s11565_s27 }
  0x44   : > { %p11573_p2 = scmp.lt.s32.totalorder %s11571_s28, %s11565_s27 }
  0x45   : > { %p11567_p13 = pnand %p11566_p12, %p11769_p5 }
  0x46   : > { %p11574_p3 = por %p11573_p2, %p11572_p1 }
  0x47   : > { %p11568_p0 = pneg %p11567_p13 }
  0x49   : > { %p11575_p4 = pnand %p11574_p3, %p11568_p0 }
  0x4a   : > { %10520 = vmatmul.mubr.msk.bf16.gmra.mxu0 %vm835_vm4, %v11003_v17 }
  0x4b   : > { %10523 = vmatprep.mubr.msk.bf16.mxu0 %vm11629_vm3, %v15043_v9 }
  0x52   : > { %10524 = vmatmul.mubr.msk.bf16.gmra.mxu0 %vm835_vm4, %v11004_v18 }
  0x53   : > { %10527 = vmatprep.mubr.msk.bf16.mxu0 %vm11629_vm3, %v15043_v9 }
  0x5a   : > { %10528 = vmatmul.mubr.msk.bf16.gmra.mxu0 %vm835_vm4, %v11005_v19  ;;  %v11033_v19 = vld [vmem:[%s15018_s5 + $0x1a4] ss:$16 sps:$4 sm:$0xff]  }
  0x5b   : > { %10531 = vmatprep.mubr.msk.bf16.mxu0 %vm11629_vm3, %v15043_v9 }
  0x62   : > { %10532 = vmatmul.mubr.msk.bf16.gmra.mxu0 %vm835_vm4, %v11006_v20 }
  0x63   : > { %10535 = vmatprep.mubr.msk.bf16.mxu0 %vm11629_vm3, %v15043_v9 }
  0x6a   : > { %10536 = vmatmul.mubr.msk.bf16.gmra.mxu0 %vm835_vm4, %v11007_v21 }
  0x6b   : > { %10539 = vmatprep.mubr.msk.bf16.mxu0 %vm11629_vm3, %v15043_v9 }
  0x72   : > { %10540 = vmatmul.mubr.msk.bf16.gmra.mxu0 %vm835_vm4, %v11008_v22 }
  0x73   : > { %10543 = vmatprep.mubr.msk.bf16.mxu0 %vm11629_vm3, %v15043_v9 }
  0x7a   : > { %10544 = vmatmul.mubr.msk.bf16.gmra.mxu0 %vm835_vm4, %v11009_v23 }
  0x7b   : > { %10547 = vmatprep.mubr.msk.bf16.mxu0 %vm11629_vm3, %v15043_v9 }
  0x82   : > { %10548 = vmatmul.mubr.msk.bf16.gmra.mxu0 %vm835_vm4, %v11010_v24 }
  0x83   : > { %10551 = vmatprep.mubr.msk.bf16.mxu0 %vm11629_vm3, %v15043_v9 }
  0x8a   : > { %10552 = vmatmul.mubr.msk.bf16.gmra.mxu0 %vm835_vm4, %v11011_v25 }
  0x8b   : > { %10555 = vmatprep.mubr.msk.bf16.mxu0 %vm11629_vm3, %v15043_v9 }
  0x92   : > { %10556 = vmatmul.mubr.msk.bf16.gmra.mxu0 %vm835_vm4, %v11012_v26 }
  0x93   : > { %10559 = vmatprep.mubr.msk.bf16.mxu0 %vm11629_vm3, %v15043_v9 }
  0x9a   : > { %10560 = vmatmul.mubr.msk.bf16.gmra.mxu0 %vm835_vm4, %v11013_v27 }
  0x9b   : > { %10563 = vmatprep.mubr.msk.bf16.mxu0 %vm11629_vm3, %v15043_v9 }
  0xa2   : > { %10564 = vmatmul.mubr.msk.bf16.gmra.mxu0 %vm835_vm4, %v11014_v28 }
  0xa3   : > { %10567 = vmatprep.mubr.msk.bf16.mxu0 %vm11629_vm3, %v15043_v9 }
  0xaa   : > { %10568 = vmatmul.mubr.msk.bf16.gmra.mxu0 %vm835_vm4, %v11015_v29 }
  0xab   : > { %10571 = vmatprep.mubr.msk.bf16.mxu0 %vm11629_vm3, %v15043_v9 }
  0xb2   : > { %10572 = vmatmul.mubr.msk.bf16.gmra.mxu0 %vm835_vm4, %v11016_v30 }
  0xb3   : > { %10575 = vmatprep.mubr.msk.bf16.mxu0 %vm11629_vm3, %v15043_v9 }
  0xba   : > { %10576 = vmatmul.mubr.msk.bf16.gmra.mxu0 %vm835_vm4, %v11017_v31 }
  0xbb   : > { %10579 = vmatprep.mubr.msk.bf16.mxu0 %vm11629_vm3, %v15043_v9 }
  0xc2   : > { %10580 = vmatmul.mubr.msk.bf16.gmra.mxu0 %vm835_vm4, %v11018_v32 }
  0xc3   : > { %10583 = vmatprep.mubr.msk.bf16.mxu0 %vm11629_vm3, %v15043_v9 }
  0xca   : > { %10584 = vmatmul.mubr.msk.bf16.gmra.mxu0 %vm835_vm4, %v11019_v33 }
  0xcb   : > { %10587 = vmatprep.mubr.msk.bf16.mxu0 %vm11629_vm3, %v15043_v9 }
  0xd2   : > { %10588 = vmatmul.mubr.msk.bf16.gmra.mxu0 %vm835_vm4, %v11020_v34 }
  0xd3   : > { %10591 = vmatprep.mubr.msk.bf16.mxu0 %vm11629_vm3, %v15043_v9 }
  0xda   : > { %10592 = vmatmul.mubr.msk.bf16.gmra.mxu0 %vm835_vm4, %v11021_v35 }
  0xdb   : > { %10595 = vmatprep.mubr.msk.bf16.mxu0 %vm11629_vm3, %v15043_v9 }
  0xe2   : > { %10596 = vmatmul.mubr.msk.bf16.gmra.mxu0 %vm835_vm4, %v11022_v36 }
  0xe3   : > { %10599 = vmatprep.mubr.msk.bf16.mxu0 %vm11629_vm3, %v15043_v9 }
  0xea   : > { %10600 = vmatmul.mubr.msk.bf16.gmra.mxu0 %vm835_vm4, %v11023_v37 }
  0xeb   : > { %10603 = vmatprep.mubr.msk.bf16.mxu0 %vm11629_vm3, %v15043_v9 }
  0xf2   : > { %10604 = vmatmul.mubr.msk.bf16.gmra.mxu0 %vm835_vm4, %v11024_v38 }
  0xf3   : > { %10607 = vmatprep.mubr.msk.bf16.mxu0 %vm11629_vm3, %v15043_v9 }
  0xfa   : > { %10608 = vmatmul.mubr.msk.bf16.gmra.mxu0 %vm835_vm4, %v11025_v39 }
  0xfb   : > { %10611 = vmatprep.mubr.msk.bf16.mxu0 %vm11629_vm3, %v15043_v9 }
 0x102   : > { %v964_v42 = vpop.f32.mrf.mxu0  ;;  %10612 = vmatmul.mubr.msk.bf16.gmra.mxu0 %vm835_vm4, %v11026_v40 }
 0x103   : > { %10615 = vmatprep.mubr.msk.bf16.mxu0 %vm11629_vm3, %v15043_v9  ;;  %v965_v44 = vadd.f32 %v11956_v41, %v964_v42 }
 0x104   : > { %v10517_v43 = vpop.f32.mrf.mxu0 }
 0x105   : > { %v1194_v49 = vmax.f32 %v965_v44, 0.0 }
 0x106   : > { %v967_v45 = vpop.f32.mrf.mxu0 }
 0x107   : > { %v968_v47 = vadd.f32 %v11956_v41, %v967_v45 }
 0x108   : > { %v10518_v48 = vpop.f32.mrf.mxu0 }
 0x109   : > { %v1195_v50 = vmax.f32 %v968_v47, 0.0 }
 0x10a   : > { %v972_v51 = vpop.f32.mrf.mxu0  ;;  %10616 = vmatmul.mubr.msk.bf16.gmra.mxu0 %vm835_vm4, %v11027_v46 }
 0x10b   : > { %v11965_v52 = vpack.c.bf16 %v1195_v50, %v1194_v49  ;;  %10619 = vmatprep.mubr.msk.bf16.mxu0 %vm11629_vm3, %v15043_v9  ;;  %v973_v54 = vadd.f32 %v11956_v41, %v972_v51  ;;  %v11045_v50 = vld [vmem:[%s15018_s5 + $0x4] ss:$16 sps:$4 sm:$0xff]  }
 0x10c   : > { %v10521_v53 = vpop.f32.mrf.mxu0  ;;  %1491 = vmatprep.mubr.bf16.mxu1 %v11045_v50 }
 0x10d   : > { %v1196_v59 = vmax.f32 %v973_v54, 0.0 }
 0x10e   : > { %v975_v55 = vpop.f32.mrf.mxu0 }
 0x10f   : > { %v976_v57 = vadd.f32 %v11956_v41, %v975_v55 }
 0x110   : > { %v10522_v58 = vpop.f32.mrf.mxu0 }
 0x111   : > { %v1197_v60 = vmax.f32 %v976_v57, 0.0 }
 0x112   : > { %v980_v61 = vpop.f32.mrf.mxu0  ;;  %10620 = vmatmul.mubr.msk.bf16.gmra.mxu0 %vm835_vm4, %v11028_v56 }
 0x113   : > { %v11973_v62 = vpack.c.bf16 %v1197_v60, %v1196_v59  ;;  %10623 = vmatprep.mubr.msk.bf16.mxu0 %vm11629_vm3, %v15043_v9  ;;  %v981_v0 = vadd.f32 %v11956_v41, %v980_v61  ;;  %v15045_v61 = vmov 0  }
 0x114   : > { %v10525_v63 = vpop.f32.mrf.mxu0  ;;  %10998 = vset.pattern.permute.xlu0 %v15045_v61 }
 0x115   : > { %v1198_v5 = vmax.f32 %v981_v0, 0.0 }
 0x116   : > { %v983_v1 = vpop.f32.mrf.mxu0 }
 0x117   : > { %v984_v3 = vadd.f32 %v11956_v41, %v983_v1 }
 0x118   : > { %v10526_v4 = vpop.f32.mrf.mxu0 }
 0x119   : > { %v1199_v6 = vmax.f32 %v984_v3, 0.0 }
 0x11a   : > { %v988_v7 = vpop.f32.mrf.mxu0  ;;  %10624 = vmatmul.mubr.msk.bf16.gmra.mxu0 %vm835_vm4, %v11029_v2 }
 0x11b   : > { %v11981_v8 = vpack.c.bf16 %v1199_v6, %v1198_v5  ;;  %10627 = vmatprep.mubr.msk.bf16.mxu0 %vm11629_vm3, %v15043_v9  ;;  %v989_v11 = vadd.f32 %v11956_v41, %v988_v7 }
 0x11c   : > { %v10529_v10 = vpop.f32.mrf.mxu0 }
 0x11d   : > { %v1200_v16 = vmax.f32 %v989_v11, 0.0 }
 0x11e   : > { %v991_v12 = vpop.f32.mrf.mxu0 }
 0x11f   : > { %v992_v14 = vadd.f32 %v11956_v41, %v991_v12 }
 0x120   : > { %v10530_v15 = vpop.f32.mrf.mxu0 }
 0x121   : > { %v1201_v17 = vmax.f32 %v992_v14, 0.0 }
 0x122   : > { %v996_v18 = vpop.f32.mrf.mxu0  ;;  %10628 = vmatmul.mubr.msk.bf16.gmra.mxu0 %vm835_vm4, %v11030_v13 }
 0x123   : > { %v11992_v20 = vpack.c.bf16 %v1201_v17, %v1200_v16  ;;  %2355 = vmatprep.mubr.bf16.mxu0 %v11033_v19  ;;  %v997_v22 = vadd.f32 %v11956_v41, %v996_v18 }
 0x124   : > { %v10533_v21 = vpop.f32.mrf.mxu0 }
 0x125   : > { %v1202_v26 = vmax.f32 %v997_v22, 0.0 }
 0x126   : > { %v999_v23 = vpop.f32.mrf.mxu0 }
 0x127   : > { %v1000_v24 = vadd.f32 %v11956_v41, %v999_v23 }
 0x128   : > { %v10534_v25 = vpop.f32.mrf.mxu0 }
 0x129   : > { %v1203_v27 = vmax.f32 %v1000_v24, 0.0 }
 0x12a   : > { %v1004_v28 = vpop.f32.mrf.mxu0 }
 0x12b   : > { %v11996_v29 = vpack.c.bf16 %v1203_v27, %v1202_v26  ;;  %v1005_v31 = vadd.f32 %v11956_v41, %v1004_v28 }
 0x12c   : > { %v10537_v30 = vpop.f32.mrf.mxu0 }
 0x12d   : > { %v1204_v35 = vmax.f32 %v1005_v31, 0.0 }
 0x12e   : > { %v1007_v32 = vpop.f32.mrf.mxu0 }
 0x12f   : > { %v1008_v33 = vadd.f32 %v11956_v41, %v1007_v32 }
 0x130   : > { %v10538_v34 = vpop.f32.mrf.mxu0 }
 0x131   : > { %v1205_v36 = vmax.f32 %v1008_v33, 0.0 }
 0x132   : > { %v1012_v37 = vpop.f32.mrf.mxu0 }
 0x133   : > { %v12000_v38 = vpack.c.bf16 %v1205_v36, %v1204_v35  ;;  %v1013_v40 = vadd.f32 %v11956_v41, %v1012_v37 }
 0x134   : > { %v10541_v39 = vpop.f32.mrf.mxu0 }
 0x135   : > { %v1206_v45 = vmax.f32 %v1013_v40, 0.0 }
 0x136   : > { %v1015_v42 = vpop.f32.mrf.mxu0 }
 0x137   : > { %v1016_v43 = vadd.f32 %v11956_v41, %v1015_v42 }
 0x138   : > { %v10542_v44 = vpop.f32.mrf.mxu0 }
 0x139   : > { %v1207_v46 = vmax.f32 %v1016_v43, 0.0 }
 0x13a   : > { %v1020_v47 = vpop.f32.mrf.mxu0 }
 0x13b   : > { %v12004_v48 = vpack.c.bf16 %v1207_v46, %v1206_v45  ;;  %v1021_v51 = vadd.f32 %v11956_v41, %v1020_v47 }
 0x13c   : > { %v10545_v49 = vpop.f32.mrf.mxu0 }
 0x13d   : > { %v1208_v56 = vmax.f32 %v1021_v51, 0.0 }
 0x13e   : > { %v1023_v53 = vpop.f32.mrf.mxu0 }
 0x13f   : > { %v1024_v54 = vadd.f32 %v11956_v41, %v1023_v53 }
 0x140   : > { %v10546_v55 = vpop.f32.mrf.mxu0 }
 0x141   : > { %v1209_v57 = vmax.f32 %v1024_v54, 0.0 }
 0x142   : > { %v1028_v58 = vpop.f32.mrf.mxu0 }
 0x143   : > { %v12011_v59 = vpack.c.bf16 %v1209_v57, %v1208_v56  ;;  %v1029_v63 = vadd.f32 %v11956_v41, %v1028_v58 }
 0x144   : > { %v10549_v60 = vpop.f32.mrf.mxu0 }
 0x145   : > { %v1210_v3 = vmax.f32 %v1029_v63, 0.0 }
 0x146   : > { %v1031_v0 = vpop.f32.mrf.mxu0 }
 0x147   : > { %v1032_v1 = vadd.f32 %v11956_v41, %v1031_v0 }
 0x148   : > { %v10550_v2 = vpop.f32.mrf.mxu0 }
 0x149   : > { %v1211_v4 = vmax.f32 %v1032_v1, 0.0 }
 0x14a   : > { %v1036_v5 = vpop.f32.mrf.mxu0 }
 0x14b   : > { %v12016_v6 = vpack.c.bf16 %v1211_v4, %v1210_v3  ;;  %v1037_v10 = vadd.f32 %v11956_v41, %v1036_v5 }
 0x14c   : > { %v10553_v7 = vpop.f32.mrf.mxu0 }
 0x14d   : > { %v1212_v14 = vmax.f32 %v1037_v10, 0.0 }
 0x14e   : > { %v1039_v11 = vpop.f32.mrf.mxu0 }
 0x14f   : > { %v1040_v12 = vadd.f32 %v11956_v41, %v1039_v11 }
 0x150   : > { %v10554_v13 = vpop.f32.mrf.mxu0 }
 0x151   : > { %v1213_v15 = vmax.f32 %v1040_v12, 0.0 }
 0x152   : > { %v12020_v16 = vpop.f32.mrf.mxu0 }
 0x153   : > { %v12022_v17 = vpack.c.bf16 %v1213_v15, %v1212_v14 }
 0x154   : > { %v10557_v18 = vpop.f32.mrf.mxu0 }
 0x156   : > { %v12024_v19 = vpop.f32.mrf.mxu0 }
 0x158   : > { %v10558_v21 = vpop.f32.mrf.mxu0 }
 0x15a   : > { %v1052_v22 = vpop.f32.mrf.mxu0 }
 0x15b   : > { %v1053_v21 = vadd.f32 %v11956_v41, %v1052_v22  ;;  %v1045_v22 = vadd.f32 %v11956_v41, %v12020_v16 }
 0x15c   : > { %v10561_v23 = vpop.f32.mrf.mxu0 }
 0x15d   : > { %v1214_v16 = vmax.f32 %v1045_v22, 0.0  ;;  %v11048_v22 = vld [vmem:[%s15018_s5 + $0x224] ss:$16 sps:$4 sm:$0xff]  }
 0x15e   : > { %v1055_v24 = vpop.f32.mrf.mxu0 }
 0x15f   : > { %v1056_v10 = vadd.f32 %v11956_v41, %v1055_v24 }
 0x160   : > { %v10562_v25 = vpop.f32.mrf.mxu0 }
 0x162   : > { %v1060_v26 = vpop.f32.mrf.mxu0 }
 0x163   : > { %v1061_v4 = vadd.f32 %v11956_v41, %v1060_v26  ;;  %v1048_v26 = vadd.f32 %v11956_v41, %v12024_v19 }
 0x164   : > { %v10565_v27 = vpop.f32.mrf.mxu0 }
 0x165   : > { %v1218_v23 = vmax.f32 %v1061_v4, 0.0  ;;  %v1217_v27 = vmax.f32 %v1056_v10, 0.0  ;;  %v11039_v4 = vld [vmem:[%s15018_s5 + $0x1e4] ss:$16 sps:$4 sm:$0xff]  }
 0x166   : > { %v1063_v28 = vpop.f32.mrf.mxu0 }
 0x167   : > { %v1064_v63 = vadd.f32 %v11956_v41, %v1063_v28 }
 0x168   : > { %v10566_v30 = vpop.f32.mrf.mxu0 }
 0x169   : > { %v1219_v12 = vmax.f32 %v1064_v63, 0.0 }
 0x16a   : > { %v1068_v31 = vpop.f32.mrf.mxu0 }
 0x16b   : > { %v1069_v56 = vadd.f32 %v11956_v41, %v1068_v31  ;;  %v12058_v28 = vpack.c.bf16 %v1219_v12, %v1218_v23  ;;  %v11037_v12 = vld [vmem:[%s15018_s5 + $0x1e0] ss:$16 sps:$4 sm:$0xff]  }
 0x16c   : > { %v10569_v32 = vpop.f32.mrf.mxu0 }
 0x16d   : > { %v1220_v5 = vmax.f32 %v1069_v56, 0.0  ;;  %v1216_v32 = vmax.f32 %v1053_v21, 0.0  ;;  %v11049_v56 = vld [vmem:[%s15018_s5 + $0x24] ss:$16 sps:$4 sm:$0xff]  }
 0x16e   : > { %v1071_v33 = vpop.f32.mrf.mxu0  ;;  %v11060_v21 = vld [vmem:[%s15018_s5 + $0x64] ss:$16 sps:$4 sm:$0xff]  }
 0x16f   : > { %v1072_v50 = vadd.f32 %v11956_v41, %v1071_v33 }
 0x170   : > { %v10570_v34 = vpop.f32.mrf.mxu0 }
 0x171   : > { %v1221_v0 = vmax.f32 %v1072_v50, 0.0  ;;  %v1215_v34 = vmax.f32 %v1048_v26, 0.0 }
 0x172   : > { %v1076_v35 = vpop.f32.mrf.mxu0 }
 0x173   : > { %v1077_v46 = vadd.f32 %v11956_v41, %v1076_v35  ;;  %v12047_v13 = vpack.c.bf16 %v1221_v0, %v1220_v5  ;;  %v12068_v35 = vpack.c.bf16 %v1217_v27, %v1216_v32  ;;  %v11034_v0 = vld [vmem:[%s15018_s5 + $0x1c0] ss:$16 sps:$4 sm:$0xff]   ;;  %v11055_v5 = vld [vmem:[%s15018_s5 + $0x44] ss:$16 sps:$4 sm:$0xff]  }
 0x174   : > { %v10573_v36 = vpop.f32.mrf.mxu0  ;;  %v11040_v27 = vld [vmem:[%s15018_s5 + $0x200] ss:$16 sps:$4 sm:$0xff]   ;;  %v11066_v32 = vld [vmem:[%s15018_s5 + $0x84] ss:$16 sps:$4 sm:$0xff]  }
 0x175   : > { %v1222_v57 = vmax.f32 %v1077_v46, 0.0 }
 0x176   : > { %v1079_v37 = vpop.f32.mrf.mxu0 }
 0x177   : > { %v1080_v43 = vadd.f32 %v11956_v41, %v1079_v37 }
 0x178   : > { %v10574_v39 = vpop.f32.mrf.mxu0 }
 0x179   : > { %v1223_v51 = vmax.f32 %v1080_v43, 0.0  ;;  %v12078_v43 = vpack.c.bf16 %v1215_v34, %v1214_v16 }
 0x17a   : > { %v1084_v40 = vpop.f32.mrf.mxu0 }
 0x17b   : > { %v1085_v44 = vadd.f32 %v11956_v41, %v1084_v40  ;;  %v12035_v1 = vpack.c.bf16 %v1223_v51, %v1222_v57  ;;  %v11031_v51 = vld [vmem:[%s15018_s5 + $0x1a0] ss:$16 sps:$4 sm:$0xff]  }
 0x17c   : > { %v10577_v42 = vpop.f32.mrf.mxu0 }
 0x17d   : > { %v1224_v53 = vmax.f32 %v1085_v44, 0.0 }
 0x17e   : > { %v1087_v45 = vpop.f32.mrf.mxu0 }
 0x17f   : > { %v1088_v47 = vadd.f32 %v11956_v41, %v1087_v45 }
 0x180   : > { %v10578_v49 = vpop.f32.mrf.mxu0 }
 0x181   : > { %v1225_v54 = vmax.f32 %v1088_v47, 0.0 }
 0x182   : > { %v1092_v55 = vpop.f32.mrf.mxu0 }
 0x183   : > { %v12032_v58 = vpack.c.bf16 %v1225_v54, %v1224_v53  ;;  %v1093_v2 = vadd.f32 %v11956_v41, %v1092_v55  ;;  %v11043_v53 = vld [vmem:[%s15018_s5] ss:$16 sps:$4 sm:$0xff]   ;;  %v11036_v55 = vld [vmem:[%s15018_s5 + $0x1c4] ss:$16 sps:$4 sm:$0xff]  }
 0x184   : > { %v10581_v60 = vpop.f32.mrf.mxu0 }
 0x185   : > { %9634 = vmatprep.subr.bf16.mxu1 %v12032_v58  ;;  %9750 = vmatprep.subr.bf16.mxu0 %v12032_v58  ;;  %v1226_v14 = vmax.f32 %v1093_v2, 0.0  ;;  %v11051_v2 = vld [vmem:[%s15018_s5 + $0x20] ss:$16 sps:$4 sm:$0xff]  }
 0x186   : > { %v1095_v3 = vpop.f32.mrf.mxu0  ;;  %9635 = vmatpush3.bf16.msra.mxu1 %v12011_v59  ;;  %9751 = vmatpush3.bf16.msra.mxu0 %v12011_v59 }
 0x187   : > { %v1096_v7 = vadd.f32 %v11956_v41, %v1095_v3  ;;  %9636 = vmatprep.subr.bf16.mxu1 %v12035_v1  ;;  %9752 = vmatprep.subr.bf16.mxu0 %v12035_v1 }
 0x188   : > { %v10582_v11 = vpop.f32.mrf.mxu0 }
 0x189   : > { %v1227_v15 = vmax.f32 %v1096_v7, 0.0 }
 0x18a   : > { %v1100_v18 = vpop.f32.mrf.mxu0  ;;  %9637 = vmatpush3.bf16.msra.mxu1 %v12004_v48  ;;  %9753 = vmatpush3.bf16.msra.mxu0 %v12004_v48 }
 0x18b   : > { %v12052_v25 = vpack.c.bf16 %v1227_v15, %v1226_v14  ;;  %9638 = vmatprep.subr.bf16.mxu1 %v12047_v13  ;;  %9754 = vmatprep.subr.bf16.mxu0 %v12047_v13  ;;  %v1101_v30 = vadd.f32 %v11956_v41, %v1100_v18  ;;  %v11057_v14 = vld [vmem:[%s15018_s5 + $0x40] ss:$16 sps:$4 sm:$0xff]   ;;  %v11042_v18 = vld [vmem:[%s15018_s5 + $0x204] ss:$16 sps:$4 sm:$0xff]  }
 0x18c   : > { %v10585_v24 = vpop.f32.mrf.mxu0 }
 0x18d   : > { %v1228_v36 = vmax.f32 %v1101_v30, 0.0  ;;  %v11062_v30 = vld [vmem:[%s15018_s5 + $0x60] ss:$16 sps:$4 sm:$0xff]  }
 0x18e   : > { %v1103_v31 = vpop.f32.mrf.mxu0  ;;  %9639 = vmatpush3.bf16.msra.mxu1 %v12000_v38  ;;  %9755 = vmatpush3.bf16.msra.mxu0 %v12000_v38 }
 0x18f   : > { %v1104_v33 = vadd.f32 %v11956_v41, %v1103_v31  ;;  %9640 = vmatprep.subr.bf16.mxu1 %v12058_v28  ;;  %9756 = vmatprep.subr.bf16.mxu0 %v12058_v28 }
 0x190   : > { %v10586_v19 = vpop.f32.mrf.mxu0 }
 0x191   : > { %v1229_v37 = vmax.f32 %v1104_v33, 0.0 }
 0x192   : > { %v12070_v39 = vpop.f32.mrf.mxu0  ;;  %9641 = vmatpush3.bf16.msra.mxu1 %v11996_v29  ;;  %9757 = vmatpush3.bf16.msra.mxu0 %v11996_v29 }
 0x193   : > { %v12074_v40 = vpack.c.bf16 %v1229_v37, %v1228_v36  ;;  %9642 = vmatprep.subr.bf16.mxu1 %v12068_v35  ;;  %9758 = vmatprep.subr.bf16.mxu0 %v12068_v35 }
 0x194   : > { %v10589_v42 = vpop.f32.mrf.mxu0 }
 0x196   : > { %v12080_v44 = vpop.f32.mrf.mxu0  ;;  %9643 = vmatpush3.bf16.msra.mxu1 %v11992_v20  ;;  %9759 = vmatpush3.bf16.msra.mxu0 %v11992_v20 }
 0x197   : > { %9644 = vmatprep.subr.bf16.mxu1 %v12078_v43  ;;  %9760 = vmatprep.subr.bf16.mxu0 %v12078_v43 }
 0x198   : > { %v10590_v45 = vpop.f32.mrf.mxu0 }
 0x19a   : > { %v12086_v46 = vpop.f32.mrf.mxu0  ;;  %9645 = vmatpush3.bf16.msra.mxu1 %v11981_v8  ;;  %9761 = vmatpush3.bf16.msra.mxu0 %v11981_v8 }
 0x19b   : > { %9646 = vmatprep.subr.bf16.mxu1 %v12022_v17  ;;  %9762 = vmatprep.subr.bf16.mxu0 %v12022_v17 }
 0x19c   : > { %v10593_v47 = vpop.f32.mrf.mxu0 }
 0x19e   : > { %v12092_v49 = vpop.f32.mrf.mxu0  ;;  %9647 = vmatpush3.bf16.msra.mxu1 %v11973_v62  ;;  %9763 = vmatpush3.bf16.msra.mxu0 %v11973_v62 }
 0x19f   : > { %9648 = vmatprep.subr.bf16.mxu1 %v12016_v6  ;;  %9764 = vmatprep.subr.bf16.mxu0 %v12016_v6 }
 0x1a0   : > { %v10594_v50 = vpop.f32.mrf.mxu0 }
 0x1a1   : > { %v11046_v50 = vld [vmem:[%s15018_s5 + $0x220] ss:$16 sps:$4 sm:$0xff]  }
 0x1a2   : > { %v12104_v54 = vpop.f32.mrf.mxu0  ;;  %9649 = vmatpush3.bf16.msra.mxu1 %v11965_v52  ;;  %9765 = vmatpush3.bf16.msra.mxu0 %v11965_v52 }
 0x1a3   : > { %9808 = vmatprep.subr.bf16.mxu0 %v12032_v58  ;;  %1547 = vmatprep.subr.bf16.mxu1 %v15045_v61 }
 0x1a4   : > { %v10597_v57 = vpop.f32.mrf.mxu0 }
 0x1a5   : > { %2356 = vmatmul.mubr.bf16.vlgmr.msra.gmra.mxu0 %v11031_v51  ;;  %1492 = vmatmul.mubr.bf16.vlgmr.msra.gmra.mxu1 %v11043_v53  ;;  %v11054_v53 = vld [vmem:[%s15018_s5 + $0x244] ss:$16 sps:$4 sm:$0xff]  }
 0x1a6   : > { %v12116_v60 = vpop.f32.mrf.mxu0  ;;  %9809 = vmatpush3.bf16.msra.mxu0 %v12011_v59  ;;  %2363 = vmatprep.mubr.bf16.mxu0 %v11036_v55 }
 0x1a7   : > { %9810 = vmatprep.subr.bf16.mxu0 %v12035_v1  ;;  %1499 = vmatprep.mubr.bf16.mxu1 %v11049_v56 }
 0x1a8   : > { %v10598_v63 = vpop.f32.mrf.mxu0 }
 0x1a9   : > { %v11068_v63 = vld [vmem:[%s15018_s5 + $0x80] ss:$16 sps:$4 sm:$0xff]  }
 0x1aa   : > { %v12126_v3 = vpop.f32.mrf.mxu0  ;;  %9811 = vmatpush3.bf16.msra.mxu0 %v12004_v48 }
 0x1ab   : > { %9812 = vmatprep.subr.bf16.mxu0 %v12047_v13 }
 0x1ac   : > { %v10601_v7 = vpop.f32.mrf.mxu0 }
 0x1ad   : > { %2364 = vmatmul.mubr.bf16.gmra.mxu0 %v11034_v0  ;;  %1500 = vmatmul.mubr.bf16.gmra.mxu1 %v11051_v2  ;;  %v11072_v2 = vld [vmem:[%s15018_s5 + $0xa4] ss:$16 sps:$4 sm:$0xff]  }
 0x1ae   : > { %v1135_v10 = vpop.f32.mrf.mxu0  ;;  %9813 = vmatpush3.bf16.msra.mxu0 %v12000_v38  ;;  %2371 = vmatprep.mubr.bf16.mxu0 %v11039_v4  ;;  %v1133_v4 = vadd.f32 %v11956_v41, %v12126_v3 }
 0x1af   : > { %9814 = vmatprep.subr.bf16.mxu0 %v12058_v28  ;;  %1507 = vmatprep.mubr.bf16.mxu1 %v11055_v5  ;;  %v1136_v55 = vadd.f32 %v11956_v41, %v1135_v10  ;;  %v1128_v10 = vadd.f32 %v11956_v41, %v12116_v60  ;;  %v11052_v60 = vld [vmem:[%s15018_s5 + $0x240] ss:$16 sps:$4 sm:$0xff]  }
 0x1b0   : > { %v10602_v11 = vpop.f32.mrf.mxu0 }
 0x1b1   : > { %v1237_v11 = vmax.f32 %v1136_v55, 0.0 }
 0x1b2   : > { %v1140_v15 = vpop.f32.mrf.mxu0  ;;  %9815 = vmatpush3.bf16.msra.mxu0 %v11996_v29 }
 0x1b3   : > { %9816 = vmatprep.subr.bf16.mxu0 %v12068_v35  ;;  %v1141_v42 = vadd.f32 %v11956_v41, %v1140_v15  ;;  %v1125_v15 = vadd.f32 %v11956_v41, %v12104_v54  ;;  %v1235_v54 = vmax.f32 %v1128_v10, 0.0  ;;  %v11071_v10 = vld [vmem:[%s15018_s5 + $0x294] ss:$16 sps:$4 sm:$0xff]  }
 0x1b4   : > { %v10605_v23 = vpop.f32.mrf.mxu0 }
 0x1b5   : > { %2372 = vmatmul.mubr.bf16.gmra.mxu0 %v11037_v12  ;;  %1508 = vmatmul.mubr.bf16.gmra.mxu1 %v11057_v14  ;;  %v1238_v5 = vmax.f32 %v1141_v42, 0.0  ;;  %v8677_v14 = vld [vmem:[%s15018_s5 + $0x260] sm:$0x11] }
 0x1b6   : > { %v1143_v24 = vpop.f32.mrf.mxu0  ;;  %9817 = vmatpush3.bf16.msra.mxu0 %v11992_v20  ;;  %2379 = vmatprep.mubr.bf16.mxu0 %v11042_v18  ;;  %v1236_v18 = vmax.f32 %v1133_v4, 0.0  ;;  %v8703_v42 = vcombine.low %v8677_v14, %v8677_v14  ;;  %v11063_v4 = vld [vmem:[%s15018_s5 + $0x270] ss:$16 sps:$4 sm:$0xff]  }
 0x1b7   : > { %9818 = vmatprep.subr.bf16.mxu0 %v12078_v43  ;;  %1515 = vmatprep.mubr.bf16.mxu1 %v11060_v21  ;;  %v1144_v36 = vadd.f32 %v11956_v41, %v1143_v24  ;;  %v1304_v21 = vld [vmem:[%s15018_s5 + $0xc0] sm:$0x11]  ;;  %v8704_v24 = vcombine.high %v8677_v14, %v8677_v14 }
 0x1b8   : > { %v10606_v26 = vpop.f32.mrf.mxu0 }
 0x1b9   : > { %v1239_v56 = vmax.f32 %v1144_v36, 0.0  ;;  %v1120_v26 = vadd.f32 %v11956_v41, %v12092_v49  ;;  %v1112_v49 = vadd.f32 %v11956_v41, %v12080_v44  ;;  %v11065_v44 = vld [vmem:[%s15018_s5 + $0x274] ss:$16 sps:$4 sm:$0xff]  }
 0x1ba   : > { %v1148_v31 = vpop.f32.mrf.mxu0  ;;  %9819 = vmatpush3.bf16.msra.mxu0 %v11981_v8 }
 0x1bb   : > { %9820 = vmatprep.subr.bf16.mxu0 %v12022_v17  ;;  %v1149_v19 = vadd.f32 %v11956_v41, %v1148_v31  ;;  %v12201_v12 = vpack.c.bf16 %v1239_v56, %v1238_v5 }
 0x1bc   : > { %v10609_v33 = vpop.f32.mrf.mxu0 }
 0x1bd   : > { %2380 = vmatmul.mubr.bf16.gmra.mxu0 %v11040_v27  ;;  %1516 = vmatmul.mubr.bf16.gmra.mxu1 %v11062_v30  ;;  %v1240_v45 = vmax.f32 %v1149_v19, 0.0  ;;  %v12220_v27 = vpack.c.bf16 %v1237_v11, %v1236_v18  ;;  %v11074_v30 = vld [vmem:[%s15018_s5 + $0xa0] ss:$16 sps:$4 sm:$0xff]   ;;  %v1234_v33 = vmax.f32 %v1125_v15, 0.0 }
 0x1be   : > { %v1151_v34 = vpop.f32.mrf.mxu0  ;;  %9821 = vmatpush3.bf16.msra.mxu0 %v11973_v62  ;;  %2387 = vmatprep.mubr.bf16.mxu0 %v11048_v22  ;;  %v8556_v22 = vcombine.high %v1304_v21, %v1304_v21  ;;  %v11069_v15 = vld [vmem:[%s15018_s5 + $0x290] ss:$16 sps:$4 sm:$0xff]  }
 0x1bf   : > { %v1152_v37 = vadd.f32 %v11956_v41, %v1151_v34  ;;  %9822 = vmatprep.subr.bf16.mxu0 %v12016_v6  ;;  %1523 = vmatprep.mubr.bf16.mxu1 %v11066_v32  ;;  %v1117_v32 = vadd.f32 %v11956_v41, %v12086_v46  ;;  %v1233_v34 = vmax.f32 %v1120_v26, 0.0  ;;  %v12233_v36 = vpack.c.bf16 %v1235_v54, %v1234_v33 }
 0x1c0   : > { %v10610_v16 = vpop.f32.mrf.mxu0  ;;  %v1109_v46 = vadd.f32 %v11956_v41, %v12070_v39  ;;  %v11085_v39 = vld [vmem:[%s15018_s5 + $0xc] ss:$16 sps:$4 sm:$0xff]  }
 0x1c1   : > { %v1241_v47 = vmax.f32 %v1152_v37, 0.0  ;;  %v1232_v16 = vmax.f32 %v1117_v32, 0.0 }
 0x1c2   : > { %v12177_v51 = vpop.f32.mrf.mxu0  ;;  %9823 = vmatpush3.bf16.msra.mxu0 %v11965_v52  ;;  %v1230_v56 = vmax.f32 %v1109_v46, 0.0 }
 0x1c3   : > { %v12184_v57 = vpack.c.bf16 %v1241_v47, %v1240_v45  ;;  %9866 = vmatprep.subr.bf16.mxu0 %v12032_v58  ;;  %v1231_v47 = vmax.f32 %v1112_v49, 0.0 }
 0x1c4   : > { %v10613_v0 = vpop.f32.mrf.mxu0 }
 0x1c5   : > { %1548 = vmatpush1.bf16.msra.mxu1 %v12184_v57  ;;  %2388 = vmatmul.mubr.bf16.gmra.mxu0 %v11046_v50  ;;  %v12242_v50 = vpack.c.bf16 %v1233_v34, %v1232_v16  ;;  %v12249_v0 = vpack.c.bf16 %v1231_v47, %v1230_v56 }
 0x1c6   : > { %v12196_v7 = vpop.f32.mrf.mxu0  ;;  %1549 = vmatprep.subr.bf16.mxu1 %v15045_v61  ;;  %2395 = vmatprep.mubr.bf16.mxu0 %v11054_v53  ;;  %v8555_v53 = vcombine.low %v1304_v21, %v1304_v21 }
 0x1c7   : > { %1524 = vmatmul.mubr.bf16.gmra.mxu1 %v11068_v63 }
 0x1c8   : > { %v10614_v3 = vpop.f32.mrf.mxu0  ;;  %1531 = vmatprep.mubr.bf16.mxu1 %v11072_v2 }
 0x1c9   : > { %1550 = vmatpush1.bf16.msra.mxu1 %v12201_v12 }
 0x1ca   : > { %v12215_v23 = vpop.f32.mrf.mxu0  ;;  %1551 = vmatprep.subr.bf16.mxu1 %v15045_v61 }
 0x1cc   : > { %v10617_v31 = vpop.f32.mrf.mxu0 }
 0x1cd   : > { %1552 = vmatpush1.bf16.msra.mxu1 %v12220_v27  ;;  %2396 = vmatmul.mubr.bf16.gmra.mxu0 %v11052_v60  ;;  %v11077_v60 = vld [vmem:[%s15018_s5 + $0x2b4] ss:$16 sps:$4 sm:$0xff]  }
 0x1ce   : > { %v12228_v19 = vpop.f32.mrf.mxu0  ;;  %1553 = vmatprep.subr.bf16.mxu1 %v15045_v61  ;;  %2403 = vmatprep.mubr.bf16.mxu0 %v8704_v24 }
 0x1cf   : > { %1532 = vmatmul.mubr.bf16.gmra.mxu1 %v11074_v30 }
 0x1d0   : > { %v10618_v37 = vpop.f32.mrf.mxu0  ;;  %1539 = vmatprep.mubr.bf16.mxu1 %v8556_v22 }
 0x1d1   : > { %1554 = vmatpush1.bf16.msra.mxu1 %v12233_v36  ;;  %v11075_v37 = vld [vmem:[%s15018_s5 + $0x2b0] ss:$16 sps:$4 sm:$0xff]  }
 0x1d2   : > { %v1172_v45 = vpop.f32.mrf.mxu0  ;;  %1555 = vmatprep.subr.bf16.mxu1 %v15045_v61 }
 0x1d3   : > { %v1173_v46 = vadd.f32 %v11956_v41, %v1172_v45  ;;  %v1165_v45 = vadd.f32 %v11956_v41, %v12215_v23  ;;  %v11080_v23 = vld [vmem:[%s15018_s5 + $0x2d0] ss:$16 sps:$4 sm:$0xff]  }
 0x1d4   : > { %v10621_v55 = vpop.f32.mrf.mxu0 }
 0x1d5   : > { %1556 = vmatpush1.bf16.msra.mxu1 %v12242_v50  ;;  %2404 = vmatmul.mubr.bf16.gmra.mxu0 %v8703_v42  ;;  %v1168_v42 = vadd.f32 %v11956_v41, %v12228_v19  ;;  %v1246_v55 = vmax.f32 %v1173_v46, 0.0  ;;  %v1160_v19 = vadd.f32 %v11956_v41, %v12196_v7  ;;  %v11111_v46 = vld [vmem:[%s15018_s5 + $0x88] ss:$16 sps:$4 sm:$0xff]  }
 0x1d6   : > { %v1175_v63 = vpop.f32.mrf.mxu0  ;;  %1557 = vmatprep.subr.bf16.mxu1 %v15045_v61  ;;  %2772 = vmatprep.mubr.bf16.mxu0 %v11065_v44 }
 0x1d7   : > { %1540 = vmatmul.mubr.bf16.gmra.mxu1 %v8555_v53  ;;  %v1176_v32 = vadd.f32 %v11956_v41, %v1175_v63  ;;  %v11082_v53 = vld [vmem:[%s15018_s5 + $0x2d4] ss:$16 sps:$4 sm:$0xff]   ;;  %v1157_v63 = vadd.f32 %v11956_v41, %v12177_v51  ;;  %v1243_v7 = vmax.f32 %v1160_v19, 0.0  ;;  %v11083_v51 = vld [vmem:[%s15018_s5 + $0x8] ss:$16 sps:$4 sm:$0xff]  }
 0x1d8   : > { %v10622_v2 = vpop.f32.mrf.mxu0  ;;  %8559 = vmatprep.mubr.msk.bf16.mxu1 %vm1433_vm5, %v11085_v39  ;;  %v1245_v39 = vmax.f32 %v1168_v42, 0.0  ;;  %v11116_v42 = vld [vmem:[%s15018_s5 + $0x384] ss:$16 sps:$4 sm:$0xff]  }
 0x1d9   : > { %1558 = vmatpush1.bf16.msra.mxu1 %v12249_v0  ;;  %v1247_v44 = vmax.f32 %v1176_v32, 0.0  ;;  %v1244_v2 = vmax.f32 %v1165_v45, 0.0  ;;  %v11105_v32 = vld [vmem:[%s15018_s5 + $0x68] ss:$16 sps:$4 sm:$0xff]   ;;  %v11121_v19 = vld [vmem:[%s15018_s5 + $0x3a4] ss:$16 sps:$4 sm:$0xff]  }
 0x1da   : > { %v1180_v5 = vpop.f32.mrf.mxu0  ;;  %1559 = vmatprep.subr.bf16.mxu1 %v15045_v61  ;;  %v11117_v45 = vld [vmem:[%s15018_s5 + $0xa8] ss:$16 sps:$4 sm:$0xff]  }
 0x1db   : > { %v1181_v30 = vadd.f32 %v11956_v41, %v1180_v5  ;;  %v12306_v56 = vpack.c.bf16 %v1247_v44, %v1246_v55  ;;  %v11088_v5 = vld [vmem:[%s15018_s5 + $0x2f4] ss:$16 sps:$4 sm:$0xff]   ;;  %v1305_v44 = vld [vmem:[%s15018_s5 + $0xc8] sm:$0x11] }
 0x1dc   : > { %v10625_v11 = vpop.f32.mrf.mxu0  ;;  %v8558_v55 = vcombine.high %v1305_v44, %v1305_v44 }
 0x1dd   : > { %1560 = vmatpush1.bf16.msra.mxu1 %v12074_v40  ;;  %2773 = vmatmul.mubr.bf16.vlgmr.msra.gmra.mxu0 %v11063_v4  ;;  %v1248_v16 = vmax.f32 %v1181_v30, 0.0  ;;  %v12317_v4 = vpack.c.bf16 %v1245_v39, %v1244_v2  ;;  %v11086_v11 = vld [vmem:[%s15018_s5 + $0x2f0] ss:$16 sps:$4 sm:$0xff]   ;;  %v11100_v30 = vld [vmem:[%s15018_s5 + $0x6c] ss:$16 sps:$4 sm:$0xff]  }
 0x1de   : > { %9867 = vmatpush3.bf16.msra.mxu0 %v12011_v59  ;;  %v1183_v14 = vpop.f32.mrf.mxu0  ;;  %1561 = vmatprep.subr.bf16.mxu1 %v15045_v61  ;;  %v11119_v39 = vld [vmem:[%s15018_s5 + $0x3a0] ss:$16 sps:$4 sm:$0xff]   ;;  %v11128_v2 = vld [vmem:[%s15018_s5 + $0x3c4] ss:$16 sps:$4 sm:$0xff]  }
 0x1df   : > { %9868 = vmatprep.subr.bf16.mxu0 %v12035_v1  ;;  %2780 = vmatprep.mubr.bf16.mxu0 %v11071_v10  ;;  %v1184_v24 = vadd.f32 %v11956_v41, %v1183_v14  ;;  %v1242_v10 = vmax.f32 %v1157_v63, 0.0  ;;  %v11089_v14 = vld [vmem:[%s15018_s5 + $0x2c] ss:$16 sps:$4 sm:$0xff]   ;;  %v11125_v63 = vld [vmem:[%s15018_s5 + $0xd4] ss:$16 sps:$4 sm:$0xff]  }
 0x1e0   : > { %v10626_v3 = vpop.f32.mrf.mxu0 }
 0x1e1   : > { %1562 = vmatpush1.bf16.msra.mxu1 %v12052_v25  ;;  %v1249_v33 = vmax.f32 %v1184_v24, 0.0  ;;  %v11093_v3 = vld [vmem:[%s15018_s5 + $0x314] ss:$16 sps:$4 sm:$0xff]  }
 0x1e2   : > { %9869 = vmatpush3.bf16.msra.mxu0 %v12004_v48  ;;  %v1188_v18 = vpop.f32.mrf.mxu0  ;;  %1569 = vmatprep.subr.bf16.mxu1 %v15045_v61 }
 0x1e3   : > { %v1189_v21 = vadd.f32 %v11956_v41, %v1188_v18  ;;  %9870 = vmatprep.subr.bf16.mxu0 %v12047_v13  ;;  %v12293_v47 = vpack.c.bf16 %v1249_v33, %v1248_v16  ;;  %v12326_v41 = vpack.c.bf16 %v1243_v7, %v1242_v10  ;;  %v11091_v18 = vld [vmem:[%s15018_s5 + $0x310] ss:$16 sps:$4 sm:$0xff]   ;;  %v11106_v33 = vld [vmem:[%s15018_s5 + $0x8c] ss:$16 sps:$4 sm:$0xff]   ;;  %v11129_v10 = vld [vmem:[%s15018_s5 + $0xf4] ss:$16 sps:$4 sm:$0xff]  }
 0x1e4   : > { %v10629_v26 = vpop.f32.mrf.mxu0  ;;  %v11112_v16 = vld [vmem:[%s15018_s5 + $0xac] ss:$16 sps:$4 sm:$0xff]   ;;  %v11123_v7 = vld [vmem:[%s15018_s5 + $0xd0] ss:$16 sps:$4 sm:$0xff]  }
 0x1e5   : > { %v1250_v54 = vmax.f32 %v1189_v21, 0.0  ;;  %2781 = vmatmul.mubr.bf16.gmra.mxu0 %v11069_v15  ;;  %v8751_v15 = vld [vmem:[%s15018_s5 + $0x330] sm:$0x11]  ;;  %v11095_v21 = vld [vmem:[%s15018_s5 + $0x4c] ss:$16 sps:$4 sm:$0xff]  }
 0x1e6   : > { %9871 = vmatpush3.bf16.msra.mxu0 %v12000_v38  ;;  %v1191_v31 = vpop.f32.mrf.mxu0  ;;  %2788 = vmatprep.mubr.bf16.mxu0 %v11077_v60  ;;  %v11094_v60 = vld [vmem:[%s15018_s5 + $0x28] ss:$16 sps:$4 sm:$0xff]   ;;  %v8778_v24 = vcombine.high %v8751_v15, %v8751_v15  ;;  %v8777_v26 = vcombine.low %v8751_v15, %v8751_v15  ;;  %v11135_v15 = vld [vmem:[%s15018_s5 + $0x114] ss:$16 sps:$4 sm:$0xff]  }
 0x1e7   : > { %v1279_v22 = vpack.c.bf16 %v1250_v54, %v1250_v54  ;;  %9872 = vmatprep.subr.bf16.mxu0 %v12058_v28  ;;  %v11099_v54 = vld [vmem:[%s15018_s5 + $0x48] ss:$16 sps:$4 sm:$0xff]   ;;  %v11104_v31 = vld [vmem:[%s15018_s5 + $0x344] ss:$16 sps:$4 sm:$0xff]  }
 0x1e8   : > { %v10630_v49 = vpop.f32.mrf.mxu0 }
 0x1e9   : > { %v12281_v34 = vsel %vm1455_vm6, %v1279_v22, 0  ;;  %v11102_v22 = vld [vmem:[%s15018_s5 + $0x340] ss:$16 sps:$4 sm:$0xff]   ;;  %v11110_v49 = vld [vmem:[%s15018_s5 + $0x364] ss:$16 sps:$4 sm:$0xff]  }
 0x1ea   : > { %9873 = vmatpush3.bf16.msra.mxu0 %v11996_v29  ;;  %1570 = vmatpush2.bf16.msra.mxu1 %v12281_v34 }
 0x1eb   : > { %9874 = vmatprep.subr.bf16.mxu0 %v12068_v35  ;;  %1571 = vmatprep.subr.bf16.mxu1 %v15045_v61 }
 0x1ed   : > { %2789 = vmatmul.mubr.bf16.gmra.mxu0 %v11075_v37  ;;  %v11108_v37 = vld [vmem:[%s15018_s5 + $0x360] ss:$16 sps:$4 sm:$0xff]  }
 0x1ee   : > { %9875 = vmatpush3.bf16.msra.mxu0 %v11992_v20  ;;  %1572 = vmatpush2.bf16.msra.mxu1 %v12293_v47 }
 0x1ef   : > { %9876 = vmatprep.subr.bf16.mxu0 %v12078_v43  ;;  %1573 = vmatprep.subr.bf16.mxu1 %v15045_v61 }
 0x1f0   : > { %2796 = vmatprep.mubr.bf16.mxu0 %v11082_v53  ;;  %v11114_v53 = vld [vmem:[%s15018_s5 + $0x380] ss:$16 sps:$4 sm:$0xff]  }
 0x1f2   : > { %9877 = vmatpush3.bf16.msra.mxu0 %v11981_v8  ;;  %1574 = vmatpush2.bf16.msra.mxu1 %v12306_v56 }
 0x1f3   : > { %9878 = vmatprep.subr.bf16.mxu0 %v12022_v17  ;;  %1575 = vmatprep.subr.bf16.mxu1 %v15045_v61 }
 0x1f5   : > { %2797 = vmatmul.mubr.bf16.gmra.mxu0 %v11080_v23  ;;  %v8557_v23 = vcombine.low %v1305_v44, %v1305_v44 }
 0x1f6   : > { %9879 = vmatpush3.bf16.msra.mxu0 %v11973_v62  ;;  %1576 = vmatpush2.bf16.msra.mxu1 %v12317_v4 }
 0x1f7   : > { %9880 = vmatprep.subr.bf16.mxu0 %v12016_v6  ;;  %1577 = vmatprep.subr.bf16.mxu1 %v15045_v61 }
 0x1f8   : > { %2804 = vmatprep.mubr.bf16.mxu0 %v11088_v5  ;;  %v11126_v5 = vld [vmem:[%s15018_s5 + $0x3c0] ss:$16 sps:$4 sm:$0xff]  }
 0x1fa   : > { %9881 = vmatpush3.bf16.msra.mxu0 %v11965_v52  ;;  %1578 = vmatpush2.bf16.msra.mxu1 %v12326_v41 }
 0x1fb   : > { %9924 = vmatprep.subr.bf16.mxu0 %v12032_v58  ;;  %9692 = vmatprep.subr.bf16.mxu1 %v12032_v58 }
 0x1fd   : > { %1580 = vmatmul.mubr.bf16.vlgmr.msra.gmra.mxu1 %v11083_v51  ;;  %2805 = vmatmul.mubr.bf16.gmra.mxu0 %v11086_v11  ;;  %v11133_v51 = vld [vmem:[%s15018_s5 + $0x3e4] ss:$16 sps:$4 sm:$0xff]  }
 0x1fe   : > { %9693 = vmatpush3.bf16.msra.mxu1 %v12011_v59  ;;  %8560 = vmatprep.mubr.msk.bf16.mxu1 %vm1433_vm5, %v11089_v14  ;;  %v8825_v11 = vld [vmem:[%s15018_s5 + $0x400] sm:$0x11] }
 0x1ff   : > { %9694 = vmatprep.subr.bf16.mxu1 %v12035_v1  ;;  %2812 = vmatprep.mubr.bf16.mxu0 %v11093_v3  ;;  %v11131_v14 = vld [vmem:[%s15018_s5 + $0x3e0] ss:$16 sps:$4 sm:$0xff]  }
 0x200   : > { %v11134_v3 = vld [vmem:[%s15018_s5 + $0xf0] ss:$16 sps:$4 sm:$0xff]  }
 0x202   : > { %9695 = vmatpush3.bf16.msra.mxu1 %v12004_v48 }
 0x203   : > { %9696 = vmatprep.subr.bf16.mxu1 %v12047_v13 }
 0x205   : > { %1588 = vmatmul.mubr.bf16.gmra.mxu1 %v11094_v60  ;;  %2813 = vmatmul.mubr.bf16.gmra.mxu0 %v11091_v18  ;;  %v8852_v18 = vcombine.high %v8825_v11, %v8825_v11  ;;  %v8851_v60 = vcombine.low %v8825_v11, %v8825_v11  ;;  %v11166_v11 = vld [vmem:[%s15018_s5 + $0x490] ss:$16 sps:$4 sm:$0xff]  }
 0x206   : > { %9697 = vmatpush3.bf16.msra.mxu1 %v12000_v38  ;;  %8561 = vmatprep.mubr.msk.bf16.mxu1 %vm1433_vm5, %v11095_v21  ;;  %v11139_v21 = vld [vmem:[%s15018_s5 + $0x110] ss:$16 sps:$4 sm:$0xff]  }
 0x207   : > { %9698 = vmatprep.subr.bf16.mxu1 %v12058_v28  ;;  %2820 = vmatprep.mubr.bf16.mxu0 %v8778_v24  ;;  %v11140_v24 = vld [vmem:[%s15018_s5 + $0x134] ss:$16 sps:$4 sm:$0xff]  }
 0x20a   : > { %9699 = vmatpush3.bf16.msra.mxu1 %v11996_v29 }
 0x20b   : > { %9700 = vmatprep.subr.bf16.mxu1 %v12068_v35 }
 0x20d   : > { %1596 = vmatmul.mubr.bf16.gmra.mxu1 %v11099_v54  ;;  %2821 = vmatmul.mubr.bf16.gmra.mxu0 %v8777_v26  ;;  %v11144_v26 = vld [vmem:[%s15018_s5 + $0x414] ss:$16 sps:$4 sm:$0xff]   ;;  %v11142_v54 = vld [vmem:[%s15018_s5 + $0x410] ss:$16 sps:$4 sm:$0xff]  }
 0x20e   : > { %9701 = vmatpush3.bf16.msra.mxu1 %v11992_v20  ;;  %8562 = vmatprep.mubr.msk.bf16.mxu1 %vm1433_vm5, %v11100_v30  ;;  %v11145_v30 = vld [vmem:[%s15018_s5 + $0x130] ss:$16 sps:$4 sm:$0xff]  }
 0x20f   : > { %9702 = vmatprep.subr.bf16.mxu1 %v12078_v43  ;;  %3215 = vmatprep.mubr.bf16.mxu0 %v11104_v31  ;;  %v11146_v31 = vld [vmem:[%s15018_s5 + $0x154] ss:$16 sps:$4 sm:$0xff]  }
 0x212   : > { %9703 = vmatpush3.bf16.msra.mxu1 %v11981_v8 }
 0x213   : > { %9704 = vmatprep.subr.bf16.mxu1 %v12022_v17 }
 0x215   : > { %1604 = vmatmul.mubr.bf16.gmra.mxu1 %v11105_v32  ;;  %3216 = vmatmul.mubr.bf16.vlgmr.msra.gmra.mxu0 %v11102_v22  ;;  %v11150_v22 = vld [vmem:[%s15018_s5 + $0x434] ss:$16 sps:$4 sm:$0xff]   ;;  %v11148_v32 = vld [vmem:[%s15018_s5 + $0x430] ss:$16 sps:$4 sm:$0xff]  }
 0x216   : > { %9925 = vmatpush3.bf16.msra.mxu0 %v12011_v59  ;;  %9705 = vmatpush3.bf16.msra.mxu1 %v11973_v62 }
 0x217   : > { %9926 = vmatprep.subr.bf16.mxu0 %v12035_v1  ;;  %9706 = vmatprep.subr.bf16.mxu1 %v12016_v6 }
 0x218   : > { %8563 = vmatprep.mubr.msk.bf16.mxu1 %vm1433_vm5, %v11106_v33  ;;  %3223 = vmatprep.mubr.bf16.mxu0 %v11110_v49  ;;  %v11151_v33 = vld [vmem:[%s15018_s5 + $0x150] ss:$16 sps:$4 sm:$0xff]   ;;  %v11152_v49 = vld [vmem:[%s15018_s5 + $0x174] ss:$16 sps:$4 sm:$0xff]  }
 0x21a   : > { %9927 = vmatpush3.bf16.msra.mxu0 %v12004_v48  ;;  %9707 = vmatpush3.bf16.msra.mxu1 %v11965_v52 }
 0x21b   : > { %9928 = vmatprep.subr.bf16.mxu0 %v12047_v13  ;;  %1966 = vmatprep.subr.bf16.mxu1 %v15045_v61 }
 0x21d   : > { %1612 = vmatmul.mubr.bf16.gmra.mxu1 %v11111_v46  ;;  %3224 = vmatmul.mubr.bf16.gmra.mxu0 %v11108_v37  ;;  %v11156_v37 = vld [vmem:[%s15018_s5 + $0x454] ss:$16 sps:$4 sm:$0xff]   ;;  %v11154_v46 = vld [vmem:[%s15018_s5 + $0x450] ss:$16 sps:$4 sm:$0xff]  }
 0x21e   : > { %9929 = vmatpush3.bf16.msra.mxu0 %v12000_v38  ;;  %8564 = vmatprep.mubr.msk.bf16.mxu1 %vm1433_vm5, %v11112_v16  ;;  %v11157_v16 = vld [vmem:[%s15018_s5 + $0x170] ss:$16 sps:$4 sm:$0xff]  }
 0x21f   : > { %9930 = vmatprep.subr.bf16.mxu0 %v12058_v28  ;;  %3231 = vmatprep.mubr.bf16.mxu0 %v11116_v42  ;;  %v8603_v42 = vld [vmem:[%s15018_s5 + $0x190] sm:$0x11] }
 0x220   : > { %v8630_v44 = vcombine.high %v8603_v42, %v8603_v42 }
 0x222   : > { %9931 = vmatpush3.bf16.msra.mxu0 %v11996_v29 }
 0x223   : > { %9932 = vmatprep.subr.bf16.mxu0 %v12068_v35 }
 0x225   : > { %1620 = vmatmul.mubr.bf16.gmra.mxu1 %v11117_v45  ;;  %3232 = vmatmul.mubr.bf16.gmra.mxu0 %v11114_v53  ;;  %v11161_v53 = vld [vmem:[%s15018_s5 + $0x474] ss:$16 sps:$4 sm:$0xff]   ;;  %v11159_v45 = vld [vmem:[%s15018_s5 + $0x470] ss:$16 sps:$4 sm:$0xff]  }
 0x226   : > { %9933 = vmatpush3.bf16.msra.mxu0 %v11992_v20  ;;  %8565 = vmatprep.mubr.msk.bf16.mxu1 %vm1433_vm5, %v8558_v55  ;;  %v8629_v55 = vcombine.low %v8603_v42, %v8603_v42 }
 0x227   : > { %9934 = vmatprep.subr.bf16.mxu0 %v12078_v43  ;;  %3239 = vmatprep.mubr.bf16.mxu0 %v11121_v19  ;;  %v11165_v19 = vld [vmem:[%s15018_s5 + $0xdc] ss:$16 sps:$4 sm:$0xff]  }
 0x22a   : > { %9935 = vmatpush3.bf16.msra.mxu0 %v11981_v8 }
 0x22b   : > { %9936 = vmatprep.subr.bf16.mxu0 %v12022_v17 }
 0x22d   : > { %1628 = vmatmul.mubr.bf16.gmra.mxu1 %v8557_v23  ;;  %3240 = vmatmul.mubr.bf16.gmra.mxu0 %v11119_v39  ;;  %v11168_v39 = vld [vmem:[%s15018_s5 + $0x494] ss:$16 sps:$4 sm:$0xff]  }
 0x22e   : > { %9937 = vmatpush3.bf16.msra.mxu0 %v11973_v62  ;;  %1910 = vmatprep.mubr.bf16.mxu1 %v11125_v63 }
 0x22f   : > { %9938 = vmatprep.subr.bf16.mxu0 %v12016_v6  ;;  %3247 = vmatprep.mubr.bf16.mxu0 %v11128_v2 }
 0x232   : > { %9939 = vmatpush3.bf16.msra.mxu0 %v11965_v52 }
 0x233   : > { %9982 = vmatprep.subr.bf16.mxu0 %v12032_v58 }
 0x235   : > { %1911 = vmatmul.mubr.bf16.vlgmr.msra.gmra.mxu1 %v11123_v7  ;;  %3248 = vmatmul.mubr.bf16.gmra.mxu0 %v11126_v5 }
 0x236   : > { %1967 = vmatpush1.bf16.msra.mxu1 %v12184_v57  ;;  %1918 = vmatprep.mubr.bf16.mxu1 %v11129_v10 }
 0x237   : > { %1968 = vmatprep.subr.bf16.mxu1 %v15045_v61  ;;  %3255 = vmatprep.mubr.bf16.mxu0 %v11133_v51  ;;  %v11163_v51 = vld [vmem:[%s15018_s5 + $0xd8] ss:$16 sps:$4 sm:$0xff]  }
 0x23a   : > { %1969 = vmatpush1.bf16.msra.mxu1 %v12201_v12 }
 0x23b   : > { %1970 = vmatprep.subr.bf16.mxu1 %v15045_v61 }
 0x23d   : > { %1919 = vmatmul.mubr.bf16.gmra.mxu1 %v11134_v3  ;;  %3256 = vmatmul.mubr.bf16.gmra.mxu0 %v11131_v14 }
 0x23e   : > { %1971 = vmatpush1.bf16.msra.mxu1 %v12220_v27  ;;  %1926 = vmatprep.mubr.bf16.mxu1 %v11135_v15  ;;  %v11169_v15 = vld [vmem:[%s15018_s5 + $0xfc] ss:$16 sps:$4 sm:$0xff]  }
 0x23f   : > { %1972 = vmatprep.subr.bf16.mxu1 %v15045_v61  ;;  %3263 = vmatprep.mubr.bf16.mxu0 %v8852_v18  ;;  %v11173_v18 = vld [vmem:[%s15018_s5 + $0x4b4] ss:$16 sps:$4 sm:$0xff]  }
 0x242   : > { %1973 = vmatpush1.bf16.msra.mxu1 %v12233_v36 }
 0x243   : > { %1974 = vmatprep.subr.bf16.mxu1 %v15045_v61 }
 0x245   : > { %1927 = vmatmul.mubr.bf16.gmra.mxu1 %v11139_v21  ;;  %3264 = vmatmul.mubr.bf16.gmra.mxu0 %v8851_v60 }
 0x246   : > { %1975 = vmatpush1.bf16.msra.mxu1 %v12242_v50  ;;  %1934 = vmatprep.mubr.bf16.mxu1 %v11140_v24 }
 0x247   : > { %1976 = vmatprep.subr.bf16.mxu1 %v15045_v61  ;;  %3632 = vmatprep.mubr.bf16.mxu0 %v11144_v26 }
 0x24a   : > { %1977 = vmatpush1.bf16.msra.mxu1 %v12249_v0 }
 0x24b   : > { %1978 = vmatprep.subr.bf16.mxu1 %v15045_v61 }
 0x24d   : > { %1935 = vmatmul.mubr.bf16.gmra.mxu1 %v11145_v30  ;;  %3633 = vmatmul.mubr.bf16.vlgmr.msra.gmra.mxu0 %v11142_v54 }
 0x24e   : > { %1979 = vmatpush1.bf16.msra.mxu1 %v12074_v40  ;;  %9983 = vmatpush3.bf16.msra.mxu0 %v12011_v59 }
 0x24f   : > { %9984 = vmatprep.subr.bf16.mxu0 %v12035_v1  ;;  %1980 = vmatprep.subr.bf16.mxu1 %v15045_v61 }
 0x250   : > { %1942 = vmatprep.mubr.bf16.mxu1 %v11146_v31  ;;  %3640 = vmatprep.mubr.bf16.mxu0 %v11150_v22 }
 0x252   : > { %1981 = vmatpush1.bf16.msra.mxu1 %v12052_v25  ;;  %9985 = vmatpush3.bf16.msra.mxu0 %v12004_v48 }
 0x253   : > { %9986 = vmatprep.subr.bf16.mxu0 %v12047_v13  ;;  %1988 = vmatprep.subr.bf16.mxu1 %v15045_v61 }
 0x255   : > { %1943 = vmatmul.mubr.bf16.gmra.mxu1 %v11151_v33  ;;  %3641 = vmatmul.mubr.bf16.gmra.mxu0 %v11148_v32  ;;  %v8899_v32 = vld [vmem:[%s15018_s5 + $0x4d0] sm:$0x11] }
 0x256   : > { %1989 = vmatpush2.bf16.msra.mxu1 %v12281_v34  ;;  %9987 = vmatpush3.bf16.msra.mxu0 %v12000_v38 }
 0x257   : > { %9988 = vmatprep.subr.bf16.mxu0 %v12058_v28  ;;  %1990 = vmatprep.subr.bf16.mxu1 %v15045_v61 }
 0x258   : > { %1950 = vmatprep.mubr.bf16.mxu1 %v11152_v49  ;;  %3648 = vmatprep.mubr.bf16.mxu0 %v11156_v37  ;;  %v11171_v37 = vld [vmem:[%s15018_s5 + $0x4b0] ss:$16 sps:$4 sm:$0xff]  }
 0x25a   : > { %1991 = vmatpush2.bf16.msra.mxu1 %v12293_v47  ;;  %9989 = vmatpush3.bf16.msra.mxu0 %v11996_v29 }
 0x25b   : > { %9990 = vmatprep.subr.bf16.mxu0 %v12068_v35  ;;  %1992 = vmatprep.subr.bf16.mxu1 %v15045_v61 }
 0x25d   : > { %1951 = vmatmul.mubr.bf16.gmra.mxu1 %v11157_v16  ;;  %3649 = vmatmul.mubr.bf16.gmra.mxu0 %v11154_v46  ;;  %v11174_v46 = vld [vmem:[%s15018_s5 + $0xf8] ss:$16 sps:$4 sm:$0xff]  }
 0x25e   : > { %1993 = vmatpush2.bf16.msra.mxu1 %v12306_v56  ;;  %9991 = vmatpush3.bf16.msra.mxu0 %v11992_v20 }
 0x25f   : > { %9992 = vmatprep.subr.bf16.mxu0 %v12078_v43  ;;  %1994 = vmatprep.subr.bf16.mxu1 %v15045_v61 }
 0x260   : > { %1958 = vmatprep.mubr.bf16.mxu1 %v8630_v44  ;;  %3656 = vmatprep.mubr.bf16.mxu0 %v11161_v53  ;;  %v11175_v44 = vld [vmem:[%s15018_s5 + $0x11c] ss:$16 sps:$4 sm:$0xff]   ;;  %v8926_v53 = vcombine.high %v8899_v32, %v8899_v32 }
 0x262   : > { %1995 = vmatpush2.bf16.msra.mxu1 %v12317_v4  ;;  %9993 = vmatpush3.bf16.msra.mxu0 %v11981_v8 }
 0x263   : > { %9994 = vmatprep.subr.bf16.mxu0 %v12022_v17  ;;  %1996 = vmatprep.subr.bf16.mxu1 %v15045_v61 }
 0x265   : > { %1959 = vmatmul.mubr.bf16.gmra.mxu1 %v8629_v55  ;;  %3657 = vmatmul.mubr.bf16.gmra.mxu0 %v11159_v45  ;;  %v9650_v23 = vpop.f32.mrf.mxu1  ;;  %v9766_v63 = vpop.f32.mrf.mxu0 }
 0x266   : > { %1997 = vmatpush2.bf16.msra.mxu1 %v12326_v41  ;;  %9995 = vmatpush3.bf16.msra.mxu0 %v11973_v62 }
 0x267   : > { %9996 = vmatprep.subr.bf16.mxu0 %v12016_v6  ;;  %8633 = vmatprep.mubr.msk.bf16.mxu1 %vm1433_vm5, %v11165_v19  ;;  %v9651_v2 = vpop.f32.mrf.mxu1  ;;  %v9767_v7 = vpop.f32.mrf.mxu0 }
 0x268   : > { %2411 = vmatprep.subr.bf16.mxu1 %v15045_v61  ;;  %3664 = vmatprep.mubr.bf16.mxu0 %v11168_v39  ;;  %v12567_v5 = vadd.f32 %v9651_v2, %v9650_v23  ;;  %v12569_v10 = vadd.f32 %v9767_v7, %v9766_v63 }
 0x269   : > { %v9653_v14 = vpop.f32.mrf.mxu1  ;;  %v9769_v3 = vpop.f32.mrf.mxu0 }
 0x26a   : > { %9997 = vmatpush3.bf16.msra.mxu0 %v11965_v52 }
 0x26b   : > { %10040 = vmatprep.subr.bf16.mxu0 %v12032_v58  ;;  %v9654_v60 = vpop.f32.mrf.mxu1  ;;  %v9770_v21 = vpop.f32.mrf.mxu0 }
 0x26c   : > { %v12585_v24 = vadd.f32 %v9654_v60, %v9653_v14  ;;  %v12587_v26 = vadd.f32 %v9770_v21, %v9769_v3  ;;  %v8925_v14 = vcombine.low %v8899_v32, %v8899_v32  ;;  %v11179_v3 = vld [vmem:[%s15018_s5 + $0x118] ss:$16 sps:$4 sm:$0xff]   ;;  %v11180_v60 = vld [vmem:[%s15018_s5 + $0x13c] ss:$16 sps:$4 sm:$0xff]   ;;  %v11184_v21 = vld [vmem:[%s15018_s5 + $0x4e4] ss:$16 sps:$4 sm:$0xff]  }
 0x26d   : > { %1999 = vmatmul.mubr.bf16.vlgmr.msra.gmra.mxu1 %v11163_v51  ;;  %3665 = vmatmul.mubr.bf16.gmra.mxu0 %v11166_v11  ;;  %v9656_v54 = vpop.f32.mrf.mxu1  ;;  %v9772_v30 = vpop.f32.mrf.mxu0 }
 0x26e   : > { %2412 = vmatpush1.bf16.msra.mxu1 %v12184_v57  ;;  %8634 = vmatprep.mubr.msk.bf16.mxu1 %vm1433_vm5, %v11169_v15 }
 0x26f   : > { %2413 = vmatprep.subr.bf16.mxu1 %v15045_v61  ;;  %3672 = vmatprep.mubr.bf16.mxu0 %v11173_v18  ;;  %v9657_v31 = vpop.f32.mrf.mxu1  ;;  %v9773_v22 = vpop.f32.mrf.mxu0 }
 0x270   : > { %v12595_v33 = vadd.f32 %v9657_v31, %v9656_v54  ;;  %v12597_v49 = vadd.f32 %v9773_v22, %v9772_v30 }
 0x271   : > { %v9659_v16 = vpop.f32.mrf.mxu1  ;;  %v9775_v42 = vpop.f32.mrf.mxu0 }
 0x272   : > { %2414 = vmatpush1.bf16.msra.mxu1 %v12201_v12 }
 0x273   : > { %2415 = vmatprep.subr.bf16.mxu1 %v15045_v61  ;;  %v9660_v45 = vpop.f32.mrf.mxu1  ;;  %v9776_v55 = vpop.f32.mrf.mxu0 }
 0x274   : > { %v12610_v19 = vadd.f32 %v9660_v45, %v9659_v16  ;;  %v12612_v39 = vadd.f32 %v9776_v55, %v9775_v42  ;;  %v11185_v45 = vld [vmem:[%s15018_s5 + $0x138] ss:$16 sps:$4 sm:$0xff]  }
 0x275   : > { %2007 = vmatmul.mubr.bf16.gmra.mxu1 %v11174_v46  ;;  %3673 = vmatmul.mubr.bf16.gmra.mxu0 %v11171_v37  ;;  %v9662_v23 = vpop.f32.mrf.mxu1  ;;  %v9778_v63 = vpop.f32.mrf.mxu0 }
 0x276   : > { %2416 = vmatpush1.bf16.msra.mxu1 %v12220_v27  ;;  %8635 = vmatprep.mubr.msk.bf16.mxu1 %vm1433_vm5, %v11175_v44 }
 0x277   : > { %2417 = vmatprep.subr.bf16.mxu1 %v15045_v61  ;;  %3680 = vmatprep.mubr.bf16.mxu0 %v8926_v53  ;;  %v9663_v2 = vpop.f32.mrf.mxu1  ;;  %v9779_v7 = vpop.f32.mrf.mxu0  ;;  %v11182_v53 = vld [vmem:[%s15018_s5 + $0x4e0] ss:$16 sps:$4 sm:$0xff]  }
 0x278   : > { %v12617_v51 = vadd.f32 %v9663_v2, %v9662_v23  ;;  %v12619_v11 = vadd.f32 %v9779_v7, %v9778_v63  ;;  %v11186_v7 = vld [vmem:[%s15018_s5 + $0x15c] ss:$16 sps:$4 sm:$0xff]  }
 0x279   : > { %v9665_v15 = vpop.f32.mrf.mxu1  ;;  %v9781_v18 = vpop.f32.mrf.mxu0 }
 0x27a   : > { %2418 = vmatpush1.bf16.msra.mxu1 %v12233_v36 }
 0x27b   : > { %2419 = vmatprep.subr.bf16.mxu1 %v15045_v61  ;;  %v9666_v54 = vpop.f32.mrf.mxu1  ;;  %v9782_v30 = vpop.f32.mrf.mxu0 }
 0x27c   : > { %v12632_v31 = vadd.f32 %v9666_v54, %v9665_v15  ;;  %v12634_v22 = vadd.f32 %v9782_v30, %v9781_v18  ;;  %v11188_v30 = vld [vmem:[%s15018_s5 + $0x500] ss:$16 sps:$4 sm:$0xff]  }
 0x27d   : > { %2015 = vmatmul.mubr.bf16.gmra.mxu1 %v11179_v3  ;;  %3681 = vmatmul.mubr.bf16.gmra.mxu0 %v8925_v14  ;;  %v9668_v32 = vpop.f32.mrf.mxu1  ;;  %v9784_v37 = vpop.f32.mrf.mxu0  ;;  %v11190_v14 = vld [vmem:[%s15018_s5 + $0x504] ss:$16 sps:$4 sm:$0xff]  }
 0x27e   : > { %2420 = vmatpush1.bf16.msra.mxu1 %v12242_v50  ;;  %8636 = vmatprep.mubr.msk.bf16.mxu1 %vm1433_vm5, %v11180_v60 }
 0x27f   : > { %2421 = vmatprep.subr.bf16.mxu1 %v15045_v61  ;;  %4075 = vmatprep.mubr.bf16.mxu0 %v11184_v21  ;;  %v9669_v46 = vpop.f32.mrf.mxu1  ;;  %v9785_v16 = vpop.f32.mrf.mxu0 }
 0x280   : > { %v12639_v42 = vadd.f32 %v9669_v46, %v9668_v32  ;;  %v12641_v44 = vadd.f32 %v9785_v16, %v9784_v37  ;;  %v11191_v32 = vld [vmem:[%s15018_s5 + $0x158] ss:$16 sps:$4 sm:$0xff]  }
 0x281   : > { %v9671_v55 = vpop.f32.mrf.mxu1  ;;  %v9787_v23 = vpop.f32.mrf.mxu0 }
 0x282   : > { %2422 = vmatpush1.bf16.msra.mxu1 %v12249_v0 }
 0x283   : > { %2423 = vmatprep.subr.bf16.mxu1 %v15045_v61  ;;  %v9672_v63 = vpop.f32.mrf.mxu1  ;;  %v9788_v2 = vpop.f32.mrf.mxu0 }
 0x284   : > { %v12657_v3 = vadd.f32 %v9672_v63, %v9671_v55  ;;  %v12659_v15 = vadd.f32 %v9788_v2, %v9787_v23  ;;  %v11192_v55 = vld [vmem:[%s15018_s5 + $0x17c] ss:$16 sps:$4 sm:$0xff]   ;;  %v11196_v23 = vld [vmem:[%s15018_s5 + $0x524] ss:$16 sps:$4 sm:$0xff]  }
 0x285   : > { %2023 = vmatmul.mubr.bf16.gmra.mxu1 %v11185_v45  ;;  %4076 = vmatmul.mubr.bf16.vlgmr.msra.gmra.mxu0 %v11182_v53  ;;  %v9790_v18 = vpop.f32.mrf.mxu0 }
 0x286   : > { %2424 = vmatpush1.bf16.msra.mxu1 %v12074_v40  ;;  %10041 = vmatpush3.bf16.msra.mxu0 %v12011_v59 }
 0x287   : > { %10042 = vmatprep.subr.bf16.mxu0 %v12035_v1  ;;  %2425 = vmatprep.subr.bf16.mxu1 %v15045_v61  ;;  %v9674_v60 = vpop.f32.mrf.mxu1  ;;  %v9791_v21 = vpop.f32.mrf.mxu0 }
 0x288   : > { %8637 = vmatprep.mubr.msk.bf16.mxu1 %vm1433_vm5, %v11186_v7  ;;  %4083 = vmatprep.mubr.bf16.mxu0 %v11190_v14  ;;  %v12666_v54 = vadd.f32 %v9791_v21, %v9790_v18 }
 0x289   : > { %v9675_v37 = vpop.f32.mrf.mxu1  ;;  %v9793_v46 = vpop.f32.mrf.mxu0 }
 0x28a   : > { %2426 = vmatpush1.bf16.msra.mxu1 %v12052_v25  ;;  %10043 = vmatpush3.bf16.msra.mxu0 %v12004_v48  ;;  %v12676_v16 = vadd.f32 %v9675_v37, %v9674_v60  ;;  %v8604_v37 = vld [vmem:[%s15018_s5 + $0x198] sm:$0x11] }
 0x28b   : > { %10044 = vmatprep.subr.bf16.mxu0 %v12047_v13  ;;  %2433 = vmatprep.subr.bf16.mxu1 %v15045_v61  ;;  %v9677_v53 = vpop.f32.mrf.mxu1  ;;  %v9794_v45 = vpop.f32.mrf.mxu0 }
 0x28c   : > { %v12686_v63 = vadd.f32 %v9794_v45, %v9793_v46 }
 0x28d   : > { %2031 = vmatmul.mubr.bf16.gmra.mxu1 %v11191_v32  ;;  %4084 = vmatmul.mubr.bf16.gmra.mxu0 %v11188_v30  ;;  %v9678_v2 = vpop.f32.mrf.mxu1  ;;  %v9796_v7 = vpop.f32.mrf.mxu0  ;;  %v11194_v30 = vld [vmem:[%s15018_s5 + $0x520] ss:$16 sps:$4 sm:$0xff]   ;;  %v11197_v32 = vld [vmem:[%s15018_s5 + $0x178] ss:$16 sps:$4 sm:$0xff]  }
 0x28e   : > { %15066 = vst [vmem:[#allocation15_spill] sm:$0xff] %v12686_v63  ;;  %2434 = vmatpush2.bf16.msra.mxu1 %v12281_v34  ;;  %10045 = vmatpush3.bf16.msra.mxu0 %v12000_v38  ;;  %v12690_v14 = vadd.f32 %v9678_v2, %v9677_v53  ;;  %v8632_v2 = vcombine.high %v8604_v37, %v8604_v37 }
 0x28f   : > { %10046 = vmatprep.subr.bf16.mxu0 %v12058_v28  ;;  %2435 = vmatprep.subr.bf16.mxu1 %v15045_v61  ;;  %v9680_v18 = vpop.f32.mrf.mxu1  ;;  %v9797_v60 = vpop.f32.mrf.mxu0 }
 0x290   : > { %8638 = vmatprep.mubr.msk.bf16.mxu1 %vm1433_vm5, %v11192_v55  ;;  %4091 = vmatprep.mubr.bf16.mxu0 %v11196_v23  ;;  %v12695_v21 = vadd.f32 %v9797_v60, %v9796_v7  ;;  %v11201_v7 = vld [vmem:[%s15018_s5 + $0x544] ss:$16 sps:$4 sm:$0xff]  }
 0x291   : > { %v9681_v46 = vpop.f32.mrf.mxu1  ;;  %v9799_v53 = vpop.f32.mrf.mxu0 }
 0x292   : > { %15067 = vst [vmem:[#allocation16_spill] sm:$0xff] %v12695_v21  ;;  %2436 = vmatpush2.bf16.msra.mxu1 %v12293_v47  ;;  %10047 = vmatpush3.bf16.msra.mxu0 %v11996_v29  ;;  %v12708_v45 = vadd.f32 %v9681_v46, %v9680_v18 }
 0x293   : > { %10048 = vmatprep.subr.bf16.mxu0 %v12068_v35  ;;  %2437 = vmatprep.subr.bf16.mxu1 %v15045_v61  ;;  %v9683_v55 = vpop.f32.mrf.mxu1  ;;  %v9800_v23 = vpop.f32.mrf.mxu0 }
 0x294   : > { %v12715_v60 = vadd.f32 %v9800_v23, %v9799_v53 }
 0x295   : > { %2039 = vmatmul.mubr.bf16.gmra.mxu1 %v11197_v32  ;;  %4092 = vmatmul.mubr.bf16.gmra.mxu0 %v11194_v30  ;;  %v9684_v9 = vpop.f32.mrf.mxu1  ;;  %v9802_v21 = vpop.f32.mrf.mxu0  ;;  %v11199_v30 = vld [vmem:[%s15018_s5 + $0x540] ss:$16 sps:$4 sm:$0xff]   ;;  %v8631_v32 = vcombine.low %v8604_v37, %v8604_v37  ;;  %v11208_v37 = vld [vmem:[%s15018_s5 + $0x564] ss:$16 sps:$4 sm:$0xff]  }
 0x296   : > { %15068 = vst [vmem:[#allocation17_spill] sm:$0xff] %v12715_v60  ;;  %2438 = vmatpush2.bf16.msra.mxu1 %v12306_v56  ;;  %10049 = vmatpush3.bf16.msra.mxu0 %v11992_v20  ;;  %v12719_v18 = vadd.f32 %v9684_v9, %v9683_v55 }
 0x297   : > { %10050 = vmatprep.subr.bf16.mxu0 %v12078_v43  ;;  %2439 = vmatprep.subr.bf16.mxu1 %v15045_v61  ;;  %v9686_v46 = vpop.f32.mrf.mxu1  ;;  %v9803_v63 = vpop.f32.mrf.mxu0 }
 0x298   : > { %8639 = vmatprep.mubr.msk.bf16.mxu1 %vm1433_vm5, %v8632_v2  ;;  %4099 = vmatprep.mubr.bf16.mxu0 %v11201_v7  ;;  %v12724_v53 = vadd.f32 %v9803_v63, %v9802_v21  ;;  %v11205_v63 = vld [vmem:[%s15018_s5 + $0x1ac] ss:$16 sps:$4 sm:$0xff]  }
 0x299   : > { %v9687_v23 = vpop.f32.mrf.mxu1  ;;  %v9805_v60 = vpop.f32.mrf.mxu0 }
 0x29a   : > { %2440 = vmatpush2.bf16.msra.mxu1 %v12317_v4  ;;  %10051 = vmatpush3.bf16.msra.mxu0 %v11981_v8  ;;  %v12731_v9 = vadd.f32 %v9687_v23, %v9686_v46  ;;  %v11209_v23 = vld [vmem:[%s15018_s5 + $0x1cc] ss:$16 sps:$4 sm:$0xff]  }
 0x29b   : > { %10052 = vmatprep.subr.bf16.mxu0 %v12022_v17  ;;  %2441 = vmatprep.subr.bf16.mxu1 %v15045_v61  ;;  %v9689_v21 = vpop.f32.mrf.mxu1  ;;  %v9806_v55 = vpop.f32.mrf.mxu0 }
 0x29c   : > { %v8973_v21 = vld [vmem:[%s15018_s5 + $0x5a0] sm:$0x11]  ;;  %v11214_v55 = vld [vmem:[%s15018_s5 + $0x1c8] ss:$16 sps:$4 sm:$0xff]  }
 0x29d   : > { %2047 = vmatmul.mubr.bf16.gmra.mxu1 %v8631_v32  ;;  %4100 = vmatmul.mubr.bf16.gmra.mxu0 %v11199_v30  ;;  %v9690_v2 = vpop.f32.mrf.mxu1  ;;  %v9824_v7 = vpop.f32.mrf.mxu0  ;;  %v11203_v30 = vld [vmem:[%s15018_s5 + $0x1a8] ss:$16 sps:$4 sm:$0xff]   ;;  %v11206_v32 = vld [vmem:[%s15018_s5 + $0x560] ss:$16 sps:$4 sm:$0xff]  }
 0x29e   : > { %2442 = vmatpush2.bf16.msra.mxu1 %v12326_v41  ;;  %10053 = vmatpush3.bf16.msra.mxu0 %v11973_v62  ;;  %v9000_v2 = vcombine.high %v8973_v21, %v8973_v21 }
 0x29f   : > { %10054 = vmatprep.subr.bf16.mxu0 %v12016_v6  ;;  %8707 = vmatprep.mubr.msk.bf16.mxu1 %vm1433_vm5, %v11205_v63  ;;  %v9825_v60 = vpop.f32.mrf.mxu0  ;;  %v11213_v63 = vld [vmem:[%s15018_s5 + $0x584] ss:$16 sps:$4 sm:$0xff]  }
 0x2a0   : > { %2828 = vmatprep.subr.bf16.mxu1 %v15045_v61  ;;  %4107 = vmatprep.mubr.bf16.mxu0 %v11208_v37  ;;  %v12746_v46 = vadd.f32 %v9825_v60, %v9824_v7  ;;  %v11215_v37 = vld [vmem:[%s15018_s5 + $0x1ec] ss:$16 sps:$4 sm:$0xff]   ;;  %v8999_v7 = vcombine.low %v8973_v21, %v8973_v21  ;;  %v11219_v60 = vld [vmem:[%s15018_s5 + $0x1e8] ss:$16 sps:$4 sm:$0xff]  }
 0x2a1   : > { %v12802_v21 = vpop.f32.mrf.mxu0 }
 0x2a2   : > { %10055 = vmatpush3.bf16.msra.mxu0 %v11965_v52 }
 0x2a3   : > { %10098 = vmatprep.subr.bf16.mxu0 %v12032_v58  ;;  %v11211_v58 = vld [vmem:[%s15018_s5 + $0x580] ss:$16 sps:$4 sm:$0xff]  }
 0x2a5   : > { %2444 = vmatmul.mubr.bf16.vlgmr.msra.gmra.mxu1 %v11203_v30  ;;  %4108 = vmatmul.mubr.bf16.gmra.mxu0 %v11206_v32  ;;  %v11220_v30 = vld [vmem:[%s15018_s5 + $0x20c] ss:$16 sps:$4 sm:$0xff]   ;;  %v11224_v32 = vld [vmem:[%s15018_s5 + $0x5b4] ss:$16 sps:$4 sm:$0xff]  }
 0x2a6   : > { %2829 = vmatpush1.bf16.msra.mxu1 %v12184_v57  ;;  %8708 = vmatprep.mubr.msk.bf16.mxu1 %vm1433_vm5, %v11209_v23  ;;  %v8666_v23 = vld [vmem:[%s15018_s5 + $0x208] sm:$0xff] }
 0x2a7   : > { %2830 = vmatprep.subr.bf16.mxu1 %v15045_v61  ;;  %4115 = vmatprep.mubr.bf16.mxu0 %v11213_v63  ;;  %v8668_v63 = vld [vmem:[%s15018_s5 + $0x218] sm:$0xff] }
 0x2aa   : > { %2831 = vmatpush1.bf16.msra.mxu1 %v12201_v12 }
 0x2ab   : > { %2832 = vmatprep.subr.bf16.mxu1 %v15045_v61 }
 0x2ad   : > { %2452 = vmatmul.mubr.bf16.gmra.mxu1 %v11214_v55  ;;  %4116 = vmatmul.mubr.bf16.gmra.mxu0 %v11211_v58  ;;  %v11222_v58 = vld [vmem:[%s15018_s5 + $0x5b0] ss:$16 sps:$4 sm:$0xff]   ;;  %v8693_v55 = vcombine.low %v8666_v23, %v8668_v63 }
 0x2ae   : > { %2833 = vmatpush1.bf16.msra.mxu1 %v12220_v27  ;;  %8709 = vmatprep.mubr.msk.bf16.mxu1 %vm1433_vm5, %v11215_v37  ;;  %v12809_v37 = vpop.f32.mrf.mxu0 }
 0x2af   : > { %2834 = vmatprep.subr.bf16.mxu1 %v15045_v61  ;;  %4123 = vmatprep.mubr.bf16.mxu0 %v9000_v2  ;;  %v11225_v2 = vld [vmem:[%s15018_s5 + $0x22c] ss:$16 sps:$4 sm:$0xff]  }
 0x2b2   : > { %2835 = vmatpush1.bf16.msra.mxu1 %v12233_v36 }
 0x2b3   : > { %2836 = vmatprep.subr.bf16.mxu1 %v15045_v61 }
 0x2b5   : > { %2460 = vmatmul.mubr.bf16.gmra.mxu1 %v11219_v60  ;;  %4124 = vmatmul.mubr.bf16.gmra.mxu0 %v8999_v7 }
 0x2b6   : > { %2837 = vmatpush1.bf16.msra.mxu1 %v12242_v50  ;;  %8710 = vmatprep.mubr.msk.bf16.mxu1 %vm1433_vm5, %v11220_v30  ;;  %v8670_v30 = vld [vmem:[%s15018_s5 + $0x228] sm:$0xff] }
 0x2b7   : > { %2838 = vmatprep.subr.bf16.mxu1 %v15045_v61  ;;  %4492 = vmatprep.mubr.bf16.mxu0 %v11224_v32  ;;  %v8672_v32 = vld [vmem:[%s15018_s5 + $0x238] sm:$0xff] }
 0x2ba   : > { %2839 = vmatpush1.bf16.msra.mxu1 %v12249_v0 }
 0x2bb   : > { %2840 = vmatprep.subr.bf16.mxu1 %v15045_v61 }
 0x2bd   : > { %v1581_v7 = vpop.f32.mrf.mxu1  ;;  %2468 = vmatmul.mubr.bf16.gmra.mxu1 %v8693_v55  ;;  %4493 = vmatmul.mubr.bf16.vlgmr.msra.gmra.mxu0 %v11222_v58  ;;  %v8697_v58 = vcombine.low %v8670_v30, %v8672_v32 }
 0x2be   : > { %v1582_v60 = vadd.f32 %v12567_v5, %v1581_v7  ;;  %2841 = vmatpush1.bf16.msra.mxu1 %v12074_v40  ;;  %10099 = vmatpush3.bf16.msra.mxu0 %v12011_v59 }
 0x2bf   : > { %10100 = vmatprep.subr.bf16.mxu0 %v12035_v1  ;;  %v1583_v23 = vpop.f32.mrf.mxu1  ;;  %2842 = vmatprep.subr.bf16.mxu1 %v15045_v61 }
 0x2c0   : > { %v9455_v63 = vpack.c.bf16 %v1582_v60, %v1582_v60  ;;  %8711 = vmatprep.mubr.msk.bf16.mxu1 %vm1433_vm5, %v11225_v2  ;;  %v11227_v2 = vld [vmem:[%s15018_s5 + $0x24c] ss:$16 sps:$4 sm:$0xff]  }
 0x2c1   : > { %v1584_v5 = vpop.f32.mrf.mxu1 }
 0x2c2   : > { %1689 = vst.msk [vmem:[#allocation2] sm:$0xf] %vm1688_vm7, %v9455_v63  ;;  %v1585_v59 = vadd.f32 %v12585_v24, %v1584_v5  ;;  %2843 = vmatpush1.bf16.msra.mxu1 %v12052_v25  ;;  %10101 = vmatpush3.bf16.msra.mxu0 %v12004_v48  ;;  %v8674_v48 = vld [vmem:[%s15018_s5 + $0x248] sm:$0xff] }
 0x2c3   : > { %10102 = vmatprep.subr.bf16.mxu0 %v12047_v13  ;;  %v1586_v55 = vpop.f32.mrf.mxu1  ;;  %2850 = vmatprep.subr.bf16.mxu1 %v15045_v61  ;;  %v8676_v13 = vld [vmem:[%s15018_s5 + $0x258] sm:$0xff] }
 0x2c4   : > { %v9456_v1 = vpack.c.bf16 %v1585_v59, %v1585_v59  ;;  %v8701_v32 = vcombine.low %v8674_v48, %v8676_v13 }
 0x2c5   : > { %v1589_v7 = vpop.f32.mrf.mxu1  ;;  %2476 = vmatmul.mubr.bf16.gmra.mxu1 %v8697_v58 }
 0x2c6   : > { %1690 = vst.msk [vmem:[#allocation2 + $0x14] sm:$0xf] %vm1688_vm7, %v9456_v1  ;;  %v1590_v24 = vadd.f32 %v12595_v33, %v1589_v7  ;;  %2851 = vmatpush2.bf16.msra.mxu1 %v12281_v34  ;;  %10103 = vmatpush3.bf16.msra.mxu0 %v12000_v38  ;;  %v8678_v38 = vld [vmem:[%s15018_s5 + $0x268] sm:$0x11] }
 0x2c7   : > { %10104 = vmatprep.subr.bf16.mxu0 %v12058_v28  ;;  %v1591_v60 = vpop.f32.mrf.mxu1  ;;  %2852 = vmatprep.subr.bf16.mxu1 %v15045_v61  ;;  %v8706_v5 = vcombine.high %v8678_v38, %v8678_v38  ;;  %v8705_v55 = vcombine.low %v8678_v38, %v8678_v38 }
 0x2c8   : > { %v9457_v30 = vpack.c.bf16 %v1590_v24, %v1590_v24  ;;  %8712 = vmatprep.mubr.msk.bf16.mxu1 %vm1433_vm5, %v11227_v2  ;;  %v11230_v24 = vld [vmem:[%s15018_s5 + $0x278] ss:$16 sps:$4 sm:$0xff]  }
 0x2c9   : > { %v1592_v33 = vpop.f32.mrf.mxu1 }
 0x2ca   : > { %1691 = vst.msk [vmem:[#allocation2 + $0x28] sm:$0xf] %vm1688_vm7, %v9457_v30  ;;  %v1593_v23 = vadd.f32 %v12610_v19, %v1592_v33  ;;  %2853 = vmatpush2.bf16.msra.mxu1 %v12293_v47  ;;  %10105 = vmatpush3.bf16.msra.mxu0 %v11996_v29 }
 0x2cb   : > { %10106 = vmatprep.subr.bf16.mxu0 %v12068_v35  ;;  %v1594_v28 = vpop.f32.mrf.mxu1  ;;  %2854 = vmatprep.subr.bf16.mxu1 %v15045_v61 }
 0x2cc   : > { %v9458_v63 = vpack.c.bf16 %v1593_v23, %v1593_v23  ;;  %v11235_v23 = vld [vmem:[%s15018_s5 + $0x2bc] ss:$16 sps:$4 sm:$0xff]  }
 0x2cd   : > { %v1597_v58 = vpop.f32.mrf.mxu1  ;;  %2484 = vmatmul.mubr.bf16.gmra.mxu1 %v8701_v32 }
 0x2ce   : > { %1692 = vst.msk [vmem:[#allocation2 + $0x3c] sm:$0xf] %vm1688_vm7, %v9458_v63  ;;  %v1598_v59 = vadd.f32 %v12617_v51, %v1597_v58  ;;  %2855 = vmatpush2.bf16.msra.mxu1 %v12306_v56  ;;  %10107 = vmatpush3.bf16.msra.mxu0 %v11992_v20 }
 0x2cf   : > { %10108 = vmatprep.subr.bf16.mxu0 %v12078_v43  ;;  %v1599_v29 = vpop.f32.mrf.mxu1  ;;  %2856 = vmatprep.subr.bf16.mxu1 %v15045_v61  ;;  %v11232_v43 = vld [vmem:[%s15018_s5 + $0x27c] ss:$16 sps:$4 sm:$0xff]  }
 0x2d0   : > { %v9459_v35 = vpack.c.bf16 %v1598_v59, %v1598_v59  ;;  %8713 = vmatprep.mubr.msk.bf16.mxu1 %vm1433_vm5, %v8706_v5  ;;  %v8738_v59 = vld [vmem:[%s15018_s5 + $0x2c8] sm:$0xff] }
 0x2d1   : > { %v1600_v19 = vpop.f32.mrf.mxu1 }
 0x2d2   : > { %1693 = vst.msk [vmem:[#allocation2 + $0x50] sm:$0xf] %vm1688_vm7, %v9459_v35  ;;  %v1601_v1 = vadd.f32 %v12632_v31, %v1600_v19  ;;  %2857 = vmatpush2.bf16.msra.mxu1 %v12317_v4  ;;  %10109 = vmatpush3.bf16.msra.mxu0 %v11981_v8 }
 0x2d3   : > { %10110 = vmatprep.subr.bf16.mxu0 %v12022_v17  ;;  %v1602_v20 = vpop.f32.mrf.mxu1  ;;  %2858 = vmatprep.subr.bf16.mxu1 %v15045_v61 }
 0x2d4   : > { %v9460_v51 = vpack.c.bf16 %v1601_v1, %v1601_v1  ;;  %v11237_v1 = vld [vmem:[%s15018_s5 + $0x2dc] ss:$16 sps:$4 sm:$0xff]  }
 0x2d5   : > { %v1605_v2 = vpop.f32.mrf.mxu1  ;;  %2492 = vmatmul.mubr.bf16.gmra.mxu1 %v8705_v55 }
 0x2d6   : > { %1694 = vst.msk [vmem:[#allocation2 + $0x64] sm:$0xf] %vm1688_vm7, %v9460_v51  ;;  %v1606_v31 = vadd.f32 %v12639_v42, %v1605_v2  ;;  %2859 = vmatpush2.bf16.msra.mxu1 %v12326_v41  ;;  %10111 = vmatpush3.bf16.msra.mxu0 %v11973_v62  ;;  %v11233_v62 = vld [vmem:[%s15018_s5 + $0x29c] ss:$16 sps:$4 sm:$0xff]  }
 0x2d7   : > { %10112 = vmatprep.subr.bf16.mxu0 %v12016_v6  ;;  %v1607_v8 = vpop.f32.mrf.mxu1  ;;  %8781 = vmatprep.mubr.msk.bf16.mxu1 %vm1433_vm5, %v11232_v43 }
 0x2d8   : > { %v9461_v17 = vpack.c.bf16 %v1606_v31, %v1606_v31  ;;  %3271 = vmatprep.subr.bf16.mxu1 %v15045_v61 }
 0x2d9   : > { %v1608_v7 = vpop.f32.mrf.mxu1 }
 0x2da   : > { %1695 = vst.msk [vmem:[#allocation2 + $0x78] sm:$0xf] %vm1688_vm7, %v9461_v17  ;;  %v1609_v42 = vadd.f32 %v12657_v3, %v1608_v7  ;;  %10113 = vmatpush3.bf16.msra.mxu0 %v11965_v52  ;;  %v8732_v3 = vld [vmem:[%s15018_s5 + $0x298] sm:$0xff]  ;;  %v8734_v52 = vld [vmem:[%s15018_s5 + $0x2a8] sm:$0xff] }
 0x2db   : > { %v1610_v6 = vpop.f32.mrf.mxu1  ;;  %v8759_v38 = vcombine.low %v8732_v3, %v8734_v52  ;;  %v11239_v17 = vld [vmem:[%s15018_s5 + $0x2d8] ss:$16 sps:$4 sm:$0xff]  }
 0x2dc   : > { %v9462_v48 = vpack.c.bf16 %v1609_v42, %v1609_v42  ;;  %v11242_v6 = vld [vmem:[%s15018_s5 + $0x2f8] ss:$16 sps:$4 sm:$0xff]  }
 0x2dd   : > { %v1613_v13 = vpop.f32.mrf.mxu1  ;;  %2861 = vmatmul.mubr.bf16.vlgmr.msra.gmra.mxu1 %v11230_v24  ;;  %v8752_v52 = vld [vmem:[%s15018_s5 + $0x338] sm:$0x11] }
 0x2de   : > { %1696 = vst.msk [vmem:[#allocation2 + $0x8c] sm:$0xf] %vm1688_vm7, %v9462_v48  ;;  %v1614_v60 = vadd.f32 %v12676_v16, %v1613_v13  ;;  %3272 = vmatpush1.bf16.msra.mxu1 %v12184_v57  ;;  %8782 = vmatprep.mubr.msk.bf16.mxu1 %vm1433_vm5, %v11233_v62  ;;  %v11243_v48 = vld [vmem:[%s15018_s5 + $0x31c] ss:$16 sps:$4 sm:$0xff]  }
 0x2df   : > { %v1615_v30 = vpop.f32.mrf.mxu1  ;;  %3273 = vmatprep.subr.bf16.mxu1 %v15045_v61 }
 0x2e0   : > { %v9463_v33 = vpack.c.bf16 %v1614_v60, %v1614_v60 }
 0x2e1   : > { %v1616_v32 = vpop.f32.mrf.mxu1 }
 0x2e2   : > { %1697 = vst.msk [vmem:[#allocation2 + $0xa0] sm:$0xf] %vm1688_vm7, %v9463_v33  ;;  %v1617_v16 = vadd.f32 %v12690_v14, %v1616_v32  ;;  %3274 = vmatpush1.bf16.msra.mxu1 %v12201_v12  ;;  %v8736_v14 = vld [vmem:[%s15018_s5 + $0x2b8] sm:$0xff]  ;;  %v8780_v32 = vcombine.high %v8752_v52, %v8752_v52 }
 0x2e3   : > { %v1618_v28 = vpop.f32.mrf.mxu1  ;;  %3275 = vmatprep.subr.bf16.mxu1 %v15045_v61  ;;  %v8763_v55 = vcombine.low %v8736_v14, %v8738_v59  ;;  %v11245_v33 = vld [vmem:[%s15018_s5 + $0x318] ss:$16 sps:$4 sm:$0xff]   ;;  %v11250_v14 = vld [vmem:[%s15018_s5 + $0x34c] ss:$16 sps:$4 sm:$0xff]  }
 0x2e4   : > { %v9464_v63 = vpack.c.bf16 %v1617_v16, %v1617_v16 }
 0x2e5   : > { %v1621_v5 = vpop.f32.mrf.mxu1  ;;  %2869 = vmatmul.mubr.bf16.gmra.mxu1 %v8759_v38 }
 0x2e6   : > { %1698 = vst.msk [vmem:[#allocation2 + $0xb4] sm:$0xf] %vm1688_vm7, %v9464_v63  ;;  %v1622_v58 = vadd.f32 %v12708_v45, %v1621_v5  ;;  %3276 = vmatpush1.bf16.msra.mxu1 %v12220_v27  ;;  %8783 = vmatprep.mubr.msk.bf16.mxu1 %vm1433_vm5, %v11235_v23 }
 0x2e7   : > { %v1623_v29 = vpop.f32.mrf.mxu1  ;;  %3277 = vmatprep.subr.bf16.mxu1 %v15045_v61 }
 0x2e8   : > { %v9465_v35 = vpack.c.bf16 %v1622_v58, %v1622_v58  ;;  %v8779_v58 = vcombine.low %v8752_v52, %v8752_v52 }
 0x2e9   : > { %v1624_v19 = vpop.f32.mrf.mxu1 }
 0x2ea   : > { %1699 = vst.msk [vmem:[#allocation2 + $0xc8] sm:$0xf] %vm1688_vm7, %v9465_v35  ;;  %v1625_v45 = vadd.f32 %v12719_v18, %v1624_v19  ;;  %3278 = vmatpush1.bf16.msra.mxu1 %v12233_v36 }
 0x2eb   : > { %v1626_v20 = vpop.f32.mrf.mxu1  ;;  %3279 = vmatprep.subr.bf16.mxu1 %v15045_v61 }
 0x2ec   : > { %v9466_v43 = vpack.c.bf16 %v1625_v45, %v1625_v45  ;;  %v11251_v20 = vld [vmem:[%s15018_s5 + $0x36c] ss:$16 sps:$4 sm:$0xff]  }
 0x2ed   : > { %v1629_v51 = vpop.f32.mrf.mxu1  ;;  %2877 = vmatmul.mubr.bf16.gmra.mxu1 %v8763_v55 }
 0x2ee   : > { %1700 = vst.msk [vmem:[#allocation2 + $0xdc] sm:$0xf] %vm1688_vm7, %v9466_v43  ;;  %v1630_v2 = vadd.f32 %v12731_v9, %v1629_v51  ;;  %3280 = vmatpush1.bf16.msra.mxu1 %v12242_v50  ;;  %8784 = vmatprep.mubr.msk.bf16.mxu1 %vm1433_vm5, %v11237_v1  ;;  %v11240_v9 = vld [vmem:[%s15018_s5 + $0x2fc] ss:$16 sps:$4 sm:$0xff]   ;;  %v11248_v1 = vld [vmem:[%s15018_s5 + $0x348] ss:$16 sps:$4 sm:$0xff]  }
 0x2ef   : > { %v1631_v18 = vpop.f32.mrf.mxu1  ;;  %3281 = vmatprep.subr.bf16.mxu1 %v15045_v61 }
 0x2f0   : > { %v9467_v31 = vpack.c.bf16 %v1630_v2, %v1630_v2 }
 0x2f1   : > { %v1632_v8 = vpop.f32.mrf.mxu1 }
 0x2f2   : > { %1702 = vst.msk [vmem:[#allocation2 + $0xf0] sm:$0x1] %vm1701_vm8, %v9467_v31  ;;  %3282 = vmatpush1.bf16.msra.mxu1 %v12249_v0 }
 0x2f3   : > { %v1633_v7 = vpop.f32.mrf.mxu1  ;;  %3283 = vmatprep.subr.bf16.mxu1 %v15045_v61 }
 0x2f5   : > { %v12939_v24 = vpop.f32.mrf.mxu1  ;;  %2885 = vmatmul.mubr.bf16.gmra.mxu1 %v11239_v17  ;;  %v11253_v17 = vld [vmem:[%s15018_s5 + $0x368] ss:$16 sps:$4 sm:$0xff]  }
 0x2f6   : > { %3284 = vmatpush1.bf16.msra.mxu1 %v12074_v40  ;;  %8785 = vmatprep.mubr.msk.bf16.mxu1 %vm1433_vm5, %v11240_v9  ;;  %v11254_v9 = vld [vmem:[%s15018_s5 + $0x38c] ss:$16 sps:$4 sm:$0xff]  }
 0x2f7   : > { %v12943_v42 = vpop.f32.mrf.mxu1  ;;  %3285 = vmatprep.subr.bf16.mxu1 %v15045_v61 }
 0x2f9   : > { %v12946_v62 = vpop.f32.mrf.mxu1 }
 0x2fa   : > { %3286 = vmatpush1.bf16.msra.mxu1 %v12052_v25 }
 0x2fb   : > { %v12955_v13 = vpop.f32.mrf.mxu1  ;;  %3293 = vmatprep.subr.bf16.mxu1 %v15045_v61 }
 0x2fd   : > { %v12958_v60 = vpop.f32.mrf.mxu1  ;;  %2893 = vmatmul.mubr.bf16.gmra.mxu1 %v11242_v6  ;;  %v9830_v6 = vpop.f32.mrf.mxu0 }
 0x2fe   : > { %3294 = vmatpush2.bf16.msra.mxu1 %v12281_v34  ;;  %8786 = vmatprep.mubr.msk.bf16.mxu1 %vm1433_vm5, %v11243_v48 }
 0x2ff   : > { %v12962_v3 = vpop.f32.mrf.mxu1  ;;  %3295 = vmatprep.subr.bf16.mxu1 %v15045_v61 }
 0x301   : > { %v9717_v30 = vpop.f32.mrf.mxu1 }
 0x302   : > { %3296 = vmatpush2.bf16.msra.mxu1 %v12293_v47 }
 0x303   : > { %v9718_v38 = vpop.f32.mrf.mxu1  ;;  %3297 = vmatprep.subr.bf16.mxu1 %v15045_v61 }
 0x304   : > { %v12973_v16 = vadd.f32 %v9718_v38, %v9717_v30  ;;  %v9831_v30 = vpop.f32.mrf.mxu0 }
 0x305   : > { %v9720_v23 = vpop.f32.mrf.mxu1  ;;  %2901 = vmatmul.mubr.bf16.gmra.mxu1 %v11245_v33  ;;  %v13017_v33 = vadd.f32 %v9831_v30, %v9830_v6 }
 0x306   : > { %3298 = vmatpush2.bf16.msra.mxu1 %v12306_v56  ;;  %8787 = vmatprep.mubr.msk.bf16.mxu1 %vm1433_vm5, %v8780_v32 }
 0x307   : > { %v9721_v28 = vpop.f32.mrf.mxu1  ;;  %3299 = vmatprep.subr.bf16.mxu1 %v15045_v61 }
 0x308   : > { %v12978_v63 = vadd.f32 %v9721_v28, %v9720_v23  ;;  %v9833_v23 = vpop.f32.mrf.mxu0 }
 0x309   : > { %v9723_v5 = vpop.f32.mrf.mxu1 }
 0x30a   : > { %3300 = vmatpush2.bf16.msra.mxu1 %v12317_v4 }
 0x30b   : > { %v9724_v59 = vpop.f32.mrf.mxu1  ;;  %3301 = vmatprep.subr.bf16.mxu1 %v15045_v61 }
 0x30c   : > { %v12985_v29 = vadd.f32 %v9724_v59, %v9723_v5  ;;  %v11256_v5 = vld [vmem:[%s15018_s5 + $0x388] ss:$16 sps:$4 sm:$0xff]  }
 0x30d   : > { %v9726_v35 = vpop.f32.mrf.mxu1  ;;  %2909 = vmatmul.mubr.bf16.gmra.mxu1 %v8779_v58  ;;  %v11257_v58 = vld [vmem:[%s15018_s5 + $0x3ac] ss:$16 sps:$4 sm:$0xff]  }
 0x30e   : > { %3302 = vmatpush2.bf16.msra.mxu1 %v12326_v41  ;;  %8855 = vmatprep.mubr.msk.bf16.mxu1 %vm1433_vm5, %v11250_v14  ;;  %v9834_v14 = vpop.f32.mrf.mxu0 }
 0x30f   : > { %v9727_v19 = vpop.f32.mrf.mxu1  ;;  %3688 = vmatprep.subr.bf16.mxu1 %v15045_v61 }
 0x310   : > { %v12990_v55 = vadd.f32 %v9727_v19, %v9726_v35  ;;  %v13030_v35 = vadd.f32 %v9834_v14, %v9833_v23 }
 0x311   : > { %v9729_v45 = vpop.f32.mrf.mxu1 }
 0x313   : > { %v9730_v43 = vpop.f32.mrf.mxu1 }
 0x314   : > { %v12998_v51 = vadd.f32 %v9730_v43, %v9729_v45  ;;  %v9836_v45 = vpop.f32.mrf.mxu0 }
 0x315   : > { %v9732_v2 = vpop.f32.mrf.mxu1  ;;  %3304 = vmatmul.mubr.bf16.vlgmr.msra.gmra.mxu1 %v11248_v1 }
 0x316   : > { %3689 = vmatpush1.bf16.msra.mxu1 %v12184_v57  ;;  %8856 = vmatprep.mubr.msk.bf16.mxu1 %vm1433_vm5, %v11251_v20  ;;  %v9837_v20 = vpop.f32.mrf.mxu0 }
 0x317   : > { %v9733_v18 = vpop.f32.mrf.mxu1  ;;  %3690 = vmatprep.subr.bf16.mxu1 %v15045_v61 }
 0x318   : > { %v13003_v31 = vadd.f32 %v9733_v18, %v9732_v2  ;;  %v13037_v2 = vadd.f32 %v9837_v20, %v9836_v45  ;;  %v9713_v45 = vadd.f32 %v12955_v13, %v12946_v62  ;;  %v11263_v62 = vld [vmem:[%s15018_s5 + $0x3ec] ss:$16 sps:$4 sm:$0xff]  }
 0x319   : > { %v9735_v8 = vpop.f32.mrf.mxu1 }
 0x31a   : > { %3691 = vmatpush1.bf16.msra.mxu1 %v12201_v12 }
 0x31b   : > { %v9736_v7 = vpop.f32.mrf.mxu1  ;;  %3692 = vmatprep.subr.bf16.mxu1 %v15045_v61 }
 0x31c   : > { %v13013_v48 = vadd.f32 %v9736_v7, %v9735_v8  ;;  %v9839_v8 = vpop.f32.mrf.mxu0  ;;  %v11260_v7 = vld [vmem:[%s15018_s5 + $0x3cc] ss:$16 sps:$4 sm:$0xff]  }
 0x31d   : > { %v9738_v52 = vpop.f32.mrf.mxu1  ;;  %3312 = vmatmul.mubr.bf16.gmra.mxu1 %v11253_v17 }
 0x31e   : > { %3693 = vmatpush1.bf16.msra.mxu1 %v12220_v27  ;;  %8857 = vmatprep.mubr.msk.bf16.mxu1 %vm1433_vm5, %v11254_v9  ;;  %v11259_v9 = vld [vmem:[%s15018_s5 + $0x3a8] ss:$16 sps:$4 sm:$0xff]   ;;  %v9840_v6 = vpop.f32.mrf.mxu0 }
 0x31f   : > { %v9739_v32 = vpop.f32.mrf.mxu1  ;;  %3694 = vmatprep.subr.bf16.mxu1 %v15045_v61  ;;  %v13049_v30 = vadd.f32 %v9840_v6, %v9839_v8 }
 0x320   : > { %v13020_v38 = vadd.f32 %v9739_v32, %v9738_v52  ;;  %v9710_v32 = vadd.f32 %v12943_v42, %v12939_v24  ;;  %v9842_v23 = vpop.f32.mrf.mxu0  ;;  %v11262_v42 = vld [vmem:[%s15018_s5 + $0x3c8] ss:$16 sps:$4 sm:$0xff]  }
 0x321   : > { %v9741_v28 = vpop.f32.mrf.mxu1 }
 0x322   : > { %3695 = vmatpush1.bf16.msra.mxu1 %v12233_v36 }
 0x323   : > { %v9742_v59 = vpop.f32.mrf.mxu1  ;;  %3696 = vmatprep.subr.bf16.mxu1 %v15045_v61 }
 0x324   : > { %v13032_v19 = vadd.f32 %v9742_v59, %v9741_v28 }
 0x325   : > { %v9744_v1 = vpop.f32.mrf.mxu1  ;;  %3320 = vmatmul.mubr.bf16.gmra.mxu1 %v11256_v5 }
 0x326   : > { %3697 = vmatpush1.bf16.msra.mxu1 %v12242_v50  ;;  %8858 = vmatprep.mubr.msk.bf16.mxu1 %vm1433_vm5, %v11257_v58  ;;  %v9843_v58 = vpop.f32.mrf.mxu0 }
 0x327   : > { %v9745_v43 = vpop.f32.mrf.mxu1  ;;  %3698 = vmatprep.subr.bf16.mxu1 %v15045_v61  ;;  %v13056_v59 = vadd.f32 %v9843_v58, %v9842_v23 }
 0x328   : > { %v13039_v18 = vadd.f32 %v9745_v43, %v9744_v1  ;;  %v9845_v20 = vpop.f32.mrf.mxu0 }
 0x329   : > { %v9747_v17 = vpop.f32.mrf.mxu1 }
 0x32a   : > { %3699 = vmatpush1.bf16.msra.mxu1 %v12249_v0  ;;  %v9846_v8 = vpop.f32.mrf.mxu0 }
 0x32b   : > { %v9748_v52 = vpop.f32.mrf.mxu1  ;;  %3700 = vmatprep.subr.bf16.mxu1 %v15045_v61  ;;  %v13069_v13 = vadd.f32 %v9846_v8, %v9845_v20 }
 0x32c   : > { %v9848_v6 = vpop.f32.mrf.mxu0 }
 0x32d   : > { %v2000_v28 = vpop.f32.mrf.mxu1  ;;  %3328 = vmatmul.mubr.bf16.gmra.mxu1 %v11259_v9  ;;  %v9716_v9 = vadd.f32 %v12962_v3, %v12958_v60 }
 0x32e   : > { %v2001_v5 = vadd.f32 %v9710_v32, %v2000_v28  ;;  %3701 = vmatpush1.bf16.msra.mxu1 %v12074_v40  ;;  %8859 = vmatprep.mubr.msk.bf16.mxu1 %vm1433_vm5, %v11260_v7  ;;  %v9849_v23 = vpop.f32.mrf.mxu0 }
 0x32f   : > { %v2002_v14 = vpop.f32.mrf.mxu1  ;;  %3702 = vmatprep.subr.bf16.mxu1 %v15045_v61  ;;  %v13080_v60 = vadd.f32 %v9849_v23, %v9848_v6 }
 0x330   : > { %v9468_v1 = vpack.c.bf16 %v2001_v5, %v2001_v5  ;;  %v8826_v5 = vld [vmem:[%s15018_s5 + $0x408] sm:$0x11]  ;;  %v9851_v58 = vpop.f32.mrf.mxu0 }
 0x331   : > { %v2003_v24 = vpop.f32.mrf.mxu1 }
 0x332   : > { %v2004_v43 = vadd.f32 %v9713_v45, %v2003_v24  ;;  %3703 = vmatpush1.bf16.msra.mxu1 %v12052_v25  ;;  %2094 = vrot.lane.b32.xlu0 %v9468_v1, %s11631_s21  ;;  %v11265_v45 = vld [vmem:[%s15018_s5 + $0x3e8] ss:$16 sps:$4 sm:$0xff]   ;;  %v11302_v1 = vld [vmem:[%s15018_s5 + $0x5d4] ss:$16 sps:$4 sm:$0xff]   ;;  %v8854_v24 = vcombine.high %v8826_v5, %v8826_v5 }
 0x333   : > { %v2005_v17 = vpop.f32.mrf.mxu1  ;;  %3710 = vmatprep.subr.bf16.mxu1 %v15045_v61  ;;  %4500 = vmatprep.mubr.bf16.mxu0 %v11302_v1 }
 0x334   : > { %v9469_v7 = vpack.c.bf16 %v2004_v43, %v2004_v43  ;;  %v11300_v43 = vld [vmem:[%s15018_s5 + $0x5d0] ss:$16 sps:$4 sm:$0xff]  }
 0x335   : > { %v2008_v52 = vpop.f32.mrf.mxu1  ;;  %3336 = vmatmul.mubr.bf16.gmra.mxu1 %v11262_v42  ;;  %v9852_v42 = vpop.f32.mrf.mxu0  ;;  %4501 = vmatmul.mubr.bf16.gmra.mxu0 %v11300_v43 }
 0x336   : > { %v2009_v32 = vadd.f32 %v9716_v9, %v2008_v52  ;;  %3711 = vmatpush2.bf16.msra.mxu1 %v12281_v34  ;;  %2096 = vrot.lane.b32.xlu0 %v9469_v7, %s11631_s21  ;;  %v13097_v17 = vadd.f32 %v9852_v42, %v9851_v58  ;;  %v11270_v58 = vld [vmem:[%s15018_s5 + $0x41c] ss:$16 sps:$4 sm:$0xff]  }
 0x337   : > { %v2010_v28 = vpop.f32.mrf.mxu1  ;;  %3712 = vmatprep.subr.bf16.mxu1 %v15045_v61  ;;  %8860 = vmatprep.mubr.msk.bf16.mxu1 %vm1433_vm5, %v11263_v62  ;;  %v9854_v62 = vpop.f32.mrf.mxu0 }
 0x338   : > { %v9470_v3 = vpack.c.bf16 %v2009_v32, %v2009_v32  ;;  %v8853_v28 = vcombine.low %v8826_v5, %v8826_v5 }
 0x339   : > { %v2011_v14 = vpop.f32.mrf.mxu1  ;;  %v9855_v7 = vpop.f32.mrf.mxu0 }
 0x33a   : > { %v13089_v20 = vadd.f32 %v12973_v16, %v2011_v14  ;;  %3713 = vmatpush2.bf16.msra.mxu1 %v12293_v47  ;;  %2098 = vrot.lane.b32.xlu0 %v9470_v3, %s11631_s21  ;;  %v13105_v52 = vadd.f32 %v9855_v7, %v9854_v62  ;;  %v11308_v3 = vld [vmem:[%s15018_s5 + $0x5f4] ss:$16 sps:$4 sm:$0xff]  }
 0x33b   : > { %v2013_v8 = vpop.f32.mrf.mxu1  ;;  %3714 = vmatprep.subr.bf16.mxu1 %v15045_v61  ;;  %v9857_v32 = vpop.f32.mrf.mxu0  ;;  %4508 = vmatprep.mubr.bf16.mxu0 %v11308_v3  ;;  %v11312_v3 = vld [vmem:[%s15018_s5 + $0x610] ss:$16 sps:$4 sm:$0xff]  }
 0x33d   : > { %v2016_v16 = vpop.f32.mrf.mxu1  ;;  %3344 = vmatmul.mubr.bf16.gmra.mxu1 %v11265_v45  ;;  %v9858_v14 = vpop.f32.mrf.mxu0  ;;  %v11306_v45 = vld [vmem:[%s15018_s5 + $0x5f0] ss:$16 sps:$4 sm:$0xff]  }
 0x33e   : > { %v13100_v9 = vadd.f32 %v12978_v63, %v2016_v16  ;;  %3715 = vmatpush2.bf16.msra.mxu1 %v12306_v56  ;;  %8861 = vmatprep.mubr.msk.bf16.mxu1 %vm1433_vm5, %v8854_v24  ;;  %v13121_v5 = vadd.f32 %v9858_v14, %v9857_v32 }
 0x33f   : > { %v2018_v6 = vpop.f32.mrf.mxu1  ;;  %3716 = vmatprep.subr.bf16.mxu1 %v15045_v61  ;;  %v9860_v24 = vpop.f32.mrf.mxu0  ;;  %4509 = vmatmul.mubr.bf16.gmra.mxu0 %v11306_v45 }
 0x340   : > { %v11268_v6 = vld [vmem:[%s15018_s5 + $0x418] ss:$16 sps:$4 sm:$0xff]  }
 0x341   : > { %v2019_v23 = vpop.f32.mrf.mxu1  ;;  %v9861_v43 = vpop.f32.mrf.mxu0 }
 0x342   : > { %v13111_v63 = vadd.f32 %v12985_v29, %v2019_v23  ;;  %3717 = vmatpush2.bf16.msra.mxu1 %v12317_v4  ;;  %v13129_v62 = vadd.f32 %v9861_v43, %v9860_v24  ;;  %v11271_v23 = vld [vmem:[%s15018_s5 + $0x43c] ss:$16 sps:$4 sm:$0xff]  }
 0x343   : > { %v2021_v1 = vpop.f32.mrf.mxu1  ;;  %3718 = vmatprep.subr.bf16.mxu1 %v15045_v61  ;;  %v9863_v16 = vpop.f32.mrf.mxu0 }
 0x344   : > { %v11273_v16 = vld [vmem:[%s15018_s5 + $0x438] ss:$16 sps:$4 sm:$0xff]  }
 0x345   : > { %v2024_v29 = vpop.f32.mrf.mxu1  ;;  %3352 = vmatmul.mubr.bf16.gmra.mxu1 %v8853_v28  ;;  %v9864_v28 = vpop.f32.mrf.mxu0 }
 0x346   : > { %v13124_v42 = vadd.f32 %v12990_v55, %v2024_v29  ;;  %3719 = vmatpush2.bf16.msra.mxu1 %v12326_v41  ;;  %8929 = vmatprep.mubr.msk.bf16.mxu1 %vm1433_vm5, %v11270_v58  ;;  %v11314_v55 = vld [vmem:[%s15018_s5 + $0x614] ss:$16 sps:$4 sm:$0xff]  }
 0x347   : > { %v2026_v8 = vpop.f32.mrf.mxu1  ;;  %4131 = vmatprep.subr.bf16.mxu1 %v15045_v61  ;;  %4516 = vmatprep.mubr.bf16.mxu0 %v11314_v55  ;;  %v9882_v14 = vpop.f32.mrf.mxu0 }
 0x348   : > { %4517 = vmatmul.mubr.bf16.gmra.mxu0 %v11312_v3 }
 0x349   : > { %v2027_v7 = vpop.f32.mrf.mxu1 }
 0x34a   : > { %v13138_v32 = vadd.f32 %v12998_v51, %v2027_v7  ;;  %v9883_v51 = vpop.f32.mrf.mxu0 }
 0x34b   : > { %v2029_v58 = vpop.f32.mrf.mxu1  ;;  %v13152_v29 = vadd.f32 %v9883_v51, %v9882_v14 }
 0x34c   : > { %v9885_v43 = vpop.f32.mrf.mxu0 }
 0x34d   : > { %v2032_v45 = vpop.f32.mrf.mxu1  ;;  %3721 = vmatmul.mubr.bf16.vlgmr.msra.gmra.mxu1 %v11268_v6  ;;  %v11274_v6 = vld [vmem:[%s15018_s5 + $0x45c] ss:$16 sps:$4 sm:$0xff]  }
 0x34e   : > { %v13147_v1 = vadd.f32 %v13003_v31, %v2032_v45  ;;  %4132 = vmatpush1.bf16.msra.mxu1 %v12184_v57  ;;  %8930 = vmatprep.mubr.msk.bf16.mxu1 %vm1433_vm5, %v11271_v23  ;;  %v11320_v31 = vld [vmem:[%s15018_s5 + $0x634] ss:$16 sps:$4 sm:$0xff]   ;;  %v9886_v55 = vpop.f32.mrf.mxu0  ;;  %v11318_v23 = vld [vmem:[%s15018_s5 + $0x630] ss:$16 sps:$4 sm:$0xff]  }
 0x34f   : > { %v2034_v24 = vpop.f32.mrf.mxu1  ;;  %4133 = vmatprep.subr.bf16.mxu1 %v15045_v61  ;;  %v13171_v3 = vadd.f32 %v9886_v55, %v9885_v43  ;;  %4524 = vmatprep.mubr.bf16.mxu0 %v11320_v31  ;;  %v11276_v31 = vld [vmem:[%s15018_s5 + $0x458] ss:$16 sps:$4 sm:$0xff]  }
 0x350   : > { %v9888_v58 = vpop.f32.mrf.mxu0  ;;  %4525 = vmatmul.mubr.bf16.gmra.mxu0 %v11318_v23  ;;  %v11323_v23 = vld [vmem:[%s15018_s5 + $0x650] ss:$16 sps:$4 sm:$0xff]  }
 0x351   : > { %v2035_v8 = vpop.f32.mrf.mxu1 }
 0x352   : > { %v13161_v7 = vadd.f32 %v13013_v48, %v2035_v8  ;;  %4134 = vmatpush1.bf16.msra.mxu1 %v12201_v12  ;;  %v9889_v45 = vpop.f32.mrf.mxu0 }
 0x353   : > { %v2037_v28 = vpop.f32.mrf.mxu1  ;;  %4135 = vmatprep.subr.bf16.mxu1 %v15045_v61  ;;  %v13179_v24 = vadd.f32 %v9889_v45, %v9888_v58 }
 0x354   : > { %v9891_v43 = vpop.f32.mrf.mxu0 }
 0x355   : > { %v2040_v48 = vpop.f32.mrf.mxu1  ;;  %3729 = vmatmul.mubr.bf16.gmra.mxu1 %v11273_v16  ;;  %15069 = vst [vmem:[#allocation18_spill] sm:$0xff] %v13179_v24 }
 0x356   : > { %v13174_v14 = vadd.f32 %v13020_v38, %v2040_v48  ;;  %4136 = vmatpush1.bf16.msra.mxu1 %v12220_v27  ;;  %8931 = vmatprep.mubr.msk.bf16.mxu1 %vm1433_vm5, %v11274_v6  ;;  %v11325_v38 = vld [vmem:[%s15018_s5 + $0x654] ss:$16 sps:$4 sm:$0xff]   ;;  %v11277_v6 = vld [vmem:[%s15018_s5 + $0x47c] ss:$16 sps:$4 sm:$0xff]   ;;  %v9892_v55 = vpop.f32.mrf.mxu0 }
 0x357   : > { %v2042_v51 = vpop.f32.mrf.mxu1  ;;  %4137 = vmatprep.subr.bf16.mxu1 %v15045_v61  ;;  %v13198_v58 = vadd.f32 %v9892_v55, %v9891_v43  ;;  %4532 = vmatprep.mubr.bf16.mxu0 %v11325_v38  ;;  %v9047_v55 = vld [vmem:[%s15018_s5 + $0x670] sm:$0x11] }
 0x358   : > { %v9894_v48 = vpop.f32.mrf.mxu0  ;;  %4533 = vmatmul.mubr.bf16.gmra.mxu0 %v11323_v23  ;;  %v8888_v51 = vld [vmem:[%s15018_s5 + $0x478] sm:$0xff] }
 0x359   : > { %v2043_v8 = vpop.f32.mrf.mxu1  ;;  %15070 = vst [vmem:[#allocation19_spill] sm:$0xff] %v13198_v58 }
 0x35a   : > { %v13188_v16 = vadd.f32 %v13032_v19, %v2043_v8  ;;  %4138 = vmatpush1.bf16.msra.mxu1 %v12233_v36  ;;  %v8890_v8 = vld [vmem:[%s15018_s5 + $0x488] sm:$0xff]  ;;  %v9895_v43 = vpop.f32.mrf.mxu0 }
 0x35b   : > { %v2045_v28 = vpop.f32.mrf.mxu1  ;;  %4139 = vmatprep.subr.bf16.mxu1 %v15045_v61 }
 0x35c   : > { %v8915_v28 = vcombine.low %v8888_v51, %v8890_v8  ;;  %v8892_v8 = vld [vmem:[%s15018_s5 + $0x498] sm:$0xff] }
 0x35d   : > { %v2048_v19 = vpop.f32.mrf.mxu1  ;;  %3737 = vmatmul.mubr.bf16.gmra.mxu1 %v11276_v31  ;;  %v13212_v31 = vadd.f32 %v9895_v43, %v9894_v48 }
 0x35e   : > { %v13201_v45 = vadd.f32 %v13039_v18, %v2048_v19  ;;  %4140 = vmatpush1.bf16.msra.mxu1 %v12242_v50  ;;  %8932 = vmatprep.mubr.msk.bf16.mxu1 %vm1433_vm5, %v11277_v6  ;;  %v9897_v18 = vpop.f32.mrf.mxu0  ;;  %v9074_v19 = vcombine.high %v9047_v55, %v9047_v55  ;;  %v11279_v6 = vld [vmem:[%s15018_s5 + $0x49c] ss:$16 sps:$4 sm:$0xff]  }
 0x35f   : > { %v2050_v38 = vpop.f32.mrf.mxu1  ;;  %4141 = vmatprep.subr.bf16.mxu1 %v15045_v61  ;;  %15071 = vst [vmem:[#allocation20_spill] sm:$0xff] %v13212_v31 }
 0x360   : > { %v9898_v58 = vpop.f32.mrf.mxu0  ;;  %v9073_v38 = vcombine.low %v9047_v55, %v9047_v55  ;;  %4540 = vmatprep.mubr.bf16.mxu0 %v9074_v19  ;;  %v11334_v19 = vld [vmem:[%s15018_s5 + $0x684] ss:$16 sps:$4 sm:$0xff]  }
 0x361   : > { %v2051_v23 = vpop.f32.mrf.mxu1  ;;  %v13222_v48 = vadd.f32 %v9898_v58, %v9897_v18 }
 0x362   : > { %4142 = vmatpush1.bf16.msra.mxu1 %v12249_v0  ;;  %v9900_v43 = vpop.f32.mrf.mxu0  ;;  %4541 = vmatmul.mubr.bf16.gmra.mxu0 %v9073_v38 }
 0x363   : > { %v2052_v24 = vpop.f32.mrf.mxu1  ;;  %4143 = vmatprep.subr.bf16.mxu1 %v15045_v61  ;;  %4935 = vmatprep.mubr.bf16.mxu0 %v11334_v19 }
 0x364   : > { %v8894_v24 = vld [vmem:[%s15018_s5 + $0x4a8] sm:$0xff]  ;;  %v9901_v58 = vpop.f32.mrf.mxu0 }
 0x365   : > { %v2445_v31 = vpop.f32.mrf.mxu1  ;;  %3745 = vmatmul.mubr.bf16.gmra.mxu1 %v8915_v28  ;;  %v13234_v55 = vadd.f32 %v9901_v58, %v9900_v43  ;;  %v8919_v28 = vcombine.low %v8892_v8, %v8894_v24 }
 0x366   : > { %v2446_v51 = vadd.f32 %v12569_v10, %v2445_v31  ;;  %4144 = vmatpush1.bf16.msra.mxu1 %v12074_v40  ;;  %8933 = vmatprep.mubr.msk.bf16.mxu1 %vm1433_vm5, %v11279_v6  ;;  %v9903_v10 = vpop.f32.mrf.mxu0  ;;  %v11281_v6 = vld [vmem:[%s15018_s5 + $0x4bc] ss:$16 sps:$4 sm:$0xff]  }
 0x367   : > { %v2447_v18 = vpop.f32.mrf.mxu1  ;;  %4145 = vmatprep.subr.bf16.mxu1 %v15045_v61 }
 0x368   : > { %v9481_v23 = vpack.c.bf16 %v2446_v51, %v2446_v51  ;;  %v9904_v43 = vpop.f32.mrf.mxu0  ;;  %v11332_v51 = vld [vmem:[%s15018_s5 + $0x680] ss:$16 sps:$4 sm:$0xff]  }
 0x369   : > { %v2448_v31 = vpop.f32.mrf.mxu1  ;;  %v13249_v24 = vadd.f32 %v9904_v43, %v9903_v10  ;;  %v8898_v10 = vld [vmem:[%s15018_s5 + $0x4c8] sm:$0xff] }
 0x36a   : > { %2552 = vst.msk [vmem:[#allocation2 + $0x4] sm:$0xf] %vm1688_vm7, %v9481_v23  ;;  %v2449_v38 = vadd.f32 %v12587_v26, %v2448_v31  ;;  %4146 = vmatpush1.bf16.msra.mxu1 %v12052_v25  ;;  %v9906_v18 = vpop.f32.mrf.mxu0  ;;  %4936 = vmatmul.mubr.bf16.vlgmr.msra.gmra.mxu0 %v11332_v51  ;;  %v8896_v31 = vld [vmem:[%s15018_s5 + $0x4b8] sm:$0xff] }
 0x36b   : > { %v2450_v8 = vpop.f32.mrf.mxu1  ;;  %4153 = vmatprep.subr.bf16.mxu1 %v15045_v61 }
 0x36c   : > { %v9482_v58 = vpack.c.bf16 %v2449_v38, %v2449_v38  ;;  %v9907_v19 = vpop.f32.mrf.mxu0 }
 0x36d   : > { %v2453_v26 = vpop.f32.mrf.mxu1  ;;  %3753 = vmatmul.mubr.bf16.gmra.mxu1 %v8919_v28  ;;  %v13265_v28 = vadd.f32 %v9907_v19, %v9906_v18  ;;  %v11336_v18 = vld [vmem:[%s15018_s5 + $0x6a0] ss:$16 sps:$4 sm:$0xff]   ;;  %v15073_v19 = vmov 0  }
 0x36e   : > { %2553 = vst.msk [vmem:[#allocation2 + $0x18] sm:$0xf] %vm1688_vm7, %v9482_v58  ;;  %v2454_v23 = vadd.f32 %v12597_v49, %v2453_v26  ;;  %4154 = vmatpush2.bf16.msra.mxu1 %v12281_v34  ;;  %8934 = vmatprep.mubr.msk.bf16.mxu1 %vm1433_vm5, %v11281_v6  ;;  %v8900_v49 = vld [vmem:[%s15018_s5 + $0x4d8] sm:$0x11]  ;;  %v9909_v51 = vpop.f32.mrf.mxu0  ;;  %v8923_v58 = vcombine.low %v8896_v31, %v8898_v10  ;;  %v11338_v26 = vld [vmem:[%s15018_s5 + $0x6a4] ss:$16 sps:$4 sm:$0xff]  }
 0x36f   : > { %v2455_v38 = vpop.f32.mrf.mxu1  ;;  %4155 = vmatprep.subr.bf16.mxu1 %v15045_v61  ;;  %15072 = vst [vmem:[#allocation21_spill] sm:$0xff] %v13265_v28  ;;  %4943 = vmatprep.mubr.bf16.mxu0 %v11338_v26 }
 0x370   : > { %v9483_v43 = vpack.c.bf16 %v2454_v23, %v2454_v23  ;;  %v8928_v38 = vcombine.high %v8900_v49, %v8900_v49  ;;  %v9910_v61 = vpop.f32.mrf.mxu0 }
 0x371   : > { %v2456_v8 = vpop.f32.mrf.mxu1  ;;  %v13277_v31 = vadd.f32 %v9910_v61, %v9909_v51 }
 0x372   : > { %2554 = vst.msk [vmem:[#allocation2 + $0x2c] sm:$0xf] %vm1688_vm7, %v9483_v43  ;;  %v2457_v6 = vadd.f32 %v12612_v39, %v2456_v8  ;;  %4156 = vmatpush2.bf16.msra.mxu1 %v12293_v47  ;;  %v9912_v28 = vpop.f32.mrf.mxu0  ;;  %4944 = vmatmul.mubr.bf16.gmra.mxu0 %v11336_v18  ;;  %v8927_v18 = vcombine.low %v8900_v49, %v8900_v49 }
 0x373   : > { %v2458_v23 = vpop.f32.mrf.mxu1  ;;  %4157 = vmatprep.subr.bf16.mxu1 %v15073_v19 }
 0x374   : > { %v9484_v10 = vpack.c.bf16 %v2457_v6, %v2457_v6  ;;  %v9913_v8 = vpop.f32.mrf.mxu0 }
 0x375   : > { %v2461_v43 = vpop.f32.mrf.mxu1  ;;  %3761 = vmatmul.mubr.bf16.gmra.mxu1 %v8923_v58  ;;  %v13284_v61 = vadd.f32 %v9913_v8, %v9912_v28  ;;  %v11341_v58 = vld [vmem:[%s15018_s5 + $0x6c4] ss:$16 sps:$4 sm:$0xff]  }
 0x376   : > { %2555 = vst.msk [vmem:[#allocation2 + $0x40] sm:$0xf] %vm1688_vm7, %v9484_v10  ;;  %v2462_v39 = vadd.f32 %v12619_v11, %v2461_v43  ;;  %4158 = vmatpush2.bf16.msra.mxu1 %v12306_v56  ;;  %8935 = vmatprep.mubr.msk.bf16.mxu1 %vm1433_vm5, %v8928_v38  ;;  %v9915_v26 = vpop.f32.mrf.mxu0  ;;  %v11286_v38 = vld [vmem:[%s15018_s5 + $0x4ec] ss:$16 sps:$4 sm:$0xff]   ;;  %v11339_v10 = vld [vmem:[%s15018_s5 + $0x6c0] ss:$16 sps:$4 sm:$0xff]  }
 0x377   : > { %v2463_v23 = vpop.f32.mrf.mxu1  ;;  %4159 = vmatprep.subr.bf16.mxu1 %v15073_v19  ;;  %4951 = vmatprep.mubr.bf16.mxu0 %v11341_v58 }
 0x378   : > { %v9485_v51 = vpack.c.bf16 %v2462_v39, %v2462_v39  ;;  %v9916_v28 = vpop.f32.mrf.mxu0 }
 0x379   : > { %v2464_v6 = vpop.f32.mrf.mxu1  ;;  %v13299_v43 = vadd.f32 %v9916_v28, %v9915_v26 }
 0x37a   : > { %2556 = vst.msk [vmem:[#allocation2 + $0x54] sm:$0xf] %vm1688_vm7, %v9485_v51  ;;  %v2465_v11 = vadd.f32 %v12634_v22, %v2464_v6  ;;  %4160 = vmatpush2.bf16.msra.mxu1 %v12317_v4  ;;  %v9918_v8 = vpop.f32.mrf.mxu0  ;;  %4952 = vmatmul.mubr.bf16.gmra.mxu0 %v11339_v10  ;;  %v11287_v10 = vld [vmem:[%s15018_s5 + $0x50c] ss:$16 sps:$4 sm:$0xff]  }
 0x37b   : > { %v2466_v49 = vpop.f32.mrf.mxu1  ;;  %4161 = vmatprep.subr.bf16.mxu1 %v15073_v19 }
 0x37c   : > { %v9486_v39 = vpack.c.bf16 %v2465_v11, %v2465_v11  ;;  %v9919_v51 = vpop.f32.mrf.mxu0 }
 0x37d   : > { %v2469_v22 = vpop.f32.mrf.mxu1  ;;  %3769 = vmatmul.mubr.bf16.gmra.mxu1 %v8927_v18  ;;  %v13306_v26 = vadd.f32 %v9919_v51, %v9918_v8  ;;  %v11284_v18 = vld [vmem:[%s15018_s5 + $0x4e8] ss:$16 sps:$4 sm:$0xff]  }
 0x37e   : > { %2557 = vst.msk [vmem:[#allocation2 + $0x68] sm:$0xf] %vm1688_vm7, %v9486_v39  ;;  %v2470_v23 = vadd.f32 %v12641_v44, %v2469_v22  ;;  %4162 = vmatpush2.bf16.msra.mxu1 %v12326_v41  ;;  %9003 = vmatprep.mubr.msk.bf16.mxu1 %vm1433_vm5, %v11286_v38  ;;  %v9921_v11 = vpop.f32.mrf.mxu0  ;;  %v11344_v44 = vld [vmem:[%s15018_s5 + $0x6e4] ss:$16 sps:$4 sm:$0xff]   ;;  %v11342_v39 = vld [vmem:[%s15018_s5 + $0x6e0] ss:$16 sps:$4 sm:$0xff]  }
 0x37f   : > { %v2471_v6 = vpop.f32.mrf.mxu1  ;;  %4548 = vmatprep.subr.bf16.mxu1 %v15073_v19  ;;  %v11345_v8 = vld [vmem:[%s15019_s6 + $0x78] sm:$0xff]   ;;  %4959 = vmatprep.mubr.bf16.mxu0 %v11344_v44  ;;  %v8954_v11 = vld [vmem:[%s15018_s5 + $0x508] sm:$0xff] }
 0x380   : > { %v9487_v58 = vpack.c.bf16 %v2470_v23, %v2470_v23  ;;  %v9922_v49 = vpop.f32.mrf.mxu0  ;;  %v11346_v23 = vld [vmem:[%s15019_s6 + $0x38] sm:$0xff]   ;;  %10156 = vmatprep.subr.bf16.mxu0 %v11345_v8 }
 0x381   : > { %v2472_v28 = vpop.f32.mrf.mxu1  ;;  %10157 = vmatpush3.bf16.msra.mxu0 %v11346_v23  ;;  %v15074_v23 = vld [vmem:[#allocation15_spill] sm:$0xff] }
 0x382   : > { %2558 = vst.msk [vmem:[#allocation2 + $0x7c] sm:$0xf] %vm1688_vm7, %v9487_v58  ;;  %v2473_v38 = vadd.f32 %v12659_v15, %v2472_v28  ;;  %v9940_v51 = vpop.f32.mrf.mxu0  ;;  %4960 = vmatmul.mubr.bf16.gmra.mxu0 %v11342_v39  ;;  %v8956_v28 = vld [vmem:[%s15018_s5 + $0x518] sm:$0xff] }
 0x383   : > { %v2474_v22 = vpop.f32.mrf.mxu1 }
 0x384   : > { %v9488_v15 = vpack.c.bf16 %v2473_v38, %v2473_v38  ;;  %v9941_v44 = vpop.f32.mrf.mxu0  ;;  %v8981_v22 = vcombine.low %v8954_v11, %v8956_v28  ;;  %v11349_v11 = vld [vmem:[%s15018_s5 + $0x700] ss:$16 sps:$4 sm:$0xff]   ;;  %v11352_v28 = vld [vmem:[%s15019_s6 + $0x68] sm:$0xff]  }
 0x385   : > { %v2477_v6 = vpop.f32.mrf.mxu1  ;;  %4164 = vmatmul.mubr.bf16.vlgmr.msra.gmra.mxu1 %v11284_v18  ;;  %v11347_v18 = vld [vmem:[%s15019_s6 + $0x70] sm:$0xff]  }
 0x386   : > { %2559 = vst.msk [vmem:[#allocation2 + $0x90] sm:$0xf] %vm1688_vm7, %v9488_v15  ;;  %v2478_v58 = vadd.f32 %v12666_v54, %v2477_v6  ;;  %4549 = vmatpush1.bf16.msra.mxu1 %v12184_v57  ;;  %9004 = vmatprep.mubr.msk.bf16.mxu1 %vm1433_vm5, %v11287_v10  ;;  %v11348_v54 = vld [vmem:[%s15019_s6 + $0x30] sm:$0xff]   ;;  %v13345_v39 = vpop.f32.mrf.mxu0  ;;  %v11289_v6 = vld [vmem:[%s15018_s5 + $0x52c] ss:$16 sps:$4 sm:$0xff]  }
 0x387   : > { %v2479_v38 = vpop.f32.mrf.mxu1  ;;  %4550 = vmatprep.subr.bf16.mxu1 %v15073_v19  ;;  %10158 = vmatprep.subr.bf16.mxu0 %v11347_v18  ;;  %v11351_v10 = vld [vmem:[%s15018_s5 + $0x704] ss:$16 sps:$4 sm:$0xff]  }
 0x388   : > { %v9489_v49 = vpack.c.bf16 %v2478_v58, %v2478_v58  ;;  %10159 = vmatpush3.bf16.msra.mxu0 %v11348_v54  ;;  %v13356_v58 = vadd.f32 %v9941_v44, %v9940_v51  ;;  %v13358_v18 = vpop.f32.mrf.mxu0  ;;  %4967 = vmatprep.mubr.bf16.mxu0 %v11351_v10  ;;  %v11353_v54 = vld [vmem:[%s15019_s6 + $0x28] sm:$0xff]  }
 0x389   : > { %v2480_v8 = vpop.f32.mrf.mxu1  ;;  %15075 = vst [vmem:[#allocation15_spill] sm:$0xff] %v13358_v18  ;;  %10160 = vmatprep.subr.bf16.mxu0 %v11352_v28  ;;  %v8958_v10 = vld [vmem:[%s15018_s5 + $0x528] sm:$0xff]  ;;  %v11358_v18 = vld [vmem:[%s15018_s5 + $0x724] ss:$16 sps:$4 sm:$0xff]  }
 0x38a   : > { %2560 = vst.msk [vmem:[#allocation2 + $0xa4] sm:$0xf] %vm1688_vm7, %v9489_v49  ;;  %v2481_v15 = vadd.f32 %v15074_v23, %v2480_v8  ;;  %4551 = vmatpush1.bf16.msra.mxu1 %v12201_v12  ;;  %v9946_v44 = vpop.f32.mrf.mxu0  ;;  %4968 = vmatmul.mubr.bf16.gmra.mxu0 %v11349_v11  ;;  %v15076_v8 = vld [vmem:[#allocation16_spill] sm:$0xff] }
 0x38b   : > { %v2482_v38 = vpop.f32.mrf.mxu1  ;;  %4552 = vmatprep.subr.bf16.mxu1 %v15073_v19  ;;  %4975 = vmatprep.mubr.bf16.mxu0 %v11358_v18 }
 0x38c   : > { %v9490_v51 = vpack.c.bf16 %v2481_v15, %v2481_v15  ;;  %10161 = vmatpush3.bf16.msra.mxu0 %v11353_v54  ;;  %v8960_v15 = vld [vmem:[%s15018_s5 + $0x538] sm:$0xff]  ;;  %v9947_v11 = vpop.f32.mrf.mxu0  ;;  %v11355_v54 = vld [vmem:[%s15019_s6 + $0x20] sm:$0xff]  }
 0x38d   : > { %v2485_v49 = vpop.f32.mrf.mxu1  ;;  %4172 = vmatmul.mubr.bf16.gmra.mxu1 %v8981_v22  ;;  %v11354_v22 = vld [vmem:[%s15019_s6 + $0x60] sm:$0xff]   ;;  %v13384_v38 = vadd.f32 %v9947_v11, %v9946_v44 }
 0x38e   : > { %2561 = vst.msk [vmem:[#allocation2 + $0xb8] sm:$0xf] %vm1688_vm7, %v9490_v51  ;;  %v2486_v23 = vadd.f32 %v15076_v8, %v2485_v49  ;;  %4553 = vmatpush1.bf16.msra.mxu1 %v12220_v27  ;;  %9005 = vmatprep.mubr.msk.bf16.mxu1 %vm1433_vm5, %v11289_v6  ;;  %v13389_v49 = vpop.f32.mrf.mxu0  ;;  %v8985_v6 = vcombine.low %v8958_v10, %v8960_v15  ;;  %v11356_v10 = vld [vmem:[%s15018_s5 + $0x720] ss:$16 sps:$4 sm:$0xff]   ;;  %v11359_v15 = vld [vmem:[%s15019_s6 + $0x58] sm:$0xff]  }
 0x38f   : > { %v2487_v28 = vpop.f32.mrf.mxu1  ;;  %4554 = vmatprep.subr.bf16.mxu1 %v15073_v19  ;;  %15077 = vst [vmem:[#allocation16_spill] sm:$0xff] %v13389_v49  ;;  %10162 = vmatprep.subr.bf16.mxu0 %v11354_v22 }
 0x390   : > { %v9491_v51 = vpack.c.bf16 %v2486_v23, %v2486_v23  ;;  %10163 = vmatpush3.bf16.msra.mxu0 %v11355_v54  ;;  %v15078_v28 = vld [vmem:[#allocation17_spill] sm:$0xff]  ;;  %v13400_v11 = vpop.f32.mrf.mxu0 }
 0x391   : > { %v2488_v8 = vpop.f32.mrf.mxu1  ;;  %v11291_v23 = vld [vmem:[%s15018_s5 + $0x54c] ss:$16 sps:$4 sm:$0xff]   ;;  %15079 = vst [vmem:[#allocation17_spill] sm:$0xff] %v13400_v11  ;;  %10164 = vmatprep.subr.bf16.mxu0 %v11359_v15 }
 0x392   : > { %2562 = vst.msk [vmem:[#allocation2 + $0xcc] sm:$0xf] %vm1688_vm7, %v9491_v51  ;;  %v2489_v44 = vadd.f32 %v15078_v28, %v2488_v8  ;;  %4555 = vmatpush1.bf16.msra.mxu1 %v12233_v36  ;;  %v11360_v54 = vld [vmem:[%s15019_s6 + $0x18] sm:$0xff]   ;;  %v9952_v8 = vpop.f32.mrf.mxu0  ;;  %4976 = vmatmul.mubr.bf16.gmra.mxu0 %v11356_v10 }
 0x393   : > { %v2490_v22 = vpop.f32.mrf.mxu1  ;;  %4556 = vmatprep.subr.bf16.mxu1 %v15073_v19 }
 0x394   : > { %v9492_v51 = vpack.c.bf16 %v2489_v44, %v2489_v44  ;;  %10165 = vmatpush3.bf16.msra.mxu0 %v11360_v54  ;;  %v9953_v18 = vpop.f32.mrf.mxu0  ;;  %v11361_v22 = vld [vmem:[%s15019_s6 + $0x50] sm:$0xff]  }
 0x395   : > { %v2493_v28 = vpop.f32.mrf.mxu1  ;;  %4180 = vmatmul.mubr.bf16.gmra.mxu1 %v8985_v6  ;;  %v13420_v10 = vadd.f32 %v9953_v18, %v9952_v8  ;;  %v11362_v6 = vld [vmem:[%s15019_s6 + $0x10] sm:$0xff]   ;;  %10166 = vmatprep.subr.bf16.mxu0 %v11361_v22  ;;  %v11365_v22 = vld [vmem:[%s15019_s6 + $0x48] sm:$0xff]  }
 0x396   : > { %2563 = vst.msk [vmem:[#allocation2 + $0xe0] sm:$0xf] %vm1688_vm7, %v9492_v51  ;;  %v2494_v11 = vadd.f32 %v12724_v53, %v2493_v28  ;;  %4557 = vmatpush1.bf16.msra.mxu1 %v12242_v50  ;;  %9006 = vmatprep.mubr.msk.bf16.mxu1 %vm1433_vm5, %v11291_v23  ;;  %v13425_v53 = vpop.f32.mrf.mxu0  ;;  %v9121_v23 = vld [vmem:[%s15018_s5 + $0x740] sm:$0x11]  ;;  %v11293_v51 = vld [vmem:[%s15018_s5 + $0x548] ss:$16 sps:$4 sm:$0xff]  }
 0x397   : > { %v2495_v44 = vpop.f32.mrf.mxu1  ;;  %4558 = vmatprep.subr.bf16.mxu1 %v15073_v19  ;;  %15080 = vst [vmem:[#allocation22_spill] sm:$0xff] %v13420_v10  ;;  %15081 = vst [vmem:[#allocation23_spill] sm:$0xff] %v13425_v53  ;;  %v9148_v8 = vcombine.high %v9121_v23, %v9121_v23  ;;  %v9147_v18 = vcombine.low %v9121_v23, %v9121_v23 }
 0x398   : > { %v9493_v15 = vpack.c.bf16 %v2494_v11, %v2494_v11  ;;  %10167 = vmatpush3.bf16.msra.mxu0 %v11362_v6  ;;  %v11294_v11 = vld [vmem:[%s15018_s5 + $0x56c] ss:$16 sps:$4 sm:$0xff]   ;;  %v13438_v28 = vpop.f32.mrf.mxu0 }
 0x399   : > { %v2496_v54 = vpop.f32.mrf.mxu1  ;;  %15082 = vst [vmem:[#allocation24_spill] sm:$0xff] %v13438_v28  ;;  %4983 = vmatprep.mubr.bf16.mxu0 %v9148_v8  ;;  %v11366_v6 = vld [vmem:[%s15019_s6 + $0x8] sm:$0xff]   ;;  %10168 = vmatprep.subr.bf16.mxu0 %v11365_v22  ;;  %v8968_v8 = vld [vmem:[%s15018_s5 + $0x578] sm:$0xff]  ;;  %v11368_v22 = vld [vmem:[%s15019_s6] sm:$0xff]  }
 0x39a   : > { %2564 = vst.msk [vmem:[#allocation2 + $0xf4] sm:$0x1] %vm1701_vm8, %v9493_v15  ;;  %4559 = vmatpush1.bf16.msra.mxu1 %v12249_v0  ;;  %v9958_v15 = vpop.f32.mrf.mxu0  ;;  %4984 = vmatmul.mubr.bf16.gmra.mxu0 %v9147_v18 }
 0x39b   : > { %v2497_v44 = vpop.f32.mrf.mxu1  ;;  %4560 = vmatprep.subr.bf16.mxu1 %v15073_v19 }
 0x39c   : > { %10169 = vmatpush3.bf16.msra.mxu0 %v11366_v6  ;;  %v8966_v44 = vld [vmem:[%s15018_s5 + $0x568] sm:$0xff]  ;;  %v9959_v28 = vpop.f32.mrf.mxu0  ;;  %v9829_v6 = vadd.f32 %v12809_v37, %v12802_v21  ;;  %v15083_v37 = vmov 0.0  }
 0x39d   : > { %v2862_v54 = vpop.f32.mrf.mxu1  ;;  %4188 = vmatmul.mubr.bf16.gmra.mxu1 %v11293_v51  ;;  %v11367_v51 = vld [vmem:[%s15019_s6 + $0x40] sm:$0xff]   ;;  %v8993_v10 = vcombine.low %v8966_v44, %v8968_v8  ;;  %v11296_v21 = vld [vmem:[%s15018_s5 + $0x58c] ss:$16 sps:$4 sm:$0xff]  }
 0x39e   : > { %v2863_v23 = vadd.f32 %v12746_v46, %v2862_v54  ;;  %4561 = vmatpush1.bf16.msra.mxu1 %v12074_v40  ;;  %9007 = vmatprep.mubr.msk.bf16.mxu1 %vm1433_vm5, %v11294_v11  ;;  %v13460_v46 = vadd.f32 %v9959_v28, %v9958_v15  ;;  %v13467_v53 = vpop.f32.mrf.mxu0 }
 0x39f   : > { %v2864_v18 = vpop.f32.mrf.mxu1  ;;  %4562 = vmatprep.subr.bf16.mxu1 %v15073_v19  ;;  %10170 = vmatprep.subr.bf16.mxu0 %v11367_v51 }
 0x3a0   : > { %v9494_v54 = vpack.c.bf16 %v2863_v23, %v2863_v23  ;;  %10171 = vmatpush3.bf16.msra.mxu0 %v11368_v22  ;;  %v13471_v28 = vpop.f32.mrf.mxu0  ;;  %v8970_v22 = vld [vmem:[%s15018_s5 + $0x588] sm:$0xff] }
 0x3a1   : > { %v2865_v11 = vpop.f32.mrf.mxu1  ;;  %10631 = vmatprep.subr.bf16.mxu0 %v15083_v37 }
 0x3a2   : > { %v2866_v49 = vadd.f32 %v9829_v6, %v2865_v11  ;;  %4563 = vmatpush1.bf16.msra.mxu1 %v12052_v25  ;;  %2956 = vrot.lane.b32.xlu1 %v9494_v54, %s11631_s21  ;;  %v9964_v8 = vpop.f32.mrf.mxu0 }
 0x3a3   : > { %v2867_v15 = vpop.f32.mrf.mxu1  ;;  %4570 = vmatprep.subr.bf16.mxu1 %v15073_v19 }
 0x3a4   : > { %v9495_v23 = vpack.c.bf16 %v2866_v49, %v2866_v49  ;;  %v2095_v44 = vpop.permute.xlu0 %2094  ;;  %v8972_v49 = vld [vmem:[%s15018_s5 + $0x598] sm:$0xff]  ;;  %v9965_v6 = vpop.f32.mrf.mxu0 }
 0x3a5   : > { %2134 = vst.msk [vmem:[#allocation2] sm:$0xf] %vm2133_vm9, %v2095_v44  ;;  %v2870_v51 = vpop.f32.mrf.mxu1  ;;  %4196 = vmatmul.mubr.bf16.gmra.mxu1 %v8993_v10  ;;  %v13490_v10 = vadd.f32 %v9965_v6, %v9964_v8 }
 0x3a6   : > { %v2871_v18 = vadd.f32 %v13017_v33, %v2870_v51  ;;  %4571 = vmatpush2.bf16.msra.mxu1 %v12281_v34  ;;  %2958 = vrot.lane.b32.xlu1 %v9495_v23, %s11631_s21  ;;  %v13492_v15 = vpop.f32.mrf.mxu0  ;;  %v9471_v23 = vpack.c.bf16 %v13089_v20, %v13089_v20  ;;  %v8997_v51 = vcombine.low %v8970_v22, %v8972_v49 }
 0x3a7   : > { %v2872_v54 = vpop.f32.mrf.mxu1  ;;  %4572 = vmatprep.subr.bf16.mxu1 %v15073_v19  ;;  %9008 = vmatprep.mubr.msk.bf16.mxu1 %vm1433_vm5, %v11296_v21  ;;  %v9472_v20 = vpack.c.bf16 %v13100_v9, %v13100_v9 }
 0x3a8   : > { %v9496_v33 = vpack.c.bf16 %v2871_v18, %v2871_v18  ;;  %v2097_v11 = vpop.permute.xlu0 %2096  ;;  %v8974_v54 = vld [vmem:[%s15018_s5 + $0x5a8] sm:$0x11]  ;;  %v13503_v21 = vpop.f32.mrf.mxu0 }
 0x3a9   : > { %2135 = vst.msk [vmem:[#allocation2 + $0x14] sm:$0xf] %vm2133_vm9, %v2097_v11  ;;  %v2873_v44 = vpop.f32.mrf.mxu1  ;;  %v9002_v49 = vcombine.high %v8974_v54, %v8974_v54 }
 0x3aa   : > { %v2874_v37 = vadd.f32 %v13030_v35, %v2873_v44  ;;  %4573 = vmatpush2.bf16.msra.mxu1 %v12293_v47  ;;  %2960 = vrot.lane.b32.xlu0 %v9496_v33, %s11631_s21  ;;  %v9970_v6 = vpop.f32.mrf.mxu0 }
 0x3ab   : > { %2100 = vrot.lane.b32.xlu1 %v9471_v23, %s11631_s21  ;;  %v2875_v8 = vpop.f32.mrf.mxu1  ;;  %4574 = vmatprep.subr.bf16.mxu1 %v15073_v19 }
 0x3ac   : > { %v9497_v18 = vpack.c.bf16 %v2874_v37, %v2874_v37  ;;  %v2099_v22 = vpop.permute.xlu0 %2098  ;;  %v9971_v11 = vpop.f32.mrf.mxu0  ;;  %v9001_v8 = vcombine.low %v8974_v54, %v8974_v54 }
 0x3ad   : > { %2136 = vst.msk [vmem:[#allocation2 + $0x28] sm:$0xf] %vm2133_vm9, %v2099_v22  ;;  %v2878_v35 = vpop.f32.mrf.mxu1  ;;  %4204 = vmatmul.mubr.bf16.gmra.mxu1 %v8997_v51  ;;  %v13515_v9 = vadd.f32 %v9971_v11, %v9970_v6 }
 0x3ae   : > { %v2879_v33 = vadd.f32 %v13037_v2, %v2878_v35  ;;  %4575 = vmatpush2.bf16.msra.mxu1 %v12306_v56  ;;  %2102 = vrot.lane.b32.xlu0 %v9472_v20, %s11631_s21  ;;  %v13518_v44 = vpop.f32.mrf.mxu0  ;;  %v9473_v2 = vpack.c.bf16 %v13111_v63, %v13111_v63  ;;  %v9474_v63 = vpack.c.bf16 %v13124_v42, %v13124_v42 }
 0x3af   : > { %2962 = vrot.lane.b32.xlu1 %v9497_v18, %s11631_s21  ;;  %v2880_v23 = vpop.f32.mrf.mxu1  ;;  %4576 = vmatprep.subr.bf16.mxu1 %v15073_v19 }
 0x3b0   : > { %v9498_v37 = vpack.c.bf16 %v2879_v33, %v2879_v33  ;;  %9009 = vmatprep.mubr.msk.bf16.mxu1 %vm1433_vm5, %v9002_v49  ;;  %v13525_v18 = vpop.f32.mrf.mxu0  ;;  %v11305_v49 = vld [vmem:[%s15018_s5 + $0x5bc] ss:$16 sps:$4 sm:$0xff]  }
 0x3b1   : > { %v2881_v51 = vpop.f32.mrf.mxu1 }
 0x3b2   : > { %v2882_v20 = vadd.f32 %v13049_v30, %v2881_v51  ;;  %4577 = vmatpush2.bf16.msra.mxu1 %v12317_v4  ;;  %2964 = vrot.lane.b32.xlu0 %v9498_v37, %s11631_s21  ;;  %v9976_v30 = vpop.f32.mrf.mxu0  ;;  %v11303_v51 = vld [vmem:[%s15018_s5 + $0x5b8] ss:$16 sps:$4 sm:$0xff]  }
 0x3b3   : > { %2104 = vrot.lane.b32.xlu1 %v9473_v2, %s11631_s21  ;;  %v2883_v22 = vpop.f32.mrf.mxu1  ;;  %4578 = vmatprep.subr.bf16.mxu1 %v15073_v19  ;;  %v9475_v2 = vpack.c.bf16 %v13138_v32, %v13138_v32  ;;  %v11309_v32 = vld [vmem:[%s15018_s5 + $0x5dc] ss:$16 sps:$4 sm:$0xff]  }
 0x3b4   : > { %v9499_v54 = vpack.c.bf16 %v2882_v20, %v2882_v20  ;;  %v9977_v33 = vpop.f32.mrf.mxu0 }
 0x3b5   : > { %v2886_v6 = vpop.f32.mrf.mxu1  ;;  %4212 = vmatmul.mubr.bf16.gmra.mxu1 %v9001_v8  ;;  %v13539_v23 = vadd.f32 %v9977_v33, %v9976_v30 }
 0x3b6   : > { %v2887_v35 = vadd.f32 %v13056_v59, %v2886_v6  ;;  %4579 = vmatpush2.bf16.msra.mxu1 %v12326_v41  ;;  %2106 = vrot.lane.b32.xlu0 %v9474_v63, %s11631_s21  ;;  %v9979_v42 = vpop.f32.mrf.mxu0 }
 0x3b7   : > { %2966 = vrot.lane.b32.xlu1 %v9499_v54, %s11631_s21  ;;  %v2888_v11 = vpop.f32.mrf.mxu1  ;;  %9077 = vmatprep.mubr.msk.bf16.mxu1 %vm1433_vm5, %v11305_v49  ;;  %v9476_v49 = vpack.c.bf16 %v13147_v1, %v13147_v1 }
 0x3b8   : > { %v9500_v37 = vpack.c.bf16 %v2887_v35, %v2887_v35  ;;  %4991 = vmatprep.subr.bf16.mxu1 %v15073_v19  ;;  %v9980_v20 = vpop.f32.mrf.mxu0 }
 0x3b9   : > { %v2889_v59 = vpop.f32.mrf.mxu1 }
 0x3ba   : > { %v2890_v8 = vadd.f32 %v13069_v13, %v2889_v59  ;;  %2968 = vrot.lane.b32.xlu0 %v9500_v37, %s11631_s21  ;;  %v9998_v54 = vpop.f32.mrf.mxu0 }
 0x3bb   : > { %2108 = vrot.lane.b32.xlu1 %v9475_v2, %s11631_s21  ;;  %v2891_v22 = vpop.f32.mrf.mxu1 }
 0x3bc   : > { %v9501_v63 = vpack.c.bf16 %v2890_v8, %v2890_v8  ;;  %v9999_v13 = vpop.f32.mrf.mxu0  ;;  %v11315_v8 = vld [vmem:[%s15018_s5 + $0x5fc] ss:$16 sps:$4 sm:$0xff]  }
 0x3bd   : > { %v2894_v30 = vpop.f32.mrf.mxu1  ;;  %4581 = vmatmul.mubr.bf16.vlgmr.msra.gmra.mxu1 %v11303_v51  ;;  %v13561_v33 = vadd.f32 %v9999_v13, %v9998_v54 }
 0x3be   : > { %v2895_v6 = vadd.f32 %v13080_v60, %v2894_v30  ;;  %4992 = vmatpush1.bf16.msra.mxu1 %v12184_v57  ;;  %2110 = vrot.lane.b32.xlu0 %v9476_v49, %s11631_s21  ;;  %v13563_v11 = vpop.f32.mrf.mxu0  ;;  %v9477_v60 = vpack.c.bf16 %v13161_v7, %v13161_v7  ;;  %v11311_v57 = vld [vmem:[%s15018_s5 + $0x5d8] ss:$16 sps:$4 sm:$0xff]   ;;  %v9478_v7 = vpack.c.bf16 %v13174_v14, %v13174_v14 }
 0x3bf   : > { %2970 = vrot.lane.b32.xlu1 %v9501_v63, %s11631_s21  ;;  %v2896_v35 = vpop.f32.mrf.mxu1  ;;  %4993 = vmatprep.subr.bf16.mxu1 %v15073_v19 }
 0x3c0   : > { %v9502_v1 = vpack.c.bf16 %v2895_v6, %v2895_v6  ;;  %9078 = vmatprep.mubr.msk.bf16.mxu1 %vm1433_vm5, %v11309_v32  ;;  %v13573_v2 = vpop.f32.mrf.mxu0 }
 0x3c1   : > { %v2897_v37 = vpop.f32.mrf.mxu1 }
 0x3c2   : > { %v2898_v42 = vadd.f32 %v13097_v17, %v2897_v37  ;;  %4994 = vmatpush1.bf16.msra.mxu1 %v12201_v12  ;;  %2972 = vrot.lane.b32.xlu0 %v9502_v1, %s11631_s21  ;;  %v10004_v17 = vpop.f32.mrf.mxu0  ;;  %v11321_v1 = vld [vmem:[%s15018_s5 + $0x61c] ss:$16 sps:$4 sm:$0xff]  }
 0x3c3   : > { %2112 = vrot.lane.b32.xlu1 %v9477_v60, %s11631_s21  ;;  %v2899_v59 = vpop.f32.mrf.mxu1  ;;  %4995 = vmatprep.subr.bf16.mxu1 %v15073_v19  ;;  %v9036_v37 = vld [vmem:[%s15018_s5 + $0x618] sm:$0xff] }
 0x3c4   : > { %v9503_v51 = vpack.c.bf16 %v2898_v42, %v2898_v42  ;;  %v10005_v22 = vpop.f32.mrf.mxu0 }
 0x3c5   : > { %v2902_v20 = vpop.f32.mrf.mxu1  ;;  %4589 = vmatmul.mubr.bf16.gmra.mxu1 %v11311_v57  ;;  %v13587_v14 = vadd.f32 %v10005_v22, %v10004_v17 }
 0x3c6   : > { %v2903_v12 = vadd.f32 %v13105_v52, %v2902_v20  ;;  %4996 = vmatpush1.bf16.msra.mxu1 %v12220_v27  ;;  %2114 = vrot.lane.b32.xlu0 %v9478_v7, %s11631_s21  ;;  %v13590_v32 = vpop.f32.mrf.mxu0  ;;  %v9479_v52 = vpack.c.bf16 %v13188_v16, %v13188_v16  ;;  %v11317_v27 = vld [vmem:[%s15018_s5 + $0x5f8] ss:$16 sps:$4 sm:$0xff]   ;;  %v9480_v16 = vpack.c.bf16 %v13201_v45, %v13201_v45 }
 0x3c7   : > { %2974 = vrot.lane.b32.xlu1 %v9503_v51, %s11631_s21  ;;  %v2904_v49 = vpop.f32.mrf.mxu1  ;;  %4997 = vmatprep.subr.bf16.mxu1 %v15073_v19  ;;  %v9038_v45 = vld [vmem:[%s15018_s5 + $0x628] sm:$0xff] }
 0x3c8   : > { %v9504_v63 = vpack.c.bf16 %v2903_v12, %v2903_v12  ;;  %9079 = vmatprep.mubr.msk.bf16.mxu1 %vm1433_vm5, %v11315_v8  ;;  %v13600_v6 = vpop.f32.mrf.mxu0  ;;  %v9063_v51 = vcombine.low %v9036_v37, %v9038_v45  ;;  %v11326_v8 = vld [vmem:[%s15018_s5 + $0x63c] ss:$16 sps:$4 sm:$0xff]   ;;  %v15084_v45 = vld [vmem:[#allocation18_spill] sm:$0xff] }
 0x3c9   : > { %v2905_v54 = vpop.f32.mrf.mxu1 }
 0x3ca   : > { %v2906_v30 = vadd.f32 %v13121_v5, %v2905_v54  ;;  %4998 = vmatpush1.bf16.msra.mxu1 %v12233_v36  ;;  %2976 = vrot.lane.b32.xlu0 %v9504_v63, %s11631_s21  ;;  %v10010_v5 = vpop.f32.mrf.mxu0  ;;  %v9042_v63 = vld [vmem:[%s15018_s5 + $0x648] sm:$0xff] }
 0x3cb   : > { %2116 = vrot.lane.b32.xlu1 %v9479_v52, %s11631_s21  ;;  %v2907_v13 = vpop.f32.mrf.mxu1  ;;  %4999 = vmatprep.subr.bf16.mxu1 %v15073_v19 }
 0x3cc   : > { %v9505_v35 = vpack.c.bf16 %v2906_v30, %v2906_v30  ;;  %v10011_v57 = vpop.f32.mrf.mxu0 }
 0x3cd   : > { %v2910_v60 = vpop.f32.mrf.mxu1  ;;  %4597 = vmatmul.mubr.bf16.gmra.mxu1 %v11317_v27  ;;  %v13620_v59 = vadd.f32 %v10011_v57, %v10010_v5 }
 0x3ce   : > { %v2911_v36 = vadd.f32 %v13129_v62, %v2910_v60  ;;  %5000 = vmatpush1.bf16.msra.mxu1 %v12242_v50  ;;  %2118 = vrot.lane.b32.xlu0 %v9480_v16, %s11631_s21  ;;  %v13623_v50 = vpop.f32.mrf.mxu0 }
 0x3cf   : > { %2978 = vrot.lane.b32.xlu1 %v9505_v35, %s11631_s21  ;;  %v2912_v42 = vpop.f32.mrf.mxu1  ;;  %5001 = vmatprep.subr.bf16.mxu1 %v15073_v19  ;;  %v11330_v35 = vld [vmem:[%s15018_s5 + $0x65c] ss:$16 sps:$4 sm:$0xff]  }
 0x3d0   : > { %v9506_v62 = vpack.c.bf16 %v2911_v36, %v2911_v36  ;;  %9080 = vmatprep.mubr.msk.bf16.mxu1 %vm1433_vm5, %v11321_v1  ;;  %v13629_v17 = vpop.f32.mrf.mxu0 }
 0x3d1   : > { %v2913_v7 = vpop.f32.mrf.mxu1 }
 0x3d2   : > { %5002 = vmatpush1.bf16.msra.mxu1 %v12249_v0  ;;  %v10016_v12 = vpop.f32.mrf.mxu0  ;;  %v9040_v0 = vld [vmem:[%s15018_s5 + $0x638] sm:$0xff] }
 0x3d3   : > { %2980 = vrot.lane.b32.xlu1 %v9506_v62, %s11631_s21  ;;  %v2914_v20 = vpop.f32.mrf.mxu1  ;;  %5003 = vmatprep.subr.bf16.mxu1 %v15073_v19  ;;  %v9067_v13 = vcombine.low %v9040_v0, %v9042_v63  ;;  %v9048_v7 = vld [vmem:[%s15018_s5 + $0x678] sm:$0x11] }
 0x3d4   : > { %v10017_v52 = vpop.f32.mrf.mxu0  ;;  %v9076_v0 = vcombine.high %v9048_v7, %v9048_v7 }
 0x3d5   : > { %v3305_v22 = vpop.f32.mrf.mxu1  ;;  %4605 = vmatmul.mubr.bf16.gmra.mxu1 %v9063_v51  ;;  %v13643_v27 = vadd.f32 %v10017_v52, %v10016_v12 }
 0x3d6   : > { %v3306_v49 = vadd.f32 %v13152_v29, %v3305_v22  ;;  %5004 = vmatpush1.bf16.msra.mxu1 %v12074_v40  ;;  %9081 = vmatprep.mubr.msk.bf16.mxu1 %vm1433_vm5, %v11326_v8  ;;  %v13645_v29 = vpop.f32.mrf.mxu0  ;;  %v15085_v22 = vld [vmem:[#allocation19_spill] sm:$0xff] }
 0x3d7   : > { %v3307_v54 = vpop.f32.mrf.mxu1  ;;  %5005 = vmatprep.subr.bf16.mxu1 %v15073_v19 }
 0x3d8   : > { %v9507_v30 = vpack.c.bf16 %v3306_v49, %v3306_v49  ;;  %v13653_v1 = vpop.f32.mrf.mxu0 }
 0x3d9   : > { %v3308_v40 = vpop.f32.mrf.mxu1 }
 0x3da   : > { %3412 = vst.msk [vmem:[#allocation2 + $0x8] sm:$0xf] %vm1688_vm7, %v9507_v30  ;;  %v3309_v16 = vadd.f32 %v13171_v3, %v3308_v40  ;;  %5006 = vmatpush1.bf16.msra.mxu1 %v12052_v25  ;;  %v10022_v36 = vpop.f32.mrf.mxu0  ;;  %v9044_v25 = vld [vmem:[%s15018_s5 + $0x658] sm:$0xff]  ;;  %v9046_v3 = vld [vmem:[%s15018_s5 + $0x668] sm:$0xff] }
 0x3db   : > { %v3310_v5 = vpop.f32.mrf.mxu1  ;;  %5013 = vmatprep.subr.bf16.mxu1 %v15073_v19  ;;  %v9071_v12 = vcombine.low %v9044_v25, %v9046_v3 }
 0x3dc   : > { %v9508_v60 = vpack.c.bf16 %v3309_v16, %v3309_v16  ;;  %v10023_v42 = vpop.f32.mrf.mxu0 }
 0x3dd   : > { %v3313_v37 = vpop.f32.mrf.mxu1  ;;  %4613 = vmatmul.mubr.bf16.gmra.mxu1 %v9067_v13  ;;  %v13670_v51 = vadd.f32 %v10023_v42, %v10022_v36  ;;  %v15086_v13 = vld [vmem:[#allocation20_spill] sm:$0xff] }
 0x3de   : > { %3413 = vst.msk [vmem:[#allocation2 + $0x1c] sm:$0xf] %vm1688_vm7, %v9508_v60  ;;  %v3314_v57 = vadd.f32 %v15084_v45, %v3313_v37  ;;  %5014 = vmatpush2.bf16.msra.mxu1 %v12281_v34  ;;  %9082 = vmatprep.mubr.msk.bf16.mxu1 %vm1433_vm5, %v11330_v35  ;;  %v13672_v8 = vpop.f32.mrf.mxu0  ;;  %v9075_v45 = vcombine.low %v9048_v7, %v9048_v7 }
 0x3df   : > { %v3315_v62 = vpop.f32.mrf.mxu1  ;;  %5015 = vmatprep.subr.bf16.mxu1 %v15073_v19 }
 0x3e0   : > { %v9509_v34 = vpack.c.bf16 %v3314_v57, %v3314_v57  ;;  %v13677_v63 = vpop.f32.mrf.mxu0 }
 0x3e1   : > { %v3316_v20 = vpop.f32.mrf.mxu1 }
 0x3e2   : > { %3414 = vst.msk [vmem:[#allocation2 + $0x30] sm:$0xf] %vm1688_vm7, %v9509_v34  ;;  %v3317_v49 = vadd.f32 %v15085_v22, %v3316_v20  ;;  %5016 = vmatpush2.bf16.msra.mxu1 %v12293_v47  ;;  %v10028_v30 = vpop.f32.mrf.mxu0 }
 0x3e3   : > { %v3318_v52 = vpop.f32.mrf.mxu1  ;;  %5017 = vmatprep.subr.bf16.mxu1 %v15073_v19 }
 0x3e4   : > { %v9510_v54 = vpack.c.bf16 %v3317_v49, %v3317_v49  ;;  %v10029_v35 = vpop.f32.mrf.mxu0 }
 0x3e5   : > { %v3321_v40 = vpop.f32.mrf.mxu1  ;;  %4621 = vmatmul.mubr.bf16.gmra.mxu1 %v9071_v12  ;;  %v13685_v5 = vadd.f32 %v10029_v35, %v10028_v30 }
 0x3e6   : > { %3415 = vst.msk [vmem:[#allocation2 + $0x44] sm:$0xf] %vm1688_vm7, %v9510_v54  ;;  %v3322_v16 = vadd.f32 %v15086_v13, %v3321_v40  ;;  %5018 = vmatpush2.bf16.msra.mxu1 %v12306_v56  ;;  %9083 = vmatprep.mubr.msk.bf16.mxu1 %vm1433_vm5, %v9076_v0  ;;  %v13687_v36 = vpop.f32.mrf.mxu0  ;;  %v11373_v56 = vld [vmem:[%s15018_s5 + $0x68c] ss:$16 sps:$4 sm:$0xff]   ;;  %v11371_v0 = vld [vmem:[%s15018_s5 + $0x688] ss:$16 sps:$4 sm:$0xff]  }
 0x3e7   : > { %v3323_v47 = vpop.f32.mrf.mxu1  ;;  %5019 = vmatprep.subr.bf16.mxu1 %v15073_v19 }
 0x3e8   : > { %v9511_v60 = vpack.c.bf16 %v3322_v16, %v3322_v16  ;;  %v13695_v25 = vpop.f32.mrf.mxu0  ;;  %v15087_v16 = vld [vmem:[#allocation21_spill] sm:$0xff] }
 0x3e9   : > { %v3324_v37 = vpop.f32.mrf.mxu1 }
 0x3ea   : > { %3416 = vst.msk [vmem:[#allocation2 + $0x58] sm:$0xf] %vm1688_vm7, %v9511_v60  ;;  %v3325_v57 = vadd.f32 %v13222_v48, %v3324_v37  ;;  %5020 = vmatpush2.bf16.msra.mxu1 %v12317_v4  ;;  %v10034_v62 = vpop.f32.mrf.mxu0 }
 0x3eb   : > { %v3326_v3 = vpop.f32.mrf.mxu1  ;;  %5021 = vmatprep.subr.bf16.mxu1 %v15073_v19 }
 0x3ec   : > { %v9512_v42 = vpack.c.bf16 %v3325_v57, %v3325_v57  ;;  %v10035_v4 = vpop.f32.mrf.mxu0  ;;  %v11379_v57 = vld [vmem:[%s15018_s5 + $0x6a8] ss:$16 sps:$4 sm:$0xff]   ;;  %v11383_v3 = vld [vmem:[%s15018_s5 + $0x6cc] ss:$16 sps:$4 sm:$0xff]  }
 0x3ed   : > { %v3329_v34 = vpop.f32.mrf.mxu1  ;;  %4629 = vmatmul.mubr.bf16.gmra.mxu1 %v9075_v45  ;;  %v13702_v20 = vadd.f32 %v10035_v4, %v10034_v62 }
 0x3ee   : > { %3417 = vst.msk [vmem:[#allocation2 + $0x6c] sm:$0xf] %vm1688_vm7, %v9512_v42  ;;  %v3330_v7 = vadd.f32 %v13234_v55, %v3329_v34  ;;  %5022 = vmatpush2.bf16.msra.mxu1 %v12326_v41  ;;  %9151 = vmatprep.mubr.msk.bf16.mxu1 %vm1433_vm5, %v11373_v56  ;;  %v10037_v22 = vpop.f32.mrf.mxu0  ;;  %v11377_v41 = vld [vmem:[%s15018_s5 + $0x6ac] ss:$16 sps:$4 sm:$0xff]  }
 0x3ef   : > { %v3331_v48 = vpop.f32.mrf.mxu1 }
 0x3f0   : > { %v9513_v12 = vpack.c.bf16 %v3330_v7, %v3330_v7  ;;  %v10038_v55 = vpop.f32.mrf.mxu0 }
 0x3f1   : > { %v3332_v49 = vpop.f32.mrf.mxu1  ;;  %v11385_v55 = vld [vmem:[%s15018_s5 + $0x6c8] ss:$16 sps:$4 sm:$0xff]  }
 0x3f2   : > { %3418 = vst.msk [vmem:[#allocation2 + $0x80] sm:$0xf] %vm1688_vm7, %v9513_v12  ;;  %v3333_v52 = vadd.f32 %v13249_v24, %v3332_v49  ;;  %v10056_v40 = vpop.f32.mrf.mxu0 }
 0x3f3   : > { %v3334_v54 = vpop.f32.mrf.mxu1 }
 0x3f4   : > { %v9514_v30 = vpack.c.bf16 %v3333_v52, %v3333_v52  ;;  %v10057_v47 = vpop.f32.mrf.mxu0 }
 0x3f5   : > { %v3337_v13 = vpop.f32.mrf.mxu1  ;;  %5024 = vmatmul.mubr.bf16.vlgmr.msra.gmra.mxu1 %v11371_v0  ;;  %v13725_v42 = vadd.f32 %v10057_v47, %v10056_v40 }
 0x3f6   : > { %3419 = vst.msk [vmem:[#allocation2 + $0x94] sm:$0xf] %vm1688_vm7, %v9514_v30  ;;  %v3338_v35 = vadd.f32 %v15087_v16, %v3337_v13  ;;  %9152 = vmatprep.mubr.msk.bf16.mxu1 %vm1433_vm5, %v11377_v41  ;;  %v13715_v24 = vpop.f32.mrf.mxu0 }
 0x3f7   : > { %v3339_v60 = vpop.f32.mrf.mxu1 }
 0x3f8   : > { %v9515_v37 = vpack.c.bf16 %v3338_v35, %v3338_v35  ;;  %v13727_v62 = vpop.f32.mrf.mxu0 }
 0x3f9   : > { %v3340_v45 = vpop.f32.mrf.mxu1 }
 0x3fa   : > { %3420 = vst.msk [vmem:[#allocation2 + $0xa8] sm:$0xf] %vm1688_vm7, %v9515_v37  ;;  %v3341_v56 = vadd.f32 %v13277_v31, %v3340_v45  ;;  %v10062_v4 = vpop.f32.mrf.mxu0 }
 0x3fb   : > { %v3342_v34 = vpop.f32.mrf.mxu1 }
 0x3fc   : > { %v9516_v7 = vpack.c.bf16 %v3341_v56, %v3341_v56  ;;  %v10063_v31 = vpop.f32.mrf.mxu0 }
 0x3fd   : > { %v3345_v48 = vpop.f32.mrf.mxu1  ;;  %5032 = vmatmul.mubr.bf16.gmra.mxu1 %v11379_v57  ;;  %v13732_v49 = vadd.f32 %v10063_v31, %v10062_v4 }
 0x3fe   : > { %3421 = vst.msk [vmem:[#allocation2 + $0xbc] sm:$0xf] %vm1688_vm7, %v9516_v7  ;;  %v3346_v12 = vadd.f32 %v13284_v61, %v3345_v48  ;;  %9153 = vmatprep.mubr.msk.bf16.mxu1 %vm1433_vm5, %v11383_v3  ;;  %v13734_v52 = vpop.f32.mrf.mxu0  ;;  %v11389_v61 = vld [vmem:[%s15018_s5 + $0x6ec] ss:$16 sps:$4 sm:$0xff]   ;;  %v11391_v3 = vld [vmem:[%s15018_s5 + $0x6e8] ss:$16 sps:$4 sm:$0xff]  }
 0x3ff   : > { %v3347_v22 = vpop.f32.mrf.mxu1 }
 0x400   : > { %v9517_v0 = vpack.c.bf16 %v3346_v12, %v3346_v12  ;;  %v13744_v30 = vpop.f32.mrf.mxu0 }
 0x401   : > { %v3348_v41 = vpop.f32.mrf.mxu1 }
 0x402   : > { %3422 = vst.msk [vmem:[#allocation2 + $0xd0] sm:$0xf] %vm1688_vm7, %v9517_v0  ;;  %v3349_v54 = vadd.f32 %v13299_v43, %v3348_v41  ;;  %v10068_v16 = vpop.f32.mrf.mxu0  ;;  %v15088_v41 = vld [vmem:[#allocation15_spill] sm:$0xff] }
 0x403   : > { %v3350_v40 = vpop.f32.mrf.mxu1 }
 0x404   : > { %v9518_v13 = vpack.c.bf16 %v3349_v54, %v3349_v54  ;;  %v10069_v60 = vpop.f32.mrf.mxu0 }
 0x405   : > { %v3353_v35 = vpop.f32.mrf.mxu1  ;;  %5040 = vmatmul.mubr.bf16.gmra.mxu1 %v11385_v55  ;;  %v13749_v43 = vadd.f32 %v10069_v60, %v10068_v16  ;;  %v9945_v55 = vadd.f32 %v15088_v41, %v13345_v39 }
 0x406   : > { %3423 = vst.msk [vmem:[#allocation2 + $0xe4] sm:$0xf] %vm1688_vm7, %v9518_v13  ;;  %v3354_v47 = vadd.f32 %v13306_v26, %v3353_v35  ;;  %9154 = vmatprep.mubr.msk.bf16.mxu1 %vm1433_vm5, %v11389_v61  ;;  %v13751_v57 = vpop.f32.mrf.mxu0  ;;  %v11395_v26 = vld [vmem:[%s15018_s5 + $0x70c] ss:$16 sps:$4 sm:$0xff]   ;;  %v11397_v13 = vld [vmem:[%s15018_s5 + $0x708] ss:$16 sps:$4 sm:$0xff]  }
 0x407   : > { %v3355_v37 = vpop.f32.mrf.mxu1 }
 0x408   : > { %v9519_v45 = vpack.c.bf16 %v3354_v47, %v3354_v47  ;;  %v13760_v34 = vpop.f32.mrf.mxu0 }
 0x409   : > { %v3356_v56 = vpop.f32.mrf.mxu1 }
 0x40a   : > { %3424 = vst.msk [vmem:[#allocation2 + $0xf8] sm:$0x1] %vm1701_vm8, %v9519_v45  ;;  %v10074_v4 = vpop.f32.mrf.mxu0 }
 0x40b   : > { %v3357_v7 = vpop.f32.mrf.mxu1 }
 0x40c   : > { %v10075_v31 = vpop.f32.mrf.mxu0  ;;  %v9122_v7 = vld [vmem:[%s15018_s5 + $0x748] sm:$0x11] }
 0x40d   : > { %v3722_v48 = vpop.f32.mrf.mxu1  ;;  %5048 = vmatmul.mubr.bf16.gmra.mxu1 %v11391_v3  ;;  %v13764_v0 = vadd.f32 %v10075_v31, %v10074_v4 }
 0x40e   : > { %v3723_v12 = vadd.f32 %v13356_v58, %v3722_v48  ;;  %9155 = vmatprep.mubr.msk.bf16.mxu1 %vm1433_vm5, %v11395_v26  ;;  %v13768_v61 = vpop.f32.mrf.mxu0  ;;  %v11403_v58 = vld [vmem:[%s15018_s5 + $0x72c] ss:$16 sps:$4 sm:$0xff]   ;;  %v15089_v48 = vld [vmem:[#allocation16_spill] sm:$0xff] }
 0x40f   : > { %v3724_v22 = vpop.f32.mrf.mxu1 }
 0x410   : > { %v9520_v54 = vpack.c.bf16 %v3723_v12, %v3723_v12  ;;  %v13777_v35 = vpop.f32.mrf.mxu0  ;;  %v15090_v12 = vld [vmem:[#allocation17_spill] sm:$0xff] }
 0x411   : > { %v3725_v40 = vpop.f32.mrf.mxu1  ;;  %v9951_v31 = vadd.f32 %v15090_v12, %v15089_v48  ;;  %v15093_v12 = vld [vmem:[#allocation23_spill] sm:$0xff] }
 0x412   : > { %v3726_v16 = vadd.f32 %v9945_v55, %v3725_v40  ;;  %3816 = vrot.lane.b32.xlu0 %v9520_v54, %s11631_s21  ;;  %v10080_v37 = vpop.f32.mrf.mxu0  ;;  %v11405_v55 = vld [vmem:[%s15018_s5 + $0x728] ss:$16 sps:$4 sm:$0xff]   ;;  %v9150_v40 = vcombine.high %v9122_v7, %v9122_v7 }
 0x413   : > { %v3727_v47 = vpop.f32.mrf.mxu1 }
 0x414   : > { %v9521_v60 = vpack.c.bf16 %v3726_v16, %v3726_v16  ;;  %v2957_v39 = vpop.permute.xlu1 %2956  ;;  %v10081_v3 = vpop.f32.mrf.mxu0 }
 0x415   : > { %2995 = vst.msk [vmem:[#allocation2 + $0x4] sm:$0xf] %vm2133_vm9, %v2957_v39  ;;  %v3730_v45 = vpop.f32.mrf.mxu1  ;;  %5056 = vmatmul.mubr.bf16.gmra.mxu1 %v11397_v13  ;;  %v13788_v4 = vadd.f32 %v10081_v3, %v10080_v37  ;;  %v15092_v37 = vld [vmem:[#allocation22_spill] sm:$0xff] }
 0x416   : > { %v13781_v56 = vadd.f32 %v13384_v38, %v3730_v45  ;;  %3818 = vrot.lane.b32.xlu1 %v9521_v60, %s11631_s21  ;;  %9156 = vmatprep.mubr.msk.bf16.mxu1 %vm1433_vm5, %v11403_v58  ;;  %v13792_v41 = vpop.f32.mrf.mxu0 }
 0x417   : > { %v3732_v26 = vpop.f32.mrf.mxu1 }
 0x418   : > { %v2959_v22 = vpop.permute.xlu1 %2958  ;;  %v13800_v13 = vpop.f32.mrf.mxu0 }
 0x419   : > { %2996 = vst.msk [vmem:[#allocation2 + $0x18] sm:$0xf] %vm2133_vm9, %v2959_v22  ;;  %v3733_v38 = vpop.f32.mrf.mxu1  ;;  %15091 = vst [vmem:[#allocation18_spill] sm:$0xff] %v13800_v13 }
 0x41a   : > { %v13798_v54 = vadd.f32 %v9951_v31, %v3733_v38  ;;  %v10086_v47 = vpop.f32.mrf.mxu0  ;;  %v15094_v31 = vld [vmem:[#allocation24_spill] sm:$0xff] }
 0x41b   : > { %v3735_v16 = vpop.f32.mrf.mxu1  ;;  %v9957_v22 = vadd.f32 %v15094_v31, %v15093_v12 }
 0x41c   : > { %v2961_v58 = vpop.permute.xlu0 %2960  ;;  %v10087_v3 = vpop.f32.mrf.mxu0  ;;  %v5145_v16 = vld [vmem:[#allocation2] sm:$0xff] }
 0x41d   : > { %2997 = vst.msk [vmem:[#allocation2 + $0x2c] sm:$0xf] %vm2133_vm9, %v2961_v58  ;;  %v2101_v60 = vpop.permute.xlu1 %2100  ;;  %v3738_v39 = vpop.f32.mrf.mxu1  ;;  %5064 = vmatmul.mubr.bf16.gmra.mxu1 %v11405_v55  ;;  %v13808_v48 = vadd.f32 %v10087_v3, %v10086_v47 }
 0x41e   : > { %2137 = vst.msk [vmem:[#allocation2 + $0x3c] sm:$0xf] %vm2133_vm9, %v2101_v60  ;;  %v13805_v45 = vadd.f32 %v15092_v37, %v3738_v39  ;;  %9157 = vmatprep.mubr.msk.bf16.mxu1 %vm1433_vm5, %v9150_v40  ;;  %v13812_v13 = vpop.f32.mrf.mxu0  ;;  %v9149_v37 = vcombine.low %v9122_v7, %v9122_v7 }
 0x41f   : > { %v3740_v26 = vpop.f32.mrf.mxu1  ;;  %15095 = vst [vmem:[#allocation19_spill] sm:$0xff] %v13812_v13 }
 0x420   : > { %v2103_v38 = vpop.permute.xlu0 %2102  ;;  %v5148_v58 = vld [vmem:[#allocation2 + $0x14] sm:$0xff]  ;;  %v13818_v47 = vpop.f32.mrf.mxu0 }
 0x421   : > { %v11369_v19 = vld [vmem:[#allocation2 + $0x4] ss:$20 sps:$4 sm:$0xff]   ;;  %2138 = vst.msk [vmem:[#allocation2 + $0x50] sm:$0xf] %vm2133_vm9, %v2103_v38  ;;  %v2963_v55 = vpop.permute.xlu1 %2962  ;;  %v3741_v60 = vpop.f32.mrf.mxu1  ;;  %v9172_v39 = vcombine.low %v5145_v16, %v5148_v58 }
 0x422   : > { %2998 = vst.msk [vmem:[#allocation2 + $0x40] sm:$0xf] %vm2133_vm9, %v2963_v55  ;;  %v13816_v40 = vadd.f32 %v9957_v22, %v3741_v60  ;;  %5700 = vmatprep.mubr.bf16.mxu0 %v11369_v19  ;;  %v10092_v12 = vpop.f32.mrf.mxu0  ;;  %v9963_v19 = vadd.f32 %v13471_v28, %v13467_v53 }
 0x423   : > { %v3743_v3 = vpop.f32.mrf.mxu1  ;;  %5701 = vmatmul.mubr.bf16.vlgmr.msra.gmra.mxu0 %v9172_v39 }
 0x424   : > { %v2965_v26 = vpop.permute.xlu0 %2964  ;;  %v10093_v38 = vpop.f32.mrf.mxu0 }
 0x425   : > { %2999 = vst.msk [vmem:[#allocation2 + $0x54] sm:$0xf] %vm2133_vm9, %v2965_v26  ;;  %v2105_v31 = vpop.permute.xlu1 %2104  ;;  %v3746_v13 = vpop.f32.mrf.mxu1  ;;  %5072 = vmatmul.mubr.bf16.gmra.mxu1 %v9149_v37  ;;  %v13827_v58 = vadd.f32 %v10093_v38, %v10092_v12  ;;  %v11374_v3 = vld [vmem:[#allocation2 + $0x28] ss:$20 sps:$4 sm:$0xff]  }
 0x426   : > { %2139 = vst.msk [vmem:[#allocation2 + $0x64] sm:$0xf] %vm2133_vm9, %v2105_v31  ;;  %v13823_v7 = vadd.f32 %v13460_v46, %v3746_v13  ;;  %v10095_v55 = vpop.f32.mrf.mxu0 }
 0x427   : > { %v3748_v22 = vpop.f32.mrf.mxu1 }
 0x428   : > { %v2107_v16 = vpop.permute.xlu0 %2106  ;;  %v10096_v46 = vpop.f32.mrf.mxu0 }
 0x429   : > { %2140 = vst.msk [vmem:[#allocation2 + $0x78] sm:$0xf] %vm2133_vm9, %v2107_v16  ;;  %v2967_v60 = vpop.permute.xlu1 %2966  ;;  %v3749_v39 = vpop.f32.mrf.mxu1  ;;  %v11376_v37 = vld [vmem:[#allocation2 + $0x2c] ss:$20 sps:$4 sm:$0xff]  }
 0x42a   : > { %3000 = vst.msk [vmem:[#allocation2 + $0x68] sm:$0xf] %vm2133_vm9, %v2967_v60  ;;  %v13831_v26 = vadd.f32 %v9963_v19, %v3749_v39  ;;  %5708 = vmatprep.mubr.bf16.mxu0 %v11376_v37  ;;  %v10114_v53 = vpop.f32.mrf.mxu0  ;;  %v9969_v19 = vadd.f32 %v13503_v21, %v13492_v15 }
 0x42b   : > { %v3751_v13 = vpop.f32.mrf.mxu1  ;;  %5709 = vmatmul.mubr.bf16.gmra.mxu0 %v11374_v3 }
 0x42c   : > { %v2969_v31 = vpop.permute.xlu0 %2968  ;;  %v10115_v22 = vpop.f32.mrf.mxu0 }
 0x42d   : > { %3001 = vst.msk [vmem:[#allocation2 + $0x7c] sm:$0xf] %vm2133_vm9, %v2969_v31  ;;  %v2109_v28 = vpop.permute.xlu1 %2108  ;;  %v3754_v12 = vpop.f32.mrf.mxu1  ;;  %v13840_v60 = vadd.f32 %v10115_v22, %v10114_v53  ;;  %v11380_v46 = vld [vmem:[#allocation2 + $0x50] ss:$20 sps:$4 sm:$0xff]  }
 0x42e   : > { %2141 = vst.msk [vmem:[#allocation2 + $0x8c] sm:$0xf] %vm2133_vm9, %v2109_v28  ;;  %v13836_v38 = vadd.f32 %v13490_v10, %v3754_v12  ;;  %v13842_v39 = vpop.f32.mrf.mxu0 }
 0x42f   : > { %v3756_v16 = vpop.f32.mrf.mxu1  ;;  %15096 = vst [vmem:[#allocation20_spill] sm:$0xff] %v13840_v60 }
 0x430   : > { %v2111_v55 = vpop.permute.xlu0 %2110  ;;  %v13848_v31 = vpop.f32.mrf.mxu0 }
 0x431   : > { %2142 = vst.msk [vmem:[#allocation2 + $0xa0] sm:$0xf] %vm2133_vm9, %v2111_v55  ;;  %v2971_v3 = vpop.permute.xlu1 %2970  ;;  %v3757_v37 = vpop.f32.mrf.mxu1  ;;  %v11382_v13 = vld [vmem:[#allocation2 + $0x54] ss:$20 sps:$4 sm:$0xff]  }
 0x432   : > { %3002 = vst.msk [vmem:[#allocation2 + $0x90] sm:$0xf] %vm2133_vm9, %v2971_v3  ;;  %v13846_v10 = vadd.f32 %v9969_v19, %v3757_v37  ;;  %5716 = vmatprep.mubr.bf16.mxu0 %v11382_v13  ;;  %v10120_v21 = vpop.f32.mrf.mxu0  ;;  %v9975_v3 = vadd.f32 %v13525_v18, %v13518_v44 }
 0x433   : > { %v3759_v28 = vpop.f32.mrf.mxu1  ;;  %5717 = vmatmul.mubr.bf16.gmra.mxu0 %v11380_v46 }
 0x434   : > { %v2973_v15 = vpop.permute.xlu0 %2972  ;;  %v10121_v16 = vpop.f32.mrf.mxu0 }
 0x435   : > { %3003 = vst.msk [vmem:[#allocation2 + $0xa4] sm:$0xf] %vm2133_vm9, %v2973_v15  ;;  %v2113_v53 = vpop.permute.xlu1 %2112  ;;  %v3762_v12 = vpop.f32.mrf.mxu1  ;;  %v13855_v19 = vadd.f32 %v10121_v16, %v10120_v21  ;;  %v11386_v15 = vld [vmem:[#allocation2 + $0x78] ss:$20 sps:$4 sm:$0xff]  }
 0x436   : > { %2143 = vst.msk [vmem:[#allocation2 + $0xb4] sm:$0xf] %vm2133_vm9, %v2113_v53  ;;  %v13853_v22 = vadd.f32 %v13515_v9, %v3762_v12  ;;  %v13859_v13 = vpop.f32.mrf.mxu0 }
 0x437   : > { %v3764_v55 = vpop.f32.mrf.mxu1  ;;  %15097 = vst [vmem:[#allocation21_spill] sm:$0xff] %v13855_v19  ;;  %15098 = vst [vmem:[#allocation15_spill] sm:$0xff] %v13859_v13 }
 0x438   : > { %v2115_v37 = vpop.permute.xlu0 %2114  ;;  %v13865_v53 = vpop.f32.mrf.mxu0 }
 0x439   : > { %2144 = vst.msk [vmem:[#allocation2 + $0xc8] sm:$0xf] %vm2133_vm9, %v2115_v37  ;;  %v2975_v46 = vpop.permute.xlu1 %2974  ;;  %v3765_v28 = vpop.f32.mrf.mxu1  ;;  %v11388_v60 = vld [vmem:[#allocation2 + $0x7c] ss:$20 sps:$4 sm:$0xff]   ;;  %15099 = vst [vmem:[#allocation16_spill] sm:$0xff] %v13865_v53 }
 0x43a   : > { %3004 = vst.msk [vmem:[#allocation2 + $0xb8] sm:$0xf] %vm2133_vm9, %v2975_v46  ;;  %v13863_v9 = vadd.f32 %v9975_v3, %v3765_v28  ;;  %5724 = vmatprep.mubr.bf16.mxu0 %v11388_v60  ;;  %v10126_v44 = vpop.f32.mrf.mxu0 }
 0x43b   : > { %v3767_v21 = vpop.f32.mrf.mxu1  ;;  %5725 = vmatmul.mubr.bf16.gmra.mxu0 %v11386_v15 }
 0x43c   : > { %v2977_v12 = vpop.permute.xlu0 %2976  ;;  %v10127_v37 = vpop.f32.mrf.mxu0 }
 0x43d   : > { %3005 = vst.msk [vmem:[#allocation2 + $0xcc] sm:$0xf] %vm2133_vm9, %v2977_v12  ;;  %v2117_v18 = vpop.permute.xlu1 %2116  ;;  %v3770_v16 = vpop.f32.mrf.mxu1  ;;  %v13872_v46 = vadd.f32 %v10127_v37, %v10126_v44  ;;  %v11392_v12 = vld [vmem:[#allocation2 + $0xa0] ss:$20 sps:$4 sm:$0xff]  }
 0x43e   : > { %2145 = vst.msk [vmem:[#allocation2 + $0xdc] sm:$0xf] %vm2133_vm9, %v2117_v18  ;;  %v13870_v55 = vadd.f32 %v13539_v23, %v3770_v16  ;;  %v13874_v21 = vpop.f32.mrf.mxu0 }
 0x43f   : > { %v3772_v3 = vpop.f32.mrf.mxu1  ;;  %15100 = vst [vmem:[#allocation17_spill] sm:$0xff] %v13872_v46  ;;  %15101 = vst [vmem:[#allocation22_spill] sm:$0xff] %v13874_v21 }
 0x440   : > { %v2119_v28 = vpop.permute.xlu0 %2118  ;;  %v13878_v18 = vpop.f32.mrf.mxu0 }
 0x441   : > { %2147 = vst.msk [vmem:[#allocation2 + $0xf0] sm:$0x1] %vm2146_vm10, %v2119_v28  ;;  %v2979_v60 = vpop.permute.xlu1 %2978  ;;  %v3773_v15 = vpop.f32.mrf.mxu1  ;;  %v11394_v19 = vld [vmem:[#allocation2 + $0xa4] ss:$20 sps:$4 sm:$0xff]   ;;  %15102 = vst [vmem:[#allocation23_spill] sm:$0xff] %v13878_v18 }
 0x442   : > { %3006 = vst.msk [vmem:[#allocation2 + $0xe0] sm:$0xf] %vm2133_vm9, %v2979_v60  ;;  %5732 = vmatprep.mubr.bf16.mxu0 %v11394_v19  ;;  %v10132_v16 = vpop.f32.mrf.mxu0  ;;  %v10003_v15 = vadd.f32 %v13573_v2, %v13563_v11 }
 0x443   : > { %v3774_v23 = vpop.f32.mrf.mxu1  ;;  %5733 = vmatmul.mubr.bf16.gmra.mxu0 %v11392_v12 }
 0x444   : > { %v10133_v46 = vpop.f32.mrf.mxu0 }
 0x445   : > { %v2981_v3 = vpop.permute.xlu1 %2980  ;;  %v4165_v44 = vpop.f32.mrf.mxu1  ;;  %v13882_v21 = vadd.f32 %v10133_v46, %v10132_v16  ;;  %v11398_v19 = vld [vmem:[#allocation2 + $0xc8] ss:$20 sps:$4 sm:$0xff]  }
 0x446   : > { %3007 = vst.msk [vmem:[#allocation2 + $0xf4] sm:$0x1] %vm2146_vm10, %v2981_v3  ;;  %v4166_v37 = vadd.f32 %v13561_v33, %v4165_v44  ;;  %v13886_v53 = vpop.f32.mrf.mxu0 }
 0x447   : > { %v4167_v28 = vpop.f32.mrf.mxu1  ;;  %15103 = vst [vmem:[#allocation24_spill] sm:$0xff] %v13882_v21 }
 0x448   : > { %v9533_v60 = vpack.c.bf16 %v4166_v37, %v4166_v37  ;;  %v13889_v13 = vpop.f32.mrf.mxu0 }
 0x449   : > { %v4168_v23 = vpop.f32.mrf.mxu1  ;;  %v11400_v12 = vld [vmem:[#allocation2 + $0xcc] ss:$20 sps:$4 sm:$0xff]  }
 0x44a   : > { %4272 = vst.msk [vmem:[#allocation2 + $0xc] sm:$0xf] %vm1688_vm7, %v9533_v60  ;;  %v4169_v18 = vadd.f32 %v10003_v15, %v4168_v23  ;;  %5740 = vmatprep.mubr.bf16.mxu0 %v11400_v12  ;;  %v10138_v46 = vpop.f32.mrf.mxu0  ;;  %v10009_v15 = vadd.f32 %v13600_v6, %v13590_v32 }
 0x44b   : > { %v4170_v3 = vpop.f32.mrf.mxu1  ;;  %5741 = vmatmul.mubr.bf16.gmra.mxu0 %v11398_v19 }
 0x44c   : > { %v9534_v33 = vpack.c.bf16 %v4169_v18, %v4169_v18  ;;  %v10139_v37 = vpop.f32.mrf.mxu0 }
 0x44d   : > { %v4173_v16 = vpop.f32.mrf.mxu1  ;;  %v5181_v44 = vld [vmem:[#allocation2 + $0xf0] sm:$0x11]  ;;  %v13893_v21 = vadd.f32 %v10139_v37, %v10138_v46  ;;  %v15105_v37 = vmov 0.0  }
 0x44e   : > { %4273 = vst.msk [vmem:[#allocation2 + $0x20] sm:$0xf] %vm1688_vm7, %v9534_v33  ;;  %v4174_v11 = vadd.f32 %v13587_v14, %v4173_v16  ;;  %v9203_v2 = vcombine.high %v5181_v44, %v5181_v44  ;;  %v13897_v23 = vpop.f32.mrf.mxu0  ;;  %v9202_v19 = vcombine.low %v5181_v44, %v5181_v44  ;;  %v10015_v44 = vadd.f32 %v13629_v17, %v13623_v50 }
 0x44f   : > { %v4175_v28 = vpop.f32.mrf.mxu1  ;;  %15104 = vst [vmem:[#allocation25_spill] sm:$0xff] %v13893_v21  ;;  %v10021_v17 = vadd.f32 %v13653_v1, %v13645_v29  ;;  %v11410_v1 = vld [vmem:[%s15019_s6 + $0xf0] sm:$0xff]  }
 0x450   : > { %v9535_v60 = vpack.c.bf16 %v4174_v11, %v4174_v11  ;;  %5748 = vmatprep.mubr.bf16.mxu0 %v9203_v2  ;;  %v13900_v3 = vpop.f32.mrf.mxu0 }
 0x451   : > { %v4176_v18 = vpop.f32.mrf.mxu1 }
 0x452   : > { %4274 = vst.msk [vmem:[#allocation2 + $0x34] sm:$0xf] %vm1688_vm7, %v9535_v60  ;;  %v4177_v12 = vadd.f32 %v10009_v15, %v4176_v18  ;;  %v10144_v16 = vpop.f32.mrf.mxu0 }
 0x453   : > { %v4178_v14 = vpop.f32.mrf.mxu1  ;;  %5749 = vmatmul.mubr.bf16.gmra.mxu0 %v9202_v19 }
 0x454   : > { %v9536_v33 = vpack.c.bf16 %v4177_v12, %v4177_v12  ;;  %10639 = vmatprep.mubr.msk.bf16.mxu0 %vm11629_vm3, %v15105_v37  ;;  %v10145_v6 = vpop.f32.mrf.mxu0 }
 0x455   : > { %v4181_v46 = vpop.f32.mrf.mxu1  ;;  %v13906_v2 = vadd.f32 %v10145_v6, %v10144_v16 }
 0x456   : > { %4275 = vst.msk [vmem:[#allocation2 + $0x48] sm:$0xf] %vm1688_vm7, %v9536_v33  ;;  %v4182_v32 = vadd.f32 %v13620_v59, %v4181_v46  ;;  %v10147_v15 = vpop.f32.mrf.mxu0 }
 0x457   : > { %v4183_v11 = vpop.f32.mrf.mxu1 }
 0x458   : > { %v9537_v28 = vpack.c.bf16 %v4182_v32, %v4182_v32  ;;  %v10148_v19 = vpop.f32.mrf.mxu0 }
 0x459   : > { %v4184_v60 = vpop.f32.mrf.mxu1  ;;  %v13911_v14 = vadd.f32 %v10148_v19, %v10147_v15 }
 0x45a   : > { %4276 = vst.msk [vmem:[#allocation2 + $0x5c] sm:$0xf] %vm1688_vm7, %v9537_v28  ;;  %v4185_v18 = vadd.f32 %v10015_v44, %v4184_v60  ;;  %v10150_v21 = vpop.f32.mrf.mxu0  ;;  %v11408_v60 = vld [vmem:[%s15019_s6 + $0xf8] sm:$0xff]  }
 0x45b   : > { %v4186_v12 = vpop.f32.mrf.mxu1  ;;  %10214 = vmatprep.subr.bf16.mxu1 %v11408_v60  ;;  %v11416_v60 = vld [vmem:[%s15019_s6 + $0xa0] sm:$0xff]  }
 0x45c   : > { %v9538_v33 = vpack.c.bf16 %v4185_v18, %v4185_v18  ;;  %v10151_v46 = vpop.f32.mrf.mxu0 }
 0x45d   : > { %v4189_v59 = vpop.f32.mrf.mxu1  ;;  %v13915_v50 = vadd.f32 %v10151_v46, %v10150_v21 }
 0x45e   : > { %4277 = vst.msk [vmem:[#allocation2 + $0x70] sm:$0xf] %vm1688_vm7, %v9538_v33  ;;  %v4190_v16 = vadd.f32 %v13643_v27, %v4189_v59  ;;  %v10153_v11 = vpop.f32.mrf.mxu0  ;;  %v11409_v27 = vld [vmem:[%s15019_s6 + $0xb8] sm:$0xff]   ;;  %v11411_v33 = vld [vmem:[%s15019_s6 + $0xb0] sm:$0xff]   ;;  %v10027_v59 = vadd.f32 %v13677_v63, %v13672_v8 }
 0x45f   : > { %v4191_v6 = vpop.f32.mrf.mxu1  ;;  %10215 = vmatpush3.bf16.msra.mxu1 %v11409_v27  ;;  %v11414_v8 = vld [vmem:[%s15019_s6 + $0x118] sm:$0xff]  }
 0x460   : > { %v9539_v32 = vpack.c.bf16 %v4190_v16, %v4190_v16  ;;  %v10154_v15 = vpop.f32.mrf.mxu0  ;;  %10216 = vmatprep.subr.bf16.mxu1 %v11410_v1  ;;  %10632 = vmatpush3.bf16.msra.mxu0 %v11414_v8 }
 0x461   : > { %v4192_v44 = vpop.f32.mrf.mxu1  ;;  %10633 = vmatprep.subr.bf16.mxu0 %v15105_v37 }
 0x462   : > { %4278 = vst.msk [vmem:[#allocation2 + $0x84] sm:$0xf] %vm1688_vm7, %v9539_v32  ;;  %v4193_v28 = vadd.f32 %v10021_v17, %v4192_v44  ;;  %v11413_v32 = vld [vmem:[%s15019_s6 + $0xa8] sm:$0xff]  }
 0x463   : > { %v4194_v18 = vpop.f32.mrf.mxu1  ;;  %10217 = vmatpush3.bf16.msra.mxu1 %v11411_v33  ;;  %v11420_v33 = vld [vmem:[%s15019_s6 + $0x108] sm:$0xff]  }
 0x464   : > { %v9540_v21 = vpack.c.bf16 %v4193_v28, %v4193_v28  ;;  %v11415_v28 = vld [vmem:[%s15019_s6 + $0xe0] sm:$0xff]   ;;  %v10033_v18 = vadd.f32 %v13695_v25, %v13687_v36  ;;  %v11419_v36 = vld [vmem:[%s15019_s6 + $0x98] sm:$0xff]  }
 0x465   : > { %v4197_v19 = vpop.f32.mrf.mxu1 }
 0x466   : > { %4279 = vst.msk [vmem:[#allocation2 + $0x98] sm:$0xf] %vm1688_vm7, %v9540_v21  ;;  %v4198_v29 = vadd.f32 %v13670_v51, %v4197_v19  ;;  %v11412_v51 = vld [vmem:[%s15019_s6 + $0xe8] sm:$0xff]  }
 0x467   : > { %v4199_v12 = vpop.f32.mrf.mxu1  ;;  %10218 = vmatprep.subr.bf16.mxu1 %v11412_v51  ;;  %v11422_v51 = vld [vmem:[%s15019_s6 + $0x90] sm:$0xff]  }
 0x468   : > { %v9541_v16 = vpack.c.bf16 %v4198_v29, %v4198_v29  ;;  %10219 = vmatpush3.bf16.msra.mxu1 %v11413_v32  ;;  %v11418_v29 = vld [vmem:[%s15019_s6 + $0xd8] sm:$0xff]  }
 0x469   : > { %v4200_v46 = vpop.f32.mrf.mxu1  ;;  %10220 = vmatprep.subr.bf16.mxu1 %v11415_v28 }
 0x46a   : > { %4280 = vst.msk [vmem:[#allocation2 + $0xac] sm:$0xf] %vm1688_vm7, %v9541_v16  ;;  %v4201_v6 = vadd.f32 %v10027_v59, %v4200_v46  ;;  %v11421_v16 = vld [vmem:[%s15019_s6 + $0xd0] sm:$0xff]  }
 0x46b   : > { %v4202_v17 = vpop.f32.mrf.mxu1 }
 0x46c   : > { %v9542_v11 = vpack.c.bf16 %v4201_v6, %v4201_v6  ;;  %10221 = vmatpush3.bf16.msra.mxu1 %v11416_v60  ;;  %v10061_v60 = vadd.f32 %v13727_v62, %v13715_v24 }
 0x46d   : > { %v4205_v44 = vpop.f32.mrf.mxu1  ;;  %10222 = vmatprep.subr.bf16.mxu1 %v11418_v29 }
 0x46e   : > { %4281 = vst.msk [vmem:[#allocation2 + $0xc0] sm:$0xf] %vm1688_vm7, %v9542_v11  ;;  %v4206_v63 = vadd.f32 %v13685_v5, %v4205_v44  ;;  %v11417_v5 = vld [vmem:[%s15019_s6 + $0x110] sm:$0xff]   ;;  %v11424_v11 = vld [vmem:[%s15019_s6 + $0xc8] sm:$0xff]  }
 0x46f   : > { %v4207_v15 = vpop.f32.mrf.mxu1  ;;  %10634 = vmatpush3.bf16.msra.mxu0 %v11417_v5  ;;  %v11425_v44 = vld [vmem:[%s15019_s6 + $0x88] sm:$0xff]  }
 0x470   : > { %v9543_v27 = vpack.c.bf16 %v4206_v63, %v4206_v63  ;;  %10635 = vmatprep.subr.bf16.mxu0 %v15105_v37  ;;  %10223 = vmatpush3.bf16.msra.mxu1 %v11419_v36  ;;  %v11427_v15 = vld [vmem:[%s15019_s6 + $0xc0] sm:$0xff]  }
 0x471   : > { %v4208_v21 = vpop.f32.mrf.mxu1  ;;  %10224 = vmatprep.subr.bf16.mxu1 %v11421_v16 }
 0x472   : > { %4282 = vst.msk [vmem:[#allocation2 + $0xd4] sm:$0xf] %vm1688_vm7, %v9543_v27  ;;  %v4209_v19 = vadd.f32 %v10033_v18, %v4208_v21  ;;  %v11428_v27 = vld [vmem:[%s15019_s6 + $0x80] sm:$0xff]  }
 0x473   : > { %v4210_v1 = vpop.f32.mrf.mxu1  ;;  %10636 = vmatpush3.bf16.msra.mxu0 %v11420_v33 }
 0x474   : > { %v9544_v25 = vpack.c.bf16 %v4209_v19, %v4209_v19  ;;  %10637 = vmatprep.subr.bf16.mxu0 %v15105_v37  ;;  %10225 = vmatpush3.bf16.msra.mxu1 %v11422_v51  ;;  %v9522_v19 = vpack.c.bf16 %v13781_v56, %v13781_v56 }
 0x475   : > { %v4213_v12 = vpop.f32.mrf.mxu1  ;;  %10226 = vmatprep.subr.bf16.mxu1 %v11424_v11 }
 0x476   : > { %4283 = vst.msk [vmem:[#allocation2 + $0xe8] sm:$0xf] %vm1688_vm7, %v9544_v25  ;;  %v4214_v59 = vadd.f32 %v13702_v20, %v4213_v12  ;;  %v11423_v20 = vld [vmem:[%s15019_s6 + $0x100] sm:$0xff]   ;;  %v9523_v25 = vpack.c.bf16 %v13798_v54, %v13798_v54  ;;  %v10067_v12 = vadd.f32 %v13744_v30, %v13734_v52  ;;  %v9525_v30 = vpack.c.bf16 %v13816_v40, %v13816_v40 }
 0x477   : > { %v4215_v46 = vpop.f32.mrf.mxu1  ;;  %10638 = vmatpush3.bf16.msra.mxu0 %v11423_v20  ;;  %v10079_v40 = vadd.f32 %v13777_v35, %v13768_v61  ;;  %v9529_v35 = vpack.c.bf16 %v13846_v10, %v13846_v10  ;;  %v9531_v10 = vpack.c.bf16 %v13863_v9, %v13863_v9 }
 0x478   : > { %v9545_v6 = vpack.c.bf16 %v4214_v59, %v4214_v59  ;;  %10227 = vmatpush3.bf16.msra.mxu1 %v11425_v44  ;;  %v9524_v46 = vpack.c.bf16 %v13805_v45, %v13805_v45 }
 0x479   : > { %v4216_v17 = vpop.f32.mrf.mxu1  ;;  %10228 = vmatprep.subr.bf16.mxu1 %v11427_v15 }
 0x47a   : > { %4284 = vst.msk [vmem:[#allocation2 + $0xfc] sm:$0x1] %vm1701_vm8, %v9545_v6  ;;  %v10073_v17 = vadd.f32 %v13760_v34, %v13751_v57  ;;  %v9527_v34 = vpack.c.bf16 %v13831_v26, %v13831_v26  ;;  %v15106_v26 = vld [vmem:[#allocation18_spill] sm:$0xff] }
 0x47b   : > { %v4217_v32 = vpop.f32.mrf.mxu1 }
 0x47c   : > { %10229 = vmatpush3.bf16.msra.mxu1 %v11428_v27 }
 0x47d   : > { %v4582_v8 = vpop.f32.mrf.mxu1 }
 0x47e   : > { %v4583_v63 = vadd.f32 %v13725_v42, %v4582_v8 }
 0x47f   : > { %v4584_v28 = vpop.f32.mrf.mxu1 }
 0x480   : > { %v9546_v18 = vpack.c.bf16 %v4583_v63, %v4583_v63 }
 0x481   : > { %v4585_v21 = vpop.f32.mrf.mxu1 }
 0x482   : > { %v4586_v5 = vadd.f32 %v10061_v60, %v4585_v21  ;;  %4676 = vrot.lane.b32.xlu0 %v9546_v18, %s11631_s21 }
 0x483   : > { %v4587_v42 = vpop.f32.mrf.mxu1 }
 0x484   : > { %v9547_v29 = vpack.c.bf16 %v4586_v5, %v4586_v5  ;;  %v3817_v1 = vpop.permute.xlu0 %3816  ;;  %v10085_v5 = vadd.f32 %v15106_v26, %v13792_v41 }
 0x485   : > { %3855 = vst.msk [vmem:[#allocation2 + $0x8] sm:$0xf] %vm2133_vm9, %v3817_v1  ;;  %v4590_v24 = vpop.f32.mrf.mxu1 }
 0x486   : > { %v4591_v62 = vadd.f32 %v13732_v49, %v4590_v24  ;;  %3820 = vrot.lane.b32.xlu0 %v9522_v19, %s11631_s21  ;;  %4678 = vrot.lane.b32.xlu1 %v9547_v29, %s11631_s21 }
 0x487   : > { %v4592_v36 = vpop.f32.mrf.mxu1 }
 0x488   : > { %v9548_v33 = vpack.c.bf16 %v4591_v62, %v4591_v62  ;;  %v3819_v56 = vpop.permute.xlu1 %3818  ;;  %v15107_v36 = vld [vmem:[#allocation19_spill] sm:$0xff] }
 0x489   : > { %3856 = vst.msk [vmem:[#allocation2 + $0x1c] sm:$0xf] %vm2133_vm9, %v3819_v56  ;;  %v4593_v59 = vpop.f32.mrf.mxu1 }
 0x48a   : > { %v4594_v16 = vadd.f32 %v10067_v12, %v4593_v59  ;;  %4680 = vrot.lane.b32.xlu0 %v9548_v33, %s11631_s21  ;;  %3822 = vrot.lane.b32.xlu1 %v9523_v25, %s11631_s21  ;;  %v10091_v25 = vadd.f32 %v13818_v47, %v15107_v36 }
 0x48b   : > { %v4595_v49 = vpop.f32.mrf.mxu1 }
 0x48c   : > { %v9549_v6 = vpack.c.bf16 %v4594_v16, %v4594_v16 }
 0x48d   : > { %v4598_v51 = vpop.f32.mrf.mxu1 }
 0x48e   : > { %v4599_v54 = vadd.f32 %v13749_v43, %v4598_v51  ;;  %3824 = vrot.lane.b32.xlu0 %v9524_v46, %s11631_s21  ;;  %4682 = vrot.lane.b32.xlu1 %v9549_v6, %s11631_s21  ;;  %v9526_v43 = vpack.c.bf16 %v13823_v7, %v13823_v7 }
 0x48f   : > { %v4600_v52 = vpop.f32.mrf.mxu1 }
 0x490   : > { %v9550_v20 = vpack.c.bf16 %v4599_v54, %v4599_v54  ;;  %v10119_v54 = vadd.f32 %v13848_v31, %v13842_v39  ;;  %v15108_v52 = vld [vmem:[#allocation20_spill] sm:$0xff] }
 0x491   : > { %v4601_v32 = vpop.f32.mrf.mxu1 }
 0x492   : > { %v4602_v11 = vadd.f32 %v10073_v17, %v4601_v32  ;;  %4684 = vrot.lane.b32.xlu0 %v9550_v20, %s11631_s21  ;;  %3826 = vrot.lane.b32.xlu1 %v9525_v30, %s11631_s21 }
 0x493   : > { %v4603_v45 = vpop.f32.mrf.mxu1 }
 0x494   : > { %v9551_v44 = vpack.c.bf16 %v4602_v11, %v4602_v11 }
 0x495   : > { %v4606_v8 = vpop.f32.mrf.mxu1 }
 0x496   : > { %v4607_v63 = vadd.f32 %v13764_v0, %v4606_v8  ;;  %3828 = vrot.lane.b32.xlu0 %v9526_v43, %s11631_s21  ;;  %4686 = vrot.lane.b32.xlu1 %v9551_v44, %s11631_s21  ;;  %v9528_v0 = vpack.c.bf16 %v13836_v38, %v13836_v38  ;;  %v15109_v43 = vld [vmem:[#allocation15_spill] sm:$0xff]  ;;  %v15110_v44 = vld [vmem:[#allocation16_spill] sm:$0xff] }
 0x497   : > { %v4608_v57 = vpop.f32.mrf.mxu1  ;;  %v10125_v8 = vadd.f32 %v15110_v44, %v15109_v43 }
 0x498   : > { %v9552_v28 = vpack.c.bf16 %v4607_v63, %v4607_v63  ;;  %v15111_v63 = vld [vmem:[#allocation21_spill] sm:$0xff] }
 0x499   : > { %v4609_v15 = vpop.f32.mrf.mxu1 }
 0x49a   : > { %v4610_v60 = vadd.f32 %v10079_v40, %v4609_v15  ;;  %4688 = vrot.lane.b32.xlu0 %v9552_v28, %s11631_s21  ;;  %3830 = vrot.lane.b32.xlu1 %v9527_v34, %s11631_s21 }
 0x49b   : > { %v4611_v7 = vpop.f32.mrf.mxu1 }
 0x49c   : > { %v9553_v18 = vpack.c.bf16 %v4610_v60, %v4610_v60 }
 0x49d   : > { %v4614_v27 = vpop.f32.mrf.mxu1 }
 0x49e   : > { %v4615_v21 = vadd.f32 %v13788_v4, %v4614_v27  ;;  %3832 = vrot.lane.b32.xlu0 %v9528_v0, %s11631_s21  ;;  %4690 = vrot.lane.b32.xlu1 %v9553_v18, %s11631_s21  ;;  %v9530_v4 = vpack.c.bf16 %v13853_v22, %v13853_v22  ;;  %v15112_v0 = vld [vmem:[#allocation22_spill] sm:$0xff]  ;;  %v15113_v18 = vld [vmem:[#allocation23_spill] sm:$0xff] }
 0x49f   : > { %v4616_v61 = vpop.f32.mrf.mxu1  ;;  %v10131_v27 = vadd.f32 %v15113_v18, %v15112_v0 }
 0x4a0   : > { %v9554_v42 = vpack.c.bf16 %v4615_v21, %v4615_v21  ;;  %v15114_v21 = vld [vmem:[#allocation17_spill] sm:$0xff] }
 0x4a1   : > { %v4617_v19 = vpop.f32.mrf.mxu1 }
 0x4a2   : > { %v4618_v29 = vadd.f32 %v10085_v5, %v4617_v19  ;;  %4692 = vrot.lane.b32.xlu0 %v9554_v42, %s11631_s21  ;;  %3834 = vrot.lane.b32.xlu1 %v9529_v35, %s11631_s21 }
 0x4a3   : > { %v4619_v38 = vpop.f32.mrf.mxu1 }
 0x4a4   : > { %v9555_v1 = vpack.c.bf16 %v4618_v29, %v4618_v29 }
 0x4a5   : > { %v4622_v24 = vpop.f32.mrf.mxu1 }
 0x4a6   : > { %v4623_v62 = vadd.f32 %v13808_v48, %v4622_v24  ;;  %3836 = vrot.lane.b32.xlu0 %v9530_v4, %s11631_s21  ;;  %4694 = vrot.lane.b32.xlu1 %v9555_v1, %s11631_s21  ;;  %v9532_v48 = vpack.c.bf16 %v13870_v55, %v13870_v55  ;;  %v10137_v1 = vadd.f32 %v13889_v13, %v13886_v53  ;;  %v15115_v24 = vld [vmem:[#allocation24_spill] sm:$0xff]  ;;  %v15116_v53 = vld [vmem:[#allocation25_spill] sm:$0xff] }
 0x4a7   : > { %v4624_v41 = vpop.f32.mrf.mxu1  ;;  %v10143_v13 = vadd.f32 %v13900_v3, %v13897_v23 }
 0x4a8   : > { %v9556_v12 = vpack.c.bf16 %v4623_v62, %v4623_v62 }
 0x4a9   : > { %v4625_v33 = vpop.f32.mrf.mxu1 }
 0x4aa   : > { %v4626_v56 = vadd.f32 %v10091_v25, %v4625_v33  ;;  %4696 = vrot.lane.b32.xlu0 %v9556_v12, %s11631_s21  ;;  %3838 = vrot.lane.b32.xlu1 %v9531_v10, %s11631_s21 }
 0x4ab   : > { %v4627_v22 = vpop.f32.mrf.mxu1 }
 0x4ac   : > { %v9557_v59 = vpack.c.bf16 %v4626_v56, %v4626_v56 }
 0x4ad   : > { %v4630_v16 = vpop.f32.mrf.mxu1 }
 0x4ae   : > { %v4631_v49 = vadd.f32 %v13827_v58, %v4630_v16  ;;  %3840 = vrot.lane.b32.xlu0 %v9532_v48, %s11631_s21  ;;  %4698 = vrot.lane.b32.xlu1 %v9557_v59, %s11631_s21 }
 0x4af   : > { %v4632_v47 = vpop.f32.mrf.mxu1 }
 0x4b0   : > { %v9558_v9 = vpack.c.bf16 %v4631_v49, %v4631_v49 }
 0x4b1   : > { %v4633_v46 = vpop.f32.mrf.mxu1 }
 0x4b2   : > { %4700 = vrot.lane.b32.xlu1 %v9558_v9, %s11631_s21 }
 0x4b3   : > { %v4634_v6 = vpop.f32.mrf.mxu1 }
 0x4b5   : > { %v5025_v51 = vpop.f32.mrf.mxu1 }
 0x4b6   : > { %v5026_v55 = vadd.f32 %v15108_v52, %v5025_v51 }
 0x4b7   : > { %v5027_v30 = vpop.f32.mrf.mxu1 }
 0x4b8   : > { %v9559_v17 = vpack.c.bf16 %v5026_v55, %v5026_v55 }
 0x4b9   : > { %v5028_v20 = vpop.f32.mrf.mxu1 }
 0x4ba   : > { %5132 = vst.msk [vmem:[#allocation2 + $0x10] sm:$0xf] %vm1688_vm7, %v9559_v17  ;;  %v5029_v58 = vadd.f32 %v10119_v54, %v5028_v20 }
 0x4bb   : > { %v5030_v32 = vpop.f32.mrf.mxu1 }
 0x4bc   : > { %v9560_v11 = vpack.c.bf16 %v5029_v58, %v5029_v58 }
 0x4bd   : > { %v5033_v45 = vpop.f32.mrf.mxu1 }
 0x4be   : > { %5133 = vst.msk [vmem:[#allocation2 + $0x24] sm:$0xf] %vm1688_vm7, %v9560_v11  ;;  %v5034_v57 = vadd.f32 %v15111_v63, %v5033_v45 }
 0x4bf   : > { %v5035_v34 = vpop.f32.mrf.mxu1 }
 0x4c0   : > { %v9561_v39 = vpack.c.bf16 %v5034_v57, %v5034_v57 }
 0x4c1   : > { %v5036_v31 = vpop.f32.mrf.mxu1 }
 0x4c2   : > { %5134 = vst.msk [vmem:[#allocation2 + $0x38] sm:$0xf] %vm1688_vm7, %v9561_v39  ;;  %v5037_v40 = vadd.f32 %v10125_v8, %v5036_v31 }
 0x4c3   : > { %v5038_v28 = vpop.f32.mrf.mxu1 }
 0x4c4   : > { %v9562_v15 = vpack.c.bf16 %v5037_v40, %v5037_v40 }
 0x4c5   : > { %v5041_v60 = vpop.f32.mrf.mxu1  ;;  %v11426_v7 = vld [vmem:[#allocation2 + $0x10] ss:$20 sps:$4 sm:$0xff]  }
 0x4c6   : > { %5135 = vst.msk [vmem:[#allocation2 + $0x4c] sm:$0xf] %vm1688_vm7, %v9562_v15  ;;  %v5042_v61 = vadd.f32 %v15114_v21, %v5041_v60  ;;  %10640 = vmatmul.mubr.msk.bf16.vlgmr.msra.gmra.mxu0 %vm5646_vm11, %v11426_v7 }
 0x4c7   : > { %v5043_v35 = vpop.f32.mrf.mxu1  ;;  %10643 = vmatprep.mubr.msk.bf16.mxu0 %vm11629_vm3, %v15105_v37 }
 0x4c8   : > { %v9563_v26 = vpack.c.bf16 %v5042_v61, %v5042_v61 }
 0x4c9   : > { %v5044_v5 = vpop.f32.mrf.mxu1 }
 0x4ca   : > { %5136 = vst.msk [vmem:[#allocation2 + $0x60] sm:$0xf] %vm1688_vm7, %v9563_v26  ;;  %v5045_v42 = vadd.f32 %v10131_v27, %v5044_v5 }
 0x4cb   : > { %v5046_v19 = vpop.f32.mrf.mxu1 }
 0x4cc   : > { %v9564_v29 = vpack.c.bf16 %v5045_v42, %v5045_v42 }
 0x4cd   : > { %v5049_v38 = vpop.f32.mrf.mxu1  ;;  %v11431_v4 = vld [vmem:[#allocation2 + $0x38] ss:$20 sps:$4 sm:$0xff]  }
 0x4ce   : > { %5137 = vst.msk [vmem:[#allocation2 + $0x74] sm:$0xf] %vm1688_vm7, %v9564_v29  ;;  %v5050_v62 = vadd.f32 %v15115_v24, %v5049_v38  ;;  %10644 = vmatmul.mubr.msk.bf16.gmra.mxu0 %vm5646_vm11, %v11431_v4 }
 0x4cf   : > { %v5051_v41 = vpop.f32.mrf.mxu1  ;;  %10647 = vmatprep.mubr.msk.bf16.mxu0 %vm11629_vm3, %v15105_v37 }
 0x4d0   : > { %v9565_v10 = vpack.c.bf16 %v5050_v62, %v5050_v62 }
 0x4d1   : > { %v5052_v36 = vpop.f32.mrf.mxu1 }
 0x4d2   : > { %5138 = vst.msk [vmem:[#allocation2 + $0x88] sm:$0xf] %vm1688_vm7, %v9565_v10  ;;  %v5053_v25 = vadd.f32 %v10137_v1, %v5052_v36 }
 0x4d3   : > { %v5054_v12 = vpop.f32.mrf.mxu1 }
 0x4d4   : > { %v9566_v33 = vpack.c.bf16 %v5053_v25, %v5053_v25 }
 0x4d5   : > { %v5057_v56 = vpop.f32.mrf.mxu1  ;;  %v11435_v22 = vld [vmem:[#allocation2 + $0x60] ss:$20 sps:$4 sm:$0xff]  }
 0x4d6   : > { %5139 = vst.msk [vmem:[#allocation2 + $0x9c] sm:$0xf] %vm1688_vm7, %v9566_v33  ;;  %v5058_v48 = vadd.f32 %v15116_v53, %v5057_v56  ;;  %10648 = vmatmul.mubr.msk.bf16.gmra.mxu0 %vm5646_vm11, %v11435_v22 }
 0x4d7   : > { %v5059_v59 = vpop.f32.mrf.mxu1  ;;  %10651 = vmatprep.mubr.msk.bf16.mxu0 %vm11629_vm3, %v15105_v37 }
 0x4d8   : > { %v9567_v16 = vpack.c.bf16 %v5058_v48, %v5058_v48 }
 0x4d9   : > { %v5060_v49 = vpop.f32.mrf.mxu1 }
 0x4da   : > { %5140 = vst.msk [vmem:[#allocation2 + $0xb0] sm:$0xf] %vm1688_vm7, %v9567_v16  ;;  %v5061_v47 = vadd.f32 %v10143_v13, %v5060_v49 }
 0x4db   : > { %v5062_v9 = vpop.f32.mrf.mxu1 }
 0x4dc   : > { %v9568_v46 = vpack.c.bf16 %v5061_v47, %v5061_v47 }
 0x4dd   : > { %v5065_v6 = vpop.f32.mrf.mxu1  ;;  %v11439_v51 = vld [vmem:[#allocation2 + $0x88] ss:$20 sps:$4 sm:$0xff]  }
 0x4de   : > { %5141 = vst.msk [vmem:[#allocation2 + $0xc4] sm:$0xf] %vm1688_vm7, %v9568_v46  ;;  %v5066_v23 = vadd.f32 %v13906_v2, %v5065_v6  ;;  %10652 = vmatmul.mubr.msk.bf16.gmra.mxu0 %vm5646_vm11, %v11439_v51 }
 0x4df   : > { %v5067_v3 = vpop.f32.mrf.mxu1  ;;  %10655 = vmatprep.mubr.msk.bf16.mxu0 %vm11629_vm3, %v15105_v37 }
 0x4e0   : > { %v9569_v54 = vpack.c.bf16 %v5066_v23, %v5066_v23 }
 0x4e1   : > { %v5068_v52 = vpop.f32.mrf.mxu1 }
 0x4e2   : > { %5142 = vst.msk [vmem:[#allocation2 + $0xd8] sm:$0xf] %vm1688_vm7, %v9569_v54  ;;  %v5069_v55 = vadd.f32 %v13911_v14, %v5068_v52 }
 0x4e3   : > { %v10172_v30 = vpop.f32.mrf.mxu0  ;;  %v5070_v17 = vpop.f32.mrf.mxu1 }
 0x4e4   : > { %v9570_v20 = vpack.c.bf16 %v5069_v55, %v5069_v55 }
 0x4e5   : > { %v10173_v58 = vpop.f32.mrf.mxu0  ;;  %v11443_v32 = vld [vmem:[#allocation2 + $0xb0] ss:$20 sps:$4 sm:$0xff]   ;;  %v5073_v11 = vpop.f32.mrf.mxu1 }
 0x4e6   : > { %v14103_v45 = vadd.f32 %v10173_v58, %v10172_v30  ;;  %5143 = vst.msk [vmem:[#allocation2 + $0xec] sm:$0xf] %vm1688_vm7, %v9570_v20  ;;  %v5074_v2 = vadd.f32 %v13915_v50, %v5073_v11  ;;  %10656 = vmatmul.mubr.msk.bf16.gmra.mxu0 %vm5646_vm11, %v11443_v32 }
 0x4e7   : > { %v10175_v43 = vpop.f32.mrf.mxu0  ;;  %v5075_v44 = vpop.f32.mrf.mxu1  ;;  %10659 = vmatprep.mubr.msk.bf16.mxu0 %vm11629_vm3, %v15105_v37 }
 0x4e8   : > { %v9571_v8 = vpack.c.bf16 %v5074_v2, %v5074_v2 }
 0x4e9   : > { %v10176_v14 = vpop.f32.mrf.mxu0  ;;  %v5076_v63 = vpop.f32.mrf.mxu1 }
 0x4ea   : > { %v14110_v57 = vadd.f32 %v10176_v14, %v10175_v43  ;;  %5144 = vst.msk [vmem:[#allocation2 + $0x100] sm:$0x1] %vm1701_vm8, %v9571_v8 }
 0x4eb   : > { %v5077_v34 = vpop.f32.mrf.mxu1  ;;  %v10178_v39 = vpop.f32.mrf.mxu0 }
 0x4ed   : > { %v11447_v31 = vld [vmem:[#allocation2 + $0xd8] ss:$20 sps:$4 sm:$0xff]   ;;  %v10179_v40 = vpop.f32.mrf.mxu0 }
 0x4ee   : > { %v14113_v28 = vadd.f32 %v10179_v40, %v10178_v39  ;;  %10660 = vmatmul.mubr.msk.bf16.gmra.mxu0 %vm5646_vm11, %v11447_v31 }
 0x4ef   : > { %v10181_v50 = vpop.f32.mrf.mxu0  ;;  %10663 = vmatprep.mubr.msk.bf16.mxu0 %vm11629_vm3, %v15105_v37 }
 0x4f1   : > { %v10182_v15 = vpop.f32.mrf.mxu0  ;;  %v11453_v7 = vld [vmem:[#allocation2 + $0x100] ss:$0 sps:$4 sm:$0x11]  }
 0x4f2   : > { %v14118_v60 = vadd.f32 %v10182_v15, %v10181_v50 }
 0x4f3   : > { %v10184_v18 = vpop.f32.mrf.mxu0 }
 0x4f4   : > { %v4677_v0 = vpop.permute.xlu0 %4676 }
 0x4f5   : > { %4715 = vst.msk [vmem:[#allocation2 + $0xc] sm:$0xf] %vm2133_vm9, %v4677_v0  ;;  %v10185_v27 = vpop.f32.mrf.mxu0 }
 0x4f6   : > { %v14121_v21 = vadd.f32 %v10185_v27, %v10184_v18  ;;  %10664 = vmatmul.mubr.msk.bf16.gmra.mxu0 %vm5646_vm11, %v11453_v7 }
 0x4f7   : > { %v10187_v26 = vpop.f32.mrf.mxu0 }
 0x4f8   : > { %v3821_v61 = vpop.permute.xlu0 %3820  ;;  %v4679_v35 = vpop.permute.xlu1 %4678 }
 0x4f9   : > { %3857 = vst.msk [vmem:[#allocation2 + $0x30] sm:$0xf] %vm2133_vm9, %v3821_v61  ;;  %4716 = vst.msk [vmem:[#allocation2 + $0x20] sm:$0xf] %vm2133_vm9, %v4679_v35  ;;  %v10188_v5 = vpop.f32.mrf.mxu0 }
 0x4fa   : > { %v14126_v42 = vadd.f32 %v10188_v5, %v10187_v26 }
 0x4fb   : > { %v10190_v38 = vpop.f32.mrf.mxu0 }
 0x4fc   : > { %v4681_v19 = vpop.permute.xlu0 %4680  ;;  %v3823_v29 = vpop.permute.xlu1 %3822  ;;  %v5146_v41 = vld [vmem:[#allocation2 + $0x8] sm:$0xff] }
 0x4fd   : > { %4717 = vst.msk [vmem:[#allocation2 + $0x34] sm:$0xf] %vm2133_vm9, %v4681_v19  ;;  %3858 = vst.msk [vmem:[#allocation2 + $0x44] sm:$0xf] %vm2133_vm9, %v3823_v29  ;;  %v10191_v4 = vpop.f32.mrf.mxu0 }
 0x4fe   : > { %v14130_v1 = vadd.f32 %v10191_v4, %v10190_v38 }
 0x4ff   : > { %v10193_v25 = vpop.f32.mrf.mxu0 }
 0x500   : > { %v3825_v24 = vpop.permute.xlu0 %3824  ;;  %v4683_v62 = vpop.permute.xlu1 %4682  ;;  %v5149_v10 = vld [vmem:[#allocation2 + $0x1c] sm:$0xff] }
 0x501   : > { %v11429_v36 = vld [vmem:[#allocation2 + $0xc] ss:$20 sps:$4 sm:$0xff]   ;;  %3859 = vst.msk [vmem:[#allocation2 + $0x58] sm:$0xf] %vm2133_vm9, %v3825_v24  ;;  %4718 = vst.msk [vmem:[#allocation2 + $0x48] sm:$0xf] %vm2133_vm9, %v4683_v62  ;;  %v9174_v12 = vcombine.low %v5146_v41, %v5149_v10  ;;  %v10194_v33 = vpop.f32.mrf.mxu0 }
 0x502   : > { %5788 = vmatprep.mubr.bf16.mxu1 %v11429_v36  ;;  %v14134_v56 = vadd.f32 %v10194_v33, %v10193_v25 }
 0x503   : > { %5789 = vmatmul.mubr.bf16.vlgmr.msra.gmra.mxu1 %v9174_v12  ;;  %v10196_v53 = vpop.f32.mrf.mxu0 }
 0x504   : > { %v4685_v22 = vpop.permute.xlu0 %4684  ;;  %v3827_v13 = vpop.permute.xlu1 %3826  ;;  %v11432_v47 = vld [vmem:[#allocation2 + $0x30] ss:$20 sps:$4 sm:$0xff]  }
 0x505   : > { %4719 = vst.msk [vmem:[#allocation2 + $0x5c] sm:$0xf] %vm2133_vm9, %v4685_v22  ;;  %3860 = vst.msk [vmem:[#allocation2 + $0x6c] sm:$0xf] %vm2133_vm9, %v3827_v13  ;;  %v10197_v48 = vpop.f32.mrf.mxu0 }
 0x506   : > { %v14138_v59 = vadd.f32 %v10197_v48, %v10196_v53  ;;  %v11454_v53 = vld [vmem:[%s15021_s8] sm:$0xff]   ;;  %v11455_v48 = vld [vmem:[%s15021_s8 + $0x18] sm:$0xff]  }
 0x507   : > { %v10199_v46 = vpop.f32.mrf.mxu0  ;;  %10717 = vmatprep.mubr.msk.bf16.mxu0 %vm5963_vm12, %v11455_v48 }
 0x508   : > { %v3829_v16 = vpop.permute.xlu0 %3828  ;;  %v4687_v49 = vpop.permute.xlu1 %4686  ;;  %v11434_v9 = vld [vmem:[#allocation2 + $0x34] ss:$20 sps:$4 sm:$0xff]  }
 0x509   : > { %3861 = vst.msk [vmem:[#allocation2 + $0x80] sm:$0xf] %vm2133_vm9, %v3829_v16  ;;  %4720 = vst.msk [vmem:[#allocation2 + $0x70] sm:$0xf] %vm2133_vm9, %v4687_v49  ;;  %5796 = vmatprep.mubr.bf16.mxu1 %v11434_v9  ;;  %v10200_v6 = vpop.f32.mrf.mxu0 }
 0x50a   : > { %v14142_v51 = vadd.f32 %v10200_v6, %v10199_v46 }
 0x50b   : > { %5797 = vmatmul.mubr.bf16.gmra.mxu1 %v11432_v47  ;;  %v10202_v54 = vpop.f32.mrf.mxu0 }
 0x50c   : > { %v4689_v23 = vpop.permute.xlu0 %4688  ;;  %v3831_v3 = vpop.permute.xlu1 %3830  ;;  %v11436_v20 = vld [vmem:[#allocation2 + $0x58] ss:$20 sps:$4 sm:$0xff]  }
 0x50d   : > { %4721 = vst.msk [vmem:[#allocation2 + $0x84] sm:$0xf] %vm2133_vm9, %v4689_v23  ;;  %3862 = vst.msk [vmem:[#allocation2 + $0x94] sm:$0xf] %vm2133_vm9, %v3831_v3  ;;  %v10203_v52 = vpop.f32.mrf.mxu0 }
 0x50e   : > { %v14146_v55 = vadd.f32 %v10203_v52, %v10202_v54 }
 0x50f   : > { %v10205_v32 = vpop.f32.mrf.mxu0 }
 0x510   : > { %v3833_v30 = vpop.permute.xlu0 %3832  ;;  %v4691_v17 = vpop.permute.xlu1 %4690  ;;  %v11438_v58 = vld [vmem:[#allocation2 + $0x5c] ss:$20 sps:$4 sm:$0xff]  }
 0x511   : > { %3863 = vst.msk [vmem:[#allocation2 + $0xa8] sm:$0xf] %vm2133_vm9, %v3833_v30  ;;  %4722 = vst.msk [vmem:[#allocation2 + $0x98] sm:$0xf] %vm2133_vm9, %v4691_v17  ;;  %5804 = vmatprep.mubr.bf16.mxu1 %v11438_v58  ;;  %v10206_v11 = vpop.f32.mrf.mxu0 }
 0x512   : > { %v14150_v2 = vadd.f32 %v10206_v11, %v10205_v32 }
 0x513   : > { %5805 = vmatmul.mubr.bf16.gmra.mxu1 %v11436_v20  ;;  %v10208_v8 = vpop.f32.mrf.mxu0 }
 0x514   : > { %v4693_v43 = vpop.permute.xlu0 %4692  ;;  %v3835_v44 = vpop.permute.xlu1 %3834  ;;  %v11440_v31 = vld [vmem:[#allocation2 + $0x80] ss:$20 sps:$4 sm:$0xff]  }
 0x515   : > { %4723 = vst.msk [vmem:[#allocation2 + $0xac] sm:$0xf] %vm2133_vm9, %v4693_v43  ;;  %3864 = vst.msk [vmem:[#allocation2 + $0xbc] sm:$0xf] %vm2133_vm9, %v3835_v44  ;;  %v10209_v14 = vpop.f32.mrf.mxu0 }
 0x516   : > { %v14154_v63 = vadd.f32 %v10209_v14, %v10208_v8  ;;  %v14192_v8 = vld [vmem:[%s15020_s7] ss:$0 sm:$0xff] }
 0x517   : > { %v10211_v50 = vpop.f32.mrf.mxu0 }
 0x518   : > { %v3837_v34 = vpop.permute.xlu0 %3836  ;;  %v4695_v39 = vpop.permute.xlu1 %4694  ;;  %v11442_v40 = vld [vmem:[#allocation2 + $0x84] ss:$20 sps:$4 sm:$0xff]  }
 0x519   : > { %3865 = vst.msk [vmem:[#allocation2 + $0xd0] sm:$0xf] %vm2133_vm9, %v3837_v34  ;;  %4724 = vst.msk [vmem:[#allocation2 + $0xc0] sm:$0xf] %vm2133_vm9, %v4695_v39  ;;  %5812 = vmatprep.mubr.bf16.mxu1 %v11442_v40  ;;  %v10212_v15 = vpop.f32.mrf.mxu0  ;;  %v5703_v39 = vadd.f32 %v14103_v45, %v14192_v8 }
 0x51b   : > { %5813 = vmatmul.mubr.bf16.gmra.mxu1 %v11440_v31 }
 0x51c   : > { %v4697_v7 = vpop.permute.xlu0 %4696  ;;  %v3839_v0 = vpop.permute.xlu1 %3838  ;;  %v11444_v61 = vld [vmem:[#allocation2 + $0xa8] ss:$20 sps:$4 sm:$0xff]  }
 0x51d   : > { %4725 = vst.msk [vmem:[#allocation2 + $0xd4] sm:$0xf] %vm2133_vm9, %v4697_v7  ;;  %3866 = vst.msk [vmem:[#allocation2 + $0xe4] sm:$0xf] %vm2133_vm9, %v3839_v0  ;;  %v5706_v7 = vadd.f32 %v14110_v57, %v14192_v8 }
 0x520   : > { %v3841_v18 = vpop.permute.xlu0 %3840  ;;  %v4699_v27 = vpop.permute.xlu1 %4698  ;;  %v11446_v35 = vld [vmem:[#allocation2 + $0xac] ss:$20 sps:$4 sm:$0xff]  }
 0x521   : > { %3867 = vst.msk [vmem:[#allocation2 + $0xf8] sm:$0x1] %vm2146_vm10, %v3841_v18  ;;  %5820 = vmatprep.mubr.bf16.mxu1 %v11446_v35 }
 0x522   : > { %4726 = vst.msk [vmem:[#allocation2 + $0xe8] sm:$0xf] %vm2133_vm9, %v4699_v27 }
 0x523   : > { %5821 = vmatmul.mubr.bf16.gmra.mxu1 %v11444_v61 }
 0x524   : > { %v4701_v26 = vpop.permute.xlu1 %4700  ;;  %v11448_v5 = vld [vmem:[#allocation2 + $0xd0] ss:$20 sps:$4 sm:$0xff]  }
 0x525   : > { %4727 = vst.msk [vmem:[#allocation2 + $0xfc] sm:$0x1] %vm2146_vm10, %v4701_v26  ;;  %v5711_v26 = vadd.f32 %v14113_v28, %v14192_v8  ;;  %v5719_v28 = vadd.f32 %v14121_v21, %v14192_v8  ;;  %v5727_v21 = vadd.f32 %v14130_v1, %v14192_v8  ;;  %v5735_v1 = vadd.f32 %v14138_v59, %v14192_v8 }
 0x526   : > { %v5743_v59 = vadd.f32 %v14146_v55, %v14192_v8  ;;  %v5751_v55 = vadd.f32 %v14154_v63, %v14192_v8 }
 0x529   : > { %v11450_v19 = vld [vmem:[#allocation2 + $0xd4] ss:$20 sps:$4 sm:$0xff]  }
 0x52a   : > { %5828 = vmatprep.mubr.bf16.mxu1 %v11450_v19 }
 0x52b   : > { %5829 = vmatmul.mubr.bf16.gmra.mxu1 %v11448_v5 }
 0x52c   : > { %v5182_v29 = vld [vmem:[#allocation2 + $0xf8] sm:$0x11] }
 0x52d   : > { %v9205_v38 = vcombine.high %v5182_v29, %v5182_v29  ;;  %v9204_v4 = vcombine.low %v5182_v29, %v5182_v29 }
 0x52f   : > { %5836 = vmatprep.mubr.bf16.mxu1 %v9205_v38 }
 0x533   : > { %5837 = vmatmul.mubr.bf16.gmra.mxu1 %v9204_v4 }
 0x534   : > { %10681 = vmatprep.mubr.msk.bf16.mxu1 %vm5963_vm12, %v11454_v53 }
 0x586   : > { %v5878_v24 = vpop.f32.mrf.mxu0 }
 0x588   : > { %v10641_v62 = vpop.f32.mrf.mxu0 }
 0x58a   : > { %v5881_v41 = vpop.f32.mrf.mxu0 }
 0x58c   : > { %v10642_v10 = vpop.f32.mrf.mxu0 }
 0x58d   : > { %v5714_v10 = vadd.f32 %v14118_v60, %v14192_v8  ;;  %v5722_v60 = vadd.f32 %v14126_v42, %v14192_v8  ;;  %v5730_v42 = vadd.f32 %v14134_v56, %v14192_v8  ;;  %v5738_v56 = vadd.f32 %v14142_v51, %v14192_v8 }
 0x58e   : > { %v5886_v36 = vpop.f32.mrf.mxu0  ;;  %v5746_v51 = vadd.f32 %v14150_v2, %v14192_v8  ;;  %v11459_v8 = vld [vmem:[%s15021_s8 + $0x30] sm:$0xff]  }
 0x590   : > { %v10645_v25 = vpop.f32.mrf.mxu0 }
 0x592   : > { %v5889_v12 = vpop.f32.mrf.mxu0 }
 0x594   : > { %v10646_v33 = vpop.f32.mrf.mxu0 }
 0x596   : > { %v14163_v22 = vpop.f32.mrf.mxu0 }
 0x598   : > { %v10649_v13 = vpop.f32.mrf.mxu0 }
 0x59a   : > { %v14171_v16 = vpop.f32.mrf.mxu0 }
 0x59c   : > { %v10650_v49 = vpop.f32.mrf.mxu0 }
 0x59e   : > { %v14175_v47 = vpop.f32.mrf.mxu0 }
 0x5a0   : > { %v10653_v9 = vpop.f32.mrf.mxu0 }
 0x5a2   : > { %v14177_v46 = vpop.f32.mrf.mxu0 }
 0x5a4   : > { %v10654_v6 = vpop.f32.mrf.mxu0 }
 0x5a6   : > { %v14179_v23 = vpop.f32.mrf.mxu0 }
 0x5a8   : > { %v10657_v3 = vpop.f32.mrf.mxu0 }
 0x5aa   : > { %v14181_v54 = vpop.f32.mrf.mxu0 }
 0x5ac   : > { %v10658_v52 = vpop.f32.mrf.mxu0 }
 0x5ae   : > { %v14183_v30 = vpop.f32.mrf.mxu0 }
 0x5b0   : > { %v10661_v17 = vpop.f32.mrf.mxu0 }
 0x5b2   : > { %v14185_v20 = vpop.f32.mrf.mxu0 }
 0x5b4   : > { %v10662_v58 = vpop.f32.mrf.mxu0 }
 0x5b6   : > { %v14187_v32 = vpop.f32.mrf.mxu0 }
 0x5b8   : > { %v10665_v11 = vpop.f32.mrf.mxu0 }
 0x5ba   : > { %v5929_v43 = vpop.f32.mrf.mxu0 }
 0x5bc   : > { %v10666_v44 = vpop.f32.mrf.mxu0 }
 0x5c3   : > { %v10230_v14 = vpop.f32.mrf.mxu1 }
 0x5c5   : > { %v10231_v34 = vpop.f32.mrf.mxu1 }
 0x5c6   : > { %v10232_v31 = vadd.f32 %v10231_v34, %v10230_v14 }
 0x5c7   : > { %v10233_v40 = vpop.f32.mrf.mxu1 }
 0x5c8   : > { %v5791_v50 = vadd.f32 %v10232_v31, %v5703_v39 }
 0x5c9   : > { %v10234_v15 = vpop.f32.mrf.mxu1 }
 0x5ca   : > { %v10235_v0 = vadd.f32 %v10234_v15, %v10233_v40  ;;  %v5879_v27 = vadd.f32 %v5878_v24, %v5791_v50 }
 0x5cb   : > { %v10236_v18 = vpop.f32.mrf.mxu1 }
 0x5cc   : > { %v5794_v61 = vadd.f32 %v10235_v0, %v5706_v7  ;;  %v5932_v38 = vmax.f32 %v5879_v27, 0.0 }
 0x5cd   : > { %v10237_v35 = vpop.f32.mrf.mxu1 }
 0x5ce   : > { %v5882_v5 = vadd.f32 %v5881_v41, %v5794_v61  ;;  %v10238_v19 = vadd.f32 %v10237_v35, %v10236_v18 }
 0x5cf   : > { %v10239_v29 = vpop.f32.mrf.mxu1 }
 0x5d0   : > { %v5933_v45 = vmax.f32 %v5882_v5, 0.0  ;;  %v5799_v4 = vadd.f32 %v10238_v19, %v5711_v26 }
 0x5d1   : > { %v10240_v62 = vpop.f32.mrf.mxu1 }
 0x5d2   : > { %v14202_v25 = vpack.c.bf16 %v5933_v45, %v5932_v38  ;;  %v10241_v57 = vadd.f32 %v10240_v62, %v10239_v29  ;;  %v5887_v24 = vadd.f32 %v5886_v36, %v5799_v4 }
 0x5d3   : > { %v10242_v33 = vpop.f32.mrf.mxu1 }
 0x5d4   : > { %v5802_v13 = vadd.f32 %v10241_v57, %v5714_v10  ;;  %v5934_v9 = vmax.f32 %v5887_v24, 0.0 }
 0x5d5   : > { %v10243_v53 = vpop.f32.mrf.mxu1 }
 0x5d6   : > { %v5890_v41 = vadd.f32 %v5889_v12, %v5802_v13  ;;  %v10244_v48 = vadd.f32 %v10243_v53, %v10242_v33 }
 0x5d7   : > { %v10245_v49 = vpop.f32.mrf.mxu1 }
 0x5d8   : > { %v5935_v6 = vmax.f32 %v5890_v41, 0.0  ;;  %v5807_v3 = vadd.f32 %v10244_v48, %v5719_v28 }
 0x5d9   : > { %v10246_v52 = vpop.f32.mrf.mxu1 }
 0x5da   : > { %v14208_v17 = vpack.c.bf16 %v5935_v6, %v5934_v9  ;;  %v10247_v58 = vadd.f32 %v10246_v52, %v10245_v49  ;;  %v5895_v36 = vadd.f32 %v14163_v22, %v5807_v3 }
 0x5db   : > { %v10248_v11 = vpop.f32.mrf.mxu1 }
 0x5dc   : > { %v5810_v43 = vadd.f32 %v10247_v58, %v5722_v60  ;;  %v5936_v39 = vmax.f32 %v5895_v36, 0.0 }
 0x5dd   : > { %v10249_v44 = vpop.f32.mrf.mxu1 }
 0x5de   : > { %v5898_v12 = vadd.f32 %v14171_v16, %v5810_v43  ;;  %v10250_v14 = vadd.f32 %v10249_v44, %v10248_v11 }
 0x5df   : > { %v10251_v34 = vpop.f32.mrf.mxu1 }
 0x5e0   : > { %v5937_v31 = vmax.f32 %v5898_v12, 0.0  ;;  %v5815_v40 = vadd.f32 %v10250_v14, %v5727_v21  ;;  %v11460_v12 = vld [vmem:[%s15021_s8 + $0x14] ss:$0 sps:$4 sm:$0x11]  }
 0x5e1   : > { %v10252_v50 = vpop.f32.mrf.mxu1  ;;  %v11461_v14 = vld [vmem:[%s15021_s8 + $0x38] ss:$0 sps:$4 sm:$0x11]  }
 0x5e2   : > { %v14216_v15 = vpack.c.bf16 %v5937_v31, %v5936_v39  ;;  %v10253_v7 = vadd.f32 %v10252_v50, %v10251_v34  ;;  %v5903_v0 = vadd.f32 %v14175_v47, %v5815_v40  ;;  %v11462_v34 = vld [vmem:[%s15021_s8 + $0x24] sm:$0xff]   ;;  %v11463_v31 = vld [vmem:[%s15021_s8 + $0x2c] ss:$0 sps:$4 sm:$0x11]   ;;  %v11466_v50 = vld [vmem:[%s15021_s8 + $0x3c] sm:$0xff]  }
 0x5e3   : > { %v10254_v22 = vpop.f32.mrf.mxu1  ;;  %v11464_v39 = vld [vmem:[%s15021_s8 + $0x48] sm:$0xff]   ;;  %v11465_v40 = vld [vmem:[%s15021_s8 + $0x50] ss:$0 sps:$4 sm:$0x11]  }
 0x5e4   : > { %v5818_v18 = vadd.f32 %v10253_v7, %v5730_v42  ;;  %v5938_v26 = vmax.f32 %v5903_v0, 0.0  ;;  %v11467_v42 = vld [vmem:[%s15021_s8 + $0x44] ss:$0 sps:$4 sm:$0x11]   ;;  %v11468_v7 = vld [vmem:[%s15021_s8 + $0x54] sm:$0xff]  }
 0x5e5   : > { %v10255_v27 = vpop.f32.mrf.mxu1  ;;  %v11471_v0 = vld [vmem:[%s15021_s8 + $0x68] ss:$0 sps:$4 sm:$0x11]  }
 0x5e6   : > { %v5906_v16 = vadd.f32 %v14177_v46, %v5818_v18  ;;  %v10256_v61 = vadd.f32 %v10255_v27, %v10254_v22  ;;  %v11470_v22 = vld [vmem:[%s15021_s8 + $0x60] sm:$0xff]   ;;  %v11469_v18 = vld [vmem:[%s15021_s8 + $0x5c] ss:$0 sps:$4 sm:$0x11]  }
 0x5e7   : > { %v10257_v35 = vpop.f32.mrf.mxu1 }
 0x5e8   : > { %v5939_v5 = vmax.f32 %v5906_v16, 0.0  ;;  %v5823_v19 = vadd.f32 %v10256_v61, %v5735_v1  ;;  %v11474_v16 = vld [vmem:[%s15022_s9 + $0x70] sm:$0xff]  }
 0x5e9   : > { %v10258_v29 = vpop.f32.mrf.mxu1 }
 0x5ea   : > { %v14224_v38 = vpack.c.bf16 %v5939_v5, %v5938_v26  ;;  %v10259_v45 = vadd.f32 %v10258_v29, %v10257_v35  ;;  %v5911_v4 = vadd.f32 %v14179_v23, %v5823_v19  ;;  %v11475_v26 = vld [vmem:[%s15022_s9 + $0x30] sm:$0xff]   ;;  %v11476_v29 = vld [vmem:[%s15022_s9 + $0x68] sm:$0xff]  }
 0x5eb   : > { %v10260_v47 = vpop.f32.mrf.mxu1 }
 0x5ec   : > { %v5826_v62 = vadd.f32 %v10259_v45, %v5738_v56  ;;  %v5940_v24 = vmax.f32 %v5911_v4, 0.0  ;;  %v11477_v56 = vld [vmem:[%s15022_s9 + $0x28] sm:$0xff]   ;;  %v11478_v45 = vld [vmem:[%s15022_s9 + $0x60] sm:$0xff]  }
 0x5ed   : > { %v10261_v10 = vpop.f32.mrf.mxu1 }
 0x5ee   : > { %v5914_v46 = vadd.f32 %v14181_v54, %v5826_v62  ;;  %v10262_v57 = vadd.f32 %v10261_v10, %v10260_v47  ;;  %v11479_v10 = vld [vmem:[%s15022_s9 + $0x20] sm:$0xff]  }
 0x5ef   : > { %v10263_v33 = vpop.f32.mrf.mxu1 }
 0x5f0   : > { %v5941_v13 = vmax.f32 %v5914_v46, 0.0  ;;  %v5831_v53 = vadd.f32 %v10262_v57, %v5743_v59  ;;  %v11480_v57 = vld [vmem:[%s15022_s9 + $0x58] sm:$0xff]  }
 0x5f1   : > { %v10264_v28 = vpop.f32.mrf.mxu1 }
 0x5f2   : > { %v14232_v41 = vpack.c.bf16 %v5941_v13, %v5940_v24  ;;  %v10265_v48 = vadd.f32 %v10264_v28, %v10263_v33  ;;  %v5919_v49 = vadd.f32 %v14183_v30, %v5831_v53  ;;  %v11456_v30 = vld [vmem:[%s15021_s8 + $0x8] ss:$0 sps:$4 sm:$0x11]  }
 0x5f3   : > { %v10266_v23 = vpop.f32.mrf.mxu1 }
 0x5f4   : > { %v5834_v9 = vadd.f32 %v10265_v48, %v5746_v51  ;;  %v5942_v60 = vmax.f32 %v5919_v49, 0.0  ;;  %v11481_v48 = vld [vmem:[%s15022_s9 + $0x18] sm:$0xff]   ;;  %v11483_v49 = vld [vmem:[%s15022_s9 + $0x10] sm:$0xff]  }
 0x5f5   : > { %v10267_v6 = vpop.f32.mrf.mxu1 }
 0x5f6   : > { %v5922_v54 = vadd.f32 %v14185_v20, %v5834_v9  ;;  %v10268_v3 = vadd.f32 %v10267_v6, %v10266_v23  ;;  %v11457_v20 = vld [vmem:[%s15021_s8 + $0x20] ss:$0 sps:$4 sm:$0x11]   ;;  %v11482_v23 = vld [vmem:[%s15022_s9 + $0x50] sm:$0xff]   ;;  %v11484_v9 = vld [vmem:[%s15022_s9 + $0x48] sm:$0xff]  }
 0x5f7   : > { %v10269_v52 = vpop.f32.mrf.mxu1  ;;  %v11485_v6 = vld [vmem:[%s15022_s9 + $0x8] sm:$0xff]  }
 0x5f8   : > { %v5943_v58 = vmax.f32 %v5922_v54, 0.0  ;;  %v5839_v11 = vadd.f32 %v10268_v3, %v5751_v55  ;;  %v11486_v55 = vld [vmem:[%s15022_s9 + $0x40] sm:$0xff]  }
 0x5f9   : > { %v10270_v36 = vpop.f32.mrf.mxu1 }
 0x5fa   : > { %v14238_v2 = vpack.c.bf16 %v5943_v58, %v5942_v60  ;;  %v5927_v43 = vadd.f32 %v14187_v32, %v5839_v11  ;;  %v11458_v32 = vld [vmem:[%s15021_s8 + $0xc] sm:$0xff]   ;;  %v11487_v60 = vld [vmem:[%s15022_s9] sm:$0xff]  }
 0x5fc   : > { %v5944_v44 = vmax.f32 %v5927_v43, 0.0 }
 0x5fe   : > { %v14241_v21 = vpack.c.bf16 %v5944_v44, %v5944_v44 }
 0x600   : > { %10944 = vmatprep.subr.msk.bf16.mxu1 %vm1455_vm6, %v14241_v21  ;;  %10946 = vmatprep.subr.msk.bf16.mxu0 %vm1455_vm6, %v14241_v21  ;;  %v14249_v63 = vsel %vm1455_vm6, %v14241_v21, 0 }
 0x601   : > { %10668 = vmatpush3.bf16.msra.mxu1 %v14249_v63  ;;  %10704 = vmatpush3.bf16.msra.mxu0 %v14249_v63 }
 0x602   : > { %10669 = vmatprep.subr.bf16.mxu1 %v14238_v2  ;;  %10705 = vmatprep.subr.bf16.mxu0 %v14238_v2 }
 0x605   : > { %10670 = vmatpush3.bf16.msra.mxu1 %v14238_v2  ;;  %10706 = vmatpush3.bf16.msra.mxu0 %v14238_v2 }
 0x606   : > { %10671 = vmatprep.subr.bf16.mxu1 %v14232_v41  ;;  %10707 = vmatprep.subr.bf16.mxu0 %v14232_v41 }
 0x609   : > { %10672 = vmatpush3.bf16.msra.mxu1 %v14232_v41  ;;  %10708 = vmatpush3.bf16.msra.mxu0 %v14232_v41 }
 0x60a   : > { %10673 = vmatprep.subr.bf16.mxu1 %v14224_v38  ;;  %10709 = vmatprep.subr.bf16.mxu0 %v14224_v38 }
 0x60d   : > { %10674 = vmatpush3.bf16.msra.mxu1 %v14224_v38  ;;  %10710 = vmatpush3.bf16.msra.mxu0 %v14224_v38 }
 0x60e   : > { %10675 = vmatprep.subr.bf16.mxu1 %v14216_v15  ;;  %10711 = vmatprep.subr.bf16.mxu0 %v14216_v15 }
 0x611   : > { %10676 = vmatpush3.bf16.msra.mxu1 %v14216_v15  ;;  %10712 = vmatpush3.bf16.msra.mxu0 %v14216_v15 }
 0x612   : > { %10677 = vmatprep.subr.bf16.mxu1 %v14208_v17  ;;  %10713 = vmatprep.subr.bf16.mxu0 %v14208_v17 }
 0x615   : > { %10678 = vmatpush3.bf16.msra.mxu1 %v14208_v17  ;;  %10714 = vmatpush3.bf16.msra.mxu0 %v14208_v17 }
 0x616   : > { %10679 = vmatprep.subr.bf16.mxu1 %v14202_v25  ;;  %10715 = vmatprep.subr.bf16.mxu0 %v14202_v25 }
 0x619   : > { %10680 = vmatpush3.bf16.msra.mxu1 %v14202_v25  ;;  %10716 = vmatpush3.bf16.msra.mxu0 %v14202_v25 }
 0x61a   : > { %10945 = vmatprep.subr.msk.bf16.mxu1 %vm1455_vm6, %v14241_v21  ;;  %10948 = vmatprep.subr.msk.bf16.mxu0 %vm1455_vm6, %v14241_v21 }
 0x61c   : > { %10682 = vmatmul.mubr.msk.bf16.vlgmr.msra.gmra.mxu1 %vm5963_vm12, %v11456_v30  ;;  %10718 = vmatmul.mubr.msk.bf16.vlgmr.msra.gmra.mxu0 %vm5963_vm12, %v11457_v20  ;;  %v11491_v20 = vld [vmem:[%s15022_s9 + $0xf8] sm:$0xff]  }
 0x61d   : > { %10686 = vmatpush3.bf16.msra.mxu1 %v14249_v63  ;;  %10740 = vmatpush3.bf16.msra.mxu0 %v14249_v63 }
 0x61e   : > { %10687 = vmatprep.subr.bf16.mxu1 %v14238_v2  ;;  %10741 = vmatprep.subr.bf16.mxu0 %v14238_v2 }
 0x61f   : > { %10699 = vmatprep.mubr.msk.bf16.mxu1 %vm5963_vm12, %v11458_v32  ;;  %10753 = vmatprep.mubr.msk.bf16.mxu0 %vm5963_vm12, %v11459_v8  ;;  %v11492_v32 = vld [vmem:[%s15022_s9 + $0xb8] sm:$0xff]   ;;  %v11493_v8 = vld [vmem:[%s15022_s9 + $0xf0] sm:$0xff]  }
 0x621   : > { %10688 = vmatpush3.bf16.msra.mxu1 %v14238_v2  ;;  %10742 = vmatpush3.bf16.msra.mxu0 %v14238_v2 }
 0x622   : > { %10689 = vmatprep.subr.bf16.mxu1 %v14232_v41  ;;  %10743 = vmatprep.subr.bf16.mxu0 %v14232_v41 }
 0x625   : > { %10690 = vmatpush3.bf16.msra.mxu1 %v14232_v41  ;;  %10744 = vmatpush3.bf16.msra.mxu0 %v14232_v41 }
 0x626   : > { %10691 = vmatprep.subr.bf16.mxu1 %v14224_v38  ;;  %10745 = vmatprep.subr.bf16.mxu0 %v14224_v38 }
 0x629   : > { %10692 = vmatpush3.bf16.msra.mxu1 %v14224_v38  ;;  %10746 = vmatpush3.bf16.msra.mxu0 %v14224_v38 }
 0x62a   : > { %10693 = vmatprep.subr.bf16.mxu1 %v14216_v15  ;;  %10747 = vmatprep.subr.bf16.mxu0 %v14216_v15 }
 0x62d   : > { %10694 = vmatpush3.bf16.msra.mxu1 %v14216_v15  ;;  %10748 = vmatpush3.bf16.msra.mxu0 %v14216_v15 }
 0x62e   : > { %10695 = vmatprep.subr.bf16.mxu1 %v14208_v17  ;;  %10749 = vmatprep.subr.bf16.mxu0 %v14208_v17 }
 0x631   : > { %10696 = vmatpush3.bf16.msra.mxu1 %v14208_v17  ;;  %10750 = vmatpush3.bf16.msra.mxu0 %v14208_v17 }
 0x632   : > { %10697 = vmatprep.subr.bf16.mxu1 %v14202_v25  ;;  %10751 = vmatprep.subr.bf16.mxu0 %v14202_v25 }
 0x635   : > { %10698 = vmatpush3.bf16.msra.mxu1 %v14202_v25  ;;  %10752 = vmatpush3.bf16.msra.mxu0 %v14202_v25 }
 0x636   : > { %10947 = vmatprep.subr.msk.bf16.mxu1 %vm1455_vm6, %v14241_v21  ;;  %10950 = vmatprep.subr.msk.bf16.mxu0 %vm1455_vm6, %v14241_v21 }
 0x638   : > { %10700 = vmatmul.mubr.msk.bf16.vlgmr.msra.gmra.mxu1 %vm5963_vm12, %v11460_v12  ;;  %10754 = vmatmul.mubr.msk.bf16.vlgmr.msra.gmra.mxu0 %vm5963_vm12, %v11461_v14  ;;  %v11494_v14 = vld [vmem:[%s15022_s9 + $0xb0] sm:$0xff]  }
 0x639   : > { %10722 = vmatpush3.bf16.msra.mxu1 %v14249_v63  ;;  %10776 = vmatpush3.bf16.msra.mxu0 %v14249_v63 }
 0x63a   : > { %10723 = vmatprep.subr.bf16.mxu1 %v14238_v2  ;;  %10777 = vmatprep.subr.bf16.mxu0 %v14238_v2 }
 0x63b   : > { %10735 = vmatprep.mubr.msk.bf16.mxu1 %vm5963_vm12, %v11462_v34  ;;  %10789 = vmatprep.mubr.msk.bf16.mxu0 %vm5963_vm12, %v11464_v39  ;;  %v11495_v34 = vld [vmem:[%s15022_s9 + $0xe8] sm:$0xff]  }
 0x63c   : > { %v11496_v39 = vld [vmem:[%s15022_s9 + $0xa8] sm:$0xff]  }
 0x63d   : > { %10724 = vmatpush3.bf16.msra.mxu1 %v14238_v2  ;;  %10778 = vmatpush3.bf16.msra.mxu0 %v14238_v2 }
 0x63e   : > { %10725 = vmatprep.subr.bf16.mxu1 %v14232_v41  ;;  %10779 = vmatprep.subr.bf16.mxu0 %v14232_v41 }
 0x641   : > { %10726 = vmatpush3.bf16.msra.mxu1 %v14232_v41  ;;  %10780 = vmatpush3.bf16.msra.mxu0 %v14232_v41 }
 0x642   : > { %10727 = vmatprep.subr.bf16.mxu1 %v14224_v38  ;;  %10781 = vmatprep.subr.bf16.mxu0 %v14224_v38 }
 0x645   : > { %10728 = vmatpush3.bf16.msra.mxu1 %v14224_v38  ;;  %10782 = vmatpush3.bf16.msra.mxu0 %v14224_v38 }
 0x646   : > { %10729 = vmatprep.subr.bf16.mxu1 %v14216_v15  ;;  %10783 = vmatprep.subr.bf16.mxu0 %v14216_v15 }
 0x649   : > { %10730 = vmatpush3.bf16.msra.mxu1 %v14216_v15  ;;  %10784 = vmatpush3.bf16.msra.mxu0 %v14216_v15 }
 0x64a   : > { %10731 = vmatprep.subr.bf16.mxu1 %v14208_v17  ;;  %10785 = vmatprep.subr.bf16.mxu0 %v14208_v17 }
 0x64d   : > { %10732 = vmatpush3.bf16.msra.mxu1 %v14208_v17  ;;  %10786 = vmatpush3.bf16.msra.mxu0 %v14208_v17 }
 0x64e   : > { %10733 = vmatprep.subr.bf16.mxu1 %v14202_v25  ;;  %10787 = vmatprep.subr.bf16.mxu0 %v14202_v25 }
 0x651   : > { %10734 = vmatpush3.bf16.msra.mxu1 %v14202_v25  ;;  %10788 = vmatpush3.bf16.msra.mxu0 %v14202_v25 }
 0x652   : > { %10949 = vmatprep.subr.msk.bf16.mxu1 %vm1455_vm6, %v14241_v21  ;;  %10952 = vmatprep.subr.msk.bf16.mxu0 %vm1455_vm6, %v14241_v21 }
 0x654   : > { %10736 = vmatmul.mubr.msk.bf16.vlgmr.msra.gmra.mxu1 %vm5963_vm12, %v11463_v31  ;;  %10790 = vmatmul.mubr.msk.bf16.vlgmr.msra.gmra.mxu0 %vm5963_vm12, %v11465_v40  ;;  %v11497_v40 = vld [vmem:[%s15022_s9 + $0xe0] sm:$0xff]  }
 0x655   : > { %10758 = vmatpush3.bf16.msra.mxu1 %v14249_v63  ;;  %10812 = vmatpush3.bf16.msra.mxu0 %v14249_v63 }
 0x656   : > { %10759 = vmatprep.subr.bf16.mxu1 %v14238_v2  ;;  %10813 = vmatprep.subr.bf16.mxu0 %v14238_v2 }
 0x657   : > { %10771 = vmatprep.mubr.msk.bf16.mxu1 %vm5963_vm12, %v11466_v50  ;;  %10825 = vmatprep.mubr.msk.bf16.mxu0 %vm5963_vm12, %v11470_v22  ;;  %v11498_v22 = vld [vmem:[%s15022_s9 + $0xa0] sm:$0xff]  }
 0x659   : > { %10760 = vmatpush3.bf16.msra.mxu1 %v14238_v2  ;;  %10814 = vmatpush3.bf16.msra.mxu0 %v14238_v2 }
 0x65a   : > { %10761 = vmatprep.subr.bf16.mxu1 %v14232_v41  ;;  %10815 = vmatprep.subr.bf16.mxu0 %v14232_v41 }
 0x65d   : > { %10762 = vmatpush3.bf16.msra.mxu1 %v14232_v41  ;;  %10816 = vmatpush3.bf16.msra.mxu0 %v14232_v41 }
 0x65e   : > { %10763 = vmatprep.subr.bf16.mxu1 %v14224_v38  ;;  %10817 = vmatprep.subr.bf16.mxu0 %v14224_v38 }
 0x661   : > { %10764 = vmatpush3.bf16.msra.mxu1 %v14224_v38  ;;  %10818 = vmatpush3.bf16.msra.mxu0 %v14224_v38 }
 0x662   : > { %10765 = vmatprep.subr.bf16.mxu1 %v14216_v15  ;;  %10819 = vmatprep.subr.bf16.mxu0 %v14216_v15 }
 0x665   : > { %10766 = vmatpush3.bf16.msra.mxu1 %v14216_v15  ;;  %10820 = vmatpush3.bf16.msra.mxu0 %v14216_v15 }
 0x666   : > { %10767 = vmatprep.subr.bf16.mxu1 %v14208_v17  ;;  %10821 = vmatprep.subr.bf16.mxu0 %v14208_v17 }
 0x669   : > { %10768 = vmatpush3.bf16.msra.mxu1 %v14208_v17  ;;  %10822 = vmatpush3.bf16.msra.mxu0 %v14208_v17 }
 0x66a   : > { %10769 = vmatprep.subr.bf16.mxu1 %v14202_v25  ;;  %10823 = vmatprep.subr.bf16.mxu0 %v14202_v25 }
 0x66d   : > { %10770 = vmatpush3.bf16.msra.mxu1 %v14202_v25  ;;  %10824 = vmatpush3.bf16.msra.mxu0 %v14202_v25 }
 0x66e   : > { %10951 = vmatprep.subr.msk.bf16.mxu1 %vm1455_vm6, %v14241_v21  ;;  %10392 = vmatprep.subr.bf16.mxu0 %v11491_v20 }
 0x670   : > { %10772 = vmatmul.mubr.msk.bf16.vlgmr.msra.gmra.mxu1 %vm5963_vm12, %v11467_v42  ;;  %10826 = vmatmul.mubr.msk.bf16.vlgmr.msra.gmra.mxu0 %vm5963_vm12, %v11471_v0 }
 0x671   : > { %10794 = vmatpush3.bf16.msra.mxu1 %v14249_v63  ;;  %10807 = vmatprep.mubr.msk.bf16.mxu1 %vm5963_vm12, %v11468_v7 }
 0x672   : > { %10795 = vmatprep.subr.bf16.mxu1 %v14238_v2  ;;  %10393 = vmatpush3.bf16.msra.mxu0 %v11492_v32 }
 0x673   : > { %10394 = vmatprep.subr.bf16.mxu0 %v11493_v8 }
 0x675   : > { %10796 = vmatpush3.bf16.msra.mxu1 %v14238_v2 }
 0x676   : > { %10797 = vmatprep.subr.bf16.mxu1 %v14232_v41  ;;  %10395 = vmatpush3.bf16.msra.mxu0 %v11494_v14 }
 0x677   : > { %10396 = vmatprep.subr.bf16.mxu0 %v11495_v34 }
 0x679   : > { %10798 = vmatpush3.bf16.msra.mxu1 %v14232_v41 }
 0x67a   : > { %10799 = vmatprep.subr.bf16.mxu1 %v14224_v38  ;;  %10397 = vmatpush3.bf16.msra.mxu0 %v11496_v39 }
 0x67b   : > { %10398 = vmatprep.subr.bf16.mxu0 %v11497_v40 }
 0x67d   : > { %10800 = vmatpush3.bf16.msra.mxu1 %v14224_v38 }
 0x67e   : > { %10801 = vmatprep.subr.bf16.mxu1 %v14216_v15  ;;  %10399 = vmatpush3.bf16.msra.mxu0 %v11498_v22 }
 0x681   : > { %10802 = vmatpush3.bf16.msra.mxu1 %v14216_v15  ;;  %v11472_v15 = vld [vmem:[%s15022_s9 + $0x78] sm:$0xff]  }
 0x682   : > { %10803 = vmatprep.subr.bf16.mxu1 %v14208_v17 }
 0x685   : > { %10804 = vmatpush3.bf16.msra.mxu1 %v14208_v17  ;;  %v11473_v17 = vld [vmem:[%s15022_s9 + $0x38] sm:$0xff]  }
 0x686   : > { %10805 = vmatprep.subr.bf16.mxu1 %v14202_v25 }
 0x689   : > { %10806 = vmatpush3.bf16.msra.mxu1 %v14202_v25 }
 0x68a   : > { %10364 = vmatprep.subr.bf16.mxu1 %v11472_v15 }
 0x68c   : > { %10808 = vmatmul.mubr.msk.bf16.vlgmr.msra.gmra.mxu1 %vm5963_vm12, %v11469_v18 }
 0x68d   : > { %10365 = vmatpush3.bf16.msra.mxu1 %v11473_v17 }
 0x68e   : > { %10366 = vmatprep.subr.bf16.mxu1 %v11474_v16 }
 0x691   : > { %10367 = vmatpush3.bf16.msra.mxu1 %v11475_v26  ;;  %v11500_v26 = vld [vmem:[%s15022_s9 + $0x98] sm:$0xff]  }
 0x692   : > { %10368 = vmatprep.subr.bf16.mxu1 %v11476_v29 }
 0x695   : > { %10369 = vmatpush3.bf16.msra.mxu1 %v11477_v56  ;;  %v11503_v56 = vld [vmem:[%s15022_s9 + $0xc8] sm:$0xff]  }
 0x696   : > { %10370 = vmatprep.subr.bf16.mxu1 %v11478_v45  ;;  %v11504_v45 = vld [vmem:[%s15022_s9 + $0x88] sm:$0xff]  }
 0x699   : > { %10371 = vmatpush3.bf16.msra.mxu1 %v11479_v10  ;;  %v11505_v10 = vld [vmem:[%s15022_s9 + $0xc0] sm:$0xff]  }
 0x69a   : > { %10372 = vmatprep.subr.bf16.mxu1 %v11480_v57 }
 0x69d   : > { %10373 = vmatpush3.bf16.msra.mxu1 %v11481_v48 }
 0x69e   : > { %10374 = vmatprep.subr.bf16.mxu1 %v11482_v23 }
 0x6a1   : > { %10375 = vmatpush3.bf16.msra.mxu1 %v11483_v49 }
 0x6a2   : > { %10376 = vmatprep.subr.bf16.mxu1 %v11484_v9 }
 0x6a5   : > { %10377 = vmatpush3.bf16.msra.mxu1 %v11485_v6 }
 0x6a6   : > { %10378 = vmatprep.subr.bf16.mxu1 %v11486_v55 }
 0x6a9   : > { %10379 = vmatpush3.bf16.msra.mxu1 %v11487_v60 }
 0x6dc   : > { %v10683_v27 = vpop.f32.mrf.mxu1  ;;  %v10719_v38 = vpop.f32.mrf.mxu0 }
 0x6dd   : > { %v9574_v1 = vpack.c.bf16 %v10683_v27, %v10683_v27  ;;  %v9580_v47 = vpack.c.bf16 %v10719_v38, %v10719_v38  ;;  %v11499_v27 = vld [vmem:[%s15022_s9 + $0xd8] sm:$0xff]  }
 0x6de   : > { %v6007_v61 = vpop.f32.mrf.mxu1  ;;  %v6177_v4 = vpop.f32.mrf.mxu0  ;;  %10400 = vmatprep.subr.bf16.mxu0 %v11499_v27 }
 0x6df   : > { %6036 = vst.msk [vmem:[#allocation2 + $0x28] sm:$0x1] %vm1701_vm8, %v9574_v1  ;;  %v9572_v25 = vpack.c.bf16 %v6007_v61, %v6007_v61  ;;  %6206 = vst.msk [vmem:[#allocation2 + $0x2c] sm:$0x1] %vm1701_vm8, %v9580_v47  ;;  %v9578_v62 = vpack.c.bf16 %v6177_v4, %v6177_v4  ;;  %10401 = vmatpush3.bf16.msra.mxu0 %v11500_v26 }
 0x6e0   : > { %v10684_v35 = vpop.f32.mrf.mxu1  ;;  %v10720_v46 = vpop.f32.mrf.mxu0 }
 0x6e1   : > { %6034 = vst.msk [vmem:[#allocation2] sm:$0xf] %vm1688_vm7, %v9572_v25  ;;  %6204 = vst.msk [vmem:[#allocation2 + $0x4] sm:$0xf] %vm1688_vm7, %v9578_v62  ;;  %v11506_v46 = vld [vmem:[%s15022_s9 + $0x118] sm:$0xff]  }
 0x6e2   : > { %v6010_v5 = vpop.f32.mrf.mxu1  ;;  %v6180_v53 = vpop.f32.mrf.mxu0  ;;  %10829 = vmatprep.subr.bf16.mxu1 %v11506_v46 }
 0x6e3   : > { %v9573_v19 = vpack.c.bf16 %v6010_v5, %v6010_v5  ;;  %v9579_v28 = vpack.c.bf16 %v6180_v53, %v6180_v53  ;;  %v11501_v5 = vld [vmem:[%s15022_s9 + $0xd0] sm:$0xff]  }
 0x6e4   : > { %10402 = vmatprep.subr.bf16.mxu0 %v11501_v5 }
 0x6e5   : > { %6035 = vst.msk [vmem:[#allocation2 + $0x14] sm:$0xf] %vm1688_vm7, %v9573_v19  ;;  %6205 = vst.msk [vmem:[#allocation2 + $0x18] sm:$0xf] %vm1688_vm7, %v9579_v28  ;;  %v11502_v19 = vld [vmem:[%s15022_s9 + $0x90] sm:$0xff]  }
 0x6e6   : > { %10403 = vmatpush3.bf16.msra.mxu0 %v11502_v19 }
 0x6e7   : > { %10404 = vmatprep.subr.bf16.mxu0 %v11503_v56 }
 0x6ea   : > { %10405 = vmatpush3.bf16.msra.mxu0 %v11504_v45 }
 0x6eb   : > { %10406 = vmatprep.subr.bf16.mxu0 %v11505_v10 }
 0x6f8   : > { %v14474_v59 = vpop.f32.mrf.mxu1  ;;  %v10755_v54 = vpop.f32.mrf.mxu0 }
 0x6f9   : > { %v9586_v44 = vpack.c.bf16 %v10755_v54, %v10755_v54  ;;  %v9577_v48 = vpack.c.bf16 %v14474_v59, %v14474_v59 }
 0x6fa   : > { %v6089_v33 = vpop.f32.mrf.mxu1  ;;  %v6347_v52 = vpop.f32.mrf.mxu0 }
 0x6fb   : > { %v9575_v24 = vpack.c.bf16 %v6089_v33, %v6089_v33  ;;  %v9584_v21 = vpack.c.bf16 %v6347_v52, %v6347_v52  ;;  %6376 = vst.msk [vmem:[#allocation2 + $0x30] sm:$0x1] %vm1701_vm8, %v9586_v44 }
 0x6fc   : > { %v10702_v13 = vpop.f32.mrf.mxu1  ;;  %v10756_v11 = vpop.f32.mrf.mxu0 }
 0x6fd   : > { %6113 = vrot.lane.b32.xlu0 %v9575_v24, %s11631_s21  ;;  %6374 = vst.msk [vmem:[#allocation2 + $0x8] sm:$0xf] %vm1688_vm7, %v9584_v21  ;;  %v11507_v13 = vld [vmem:[%s15022_s9 + $0x80] sm:$0xff]   ;;  %v11514_v11 = vld [vmem:[%s15022_s9 + $0x108] sm:$0xff]  }
 0x6fe   : > { %v6092_v51 = vpop.f32.mrf.mxu1  ;;  %v6350_v43 = vpop.f32.mrf.mxu0  ;;  %10407 = vmatpush3.bf16.msra.mxu0 %v11507_v13 }
 0x6ff   : > { %v9576_v41 = vpack.c.bf16 %v6092_v51, %v6092_v51  ;;  %v9585_v63 = vpack.c.bf16 %v6350_v43, %v6350_v43  ;;  %10849 = vmatprep.subr.bf16.mxu0 %v15105_v37 }
 0x701   : > { %6115 = vrot.lane.b32.xlu1 %v9576_v41, %s11631_s21  ;;  %6375 = vst.msk [vmem:[#allocation2 + $0x1c] sm:$0xf] %vm1688_vm7, %v9585_v63 }
 0x714   : > { %v14501_v3 = vpop.f32.mrf.mxu1  ;;  %v10791_v31 = vpop.f32.mrf.mxu0 }
 0x715   : > { %v9592_v50 = vpack.c.bf16 %v10791_v31, %v10791_v31  ;;  %v9583_v49 = vpack.c.bf16 %v14501_v3, %v14501_v3 }
 0x716   : > { %v6259_v58 = vpop.f32.mrf.mxu1  ;;  %v6517_v42 = vpop.f32.mrf.mxu0 }
 0x717   : > { %v9581_v36 = vpack.c.bf16 %v6259_v58, %v6259_v58  ;;  %6546 = vst.msk [vmem:[#allocation2 + $0x34] sm:$0x1] %vm1701_vm8, %v9592_v50  ;;  %v9590_v7 = vpack.c.bf16 %v6517_v42, %v6517_v42  ;;  %v11511_v58 = vld [vmem:[%s15022_s9 + $0x110] sm:$0xff]  }
 0x718   : > { %v10738_v2 = vpop.f32.mrf.mxu1  ;;  %v10792_v18 = vpop.f32.mrf.mxu0 }
 0x719   : > { %6283 = vrot.lane.b32.xlu0 %v9581_v36, %s11631_s21  ;;  %6544 = vst.msk [vmem:[#allocation2 + $0xc] sm:$0xf] %vm1688_vm7, %v9590_v7  ;;  %v11517_v36 = vld [vmem:[%s15022_s9 + $0x100] sm:$0xff]  }
 0x71a   : > { %v6262_v30 = vpop.f32.mrf.mxu1  ;;  %v6520_v16 = vpop.f32.mrf.mxu0 }
 0x71b   : > { %v9582_v12 = vpack.c.bf16 %v6262_v30, %v6262_v30  ;;  %v9591_v61 = vpack.c.bf16 %v6520_v16, %v6520_v16 }
 0x71d   : > { %6285 = vrot.lane.b32.xlu1 %v9582_v12, %s11631_s21  ;;  %6545 = vst.msk [vmem:[#allocation2 + $0x20] sm:$0xf] %vm1688_vm7, %v9591_v61 }
 0x730   : > { %v10773_v0 = vpop.f32.mrf.mxu1  ;;  %v10827_v29 = vpop.f32.mrf.mxu0 }
 0x731   : > { %v9598_v38 = vpack.c.bf16 %v10827_v29, %v10827_v29  ;;  %v9589_v9 = vpack.c.bf16 %v10773_v0, %v10773_v0  ;;  %v9337_v29 = vld [vmem:[%s15023_s10] ss:$0 sm:$0xff] }
 0x732   : > { %v6429_v1 = vpop.f32.mrf.mxu1  ;;  %v6687_v47 = vpop.f32.mrf.mxu0 }
 0x733   : > { %v9587_v15 = vpack.c.bf16 %v6429_v1, %v6429_v1  ;;  %6716 = vst.msk [vmem:[#allocation2 + $0x38] sm:$0x1] %vm1701_vm8, %v9598_v38  ;;  %v9596_v62 = vpack.c.bf16 %v6687_v47, %v6687_v47 }
 0x734   : > { %v10774_v17 = vpop.f32.mrf.mxu1  ;;  %v10828_v57 = vpop.f32.mrf.mxu0 }
 0x735   : > { %6453 = vrot.lane.b32.xlu0 %v9587_v15, %s11631_s21  ;;  %6714 = vst.msk [vmem:[#allocation2 + $0x10] sm:$0xf] %vm1688_vm7, %v9596_v62 }
 0x736   : > { %v6432_v25 = vpop.f32.mrf.mxu1  ;;  %v6690_v53 = vpop.f32.mrf.mxu0 }
 0x737   : > { %v9588_v35 = vpack.c.bf16 %v6432_v25, %v6432_v25  ;;  %v9597_v51 = vpack.c.bf16 %v6690_v53, %v6690_v53 }
 0x739   : > { %6455 = vrot.lane.b32.xlu1 %v9588_v35, %s11631_s21  ;;  %6715 = vst.msk [vmem:[#allocation2 + $0x24] sm:$0xf] %vm1688_vm7, %v9597_v51 }
 0x73a   : > { %v11519_v7 = vld [vmem:[#allocation2 + $0x38] ss:$0 sps:$4 sm:$0x11]  }
 0x740   : > { %v11518_v31 = vld [vmem:[#allocation2 + $0x10] ss:$20 sps:$4 sm:$0xff]  }
 0x74c   : > { %v10809_v4 = vpop.f32.mrf.mxu1 }
 0x74d   : > { %v9595_v6 = vpack.c.bf16 %v10809_v4, %v10809_v4 }
 0x74e   : > { %v6599_v33 = vpop.f32.mrf.mxu1 }
 0x74f   : > { %v9593_v24 = vpack.c.bf16 %v6599_v33, %v6599_v33 }
 0x750   : > { %v10810_v28 = vpop.f32.mrf.mxu1 }
 0x751   : > { %6623 = vrot.lane.b32.xlu0 %v9593_v24, %s11631_s21 }
 0x752   : > { %v6602_v41 = vpop.f32.mrf.mxu1 }
 0x753   : > { %v9594_v23 = vpack.c.bf16 %v6602_v41, %v6602_v41 }
 0x755   : > { %6117 = vrot.lane.b32.xlu0 %v9577_v48, %s11631_s21  ;;  %6625 = vrot.lane.b32.xlu1 %v9594_v23, %s11631_s21 }
 0x759   : > { %6457 = vrot.lane.b32.xlu0 %v9589_v9, %s11631_s21  ;;  %6287 = vrot.lane.b32.xlu1 %v9583_v49, %s11631_s21 }
 0x75d   : > { %6627 = vrot.lane.b32.xlu1 %v9595_v6, %s11631_s21 }
 0x76f   : > { %v6114_v55 = vpop.permute.xlu0 %6113 }
 0x770   : > { %6122 = vst.msk [vmem:[#allocation2] sm:$0xf] %vm2133_vm9, %v6114_v55 }
 0x773   : > { %v6116_v59 = vpop.permute.xlu1 %6115 }
 0x774   : > { %6123 = vst.msk [vmem:[#allocation2 + $0x14] sm:$0xf] %vm2133_vm9, %v6116_v59 }
 0x77b   : > { %v11488_v3 = vld [vmem:[#allocation2] ss:$20 sps:$4 sm:$0xff]  }
 0x78b   : > { %v6284_v54 = vpop.permute.xlu0 %6283 }
 0x78c   : > { %6292 = vst.msk [vmem:[#allocation2 + $0x4] sm:$0xf] %vm2133_vm9, %v6284_v54 }
 0x78f   : > { %v6286_v52 = vpop.permute.xlu1 %6285 }
 0x790   : > { %6293 = vst.msk [vmem:[#allocation2 + $0x18] sm:$0xf] %vm2133_vm9, %v6286_v52 }
 0x797   : > { %v11490_v60 = vld [vmem:[#allocation2 + $0x4] ss:$20 sps:$4 sm:$0xff]  }
 0x798   : > { %7101 = vmatprep.mubr.bf16.mxu1 %v11490_v60 }
 0x799   : > { %7102 = vmatmul.mubr.bf16.vlgmr.msra.gmra.mxu1 %v11488_v3 }
 0x79a   : > { %10830 = vmatpush3.bf16.msra.mxu1 %v11506_v46 }
 0x79b   : > { %10831 = vmatprep.subr.bf16.mxu1 %v11511_v58 }
 0x79e   : > { %10832 = vmatpush3.bf16.msra.mxu1 %v11511_v58  ;;  %v9387_v58 = vld [vmem:[%s15024_s11 + $0x1] sm:$0x1] }
 0x79f   : > { %10833 = vmatprep.subr.bf16.mxu1 %v11514_v11 }
 0x7a2   : > { %10834 = vmatpush3.bf16.msra.mxu1 %v11514_v11  ;;  %v7218_v11 = vld [vmem:[%s15024_s11] sm:$0x1] }
 0x7a3   : > { %10835 = vmatprep.subr.bf16.mxu1 %v11517_v36 }
 0x7a6   : > { %10836 = vmatpush3.bf16.msra.mxu1 %v11517_v36  ;;  %v9392_v36 = vld [vmem:[%s15024_s11 + $0x3] sm:$0x1] }
 0x7a7   : > { %v6454_v2 = vpop.permute.xlu0 %6453  ;;  %10841 = vmatprep.subr.bf16.mxu1 %v15105_v37 }
 0x7a8   : > { %6462 = vst.msk [vmem:[#allocation2 + $0x8] sm:$0xf] %vm2133_vm9, %v6454_v2  ;;  %v9390_v2 = vld [vmem:[%s15024_s11 + $0x2] sm:$0x1] }
 0x7ab   : > { %v6456_v43 = vpop.permute.xlu1 %6455 }
 0x7ac   : > { %6463 = vst.msk [vmem:[#allocation2 + $0x1c] sm:$0xf] %vm2133_vm9, %v6456_v43  ;;  %v9397_v43 = vld [vmem:[%s15024_s11 + $0x5] sm:$0x1] }
 0x7b3   : > { %v11508_v8 = vld [vmem:[#allocation2 + $0x8] ss:$20 sps:$4 sm:$0xff]  }
 0x7c3   : > { %v6624_v44 = vpop.permute.xlu0 %6623 }
 0x7c4   : > { %6632 = vst.msk [vmem:[#allocation2 + $0xc] sm:$0xf] %vm2133_vm9, %v6624_v44  ;;  %v9395_v44 = vld [vmem:[%s15024_s11 + $0x4] sm:$0x1] }
 0x7c7   : > { %v6118_v21 = vpop.permute.xlu0 %6117  ;;  %v6626_v63 = vpop.permute.xlu1 %6625 }
 0x7c8   : > { %6124 = vst.msk [vmem:[#allocation2 + $0x28] sm:$0x1] %vm2146_vm10, %v6118_v21  ;;  %v9402_v21 = vld [vmem:[%s15024_s11 + $0x7] sm:$0x1] }
 0x7c9   : > { %6633 = vst.msk [vmem:[#allocation2 + $0x20] sm:$0xf] %vm2133_vm9, %v6626_v63  ;;  %v9400_v63 = vld [vmem:[%s15024_s11 + $0x6] sm:$0x1] }
 0x7cb   : > { %v6458_v30 = vpop.permute.xlu0 %6457  ;;  %v6288_v20 = vpop.permute.xlu1 %6287 }
 0x7cc   : > { %6464 = vst.msk [vmem:[#allocation2 + $0x30] sm:$0x1] %vm2146_vm10, %v6458_v30  ;;  %6294 = vst.msk [vmem:[#allocation2 + $0x2c] sm:$0x1] %vm2146_vm10, %v6288_v20  ;;  %v9405_v30 = vld [vmem:[%s15024_s11 + $0x8] sm:$0x1] }
 0x7cd   : > { %v11520_v20 = vld [vmem:[%s15025_s12 + $0x78] sm:$0xff]  }
 0x7cf   : > { %v6628_v32 = vpop.permute.xlu1 %6627 }
 0x7d0   : > { %v11510_v12 = vld [vmem:[#allocation2 + $0xc] ss:$20 sps:$4 sm:$0xff]   ;;  %6634 = vst.msk [vmem:[#allocation2 + $0x34] sm:$0x1] %vm2146_vm10, %v6628_v32  ;;  %v11521_v32 = vld [vmem:[%s15025_s12 + $0x38] sm:$0xff]  }
 0x7d1   : > { %7149 = vmatprep.mubr.bf16.mxu0 %v11510_v12  ;;  %v11526_v12 = vld [vmem:[%s15025_s12 + $0xf8] sm:$0xff]  }
 0x7d2   : > { %7150 = vmatmul.mubr.bf16.vlgmr.msra.gmra.mxu0 %v11508_v8  ;;  %v11522_v8 = vld [vmem:[%s15025_s12 + $0x70] sm:$0xff]  }
 0x7d3   : > { %v6723_v14 = vld [vmem:[#allocation2 + $0x28] sm:$0x11] }
 0x7d4   : > { %v9343_v34 = vcombine.low %v6723_v14, %v6723_v14  ;;  %v9344_v39 = vcombine.high %v6723_v14, %v6723_v14  ;;  %v11527_v14 = vld [vmem:[%s15025_s12 + $0xb8] sm:$0xff]  }
 0x7d6   : > { %7109 = vmatprep.mubr.bf16.mxu1 %v9344_v39  ;;  %v11530_v39 = vld [vmem:[%s15025_s12 + $0xf0] sm:$0xff]  }
 0x7d7   : > { %7110 = vmatmul.mubr.bf16.gmra.mxu1 %v9343_v34  ;;  %v6724_v40 = vld [vmem:[#allocation2 + $0x30] sm:$0x11] }
 0x7d8   : > { %v9345_v50 = vcombine.low %v6724_v40, %v6724_v40  ;;  %v9346_v42 = vcombine.high %v6724_v40, %v6724_v40  ;;  %10837 = vmatprep.mubr.msk.bf16.mxu1 %vm5646_vm11, %v11518_v31  ;;  %v11523_v34 = vld [vmem:[%s15025_s12 + $0x30] sm:$0xff]   ;;  %v11524_v31 = vld [vmem:[%s15025_s12 + $0x68] sm:$0xff]  }
 0x7d9   : > { %v11531_v40 = vld [vmem:[%s15025_s12 + $0xb0] sm:$0xff]  }
 0x7da   : > { %7157 = vmatprep.mubr.bf16.mxu0 %v9346_v42  ;;  %v11525_v42 = vld [vmem:[%s15025_s12 + $0x28] sm:$0xff]  }
 0x7db   : > { %7158 = vmatmul.mubr.bf16.gmra.mxu0 %v9345_v50  ;;  %v11534_v50 = vld [vmem:[%s15025_s12 + $0xe8] sm:$0xff]  }
 0x7dc   : > { %10853 = vmatprep.mubr.msk.bf16.mxu0 %vm11629_vm3, %v15105_v37 }
 0x7df   : > { %10838 = vmatmul.mubr.msk.bf16.vlgmr.msra.gmra.mxu1 %vm5646_vm11, %v11519_v7  ;;  %v11528_v7 = vld [vmem:[%s15025_s12 + $0x60] sm:$0xff]  }
 0x7e0   : > { %10845 = vmatprep.mubr.msk.bf16.mxu1 %vm11629_vm3, %v15105_v37 }
 0x859   : > { %v10380_v22 = vpop.f32.mrf.mxu1 }
 0x85b   : > { %v10381_v0 = vpop.f32.mrf.mxu1 }
 0x85c   : > { %v10382_v19 = vadd.f32 %v10381_v0, %v10380_v22  ;;  %v11535_v22 = vld [vmem:[%s15025_s12 + $0xa8] sm:$0xff]   ;;  %v11529_v0 = vld [vmem:[%s15025_s12 + $0x20] sm:$0xff]  }
 0x85d   : > { %v10383_v18 = vpop.f32.mrf.mxu1 }
 0x85e   : > { %v7104_v57 = vadd.f32 %v10382_v19, %v9337_v29  ;;  %v11544_v19 = vld [vmem:[%s15025_s12 + $0x40] sm:$0xff]  }
 0x85f   : > { %v10384_v15 = vpop.f32.mrf.mxu1 }
 0x860   : > { %v10385_v45 = vadd.f32 %v10384_v15, %v10383_v18  ;;  %v11532_v18 = vld [vmem:[%s15025_s12 + $0x58] sm:$0xff]   ;;  %v11537_v15 = vld [vmem:[%s15025_s12 + $0x10] sm:$0xff]  }
 0x862   : > { %v7107_v28 = vadd.f32 %v10385_v45, %v9337_v29  ;;  %v11545_v45 = vld [vmem:[%s15025_s12] sm:$0xff]  }
 0x892   : > { %v10408_v27 = vpop.f32.mrf.mxu0 }
 0x894   : > { %v10409_v1 = vpop.f32.mrf.mxu0 }
 0x895   : > { %v10410_v47 = vadd.f32 %v10409_v1, %v10408_v27  ;;  %v11533_v27 = vld [vmem:[%s15025_s12 + $0x18] sm:$0xff]   ;;  %v11536_v1 = vld [vmem:[%s15025_s12 + $0x50] sm:$0xff]  }
 0x896   : > { %v10411_v17 = vpop.f32.mrf.mxu0 }
 0x897   : > { %v10386_v16 = vpop.f32.mrf.mxu1  ;;  %v7152_v41 = vadd.f32 %v10410_v47, %v7104_v57 }
 0x898   : > { %v10412_v61 = vpop.f32.mrf.mxu0 }
 0x899   : > { %v10387_v25 = vpop.f32.mrf.mxu1  ;;  %v10413_v33 = vadd.f32 %v10412_v61, %v10411_v17  ;;  %v11538_v17 = vld [vmem:[%s15025_s12 + $0xe0] sm:$0xff]   ;;  %v11540_v61 = vld [vmem:[%s15025_s12 + $0x48] sm:$0xff]  }
 0x89a   : > { %v10388_v35 = vadd.f32 %v10387_v25, %v10386_v16  ;;  %v11539_v16 = vld [vmem:[%s15025_s12 + $0xa0] sm:$0xff]   ;;  %v11541_v25 = vld [vmem:[%s15025_s12 + $0x8] sm:$0xff]  }
 0x89b   : > { %v10389_v26 = vpop.f32.mrf.mxu1  ;;  %v10414_v5 = vpop.f32.mrf.mxu0  ;;  %v7155_v9 = vadd.f32 %v10413_v33, %v7107_v28 }
 0x89c   : > { %v7112_v4 = vadd.f32 %v10388_v35, %v9337_v29  ;;  %v11542_v35 = vld [vmem:[%s15025_s12 + $0xd8] sm:$0xff]  }
 0x89d   : > { %v10390_v56 = vpop.f32.mrf.mxu1  ;;  %v10415_v38 = vpop.f32.mrf.mxu0 }
 0x89e   : > { %v10416_v62 = vadd.f32 %v10415_v38, %v10414_v5  ;;  %v11543_v38 = vld [vmem:[%s15025_s12 + $0x98] sm:$0xff]  }
 0x89f   : > { %v10417_v10 = vpop.f32.mrf.mxu0  ;;  %v10839_v46 = vpop.f32.mrf.mxu1 }
 0x8a0   : > { %v7160_v24 = vadd.f32 %v10416_v62, %v7112_v4 }
 0x8a1   : > { %v10418_v13 = vpop.f32.mrf.mxu0  ;;  %v7199_v53 = vpop.f32.mrf.mxu1 }
 0x8a2   : > { %v7208_v51 = vadd.f32 %v10839_v46, %v7160_v24  ;;  %v7200_v49 = vadd.f32 %v7199_v53, %v7152_v41 }
 0x8a3   : > { %v10840_v48 = vpop.f32.mrf.mxu1 }
 0x8a4   : > { %v7215_v23 = vmax.f32 %v7208_v51, 0.0  ;;  %v7213_v52 = vmax.f32 %v7200_v49, 0.0 }
 0x8a5   : > { %v7202_v6 = vpop.f32.mrf.mxu1 }
 0x8a6   : > { %v7217_v55 = vpack.c.bf16 %v7215_v23, %v7215_v23  ;;  %v7203_v59 = vadd.f32 %v7202_v6, %v7155_v9  ;;  %v11546_v23 = vld [vmem:[%s15025_s12 + $0xd0] sm:$0xff]  }
 0x8a7   : > { %v11547_v6 = vld [vmem:[%s15025_s12 + $0x90] sm:$0xff]  }
 0x8a8   : > { %v7224_v54 = vsel %vm1455_vm6, %v7217_v55, 0  ;;  %v7214_v3 = vmax.f32 %v7203_v59, 0.0  ;;  %v11551_v55 = vld [vmem:[%s15025_s12 + $0xc8] sm:$0xff]  }
 0x8a9   : > { %10842 = vmatpush3.bf16.msra.mxu1 %v7224_v54  ;;  %10850 = vmatpush3.bf16.msra.mxu0 %v7224_v54 }
 0x8aa   : > { %v7216_v60 = vpack.c.bf16 %v7214_v3, %v7213_v52  ;;  %10843 = vmatprep.subr.bf16.mxu1 %v15105_v37  ;;  %10851 = vmatprep.subr.bf16.mxu0 %v15105_v37  ;;  %v11552_v52 = vld [vmem:[%s15025_s12 + $0x88] sm:$0xff]  }
 0x8ad   : > { %10844 = vmatpush3.bf16.msra.mxu1 %v7216_v60  ;;  %10852 = vmatpush3.bf16.msra.mxu0 %v7216_v60 }
 0x8ae   : > { %10857 = vmatprep.subr.bf16.mxu1 %v15105_v37  ;;  %10865 = vmatprep.subr.bf16.mxu0 %v15105_v37 }
 0x8b0   : > { %10854 = vmatmul.mubr.msk.bf16.vlgmr.msra.gmra.mxu0 %vm7219_vm13, %v9387_v58  ;;  %10846 = vmatmul.mubr.msk.bf16.vlgmr.msra.gmra.mxu1 %vm7219_vm13, %v7218_v11  ;;  %v11554_v58 = vld [vmem:[%s15025_s12 + $0xc0] sm:$0xff]  }
 0x8b1   : > { %10858 = vmatpush3.bf16.msra.mxu1 %v7224_v54  ;;  %10866 = vmatpush3.bf16.msra.mxu0 %v7224_v54 }
 0x8b2   : > { %10859 = vmatprep.subr.bf16.mxu1 %v15105_v37  ;;  %10867 = vmatprep.subr.bf16.mxu0 %v15105_v37 }
 0x8b3   : > { %10869 = vmatprep.mubr.msk.bf16.mxu0 %vm11629_vm3, %v15105_v37  ;;  %10861 = vmatprep.mubr.msk.bf16.mxu1 %vm11629_vm3, %v15105_v37 }
 0x8b5   : > { %10860 = vmatpush3.bf16.msra.mxu1 %v7216_v60  ;;  %10868 = vmatpush3.bf16.msra.mxu0 %v7216_v60 }
 0x8b6   : > { %10873 = vmatprep.subr.bf16.mxu1 %v15105_v37  ;;  %10881 = vmatprep.subr.bf16.mxu0 %v15105_v37 }
 0x8b8   : > { %10870 = vmatmul.mubr.msk.bf16.vlgmr.msra.gmra.mxu0 %vm7219_vm13, %v9392_v36  ;;  %10862 = vmatmul.mubr.msk.bf16.vlgmr.msra.gmra.mxu1 %vm7219_vm13, %v9390_v2 }
 0x8b9   : > { %10874 = vmatpush3.bf16.msra.mxu1 %v7224_v54  ;;  %10882 = vmatpush3.bf16.msra.mxu0 %v7224_v54 }
 0x8ba   : > { %10875 = vmatprep.subr.bf16.mxu1 %v15105_v37  ;;  %10883 = vmatprep.subr.bf16.mxu0 %v15105_v37 }
 0x8bb   : > { %10885 = vmatprep.mubr.msk.bf16.mxu0 %vm11629_vm3, %v15105_v37  ;;  %10877 = vmatprep.mubr.msk.bf16.mxu1 %vm11629_vm3, %v15105_v37 }
 0x8bd   : > { %10876 = vmatpush3.bf16.msra.mxu1 %v7216_v60  ;;  %10884 = vmatpush3.bf16.msra.mxu0 %v7216_v60 }
 0x8be   : > { %10889 = vmatprep.subr.bf16.mxu1 %v15105_v37  ;;  %10897 = vmatprep.subr.bf16.mxu0 %v15105_v37 }
 0x8c0   : > { %10886 = vmatmul.mubr.msk.bf16.vlgmr.msra.gmra.mxu0 %vm7219_vm13, %v9397_v43  ;;  %10878 = vmatmul.mubr.msk.bf16.vlgmr.msra.gmra.mxu1 %vm7219_vm13, %v9395_v44  ;;  %v11555_v44 = vld [vmem:[%s15025_s12 + $0x80] sm:$0xff]  }
 0x8c1   : > { %10890 = vmatpush3.bf16.msra.mxu1 %v7224_v54  ;;  %10898 = vmatpush3.bf16.msra.mxu0 %v7224_v54 }
 0x8c2   : > { %10891 = vmatprep.subr.bf16.mxu1 %v15105_v37  ;;  %10899 = vmatprep.subr.bf16.mxu0 %v15105_v37 }
 0x8c3   : > { %10901 = vmatprep.mubr.msk.bf16.mxu0 %vm11629_vm3, %v15105_v37  ;;  %10893 = vmatprep.mubr.msk.bf16.mxu1 %vm11629_vm3, %v15105_v37 }
 0x8c5   : > { %10892 = vmatpush3.bf16.msra.mxu1 %v7216_v60  ;;  %10900 = vmatpush3.bf16.msra.mxu0 %v7216_v60 }
 0x8c6   : > { %10905 = vmatprep.subr.bf16.mxu1 %v15105_v37  ;;  %10453 = vmatprep.subr.bf16.mxu0 %v11520_v20 }
 0x8c8   : > { %10902 = vmatmul.mubr.msk.bf16.vlgmr.msra.gmra.mxu0 %vm7219_vm13, %v9402_v21  ;;  %10894 = vmatmul.mubr.msk.bf16.vlgmr.msra.gmra.mxu1 %vm7219_vm13, %v9400_v63 }
 0x8c9   : > { %10906 = vmatpush3.bf16.msra.mxu1 %v7224_v54  ;;  %10909 = vmatprep.mubr.msk.bf16.mxu1 %vm11629_vm3, %v15105_v37 }
 0x8ca   : > { %10907 = vmatprep.subr.bf16.mxu1 %v15105_v37  ;;  %10454 = vmatpush3.bf16.msra.mxu0 %v11521_v32 }
 0x8cb   : > { %10455 = vmatprep.subr.bf16.mxu0 %v11522_v8 }
 0x8cd   : > { %10908 = vmatpush3.bf16.msra.mxu1 %v7216_v60 }
 0x8ce   : > { %10475 = vmatprep.subr.bf16.mxu1 %v11526_v12  ;;  %10456 = vmatpush3.bf16.msra.mxu0 %v11523_v34 }
 0x8cf   : > { %10457 = vmatprep.subr.bf16.mxu0 %v11524_v31 }
 0x8d0   : > { %10910 = vmatmul.mubr.msk.bf16.vlgmr.msra.gmra.mxu1 %vm7219_vm13, %v9405_v30 }
 0x8d1   : > { %10476 = vmatpush3.bf16.msra.mxu1 %v11527_v14 }
 0x8d2   : > { %10477 = vmatprep.subr.bf16.mxu1 %v11530_v39  ;;  %10458 = vmatpush3.bf16.msra.mxu0 %v11525_v42 }
 0x8d3   : > { %10459 = vmatprep.subr.bf16.mxu0 %v11528_v7 }
 0x8d5   : > { %10478 = vmatpush3.bf16.msra.mxu1 %v11531_v40 }
 0x8d6   : > { %10479 = vmatprep.subr.bf16.mxu1 %v11534_v50  ;;  %10460 = vmatpush3.bf16.msra.mxu0 %v11529_v0 }
 0x8d7   : > { %10461 = vmatprep.subr.bf16.mxu0 %v11532_v18 }
 0x8d9   : > { %10480 = vmatpush3.bf16.msra.mxu1 %v11535_v22 }
 0x8da   : > { %10462 = vmatpush3.bf16.msra.mxu0 %v11533_v27  ;;  %10481 = vmatprep.subr.bf16.mxu1 %v11538_v17 }
 0x8db   : > { %10463 = vmatprep.subr.bf16.mxu0 %v11536_v1 }
 0x8dd   : > { %10482 = vmatpush3.bf16.msra.mxu1 %v11539_v16 }
 0x8de   : > { %10464 = vmatpush3.bf16.msra.mxu0 %v11537_v15  ;;  %10483 = vmatprep.subr.bf16.mxu1 %v11542_v35 }
 0x8df   : > { %10465 = vmatprep.subr.bf16.mxu0 %v11540_v61  ;;  %v11550_v61 = vld [vmem:[%s15025_s12 + $0x118] sm:$0xff]  }
 0x8e1   : > { %10484 = vmatpush3.bf16.msra.mxu1 %v11543_v38  ;;  %v8122_v38 = vld [vmem:[%s15027_s14 + $0x38] sm:$0xff] }
 0x8e2   : > { %10466 = vmatpush3.bf16.msra.mxu0 %v11541_v25  ;;  %10485 = vmatprep.subr.bf16.mxu1 %v11546_v23  ;;  %v11553_v25 = vld [vmem:[%s15025_s12 + $0x110] sm:$0xff]   ;;  %v8127_v23 = vld [vmem:[%s15028_s15 + $0x20] sm:$0xff] }
 0x8e3   : > { %10467 = vmatprep.subr.bf16.mxu0 %v11544_v19  ;;  %v8130_v19 = vld [vmem:[%s15028_s15 + $0x38] sm:$0xff] }
 0x8e5   : > { %10486 = vmatpush3.bf16.msra.mxu1 %v11547_v6  ;;  %v8119_v6 = vld [vmem:[%s15027_s14 + $0x20] sm:$0xff] }
 0x8e6   : > { %10468 = vmatpush3.bf16.msra.mxu0 %v11545_v45  ;;  %10487 = vmatprep.subr.bf16.mxu1 %v11551_v55  ;;  %v14863_v55 = vld [vmem:[%s15031_s18 + $0x18] sm:$0xff] }
 0x8e7   : > { %10913 = vmatprep.subr.bf16.mxu0 %v15105_v37 }
 0x8e9   : > { %10488 = vmatpush3.bf16.msra.mxu1 %v11552_v52 }
 0x8ea   : > { %10489 = vmatprep.subr.bf16.mxu1 %v11554_v58  ;;  %v8125_v58 = vld [vmem:[%s15028_s15 + $0x10] sm:$0xff] }
 0x8ed   : > { %10490 = vmatpush3.bf16.msra.mxu1 %v11555_v44  ;;  %v8124_v44 = vld [vmem:[%s15028_s15 + $0x8] sm:$0xff] }
 0x8ee   : > { %10925 = vmatprep.subr.mxu1 %v15105_v37 }
 0x970   : > { %v7307_v26 = vpop.f32.mrf.mxu0  ;;  %v7260_v5 = vpop.f32.mrf.mxu1 }
 0x971   : > { %v9599_v29 = vpack.c.bf16 %v7307_v26, %v7307_v26  ;;  %v7266_v56 = vpack.c.bf16 %v7260_v5, %v7260_v5  ;;  %v11558_v26 = vld [vmem:[%s15025_s12 + $0x108] sm:$0xff]   ;;  %v14806_v5 = vld [vmem:[%s15031_s18 + $0x38] sm:$0xff] }
 0x972   : > { %v10855_v47 = vpop.f32.mrf.mxu0  ;;  %v10847_v4 = vpop.f32.mrf.mxu1 }
 0x973   : > { %7317 = vrot.lane.b32.xlu0 %v9599_v29, %s11631_s21  ;;  %7267 = vst.msk [vmem:[#allocation2] sm:$0x1] %vm1701_vm8, %v7266_v56  ;;  %v11559_v29 = vld [vmem:[%s15025_s12 + $0x100] sm:$0xff]   ;;  %v8138_v56 = vmul.f32 %v8130_v19, %v14806_v5  ;;  %v15118_v19 = vmov 0  }
 0x974   : > { %v7310_v62 = vpop.f32.mrf.mxu0  ;;  %v7263_v10 = vpop.f32.mrf.mxu1 }
 0x975   : > { %v8146_v10 = vadd.f32 %v8138_v56, %v8122_v38  ;;  %v8147_v38 = vld [vmem:[%s11789_s22] sm:$0x3]  ;;  %s9452_s22 = sshll.u32 %s11752_s20, 5  ;;  %s15123_s20 = sand.u32 1, %s15119_s19  }
 0x976   : > { %v10856_v46 = vpop.f32.mrf.mxu0  ;;  %v10848_v57 = vpop.f32.mrf.mxu1  ;;  %s8372_s0 = scalar_lea.sflag [#allocation5], %s15123_s20 }
 0x977   : > { %v14826_v46 = vld [vmem:[%s15031_s18 + $0x30] sm:$0xff] }
 0x978   : > { %v7407_v33 = vpop.f32.mrf.mxu0  ;;  %v7360_v24 = vpop.f32.mrf.mxu1  ;;  %v8121_v57 = vld [vmem:[%s15027_s14 + $0x30] sm:$0xff] }
 0x979   : > { %v9600_v13 = vpack.c.bf16 %v7407_v33, %v7407_v33  ;;  %v7366_v53 = vpack.c.bf16 %v7360_v24, %v7360_v24  ;;  %v8129_v33 = vld [vmem:[%s15028_s15 + $0x30] sm:$0xff] }
 0x97a   : > { %v10871_v28 = vpop.f32.mrf.mxu0  ;;  %v10863_v51 = vpop.f32.mrf.mxu1  ;;  %v8137_v24 = vmul.f32 %v8129_v33, %v14826_v46 }
 0x97b   : > { %7417 = vrot.lane.b32.xlu1 %v9600_v13, %s11631_s21  ;;  %7367 = vst.msk [vmem:[#allocation2 + $0x4] sm:$0x1] %vm1701_vm8, %v7366_v53  ;;  %v14839_v53 = vld [vmem:[%s15031_s18 + $0x28] sm:$0xff] }
 0x97c   : > { %v7410_v41 = vpop.f32.mrf.mxu0  ;;  %v7363_v48 = vpop.f32.mrf.mxu1  ;;  %v8145_v13 = vadd.f32 %v8137_v24, %v8121_v57  ;;  %v8128_v28 = vld [vmem:[%s15028_s15 + $0x28] sm:$0xff] }
 0x97d   : > { %v8136_v51 = vmul.f32 %v8128_v28, %v14839_v53  ;;  %v8120_v41 = vld [vmem:[%s15027_s14 + $0x28] sm:$0xff]  ;;  %v14851_v48 = vld [vmem:[%s15031_s18 + $0x20] sm:$0xff] }
 0x97e   : > { %v10872_v49 = vpop.f32.mrf.mxu0  ;;  %v10864_v9 = vpop.f32.mrf.mxu1 }
 0x97f   : > { %v8144_v49 = vadd.f32 %v8136_v51, %v8120_v41  ;;  %v8135_v9 = vmul.f32 %v8127_v23, %v14851_v48  ;;  %v8269_v51 = vlaneseq  ;;  %v8234_v23 = vld [vmem:[#allocation3] sm:$0x1] }
 0x980   : > { %v7507_v59 = vpop.f32.mrf.mxu0  ;;  %v7460_v54 = vpop.f32.mrf.mxu1 }
 0x981   : > { %v9601_v3 = vpack.c.bf16 %v7507_v59, %v7507_v59  ;;  %v7466_v60 = vpack.c.bf16 %v7460_v54, %v7460_v54  ;;  %v8126_v59 = vld [vmem:[%s15028_s15 + $0x18] sm:$0xff]  ;;  %v8143_v54 = vadd.f32 %v8135_v9, %v8119_v6  ;;  %v8270_v41 = vshrl.u32 %v8269_v51, 7 }
 0x982   : > { %v10887_v11 = vpop.f32.mrf.mxu0  ;;  %v10879_v36 = vpop.f32.mrf.mxu1  ;;  %v8134_v52 = vmul.f32 %v8126_v59, %v14863_v55  ;;  %v8267_v9 = vsub.f32 1.0, %v8234_v23 }
 0x983   : > { %7517 = vrot.lane.b32.xlu0 %v9601_v3, %s11631_s21  ;;  %7467 = vst.msk [vmem:[#allocation2 + $0x8] sm:$0x1] %vm1701_vm8, %v7466_v60  ;;  %v8118_v3 = vld [vmem:[%s15027_s14 + $0x18] sm:$0xff]  ;;  %v14876_v60 = vld [vmem:[%s15031_s18 + $0x10] sm:$0xff] }
 0x984   : > { %v7510_v2 = vpop.f32.mrf.mxu0  ;;  %v7463_v43 = vpop.f32.mrf.mxu1  ;;  %v8142_v11 = vadd.f32 %v8134_v52, %v8118_v3  ;;  %v8133_v36 = vmul.f32 %v8125_v58, %v14876_v60 }
 0x985   : > { %v8117_v2 = vld [vmem:[%s15027_s14 + $0x10] sm:$0xff]  ;;  %v14889_v43 = vld [vmem:[%s15031_s18 + $0x8] sm:$0xff] }
 0x986   : > { %v10888_v21 = vpop.f32.mrf.mxu0  ;;  %v10880_v63 = vpop.f32.mrf.mxu1 }
 0x987   : > { %v8141_v21 = vadd.f32 %v8133_v36, %v8117_v2  ;;  %v8132_v63 = vmul.f32 %v8124_v44, %v14889_v43 }
 0x988   : > { %v7607_v30 = vpop.f32.mrf.mxu0  ;;  %v7560_v20 = vpop.f32.mrf.mxu1 }
 0x989   : > { %v9602_v32 = vpack.c.bf16 %v7607_v30, %v7607_v30  ;;  %v7566_v8 = vpack.c.bf16 %v7560_v20, %v7560_v20  ;;  %v8116_v30 = vld [vmem:[%s15027_s14 + $0x8] sm:$0xff]  ;;  %v14902_v20 = vld [vmem:[%s15031_s18] sm:$0xff] }
 0x98a   : > { %v10903_v12 = vpop.f32.mrf.mxu0  ;;  %v10895_v14 = vpop.f32.mrf.mxu1 }
 0x98b   : > { %7617 = vrot.lane.b32.xlu1 %v9602_v32, %s11631_s21  ;;  %7567 = vst.msk [vmem:[#allocation2 + $0xc] sm:$0x1] %vm1701_vm8, %v7566_v8  ;;  %v8123_v32 = vld [vmem:[%s15028_s15] sm:$0xff]  ;;  %v8140_v8 = vadd.f32 %v8132_v63, %v8116_v30  ;;  %s14927_s21 = scalar_lea.hbm %s15120_s1, %s9452_s22 }
 0x98c   : > { %v7610_v34 = vpop.f32.mrf.mxu0  ;;  %v7563_v39 = vpop.f32.mrf.mxu1  ;;  %v8131_v12 = vmul.f32 %v8123_v32, %v14902_v20  ;;  %v8115_v14 = vld [vmem:[%s15027_s14] sm:$0xff] }
 0x98e   : > { %v10904_v31 = vpop.f32.mrf.mxu0  ;;  %v10896_v40 = vpop.f32.mrf.mxu1  ;;  %v8139_v34 = vadd.f32 %v8131_v12, %v8115_v14 }
 0x990   : > { %v7660_v50 = vpop.f32.mrf.mxu1 }
 0x991   : > { %v7666_v42 = vpack.c.bf16 %v7660_v50, %v7660_v50 }
 0x992   : > { %v10911_v7 = vpop.f32.mrf.mxu1 }
 0x993   : > { %7667 = vst.msk [vmem:[#allocation2 + $0x10] sm:$0x1] %vm1701_vm8, %v7666_v42  ;;  %v9407_v7 = vld [vmem:[%s15117_s29] ss:$0 sm:$0xff] }
 0x994   : > { %v7663_v22 = vpop.f32.mrf.mxu1 }
 0x996   : > { %v10912_v0 = vpop.f32.mrf.mxu1 }
 0x99a   : > { %v11560_v47 = vld [vmem:[#allocation2 + $0x10] ss:$0 sps:$4 sm:$0x11]  }
 0x9e5   : > { %v7318_v18 = vpop.permute.xlu0 %7317 }
 0x9e6   : > { %7320 = vst.msk [vmem:[#allocation2] sm:$0x1] %vm2146_vm10, %v7318_v18 }
 0x9ed   : > { %v7418_v27 = vpop.permute.xlu1 %7417 }
 0x9ee   : > { %7420 = vst.msk [vmem:[#allocation2 + $0x4] sm:$0x1] %vm2146_vm10, %v7418_v27 }
 0x9f5   : > { %v7518_v1 = vpop.permute.xlu0 %7517  ;;  %v7668_v15 = vld [vmem:[#allocation2] sm:$0x11] }
 0x9f6   : > { %7520 = vst.msk [vmem:[#allocation2 + $0x8] sm:$0x1] %vm2146_vm10, %v7518_v1  ;;  %v9408_v17 = vcombine.low %v7668_v15, %v7668_v15  ;;  %v9409_v16 = vcombine.high %v7668_v15, %v7668_v15 }
 0x9f8   : > { %8018 = vmatprep.mubr.bf16.mxu0 %v9409_v16 }
 0x9f9   : > { %8019 = vmatmul.mubr.bf16.vlgmr.msra.gmra.mxu0 %v9408_v17 }
 0x9fa   : > { %10914 = vmatpush3.bf16.msra.mxu0 %v11550_v61  ;;  %10921 = vmatprep.mubr.msk.bf16.mxu0 %vm11629_vm3, %v15105_v37 }
 0x9fb   : > { %10915 = vmatprep.subr.bf16.mxu0 %v15105_v37 }
 0x9fd   : > { %v7618_v35 = vpop.permute.xlu1 %7617 }
 0x9fe   : > { %7620 = vst.msk [vmem:[#allocation2 + $0xc] sm:$0x1] %vm2146_vm10, %v7618_v35  ;;  %10916 = vmatpush3.bf16.msra.mxu0 %v11553_v25 }
 0x9ff   : > { %10917 = vmatprep.subr.bf16.mxu0 %v15105_v37 }
 0xa02   : > { %10918 = vmatpush3.bf16.msra.mxu0 %v11558_v26 }
 0xa03   : > { %10919 = vmatprep.subr.bf16.mxu0 %v15105_v37 }
 0xa05   : > { %v7669_v45 = vld [vmem:[#allocation2 + $0x8] sm:$0x11] }
 0xa06   : > { %v9410_v4 = vcombine.low %v7669_v45, %v7669_v45  ;;  %v9411_v62 = vcombine.high %v7669_v45, %v7669_v45  ;;  %10920 = vmatpush3.bf16.msra.mxu0 %v11559_v29 }
 0xa08   : > { %8058 = vmatprep.mubr.bf16.mxu1 %v9411_v62 }
 0xa09   : > { %8059 = vmatmul.mubr.bf16.vlgmr.msra.gmra.mxu1 %v9410_v4  ;;  %10922 = vmatmul.mubr.msk.bf16.vlgmr.msra.gmra.mxu0 %vm5646_vm11, %v11560_v47 }
 0xa0a   : > { %10926 = vmatpush3.msra.mxu1 %v8146_v10  ;;  %10941 = vmatprep.mubr.msk.f32.mxu1 %vm11629_vm3, %v15105_v37 }
 0xa0b   : > { %10927 = vmatprep.subr.mxu1 %v15105_v37 }
 0xa0c   : > { %10928 = vmatpush3.msra.mxu1 %v8145_v13 }
 0xa0d   : > { %10929 = vmatprep.subr.mxu1 %v15105_v37 }
 0xa0e   : > { %10930 = vmatpush3.msra.mxu1 %v8144_v49  ;;  %v8271_v49 = vsub.s32 0, %v8270_v41 }
 0xa0f   : > { %10931 = vmatprep.subr.mxu1 %v15105_v37 }
 0xa10   : > { %10932 = vmatpush3.msra.mxu1 %v8143_v54  ;;  %v8272_v6 = vrot.slane %v8267_v9, %v8271_v49 }
 0xa11   : > { %10933 = vmatprep.subr.mxu1 %v15105_v37 }
 0xa12   : > { %10934 = vmatpush3.msra.mxu1 %v8142_v11  ;;  %v8341_v11 = vrot.slane %v8234_v23, %v8271_v49 }
 0xa13   : > { %10935 = vmatprep.subr.mxu1 %v15105_v37 }
 0xa14   : > { %10936 = vmatpush3.msra.mxu1 %v8141_v21 }
 0xa15   : > { %10937 = vmatprep.subr.mxu1 %v15105_v37 }
 0xa16   : > { %10938 = vmatpush3.msra.mxu1 %v8140_v8 }
 0xa17   : > { %10939 = vmatprep.subr.mxu1 %v15105_v37 }
 0xa18   : > { %10940 = vmatpush3.msra.mxu1 %v8139_v34 }
 0xab9   : > { %v10469_v39 = vpop.f32.mrf.mxu0 }
 0xabb   : > { %v10470_v31 = vpop.f32.mrf.mxu0 }
 0xabc   : > { %v10471_v42 = vadd.f32 %v10470_v31, %v10469_v39 }
 0xabd   : > { %v10472_v40 = vpop.f32.mrf.mxu0 }
 0xabe   : > { %v8021_v1 = vadd.f32 %v10471_v42, %v9407_v7 }
 0xabf   : > { %v10473_v50 = vpop.f32.mrf.mxu0 }
 0xac9   : > { %v10491_v22 = vpop.f32.mrf.mxu1  ;;  %v8100_v0 = vpop.f32.mrf.mxu0 }
 0xacb   : > { %v10492_v18 = vpop.f32.mrf.mxu1  ;;  %v10923_v27 = vpop.f32.mrf.mxu0 }
 0xacc   : > { %v10493_v15 = vadd.f32 %v10492_v18, %v10491_v22 }
 0xacd   : > { %v10494_v17 = vpop.f32.mrf.mxu1  ;;  %v8103_v16 = vpop.f32.mrf.mxu0 }
 0xace   : > { %v8061_v37 = vadd.f32 %v10493_v15, %v8021_v1 }
 0xacf   : > { %v10495_v61 = vpop.f32.mrf.mxu1  ;;  %v10924_v25 = vpop.f32.mrf.mxu0 }
 0xad0   : > { %v8101_v35 = vadd.f32 %v8100_v0, %v8061_v37 }
 0xad2   : > { %v8106_v26 = vmax.f32 %v8101_v35, 0.0 }
 0xad4   : > { %10942 = vmatmul.mubr.msk.f32.vlgmr.msra.gmra.mxu1 %vm5646_vm11, %v8106_v26  ;;  %8235 = vxpose.xlu1.b32.start.end [1/1] (short) (narrow) %v8106_v26, 64 }
 0xaf2   : > { %10999 = vset.pattern.permute.xlu1 %v15118_v19 }
 0xb50   : > { %v8251_v29 = vpop.trf.xlu1 }
 0xb54   : > { %v8252_v56 = vpop.trf.xlu1 }
 0xb55   : > { %8292 = vperm.xlu1 %10999, %v8252_v56  }
 0xb58   : > { %v8253_v10 = vpop.trf.xlu1 }
 0xb59   : > { %8274 = vperm.xlu1 %10999, %v8272_v6  }
 0xb5c   : > { %v8254_v57 = vpop.trf.xlu1 }
 0xb60   : > { %v8255_v33 = vpop.trf.xlu1 }
 0xb64   : > { %v8256_v24 = vpop.trf.xlu1 }
 0xb68   : > { %v8257_v13 = vpop.trf.xlu1 }
 0xb6c   : > { %v8258_v28 = vpop.trf.xlu1 }
 0xb94   : > { %v8217_v45 = vpop.f32.mrf.mxu1 }
 0xb95   : > { %v8218_v47 = vadd.f32 %v8217_v45, %v8147_v38 }
 0xb96   : > { %v10943_v4 = vpop.f32.mrf.mxu1 }
 0xb97   : > { %v8222_v62 = vsel %vm8221_vm14, %v8218_v47, -inf }
 0xb98   : > { %8223 = vmax.xlane.f32.xlu0 %v8222_v62 }
 0xbae   : > { %8287 = vperm.xlu0 %10998, %v8251_v29  }
 0xbb2   : > { %8297 = vperm.xlu0 %10998, %v8253_v10  }
 0xbb6   : > { %8302 = vperm.xlu0 %10998, %v8254_v57  }
 0xbba   : > { %8307 = vperm.xlu0 %10998, %v8255_v33  }
 0xbbe   : > { %8312 = vperm.xlu0 %10998, %v8256_v24  }
 0xbc2   : > { %8317 = vperm.xlu0 %10998, %v8257_v13  }
 0xbc6   : > { %8322 = vperm.xlu0 %10998, %v8258_v28  }
 0xbd0   : > { %v8293_v12 = vpop.permute.xlu1 %8292 }
 0xbd4   : > { %v8275_v14 = vpop.permute.xlu1 %8274 }
 0xbd5   : > { %v8277_v31 = vmul.f32 %v8275_v14, %v14902_v20  ;;  %v8278_v40 = vmul.f32 %v8275_v14, %v14889_v43  ;;  %v8279_v50 = vmul.f32 %v8275_v14, %v14876_v60  ;;  %v8280_v42 = vmul.f32 %v8275_v14, %v14863_v55 }
 0xbd6   : > { %v8281_v7 = vmul.f32 %v8275_v14, %v14851_v48  ;;  %v8282_v0 = vmul.f32 %v8275_v14, %v14839_v53  ;;  %v8283_v18 = vmul.f32 %v8275_v14, %v14826_v46  ;;  %v8284_v27 = vmul.f32 %v8275_v14, %v14806_v5 }
 0xc21   : > { %v8224_v59 = vpop.xlane.xlu0 %8223 }
 0xc22   : > { %v8225_v54 = vsub.f32 %v8218_v47, %v8224_v59 }
 0xc24   : > { %v8226_v52 = vmul.f32 1.442695, %v8225_v54 }
 0xc26   : > { %11561 = vpow2.f32 %v8226_v52 }
 0xc29   : > { %v8288_v36 = vpop.permute.xlu0 %8287 }
 0xc2d   : > { %v8298_v2 = vpop.permute.xlu0 %8297 }
 0xc31   : > { %v8303_v44 = vpop.permute.xlu0 %8302 }
 0xc33   : > { %v11562_v3 = vpop.eup %11561 }
 0xc34   : > { %v8228_v58 = vsel %vm8221_vm14, %v11562_v3, 0.0 }
 0xc35   : > { %8229 = vadd.xlane.f32.xlu0 %v8228_v58  ;;  %v8308_v21 = vpop.permute.xlu0 %8307 }
 0xc39   : > { %v8313_v63 = vpop.permute.xlu0 %8312 }
 0xc3d   : > { %v8318_v30 = vpop.permute.xlu0 %8317 }
 0xc41   : > { %v8323_v32 = vpop.permute.xlu0 %8322 }
 0xc4b   : > { %8343 = vperm.xlu0 %10998, %v8341_v11  }
 0xcbe   : > { %v8230_v8 = vpop.xlane.xlu0 %8229 }
 0xcbf   : > { %11563 = vrcp.f32 %v8230_v8 }
 0xccc   : > { %v11564_v34 = vpop.eup %11563 }
 0xccd   : > { %v8232_v39 = vmul.f32 %v11564_v34, %v11562_v3 }
 0xccf   : > { %8233 = vst.msk [vmem:[%s579_s17] sm:$0x3] %vm8221_vm14, %v8232_v39  ;;  %v8328_v22 = vrot.slane %v8232_v39, %v8271_v49 }
 0xcd0   : > { %11578 = shalt.err (!%p11575_p4)
}
 0xcd1   : > { %s11579_s17 = scalar_lea.hbm %s14927_s21, 32  ;;  %s11583_s19 = scalar_lea.hbm %s15121_s26, 192 }
 0xcd2   : > { %p11580_p7 = scmp.ne.s32.totalorder %s14927_s21, %s11579_s17  ;;  %p11584_p10 = scmp.lt.s32.totalorder %s14927_s21, %s15121_s26 }
 0xcd3   : > { %p11585_p11 = scmp.lt.s32.totalorder %s11583_s19, %s11579_s17 }
 0xcd4   : > { %p11581_p8 = pnand %p11580_p7, %p11769_p5 }
 0xcd5   : > { %p11586_p12 = por %p11585_p11, %p11584_p10 }
 0xcd6   : > { %p11582_p9 = pneg %p11581_p8 }
 0xcd8   : > { %p11587_p13 = pnand %p11586_p12, %p11582_p9 }
 0xcda   : > { %11590 = shalt.err (!%p11587_p13)
}
 0xcdb   : > { %10954 = dma.vmem_to_hbm [thread:$0]  (%p11769_p5), %s14929_s25, 32, %s14927_s21, %s8372_s0   ;;  %v8329_v5 = vmul.f32 %v8328_v22, %v8288_v36  ;;  %v8330_v46 = vmul.f32 %v8328_v22, %v8293_v12  ;;  %v8331_v53 = vmul.f32 %v8328_v22, %v8298_v2  ;;  %v8332_v48 = vmul.f32 %v8328_v22, %v8303_v44  ;;  %v8344_v55 = vpop.permute.xlu0 %8343 }
 0xcdc   : > { %v8333_v60 = vmul.f32 %v8328_v22, %v8308_v21  ;;  %v8334_v43 = vmul.f32 %v8328_v22, %v8313_v63  ;;  %v8335_v20 = vmul.f32 %v8328_v22, %v8318_v30  ;;  %v8336_v1 = vmul.f32 %v8328_v22, %v8323_v32 }
 0xcdd   : > { %v8346_v15 = vmul.f32 %v8344_v55, %v8329_v5  ;;  %v8347_v17 = vmul.f32 %v8344_v55, %v8330_v46  ;;  %v8348_v16 = vmul.f32 %v8344_v55, %v8331_v53  ;;  %v8349_v37 = vmul.f32 %v8344_v55, %v8332_v48 }
 0xcde   : > { %v8350_v61 = vmul.f32 %v8344_v55, %v8333_v60  ;;  %v8351_v25 = vmul.f32 %v8344_v55, %v8334_v43  ;;  %v8352_v35 = vmul.f32 %v8344_v55, %v8335_v20  ;;  %v8353_v26 = vmul.f32 %v8344_v55, %v8336_v1 }
 0xcdf   : > { %v8354_v19 = vadd.f32 %v8346_v15, %v8277_v31  ;;  %v8355_v29 = vadd.f32 %v8347_v17, %v8278_v40  ;;  %v8356_v56 = vadd.f32 %v8348_v16, %v8279_v50  ;;  %v8357_v38 = vadd.f32 %v8349_v37, %v8280_v42 }
 0xce0   : > { %v8358_v45 = vadd.f32 %v8350_v61, %v8281_v7  ;;  %v8359_v47 = vadd.f32 %v8351_v25, %v8282_v0  ;;  %v8360_v4 = vadd.f32 %v8352_v35, %v8283_v18  ;;  %v8361_v62 = vadd.f32 %v8353_v26, %v8284_v27 }
 0xce1   : > { %8363 = vst.msk [vmem:[%s15031_s18] sm:$0xff] %vm8362_vm15, %v8354_v19  ;;  %8364 = vst.msk [vmem:[%s15031_s18 + $0x8] sm:$0xff] %vm8362_vm15, %v8355_v29 }
 0xce2   : > { %8365 = vst.msk [vmem:[%s15031_s18 + $0x10] sm:$0xff] %vm8362_vm15, %v8356_v56  ;;  %8366 = vst.msk [vmem:[%s15031_s18 + $0x18] sm:$0xff] %vm8362_vm15, %v8357_v38 }
 0xce3   : > { %8367 = vst.msk [vmem:[%s15031_s18 + $0x20] sm:$0xff] %vm8362_vm15, %v8358_v45  ;;  %8368 = vst.msk [vmem:[%s15031_s18 + $0x28] sm:$0xff] %vm8362_vm15, %v8359_v47 }
 0xce4   : > { %8369 = vst.msk [vmem:[%s15031_s18 + $0x30] sm:$0xff] %vm8362_vm15, %v8360_v4  ;;  %8370 = vst.msk [vmem:[%s15031_s18 + $0x38] sm:$0xff] %vm8362_vm15, %v8361_v62 }
 0xce5 PF: > { %s15124_s25 = sld [smem:[#allocation10_spill]] }
 0xce6   : > { %s15125_s1 = sld [smem:[#allocation7_spill]] }
 0xceb   : > { %p10960_p5 = scmp.ge.s32.totalorder %s15124_s25, 2 }
 0xcec   : > { %s8403_s2 = sand.u32 1, %s15125_s1  }
 0xced   : > { %p10957_p0 = pnand %p10960_p5, %p11773_p6  ;;  %s8404_s20 = scalar_lea.sflag [#allocation5], %s8403_s2 }
 0xcef   : > { %p10958_p1 = pneg %p10957_p0 }
 0xcf1   : > { %11608 = dma.done.wait (%p10958_p1), %s8404_s20, 32  }
 0xcf2   : > { %11610 = vsyncadd (%p10958_p1), %s8404_s20, 4294967264  ;;  %s15127_s1 = sld [smem:[#allocation11_spill]] }
 0xcf3   : > { %s15128_s30 = sld [smem:[#allocation8_spill]] }
 0xcf4   : > { %s15129_s0 = sld [smem:[#allocation9_spill]] }
 0xcf5   : > { %s15130_s19 = sld [smem:[#allocation12_spill]] }
 0xcf8   : > { %p31_p2 = scmp.ge.s32.totalorder %s15127_s1, 8  }
 0xcfa   :  { %33 = sbr.rel (!%p31_p2) target bundleno = 17 (0x11), region = 162 }
 0xcff   :  { %8409 = vsyncpa [#allocation5], 1 }
 0xd00   :  { %8411 = vsyncpa [#allocation5 + $0x1], 1 }

</bundles_post_ra>
